<compile_context>
chip_gen: v7x
topology: tpu7x:2x2x1
jax: 0.10.0
libtpu: 0.0.40
codegen_flags: <defaults>
</compile_context>

<pallas_src>
import functools

import jax
import jax.numpy as jnp
from jax import lax
from jax.experimental import pallas as pl
from jax.experimental.pallas import tpu as pltpu


# ----------------------------- helpers --------------------------------------


def _round_up(x, m):
    return (x + m - 1) // m * m


def _pad2(a, rows, cols):
    return jnp.pad(a, ((0, rows - a.shape[0]), (0, cols - a.shape[1])))


def _vmem_capacity_bytes():
    """Physical VMEM of the attached TPU generation (fallbacks if query fails)."""
    try:
        return int(pltpu.get_tpu_info().vmem_capacity_bytes)
    except Exception:
        try:
            kind = jax.devices()[0].device_kind.lower()
        except Exception:
            return 64 * 1024 * 1024
        if "v7" in kind:
            return 64 * 1024 * 1024
        return 128 * 1024 * 1024


def _device_has_bf16_eup():
    """bf16 transcendentals are worthwhile on v6e/v7x; not on <= v5."""
    try:
        kind = jax.devices()[0].device_kind.lower()
    except Exception:
        return False
    if "tpu" not in kind:
        return False
    return not any(v in kind for v in ("v2", "v3", "v4", "v5"))


def _pick_edge_tile(n_pad, n_edges, head, hc, capacity):
    """Largest multiple-of-128 edge tile whose streaming working set fits a
    generation-aware VMEM budget.  Residents (xl, a_x, output block, scratch) are
    subtracted; the per-column cost includes the head-unrolled (N, TE) temporaries
    so the static Python head loop cannot blow the budget via extended live ranges."""
    resident = (2 * n_pad * hc * 2            # xl bf16, double-buffered
                + 2 * n_pad * 128 * 4         # a_x f32, double-buffered
                + 2 * n_pad * hc * 4          # resident output block
                + n_pad * 128 * 4             # accumulator scratch (lane-padded)
                + n_pad * 4                   # node-degree scratch
                + 2 * 1024 * 1024)            # small operands / compiler margin
    budget = max(int(capacity * 0.55) - resident, 4 * 1024 * 1024)
    per_col = n_pad * (2 * 2                  # incidence bf16, double-buffered
                       + 4                    # mask f32
                       + 4                    # score / p live
                       + head * (4 + 2))      # per-head score(f32)+beta(bf16) overlap
    per_col += 2 * 8 * 4                      # a_e tile (negligible)
    te = max(128, budget // max(per_col, 1) // 128 * 128)
    return int(min(te, _round_up(n_edges, 128), 2048))


# ----------------------------- Pallas kernels --------------------------------


def _hconv_kernel(head, conv_dim, use_bf16_exp,
                  m_ref, xl_ref, ax_ref, ae_ref, b_conv_ref,
                  nodes_ref,
                  acc_sc, degn_sc):
    """Pass 1: hypergraph conv, accumulated over hyperedge (E) tiles.

    nodes_ref: lane-dense (N, head*conv_dim) f32 output (written at finalize).
    acc_sc   : (N, head*conv_dim) f32 running un-normalized accumulator.
    """
    f32 = jnp.float32
    bf16 = jnp.bfloat16
    j = pl.program_id(0)
    C = conv_dim

    @pl.when(j == 0)
    def _init():
        acc_sc[...] = jnp.zeros_like(acc_sc)
        degn_sc[...] = jnp.zeros_like(degn_sc)

    m = m_ref[...]                                         # (N, TE) bf16 incidence cols
    mask = m != 0
    maskf = mask.astype(f32)
    deg_e = jnp.sum(maskf, axis=0, keepdims=True)          # (1, TE)  |e| per edge (B)
    degn_sc[...] += jnp.sum(maskf, axis=1, keepdims=True)  # (N, 1)   accumulate D
    sqrt_b_inv = jnp.where(deg_e > 0.0, lax.rsqrt(deg_e), 0.0)

    xl = xl_ref[...]                                       # (N, H*C) bf16 (precomputed)
    ax = ax_ref[...]                                       # (N, 128) f32; cols [:head] real
    ae = ae_ref[...]                                       # (8, TE)  f32; rows [:head] real

    for h in range(head):                                  # static unrolled loop
        xh = xl[:, h * C:(h + 1) * C]                      # (N, C) bf16
        score = ax[:, h:h + 1] + ae[h:h + 1, :]            # (N, TE) f32
        score = jnp.maximum(score, 0.2 * score)            # LeakyReLU(0.2): mul+max
        score = jnp.where(mask, score, -1e30)              # fill; exp underflows to 0
        smax = jnp.max(score, axis=0, keepdims=True)       # softmax grouped per edge
        z = score - smax
        if use_bf16_exp:                                   # bf16 EUP ~2x exp on v6e/v7x
            p = jnp.exp(z.astype(bf16))
        else:
            p = jnp.exp(z)
        denom = jnp.sum(p.astype(f32), axis=0, keepdims=True) + 1e-16
        # Fold B^-1 and the softmax normalization into ONE (1, TE) scale vector.
        scale = sqrt_b_inv * pl.reciprocal(denom, approx=True)
        # TODO(synk): dropout on alpha (p=0.1) is a training-only no-op; omitted.
        beta = (p * scale.astype(p.dtype)).astype(bf16)    # (N, TE) bf16
        #   beta @ (beta^T @ xh) == alpha @ diag(B^-1) @ alpha^T @ xh
        out_e = lax.dot_general(beta, xh, (((0,), (0,)), ((), ())),
                                preferred_element_type=f32)        # (TE, C)
        out_n = jnp.dot(beta, out_e.astype(bf16),
                        preferred_element_type=f32)                # (N, C)
        acc_sc[:, h * C:(h + 1) * C] += out_n              # accumulate across E tiles

    @pl.when(j == pl.num_programs(0) - 1)
    def _finalize():
        deg_n = degn_sc[...]
        d_inv = jnp.where(deg_n > 0.0, 1.0 / deg_n, 0.0)           # (N, 1)
        nodes_ref[...] = acc_sc[...] * d_inv + b_conv_ref[...]     # D^-1 + conv bias


def _readout_kernel(m_ref, nodes_ref, w_out_ref, b_out_ref, out_ref):
    """Pass 2: he = incidence^T @ nodes ; logits = he @ w_out + b_out (lane-padded)."""
    f32 = jnp.float32
    bf16 = jnp.bfloat16
    he = lax.dot_general(m_ref[...], nodes_ref[...], (((0,), (0,)), ((), ())),
                         preferred_element_type=f32)               # (TE, H*C)
    out_ref[...] = jnp.dot(he.astype(bf16), w_out_ref[...],
                           preferred_element_type=f32) + b_out_ref[...]


# ----------------------------- wrapper ---------------------------------------


def closegaps_forward(params, input_features, incidence_matrix, *,
                      head, conv_dim, edge_tile=None, use_bf16_exp=None):
    f32, bf16 = jnp.float32, jnp.bfloat16
    n_nodes, n_edges = incidence_matrix.shape
    HC = head * conv_dim
    OUT_PAD = 128                                      # lane-dense classifier output

    n_pad = _round_up(n_nodes, 128)
    capacity = _vmem_capacity_bytes()
    te = edge_tile if edge_tile is not None else _pick_edge_tile(
        n_pad, n_edges, head, HC, capacity)
    e_pad = _round_up(n_edges, te)
    grid = (e_pad // te,)
    if use_bf16_exp is None:
        use_bf16_exp = _device_has_bf16_eup()
    vmem_limit = int(capacity * 3 // 4)

    # ----- tile-invariant attention terms precomputed in XLA (f32), then padded -----
    xenc = jnp.maximum(input_features @ params["w_enc"] + params["b_enc"], 0.0)
    xl = xenc @ params["w_conv"]                                        # (N, H*C)
    a_x = jnp.einsum("nhc,hc->nh", xl.reshape(n_nodes, head, conv_dim),
                     params["att_x"])                                   # (N, head)
    hattr = incidence_matrix.T @ params["w_attr"] + params["b_attr"]    # (E, emb)
    hl = hattr @ params["w_conv"]                                       # (E, H*C)
    a_e = jnp.einsum("ehc,ch->eh", hl.reshape(n_edges, head, conv_dim),
                     params["att_e_t"])                                 # (E, head)

    m_pad = _pad2(incidence_matrix, n_pad, e_pad).astype(bf16)          # (N_pad, E_pad)
    xl_pad = _pad2(xl, n_pad, HC).astype(bf16)
    ax_pad = _pad2(a_x, n_pad, 128).astype(f32)
    ae_pad = _pad2(a_e.T, 8, e_pad).astype(f32)
    b_conv = params["b_conv"].reshape(1, HC).astype(f32)
    w_out = _pad2(params["w_out"], HC, OUT_PAD).astype(bf16)
    b_out = _pad2(params["b_out"], 1, OUT_PAD).astype(f32)

    flops = head * 4 * n_pad * e_pad * conv_dim
    bytes_accessed = (m_pad.size * 2 + ae_pad.size * 4 + xl_pad.size * 2
                      + ax_pad.size * 4 + n_pad * HC * 4)

    # ----- pass 1: hypergraph conv, E-tiled accumulation into resident node output
    nodes = pl.pallas_call(
        functools.partial(_hconv_kernel, head, conv_dim, use_bf16_exp),
        out_shape=jax.ShapeDtypeStruct((n_pad, HC), f32),
        grid_spec=pltpu.PrefetchScalarGridSpec(
            num_scalar_prefetch=0,
            grid=grid,
            in_specs=[
                pl.BlockSpec((n_pad, te), lambda j: (0, j)),       # incidence cols
                pl.BlockSpec((n_pad, HC), lambda j: (0, 0)),       # xl (precomputed)
                pl.BlockSpec((n_pad, 128), lambda j: (0, 0)),      # a_x per head
                pl.BlockSpec((8, te), lambda j: (0, j)),           # a_e per head (tiled)
                pl.BlockSpec((1, HC), lambda j: (0, 0)),           # conv bias
            ],
            out_specs=pl.BlockSpec((n_pad, HC), lambda j: (0, 0)),
            scratch_shapes=[pltpu.VMEM((n_pad, HC), f32),          # node accumulator
                            pltpu.VMEM((n_pad, 1), f32)],          # node degree acc
        ),
        compiler_params=pltpu.CompilerParams(
            dimension_semantics=("arbitrary",),
            vmem_limit_bytes=vmem_limit),
        cost_estimate=pl.CostEstimate(flops=int(flops),
                                      transcendentals=int(head * n_pad * e_pad),
                                      bytes_accessed=int(bytes_accessed)),
    )(m_pad, xl_pad, ax_pad, ae_pad, b_conv)

    nodes_bf16 = nodes.astype(bf16)     # tiny cast; no relayout between passes

    # ----- pass 2: per-edge-tile readout + classifier (lane-dense padded output)
    logits_pad = pl.pallas_call(
        _readout_kernel,
        out_shape=jax.ShapeDtypeStruct((e_pad, OUT_PAD), f32),
        grid_spec=pltpu.PrefetchScalarGridSpec(
            num_scalar_prefetch=0,
            grid=grid,
            in_specs=[
                pl.BlockSpec((n_pad, te), lambda j: (0, j)),
                pl.BlockSpec((n_pad, HC), lambda j: (0, 0)),
                pl.BlockSpec((HC, OUT_PAD), lambda j: (0, 0)),
                pl.BlockSpec((1, OUT_PAD), lambda j: (0, 0)),
            ],
            out_specs=pl.BlockSpec((te, OUT_PAD), lambda j: (j, 0)),
        ),
        compiler_params=pltpu.CompilerParams(
            dimension_semantics=("parallel",),
            vmem_limit_bytes=vmem_limit),
    )(m_pad, nodes_bf16, w_out, b_out)

    return logits_pad[:n_edges, :2]


# ----------------------------- reference (plain JAX, f32) ---------------------


def closegaps_reference(params, x, m, *, head, conv_dim):
    f32 = jnp.float32
    mt = m.T
    xenc = jnp.maximum(x @ params["w_enc"] + params["b_enc"], 0.0)
    hattr = mt @ params["w_attr"] + params["b_attr"]
    xl = xenc @ params["w_conv"]
    hl = hattr @ params["w_conv"]
    mask = m != 0
    maskf = mask.astype(f32)
    deg_n = jnp.sum(maskf, axis=1, keepdims=True)
    deg_e = jnp.sum(maskf, axis=0, keepdims=True)
    d_inv = jnp.where(deg_n > 0.0, 1.0 / deg_n, 0.0)
    b_inv = jnp.where(deg_e > 0.0, 1.0 / deg_e, 0.0)
    C = conv_dim
    outs = []
    for h in range(head):
        xh = xl[:, h * C:(h + 1) * C]
        a_x = xh @ params["att_x"][h]                               # (N,)
        a_e = hl[:, h * C:(h + 1) * C] @ params["att_e_t"][:, h]    # (E,)
        score = a_x[:, None] + a_e[None, :]
        score = jnp.where(score > 0.0, score, 0.2 * score)
        score = jnp.where(mask, score, -1e30)
        p = jnp.exp(score - jnp.max(score, axis=0, keepdims=True)) * maskf
        alpha = p / (jnp.sum(p, axis=0, keepdims=True) + 1e-16)
        out_e = (alpha.T @ xh) * b_inv.T
        out_n = (alpha @ out_e) * d_inv
        outs.append(out_n)
    nodes = jnp.concatenate(outs, axis=1) + params["b_conv"]
    he = mt @ nodes
    return he @ params["w_out"] + params["b_out"]


# ----------------------------- parameter init --------------------------------


def xavier(key, shape):
    fan_in, fan_out = shape
    lim = (6.0 / (fan_in + fan_out)) ** 0.5
    return jax.random.uniform(key, shape, jnp.float32, -lim, lim)


def init_params(key, *, n_nodes, in_feat, emb_dim, conv_dim, head):
    HC = head * conv_dim
    ks = jax.random.split(key, 10)
    att = xavier(ks[4], (head, 2 * conv_dim))              # PyG att: (1, H, 2*C)
    return {
        "w_enc": xavier(ks[0], (in_feat, emb_dim)),        # linear_encoder
        "b_enc": 0.01 * jax.random.normal(ks[5], (1, emb_dim), jnp.float32),
        "w_attr": xavier(ks[1], (n_nodes, emb_dim)),       # hyper_attr_liner
        "b_attr": 0.01 * jax.random.normal(ks[6], (1, emb_dim), jnp.float32),
        "w_conv": xavier(ks[2], (emb_dim, HC)),            # HypergraphConv.lin
        "att_x": att[:, :conv_dim],                        # (H, C)  node half of att
        "att_e_t": att[:, conv_dim:].T,                    # (C, H)  edge half of att
        "b_conv": 0.02 * jax.random.normal(ks[7], (1, HC), jnp.float32),
        "w_out": xavier(ks[3], (HC, 2)),                   # hyperedge_linear
        "b_out": 0.01 * jax.random.normal(ks[8], (1, 2), jnp.float32),
    }


# ----------------------------- main -------------------------------------------


if __name__ == "__main__":
    # small, module-consistent shapes
    N = 40        # metabolite nodes (input_num)
    E = 200       # hyperedges (reactions)
    FIN = 32      # input_feature_num
    EMB = 32      # emb_dim (extra_feature is None -> in_channel == emb_dim)
    CONV = 16     # conv_dim
    HEAD = 3      # head

    key = jax.random.PRNGKey(0)
    k_feat, k_inc, k_par = jax.random.split(key, 3)

    input_features = jax.random.normal(k_feat, (N, FIN), jnp.float32)
    incidence = (jax.random.uniform(k_inc, (N, E)) < 0.3).astype(jnp.float32)
    cols = jnp.arange(E)
    incidence = incidence.at[cols % N, cols].set(1.0)   # every hyperedge has a node

    params = init_params(k_par, n_nodes=N, in_feat=FIN, emb_dim=EMB,
                         conv_dim=CONV, head=HEAD)

    try:
        out = closegaps_forward(params, input_features, incidence,
                                head=HEAD, conv_dim=CONV)
        out = jax.block_until_ready(out)
    except Exception:
        # Safety net: retry with f32 exp if bf16 transcendentals are unavailable.
        out = closegaps_forward(params, input_features, incidence,
                                head=HEAD, conv_dim=CONV, use_bf16_exp=False)
        out = jax.block_until_ready(out)

    ref = closegaps_reference(params, input_features, incidence,
                              head=HEAD, conv_dim=CONV)
    ref = jax.block_until_ready(ref)

    assert out.shape == (E, 2)
    assert bool(jnp.all(jnp.isfinite(out)))
    # kernel uses bf16 MXU operands, approx reciprocal and (v6e/v7x) bf16 exp
    # -> loose compare vs the f32 reference
    assert bool(jnp.allclose(out, ref, atol=7.5e-2, rtol=7.5e-2)), \
        float(jnp.max(jnp.abs(out - ref)))
    print("KERNEL_OK")
</pallas_src>

<mosaic_0001>
module attributes {stable_mosaic.version = 11 : i64} {
  func.func @_hconv_kernel(%arg0: i32, %arg1: memref<128x256xbf16, #tpu.memory_space<vmem>>, %arg2: memref<128x48xbf16, #tpu.memory_space<vmem>>, %arg3: memref<128x128xf32, #tpu.memory_space<vmem>>, %arg4: memref<8x256xf32, #tpu.memory_space<vmem>>, %arg5: memref<1x48xf32, #tpu.memory_space<vmem>>, %arg6: memref<128x48xf32, #tpu.memory_space<vmem>>, %arg7: memref<128x48xf32, #tpu.memory_space<vmem>>, %arg8: memref<128x1xf32, #tpu.memory_space<vmem>>) attributes {dimension_semantics = [#tpu.dimension_semantics<arbitrary>], iteration_bounds = array<i64: 1>, scalar_prefetch = 0 : i64, scratch_operands = 2 : i64, tpu.core_type = #tpu.core_type<tc>, window_params = [{transform_indices = @transform_0, window_bounds = array<i64: 128, 256>}, {pipeline_mode = #tpu.pipeline_mode<synchronous>, transform_indices = @transform_1, window_bounds = array<i64: 128, 48>}, {pipeline_mode = #tpu.pipeline_mode<synchronous>, transform_indices = @transform_2, window_bounds = array<i64: 128, 128>}, {transform_indices = @transform_3, window_bounds = array<i64: 8, 256>}, {pipeline_mode = #tpu.pipeline_mode<synchronous>, transform_indices = @transform_4, window_bounds = array<i64: 1, 48>}, {pipeline_mode = #tpu.pipeline_mode<synchronous>, transform_indices = @transform_5, window_bounds = array<i64: 128, 48>}]} {
    %c0_i32 = arith.constant 0 : i32
    %0 = arith.cmpi eq, %arg0, %c0_i32 : i32
    %1 = arith.extui %0 : i1 to i32
    %c0_i32_0 = arith.constant 0 : i32
    %2 = arith.cmpi ne, %1, %c0_i32_0 : i32
    scf.if %2 {
      %cst_49 = arith.constant 0.000000e+00 : f32
      %119 = vector.broadcast %cst_49 : f32 to vector<128x48xf32>
      %c0_50 = arith.constant 0 : index
      %c0_51 = arith.constant 0 : index
      %120 = vector.load %arg7[%c0_50, %c0_51] : memref<128x48xf32, #tpu.memory_space<vmem>>, vector<128x48xf32>
      tpu.vector_store %arg7[%c0_50, %c0_51], %119 {strides = array<i32>} : memref<128x48xf32, #tpu.memory_space<vmem>>, vector<128x48xf32>,
      %cst_52 = arith.constant 0.000000e+00 : f32
      %121 = vector.broadcast %cst_52 : f32 to vector<128x1xf32>
      %c0_53 = arith.constant 0 : index
      %c0_54 = arith.constant 0 : index
      %122 = vector.load %arg8[%c0_53, %c0_54] : memref<128x1xf32, #tpu.memory_space<vmem>>, vector<128x1xf32>
      tpu.vector_store %arg8[%c0_53, %c0_54], %121 {strides = array<i32>} : memref<128x1xf32, #tpu.memory_space<vmem>>, vector<128x1xf32>,
    } else {
    }
    %c0 = arith.constant 0 : index
    %c0_1 = arith.constant 0 : index
    %3 = vector.load %arg1[%c0, %c0_1] : memref<128x256xbf16, #tpu.memory_space<vmem>>, vector<128x256xbf16>
    %cst = arith.constant 0.000000e+00 : bf16
    %4 = vector.broadcast %cst : bf16 to vector<128x256xbf16>
    %5 = arith.cmpf one, %3, %4 : vector<128x256xbf16>
    %6 = arith.extui %5 : vector<128x256xi1> to vector<128x256xi32>
    %7 = arith.sitofp %6 : vector<128x256xi32> to vector<128x256xf32>
    %cst_2 = arith.constant dense<0.000000e+00> : vector<256xf32>
    %8 = vector.multi_reduction <add>, %7, %cst_2 [0] : vector<128x256xf32> to vector<256xf32>
    %9 = vector.shape_cast %8 : vector<256xf32> to vector<1x256xf32>
    %c0_3 = arith.constant 0 : index
    %c0_4 = arith.constant 0 : index
    %10 = vector.load %arg8[%c0_3, %c0_4] : memref<128x1xf32, #tpu.memory_space<vmem>>, vector<128x1xf32>
    %cst_5 = arith.constant dense<0.000000e+00> : vector<128xf32>
    %11 = vector.multi_reduction <add>, %7, %cst_5 [1] : vector<128x256xf32> to vector<128xf32>
    %12 = vector.shape_cast %11 : vector<128xf32> to vector<128x1xf32>
    %13 = arith.addf %10, %12 : vector<128x1xf32>
    %c0_6 = arith.constant 0 : index
    %c0_7 = arith.constant 0 : index
    %14 = vector.load %arg8[%c0_6, %c0_7] : memref<128x1xf32, #tpu.memory_space<vmem>>, vector<128x1xf32>
    tpu.vector_store %arg8[%c0_6, %c0_7], %13 {strides = array<i32>} : memref<128x1xf32, #tpu.memory_space<vmem>>, vector<128x1xf32>,
    %cst_8 = arith.constant 0.000000e+00 : f32
    %15 = vector.broadcast %cst_8 : f32 to vector<1x256xf32>
    %16 = arith.cmpf ogt, %9, %15 : vector<1x256xf32>
    %17 = math.rsqrt %9 : vector<1x256xf32>
    %cst_9 = arith.constant 0.000000e+00 : f32
    %18 = vector.broadcast %cst_9 : f32 to vector<1x256xf32>
    %19 = arith.select %16, %17, %18 : vector<1x256xi1>, vector<1x256xf32>
    %c0_10 = arith.constant 0 : index
    %c0_11 = arith.constant 0 : index
    %20 = vector.load %arg2[%c0_10, %c0_11] : memref<128x48xbf16, #tpu.memory_space<vmem>>, vector<128x48xbf16>
    %c0_12 = arith.constant 0 : index
    %c0_13 = arith.constant 0 : index
    %21 = vector.load %arg3[%c0_12, %c0_13] : memref<128x128xf32, #tpu.memory_space<vmem>>, vector<128x128xf32>
    %c0_14 = arith.constant 0 : index
    %c0_15 = arith.constant 0 : index
    %22 = vector.load %arg4[%c0_14, %c0_15] : memref<8x256xf32, #tpu.memory_space<vmem>>, vector<8x256xf32>
    %23 = vector.extract_strided_slice %20 {offsets = [0, 0], sizes = [128, 16], strides = [1, 1]} : vector<128x48xbf16> to vector<128x16xbf16>
    %24 = vector.extract_strided_slice %21 {offsets = [0, 0], sizes = [128, 1], strides = [1, 1]} : vector<128x128xf32> to vector<128x1xf32>
    %25 = vector.extract_strided_slice %22 {offsets = [0, 0], sizes = [1, 256], strides = [1, 1]} : vector<8x256xf32> to vector<1x256xf32>
    %26 = vector.broadcast %24 : vector<128x1xf32> to vector<128x256xf32>
    %27 = vector.broadcast %25 : vector<1x256xf32> to vector<128x256xf32>
    %28 = arith.addf %26, %27 : vector<128x256xf32>
    %cst_16 = arith.constant 2.000000e-01 : f32
    %29 = vector.broadcast %cst_16 : f32 to vector<128x256xf32>
    %30 = arith.mulf %29, %28 : vector<128x256xf32>
    %31 = arith.maximumf %28, %30 : vector<128x256xf32>
    %cst_17 = arith.constant -1.000000e+30 : f32
    %32 = vector.broadcast %cst_17 : f32 to vector<128x256xf32>
    %33 = arith.select %5, %31, %32 : vector<128x256xi1>, vector<128x256xf32>
    %cst_18 = arith.constant dense<0xFF800000> : vector<256xf32>
    %34 = vector.multi_reduction <maximumf>, %33, %cst_18 [0] : vector<128x256xf32> to vector<256xf32>
    %35 = vector.shape_cast %34 : vector<256xf32> to vector<1x256xf32>
    %36 = vector.broadcast %35 : vector<1x256xf32> to vector<128x256xf32>
    %37 = arith.subf %33, %36 : vector<128x256xf32>
    %38 = math.exp %37 : vector<128x256xf32>
    %cst_19 = arith.constant dense<0.000000e+00> : vector<256xf32>
    %39 = vector.multi_reduction <add>, %38, %cst_19 [0] : vector<128x256xf32> to vector<256xf32>
    %40 = vector.shape_cast %39 : vector<256xf32> to vector<1x256xf32>
    %cst_20 = arith.constant 1.000000e-16 : f32
    %41 = vector.broadcast %cst_20 : f32 to vector<1x256xf32>
    %42 = arith.addf %40, %41 : vector<1x256xf32>
    %43 = tpu.reciprocal %42 {approx = true} : vector<1x256xf32> -> vector<1x256xf32>
    %44 = arith.mulf %19, %43 : vector<1x256xf32>
    %45 = vector.broadcast %44 : vector<1x256xf32> to vector<128x256xf32>
    %46 = arith.mulf %38, %45 : vector<128x256xf32>
    %47 = arith.truncf %46 : vector<128x256xf32> to vector<128x256xbf16>
    %cst_21 = arith.constant dense<0.000000e+00> : vector<256x16xf32>
    %48 = tpu.matmul %47, %23, %cst_21 {dimension_numbers = #tpu.dot_dimension_numbers<[0], [0], [1], [1], [0, 1, 1, 1], [], []>} : vector<128x256xbf16>, vector<128x16xbf16>, vector<256x16xf32> -> vector<256x16xf32>
    %49 = arith.truncf %48 : vector<256x16xf32> to vector<256x16xbf16>
    %cst_22 = arith.constant dense<0.000000e+00> : vector<128x16xf32>
    %50 = tpu.matmul %47, %49, %cst_22 {dimension_numbers = #tpu.dot_dimension_numbers<[1], [0], [0], [1], [0, 0, 1, 1], [], []>} : vector<128x256xbf16>, vector<256x16xbf16>, vector<128x16xf32> -> vector<128x16xf32>
    %c0_23 = arith.constant 0 : index
    %c0_24 = arith.constant 0 : index
    %51 = vector.load %arg7[%c0_23, %c0_24] : memref<128x48xf32, #tpu.memory_space<vmem>>, vector<128x16xf32>
    %52 = arith.addf %51, %50 : vector<128x16xf32>
    %c0_25 = arith.constant 0 : index
    %c0_26 = arith.constant 0 : index
    %53 = vector.load %arg7[%c0_25, %c0_26] : memref<128x48xf32, #tpu.memory_space<vmem>>, vector<128x16xf32>
    tpu.vector_store %arg7[%c0_25, %c0_26], %52 {strides = array<i32>} : memref<128x48xf32, #tpu.memory_space<vmem>>, vector<128x16xf32>,
    %54 = vector.extract_strided_slice %20 {offsets = [0, 16], sizes = [128, 16], strides = [1, 1]} : vector<128x48xbf16> to vector<128x16xbf16>
    %55 = vector.extract_strided_slice %21 {offsets = [0, 1], sizes = [128, 1], strides = [1, 1]} : vector<128x128xf32> to vector<128x1xf32>
    %56 = vector.extract_strided_slice %22 {offsets = [1, 0], sizes = [1, 256], strides = [1, 1]} : vector<8x256xf32> to vector<1x256xf32>
    %57 = vector.broadcast %55 : vector<128x1xf32> to vector<128x256xf32>
    %58 = vector.broadcast %56 : vector<1x256xf32> to vector<128x256xf32>
    %59 = arith.addf %57, %58 : vector<128x256xf32>
    %cst_27 = arith.constant 2.000000e-01 : f32
    %60 = vector.broadcast %cst_27 : f32 to vector<128x256xf32>
    %61 = arith.mulf %60, %59 : vector<128x256xf32>
    %62 = arith.maximumf %59, %61 : vector<128x256xf32>
    %cst_28 = arith.constant -1.000000e+30 : f32
    %63 = vector.broadcast %cst_28 : f32 to vector<128x256xf32>
    %64 = arith.select %5, %62, %63 : vector<128x256xi1>, vector<128x256xf32>
    %cst_29 = arith.constant dense<0xFF800000> : vector<256xf32>
    %65 = vector.multi_reduction <maximumf>, %64, %cst_29 [0] : vector<128x256xf32> to vector<256xf32>
    %66 = vector.shape_cast %65 : vector<256xf32> to vector<1x256xf32>
    %67 = vector.broadcast %66 : vector<1x256xf32> to vector<128x256xf32>
    %68 = arith.subf %64, %67 : vector<128x256xf32>
    %69 = math.exp %68 : vector<128x256xf32>
    %cst_30 = arith.constant dense<0.000000e+00> : vector<256xf32>
    %70 = vector.multi_reduction <add>, %69, %cst_30 [0] : vector<128x256xf32> to vector<256xf32>
    %71 = vector.shape_cast %70 : vector<256xf32> to vector<1x256xf32>
    %cst_31 = arith.constant 1.000000e-16 : f32
    %72 = vector.broadcast %cst_31 : f32 to vector<1x256xf32>
    %73 = arith.addf %71, %72 : vector<1x256xf32>
    %74 = tpu.reciprocal %73 {approx = true} : vector<1x256xf32> -> vector<1x256xf32>
    %75 = arith.mulf %19, %74 : vector<1x256xf32>
    %76 = vector.broadcast %75 : vector<1x256xf32> to vector<128x256xf32>
    %77 = arith.mulf %69, %76 : vector<128x256xf32>
    %78 = arith.truncf %77 : vector<128x256xf32> to vector<128x256xbf16>
    %cst_32 = arith.constant dense<0.000000e+00> : vector<256x16xf32>
    %79 = tpu.matmul %78, %54, %cst_32 {dimension_numbers = #tpu.dot_dimension_numbers<[0], [0], [1], [1], [0, 1, 1, 1], [], []>} : vector<128x256xbf16>, vector<128x16xbf16>, vector<256x16xf32> -> vector<256x16xf32>
    %80 = arith.truncf %79 : vector<256x16xf32> to vector<256x16xbf16>
    %cst_33 = arith.constant dense<0.000000e+00> : vector<128x16xf32>
    %81 = tpu.matmul %78, %80, %cst_33 {dimension_numbers = #tpu.dot_dimension_numbers<[1], [0], [0], [1], [0, 0, 1, 1], [], []>} : vector<128x256xbf16>, vector<256x16xbf16>, vector<128x16xf32> -> vector<128x16xf32>
    %c0_34 = arith.constant 0 : index
    %c16 = arith.constant 16 : index
    %82 = vector.load %arg7[%c0_34, %c16] : memref<128x48xf32, #tpu.memory_space<vmem>>, vector<128x16xf32>
    %83 = arith.addf %82, %81 : vector<128x16xf32>
    %c0_35 = arith.constant 0 : index
    %c16_36 = arith.constant 16 : index
    %84 = vector.load %arg7[%c0_35, %c16_36] : memref<128x48xf32, #tpu.memory_space<vmem>>, vector<128x16xf32>
    tpu.vector_store %arg7[%c0_35, %c16_36], %83 {strides = array<i32>} : memref<128x48xf32, #tpu.memory_space<vmem>>, vector<128x16xf32>,
    %85 = vector.extract_strided_slice %20 {offsets = [0, 32], sizes = [128, 16], strides = [1, 1]} : vector<128x48xbf16> to vector<128x16xbf16>
    %86 = vector.extract_strided_slice %21 {offsets = [0, 2], sizes = [128, 1], strides = [1, 1]} : vector<128x128xf32> to vector<128x1xf32>
    %87 = vector.extract_strided_slice %22 {offsets = [2, 0], sizes = [1, 256], strides = [1, 1]} : vector<8x256xf32> to vector<1x256xf32>
    %88 = vector.broadcast %86 : vector<128x1xf32> to vector<128x256xf32>
    %89 = vector.broadcast %87 : vector<1x256xf32> to vector<128x256xf32>
    %90 = arith.addf %88, %89 : vector<128x256xf32>
    %cst_37 = arith.constant 2.000000e-01 : f32
    %91 = vector.broadcast %cst_37 : f32 to vector<128x256xf32>
    %92 = arith.mulf %91, %90 : vector<128x256xf32>
    %93 = arith.maximumf %90, %92 : vector<128x256xf32>
    %cst_38 = arith.constant -1.000000e+30 : f32
    %94 = vector.broadcast %cst_38 : f32 to vector<128x256xf32>
    %95 = arith.select %5, %93, %94 : vector<128x256xi1>, vector<128x256xf32>
    %cst_39 = arith.constant dense<0xFF800000> : vector<256xf32>
    %96 = vector.multi_reduction <maximumf>, %95, %cst_39 [0] : vector<128x256xf32> to vector<256xf32>
    %97 = vector.shape_cast %96 : vector<256xf32> to vector<1x256xf32>
    %98 = vector.broadcast %97 : vector<1x256xf32> to vector<128x256xf32>
    %99 = arith.subf %95, %98 : vector<128x256xf32>
    %100 = math.exp %99 : vector<128x256xf32>
    %cst_40 = arith.constant dense<0.000000e+00> : vector<256xf32>
    %101 = vector.multi_reduction <add>, %100, %cst_40 [0] : vector<128x256xf32> to vector<256xf32>
    %102 = vector.shape_cast %101 : vector<256xf32> to vector<1x256xf32>
    %cst_41 = arith.constant 1.000000e-16 : f32
    %103 = vector.broadcast %cst_41 : f32 to vector<1x256xf32>
    %104 = arith.addf %102, %103 : vector<1x256xf32>
    %105 = tpu.reciprocal %104 {approx = true} : vector<1x256xf32> -> vector<1x256xf32>
    %106 = arith.mulf %19, %105 : vector<1x256xf32>
    %107 = vector.broadcast %106 : vector<1x256xf32> to vector<128x256xf32>
    %108 = arith.mulf %100, %107 : vector<128x256xf32>
    %109 = arith.truncf %108 : vector<128x256xf32> to vector<128x256xbf16>
    %cst_42 = arith.constant dense<0.000000e+00> : vector<256x16xf32>
    %110 = tpu.matmul %109, %85, %cst_42 {dimension_numbers = #tpu.dot_dimension_numbers<[0], [0], [1], [1], [0, 1, 1, 1], [], []>} : vector<128x256xbf16>, vector<128x16xbf16>, vector<256x16xf32> -> vector<256x16xf32>
    %111 = arith.truncf %110 : vector<256x16xf32> to vector<256x16xbf16>
    %cst_43 = arith.constant dense<0.000000e+00> : vector<128x16xf32>
    %112 = tpu.matmul %109, %111, %cst_43 {dimension_numbers = #tpu.dot_dimension_numbers<[1], [0], [0], [1], [0, 0, 1, 1], [], []>} : vector<128x256xbf16>, vector<256x16xbf16>, vector<128x16xf32> -> vector<128x16xf32>
    %c0_44 = arith.constant 0 : index
    %c32 = arith.constant 32 : index
    %113 = vector.load %arg7[%c0_44, %c32] : memref<128x48xf32, #tpu.memory_space<vmem>>, vector<128x16xf32>
    %114 = arith.addf %113, %112 : vector<128x16xf32>
    %c0_45 = arith.constant 0 : index
    %c32_46 = arith.constant 32 : index
    %115 = vector.load %arg7[%c0_45, %c32_46] : memref<128x48xf32, #tpu.memory_space<vmem>>, vector<128x16xf32>
    tpu.vector_store %arg7[%c0_45, %c32_46], %114 {strides = array<i32>} : memref<128x48xf32, #tpu.memory_space<vmem>>, vector<128x16xf32>,
    %c0_i32_47 = arith.constant 0 : i32
    %116 = arith.cmpi eq, %arg0, %c0_i32_47 : i32
    %117 = arith.extui %116 : i1 to i32
    %c0_i32_48 = arith.constant 0 : i32
    %118 = arith.cmpi ne, %117, %c0_i32_48 : i32
    scf.if %118 {
      %c0_49 = arith.constant 0 : index
      %c0_50 = arith.constant 0 : index
      %119 = vector.load %arg8[%c0_49, %c0_50] : memref<128x1xf32, #tpu.memory_space<vmem>>, vector<128x1xf32>
      %cst_51 = arith.constant 0.000000e+00 : f32
      %120 = vector.broadcast %cst_51 : f32 to vector<128x1xf32>
      %121 = arith.cmpf ogt, %119, %120 : vector<128x1xf32>
      %cst_52 = arith.constant 1.000000e+00 : f32
      %122 = vector.broadcast %cst_52 : f32 to vector<128x1xf32>
      %123 = arith.divf %122, %119 : vector<128x1xf32>
      %cst_53 = arith.constant 0.000000e+00 : f32
      %124 = vector.broadcast %cst_53 : f32 to vector<128x1xf32>
      %125 = arith.select %121, %123, %124 : vector<128x1xi1>, vector<128x1xf32>
      %c0_54 = arith.constant 0 : index
      %c0_55 = arith.constant 0 : index
      %126 = vector.load %arg7[%c0_54, %c0_55] : memref<128x48xf32, #tpu.memory_space<vmem>>, vector<128x48xf32>
      %127 = vector.broadcast %125 : vector<128x1xf32> to vector<128x48xf32>
      %128 = arith.mulf %126, %127 : vector<128x48xf32>
      %c0_56 = arith.constant 0 : index
      %c0_57 = arith.constant 0 : index
      %129 = vector.load %arg5[%c0_56, %c0_57] : memref<1x48xf32, #tpu.memory_space<vmem>>, vector<1x48xf32>
      %130 = vector.broadcast %129 : vector<1x48xf32> to vector<128x48xf32>
      %131 = arith.addf %128, %130 : vector<128x48xf32>
      %c0_58 = arith.constant 0 : index
      %c0_59 = arith.constant 0 : index
      %132 = vector.load %arg6[%c0_58, %c0_59] : memref<128x48xf32, #tpu.memory_space<vmem>>, vector<128x48xf32>
      tpu.vector_store %arg6[%c0_58, %c0_59], %131 {strides = array<i32>} : memref<128x48xf32, #tpu.memory_space<vmem>>, vector<128x48xf32>,
    } else {
    }
    return
  }
  func.func @transform_0(%arg0: i32) -> (i32, i32) {
    %c0_i32 = arith.constant 0 : i32
    %c0_i32_0 = arith.constant 0 : i32
    return %c0_i32, %arg0 : i32, i32
  }
  func.func @transform_1(%arg0: i32) -> (i32, i32) {
    %c0_i32 = arith.constant 0 : i32
    %c0_i32_0 = arith.constant 0 : i32
    %c0_i32_1 = arith.constant 0 : i32
    return %c0_i32, %c0_i32_0 : i32, i32
  }
  func.func @transform_2(%arg0: i32) -> (i32, i32) {
    %c0_i32 = arith.constant 0 : i32
    %c0_i32_0 = arith.constant 0 : i32
    %c0_i32_1 = arith.constant 0 : i32
    return %c0_i32, %c0_i32_0 : i32, i32
  }
  func.func @transform_3(%arg0: i32) -> (i32, i32) {
    %c0_i32 = arith.constant 0 : i32
    %c0_i32_0 = arith.constant 0 : i32
    return %c0_i32, %arg0 : i32, i32
  }
  func.func @transform_4(%arg0: i32) -> (i32, i32) {
    %c0_i32 = arith.constant 0 : i32
    %c0_i32_0 = arith.constant 0 : i32
    %c0_i32_1 = arith.constant 0 : i32
    return %c0_i32, %c0_i32_0 : i32, i32
  }
  func.func @transform_5(%arg0: i32) -> (i32, i32) {
    %c0_i32 = arith.constant 0 : i32
    %c0_i32_0 = arith.constant 0 : i32
    %c0_i32_1 = arith.constant 0 : i32
    return %c0_i32, %c0_i32_0 : i32, i32
  }
}

module attributes {stable_mosaic.version = 11 : i64} {
  func.func @_hconv_kernel(%arg0: i32, %arg1: memref<128x256xbf16, #tpu.memory_space<vmem>>, %arg2: memref<128x48xbf16, #tpu.memory_space<vmem>>, %arg3: memref<128x128xf32, #tpu.memory_space<vmem>>, %arg4: memref<8x256xf32, #tpu.memory_space<vmem>>, %arg5: memref<1x48xf32, #tpu.memory_space<vmem>>, %arg6: memref<128x48xf32, #tpu.memory_space<vmem>>, %arg7: memref<128x48xf32, #tpu.memory_space<vmem>>, %arg8: memref<128x1xf32, #tpu.memory_space<vmem>>) attributes {dimension_semantics = [#tpu.dimension_semantics<arbitrary>], iteration_bounds = array<i64: 1>, scalar_prefetch = 0 : i64, scratch_operands = 2 : i64, tpu.core_type = #tpu.core_type<tc>, window_params = [{transform_indices = @transform_0, window_bounds = array<i64: 128, 256>}, {pipeline_mode = #tpu.pipeline_mode<synchronous>, transform_indices = @transform_1, window_bounds = array<i64: 128, 48>}, {pipeline_mode = #tpu.pipeline_mode<synchronous>, transform_indices = @transform_2, window_bounds = array<i64: 128, 128>}, {transform_indices = @transform_3, window_bounds = array<i64: 8, 256>}, {pipeline_mode = #tpu.pipeline_mode<synchronous>, transform_indices = @transform_4, window_bounds = array<i64: 1, 48>}, {pipeline_mode = #tpu.pipeline_mode<synchronous>, transform_indices = @transform_5, window_bounds = array<i64: 128, 48>}]} {
    %c0_i32 = arith.constant 0 : i32
    %0 = arith.cmpi eq, %arg0, %c0_i32 : i32
    %1 = arith.extui %0 : i1 to i32
    %c0_i32_0 = arith.constant 0 : i32
    %2 = arith.cmpi ne, %1, %c0_i32_0 : i32
    scf.if %2 {
      %cst_49 = arith.constant 0.000000e+00 : f32
      %119 = vector.broadcast %cst_49 : f32 to vector<128x48xf32>
      %c0_50 = arith.constant 0 : index
      %c0_51 = arith.constant 0 : index
      %120 = vector.load %arg7[%c0_50, %c0_51] : memref<128x48xf32, #tpu.memory_space<vmem>>, vector<128x48xf32>
      tpu.vector_store %arg7[%c0_50, %c0_51], %119 {strides = array<i32>} : memref<128x48xf32, #tpu.memory_space<vmem>>, vector<128x48xf32>,
      %cst_52 = arith.constant 0.000000e+00 : f32
      %121 = vector.broadcast %cst_52 : f32 to vector<128x1xf32>
      %c0_53 = arith.constant 0 : index
      %c0_54 = arith.constant 0 : index
      %122 = vector.load %arg8[%c0_53, %c0_54] : memref<128x1xf32, #tpu.memory_space<vmem>>, vector<128x1xf32>
      tpu.vector_store %arg8[%c0_53, %c0_54], %121 {strides = array<i32>} : memref<128x1xf32, #tpu.memory_space<vmem>>, vector<128x1xf32>,
    } else {
    }
    %c0 = arith.constant 0 : index
    %c0_1 = arith.constant 0 : index
    %3 = vector.load %arg1[%c0, %c0_1] : memref<128x256xbf16, #tpu.memory_space<vmem>>, vector<128x256xbf16>
    %cst = arith.constant 0.000000e+00 : bf16
    %4 = vector.broadcast %cst : bf16 to vector<128x256xbf16>
    %5 = arith.cmpf one, %3, %4 : vector<128x256xbf16>
    %6 = arith.extui %5 : vector<128x256xi1> to vector<128x256xi32>
    %7 = arith.sitofp %6 : vector<128x256xi32> to vector<128x256xf32>
    %cst_2 = arith.constant dense<0.000000e+00> : vector<256xf32>
    %8 = vector.multi_reduction <add>, %7, %cst_2 [0] : vector<128x256xf32> to vector<256xf32>
    %9 = vector.shape_cast %8 : vector<256xf32> to vector<1x256xf32>
    %c0_3 = arith.constant 0 : index
    %c0_4 = arith.constant 0 : index
    %10 = vector.load %arg8[%c0_3, %c0_4] : memref<128x1xf32, #tpu.memory_space<vmem>>, vector<128x1xf32>
    %cst_5 = arith.constant dense<0.000000e+00> : vector<128xf32>
    %11 = vector.multi_reduction <add>, %7, %cst_5 [1] : vector<128x256xf32> to vector<128xf32>
    %12 = vector.shape_cast %11 : vector<128xf32> to vector<128x1xf32>
    %13 = arith.addf %10, %12 : vector<128x1xf32>
    %c0_6 = arith.constant 0 : index
    %c0_7 = arith.constant 0 : index
    %14 = vector.load %arg8[%c0_6, %c0_7] : memref<128x1xf32, #tpu.memory_space<vmem>>, vector<128x1xf32>
    tpu.vector_store %arg8[%c0_6, %c0_7], %13 {strides = array<i32>} : memref<128x1xf32, #tpu.memory_space<vmem>>, vector<128x1xf32>,
    %cst_8 = arith.constant 0.000000e+00 : f32
    %15 = vector.broadcast %cst_8 : f32 to vector<1x256xf32>
    %16 = arith.cmpf ogt, %9, %15 : vector<1x256xf32>
    %17 = math.rsqrt %9 : vector<1x256xf32>
    %cst_9 = arith.constant 0.000000e+00 : f32
    %18 = vector.broadcast %cst_9 : f32 to vector<1x256xf32>
    %19 = arith.select %16, %17, %18 : vector<1x256xi1>, vector<1x256xf32>
    %c0_10 = arith.constant 0 : index
    %c0_11 = arith.constant 0 : index
    %20 = vector.load %arg2[%c0_10, %c0_11] : memref<128x48xbf16, #tpu.memory_space<vmem>>, vector<128x48xbf16>
    %c0_12 = arith.constant 0 : index
    %c0_13 = arith.constant 0 : index
    %21 = vector.load %arg3[%c0_12, %c0_13] : memref<128x128xf32, #tpu.memory_space<vmem>>, vector<128x128xf32>
    %c0_14 = arith.constant 0 : index
    %c0_15 = arith.constant 0 : index
    %22 = vector.load %arg4[%c0_14, %c0_15] : memref<8x256xf32, #tpu.memory_space<vmem>>, vector<8x256xf32>
    %23 = vector.extract_strided_slice %20 {offsets = [0, 0], sizes = [128, 16], strides = [1, 1]} : vector<128x48xbf16> to vector<128x16xbf16>
    %24 = vector.extract_strided_slice %21 {offsets = [0, 0], sizes = [128, 1], strides = [1, 1]} : vector<128x128xf32> to vector<128x1xf32>
    %25 = vector.extract_strided_slice %22 {offsets = [0, 0], sizes = [1, 256], strides = [1, 1]} : vector<8x256xf32> to vector<1x256xf32>
    %26 = vector.broadcast %24 : vector<128x1xf32> to vector<128x256xf32>
    %27 = vector.broadcast %25 : vector<1x256xf32> to vector<128x256xf32>
    %28 = arith.addf %26, %27 : vector<128x256xf32>
    %cst_16 = arith.constant 2.000000e-01 : f32
    %29 = vector.broadcast %cst_16 : f32 to vector<128x256xf32>
    %30 = arith.mulf %29, %28 : vector<128x256xf32>
    %31 = arith.maximumf %28, %30 : vector<128x256xf32>
    %cst_17 = arith.constant -1.000000e+30 : f32
    %32 = vector.broadcast %cst_17 : f32 to vector<128x256xf32>
    %33 = arith.select %5, %31, %32 : vector<128x256xi1>, vector<128x256xf32>
    %cst_18 = arith.constant dense<0xFF800000> : vector<256xf32>
    %34 = vector.multi_reduction <maximumf>, %33, %cst_18 [0] : vector<128x256xf32> to vector<256xf32>
    %35 = vector.shape_cast %34 : vector<256xf32> to vector<1x256xf32>
    %36 = vector.broadcast %35 : vector<1x256xf32> to vector<128x256xf32>
    %37 = arith.subf %33, %36 : vector<128x256xf32>
    %38 = math.exp %37 : vector<128x256xf32>
    %cst_19 = arith.constant dense<0.000000e+00> : vector<256xf32>
    %39 = vector.multi_reduction <add>, %38, %cst_19 [0] : vector<128x256xf32> to vector<256xf32>
    %40 = vector.shape_cast %39 : vector<256xf32> to vector<1x256xf32>
    %cst_20 = arith.constant 1.000000e-16 : f32
    %41 = vector.broadcast %cst_20 : f32 to vector<1x256xf32>
    %42 = arith.addf %40, %41 : vector<1x256xf32>
    %43 = tpu.reciprocal %42 {approx = true} : vector<1x256xf32> -> vector<1x256xf32>
    %44 = arith.mulf %19, %43 : vector<1x256xf32>
    %45 = vector.broadcast %44 : vector<1x256xf32> to vector<128x256xf32>
    %46 = arith.mulf %38, %45 : vector<128x256xf32>
    %47 = arith.truncf %46 : vector<128x256xf32> to vector<128x256xbf16>
    %cst_21 = arith.constant dense<0.000000e+00> : vector<256x16xf32>
    %48 = tpu.matmul %47, %23, %cst_21 {dimension_numbers = #tpu.dot_dimension_numbers<[0], [0], [1], [1], [0, 1, 1, 1], [], []>} : vector<128x256xbf16>, vector<128x16xbf16>, vector<256x16xf32> -> vector<256x16xf32>
    %49 = arith.truncf %48 : vector<256x16xf32> to vector<256x16xbf16>
    %cst_22 = arith.constant dense<0.000000e+00> : vector<128x16xf32>
    %50 = tpu.matmul %47, %49, %cst_22 {dimension_numbers = #tpu.dot_dimension_numbers<[1], [0], [0], [1], [0, 0, 1, 1], [], []>} : vector<128x256xbf16>, vector<256x16xbf16>, vector<128x16xf32> -> vector<128x16xf32>
    %c0_23 = arith.constant 0 : index
    %c0_24 = arith.constant 0 : index
    %51 = vector.load %arg7[%c0_23, %c0_24] : memref<128x48xf32, #tpu.memory_space<vmem>>, vector<128x16xf32>
    %52 = arith.addf %51, %50 : vector<128x16xf32>
    %c0_25 = arith.constant 0 : index
    %c0_26 = arith.constant 0 : index
    %53 = vector.load %arg7[%c0_25, %c0_26] : memref<128x48xf32, #tpu.memory_space<vmem>>, vector<128x16xf32>
    tpu.vector_store %arg7[%c0_25, %c0_26], %52 {strides = array<i32>} : memref<128x48xf32, #tpu.memory_space<vmem>>, vector<128x16xf32>,
    %54 = vector.extract_strided_slice %20 {offsets = [0, 16], sizes = [128, 16], strides = [1, 1]} : vector<128x48xbf16> to vector<128x16xbf16>
    %55 = vector.extract_strided_slice %21 {offsets = [0, 1], sizes = [128, 1], strides = [1, 1]} : vector<128x128xf32> to vector<128x1xf32>
    %56 = vector.extract_strided_slice %22 {offsets = [1, 0], sizes = [1, 256], strides = [1, 1]} : vector<8x256xf32> to vector<1x256xf32>
    %57 = vector.broadcast %55 : vector<128x1xf32> to vector<128x256xf32>
    %58 = vector.broadcast %56 : vector<1x256xf32> to vector<128x256xf32>
    %59 = arith.addf %57, %58 : vector<128x256xf32>
    %cst_27 = arith.constant 2.000000e-01 : f32
    %60 = vector.broadcast %cst_27 : f32 to vector<128x256xf32>
    %61 = arith.mulf %60, %59 : vector<128x256xf32>
    %62 = arith.maximumf %59, %61 : vector<128x256xf32>
    %cst_28 = arith.constant -1.000000e+30 : f32
    %63 = vector.broadcast %cst_28 : f32 to vector<128x256xf32>
    %64 = arith.select %5, %62, %63 : vector<128x256xi1>, vector<128x256xf32>
    %cst_29 = arith.constant dense<0xFF800000> : vector<256xf32>
    %65 = vector.multi_reduction <maximumf>, %64, %cst_29 [0] : vector<128x256xf32> to vector<256xf32>
    %66 = vector.shape_cast %65 : vector<256xf32> to vector<1x256xf32>
    %67 = vector.broadcast %66 : vector<1x256xf32> to vector<128x256xf32>
    %68 = arith.subf %64, %67 : vector<128x256xf32>
    %69 = math.exp %68 : vector<128x256xf32>
    %cst_30 = arith.constant dense<0.000000e+00> : vector<256xf32>
    %70 = vector.multi_reduction <add>, %69, %cst_30 [0] : vector<128x256xf32> to vector<256xf32>
    %71 = vector.shape_cast %70 : vector<256xf32> to vector<1x256xf32>
    %cst_31 = arith.constant 1.000000e-16 : f32
    %72 = vector.broadcast %cst_31 : f32 to vector<1x256xf32>
    %73 = arith.addf %71, %72 : vector<1x256xf32>
    %74 = tpu.reciprocal %73 {approx = true} : vector<1x256xf32> -> vector<1x256xf32>
    %75 = arith.mulf %19, %74 : vector<1x256xf32>
    %76 = vector.broadcast %75 : vector<1x256xf32> to vector<128x256xf32>
    %77 = arith.mulf %69, %76 : vector<128x256xf32>
    %78 = arith.truncf %77 : vector<128x256xf32> to vector<128x256xbf16>
    %cst_32 = arith.constant dense<0.000000e+00> : vector<256x16xf32>
    %79 = tpu.matmul %78, %54, %cst_32 {dimension_numbers = #tpu.dot_dimension_numbers<[0], [0], [1], [1], [0, 1, 1, 1], [], []>} : vector<128x256xbf16>, vector<128x16xbf16>, vector<256x16xf32> -> vector<256x16xf32>
    %80 = arith.truncf %79 : vector<256x16xf32> to vector<256x16xbf16>
    %cst_33 = arith.constant dense<0.000000e+00> : vector<128x16xf32>
    %81 = tpu.matmul %78, %80, %cst_33 {dimension_numbers = #tpu.dot_dimension_numbers<[1], [0], [0], [1], [0, 0, 1, 1], [], []>} : vector<128x256xbf16>, vector<256x16xbf16>, vector<128x16xf32> -> vector<128x16xf32>
    %c0_34 = arith.constant 0 : index
    %c16 = arith.constant 16 : index
    %82 = vector.load %arg7[%c0_34, %c16] : memref<128x48xf32, #tpu.memory_space<vmem>>, vector<128x16xf32>
    %83 = arith.addf %82, %81 : vector<128x16xf32>
    %c0_35 = arith.constant 0 : index
    %c16_36 = arith.constant 16 : index
    %84 = vector.load %arg7[%c0_35, %c16_36] : memref<128x48xf32, #tpu.memory_space<vmem>>, vector<128x16xf32>
    tpu.vector_store %arg7[%c0_35, %c16_36], %83 {strides = array<i32>} : memref<128x48xf32, #tpu.memory_space<vmem>>, vector<128x16xf32>,
    %85 = vector.extract_strided_slice %20 {offsets = [0, 32], sizes = [128, 16], strides = [1, 1]} : vector<128x48xbf16> to vector<128x16xbf16>
    %86 = vector.extract_strided_slice %21 {offsets = [0, 2], sizes = [128, 1], strides = [1, 1]} : vector<128x128xf32> to vector<128x1xf32>
    %87 = vector.extract_strided_slice %22 {offsets = [2, 0], sizes = [1, 256], strides = [1, 1]} : vector<8x256xf32> to vector<1x256xf32>
    %88 = vector.broadcast %86 : vector<128x1xf32> to vector<128x256xf32>
    %89 = vector.broadcast %87 : vector<1x256xf32> to vector<128x256xf32>
    %90 = arith.addf %88, %89 : vector<128x256xf32>
    %cst_37 = arith.constant 2.000000e-01 : f32
    %91 = vector.broadcast %cst_37 : f32 to vector<128x256xf32>
    %92 = arith.mulf %91, %90 : vector<128x256xf32>
    %93 = arith.maximumf %90, %92 : vector<128x256xf32>
    %cst_38 = arith.constant -1.000000e+30 : f32
    %94 = vector.broadcast %cst_38 : f32 to vector<128x256xf32>
    %95 = arith.select %5, %93, %94 : vector<128x256xi1>, vector<128x256xf32>
    %cst_39 = arith.constant dense<0xFF800000> : vector<256xf32>
    %96 = vector.multi_reduction <maximumf>, %95, %cst_39 [0] : vector<128x256xf32> to vector<256xf32>
    %97 = vector.shape_cast %96 : vector<256xf32> to vector<1x256xf32>
    %98 = vector.broadcast %97 : vector<1x256xf32> to vector<128x256xf32>
    %99 = arith.subf %95, %98 : vector<128x256xf32>
    %100 = math.exp %99 : vector<128x256xf32>
    %cst_40 = arith.constant dense<0.000000e+00> : vector<256xf32>
    %101 = vector.multi_reduction <add>, %100, %cst_40 [0] : vector<128x256xf32> to vector<256xf32>
    %102 = vector.shape_cast %101 : vector<256xf32> to vector<1x256xf32>
    %cst_41 = arith.constant 1.000000e-16 : f32
    %103 = vector.broadcast %cst_41 : f32 to vector<1x256xf32>
    %104 = arith.addf %102, %103 : vector<1x256xf32>
    %105 = tpu.reciprocal %104 {approx = true} : vector<1x256xf32> -> vector<1x256xf32>
    %106 = arith.mulf %19, %105 : vector<1x256xf32>
    %107 = vector.broadcast %106 : vector<1x256xf32> to vector<128x256xf32>
    %108 = arith.mulf %100, %107 : vector<128x256xf32>
    %109 = arith.truncf %108 : vector<128x256xf32> to vector<128x256xbf16>
    %cst_42 = arith.constant dense<0.000000e+00> : vector<256x16xf32>
    %110 = tpu.matmul %109, %85, %cst_42 {dimension_numbers = #tpu.dot_dimension_numbers<[0], [0], [1], [1], [0, 1, 1, 1], [], []>} : vector<128x256xbf16>, vector<128x16xbf16>, vector<256x16xf32> -> vector<256x16xf32>
    %111 = arith.truncf %110 : vector<256x16xf32> to vector<256x16xbf16>
    %cst_43 = arith.constant dense<0.000000e+00> : vector<128x16xf32>
    %112 = tpu.matmul %109, %111, %cst_43 {dimension_numbers = #tpu.dot_dimension_numbers<[1], [0], [0], [1], [0, 0, 1, 1], [], []>} : vector<128x256xbf16>, vector<256x16xbf16>, vector<128x16xf32> -> vector<128x16xf32>
    %c0_44 = arith.constant 0 : index
    %c32 = arith.constant 32 : index
    %113 = vector.load %arg7[%c0_44, %c32] : memref<128x48xf32, #tpu.memory_space<vmem>>, vector<128x16xf32>
    %114 = arith.addf %113, %112 : vector<128x16xf32>
    %c0_45 = arith.constant 0 : index
    %c32_46 = arith.constant 32 : index
    %115 = vector.load %arg7[%c0_45, %c32_46] : memref<128x48xf32, #tpu.memory_space<vmem>>, vector<128x16xf32>
    tpu.vector_store %arg7[%c0_45, %c32_46], %114 {strides = array<i32>} : memref<128x48xf32, #tpu.memory_space<vmem>>, vector<128x16xf32>,
    %c0_i32_47 = arith.constant 0 : i32
    %116 = arith.cmpi eq, %arg0, %c0_i32_47 : i32
    %117 = arith.extui %116 : i1 to i32
    %c0_i32_48 = arith.constant 0 : i32
    %118 = arith.cmpi ne, %117, %c0_i32_48 : i32
    scf.if %118 {
      %c0_49 = arith.constant 0 : index
      %c0_50 = arith.constant 0 : index
      %119 = vector.load %arg8[%c0_49, %c0_50] : memref<128x1xf32, #tpu.memory_space<vmem>>, vector<128x1xf32>
      %cst_51 = arith.constant 0.000000e+00 : f32
      %120 = vector.broadcast %cst_51 : f32 to vector<128x1xf32>
      %121 = arith.cmpf ogt, %119, %120 : vector<128x1xf32>
      %cst_52 = arith.constant 1.000000e+00 : f32
      %122 = vector.broadcast %cst_52 : f32 to vector<128x1xf32>
      %123 = arith.divf %122, %119 : vector<128x1xf32>
      %cst_53 = arith.constant 0.000000e+00 : f32
      %124 = vector.broadcast %cst_53 : f32 to vector<128x1xf32>
      %125 = arith.select %121, %123, %124 : vector<128x1xi1>, vector<128x1xf32>
      %c0_54 = arith.constant 0 : index
      %c0_55 = arith.constant 0 : index
      %126 = vector.load %arg7[%c0_54, %c0_55] : memref<128x48xf32, #tpu.memory_space<vmem>>, vector<128x48xf32>
      %127 = vector.broadcast %125 : vector<128x1xf32> to vector<128x48xf32>
      %128 = arith.mulf %126, %127 : vector<128x48xf32>
      %c0_56 = arith.constant 0 : index
      %c0_57 = arith.constant 0 : index
      %129 = vector.load %arg5[%c0_56, %c0_57] : memref<1x48xf32, #tpu.memory_space<vmem>>, vector<1x48xf32>
      %130 = vector.broadcast %129 : vector<1x48xf32> to vector<128x48xf32>
      %131 = arith.addf %128, %130 : vector<128x48xf32>
      %c0_58 = arith.constant 0 : index
      %c0_59 = arith.constant 0 : index
      %132 = vector.load %arg6[%c0_58, %c0_59] : memref<128x48xf32, #tpu.memory_space<vmem>>, vector<128x48xf32>
      tpu.vector_store %arg6[%c0_58, %c0_59], %131 {strides = array<i32>} : memref<128x48xf32, #tpu.memory_space<vmem>>, vector<128x48xf32>,
    } else {
    }
    return
  }
  func.func @transform_0(%arg0: i32) -> (i32, i32) {
    %c0_i32 = arith.constant 0 : i32
    %c0_i32_0 = arith.constant 0 : i32
    return %c0_i32, %arg0 : i32, i32
  }
  func.func @transform_1(%arg0: i32) -> (i32, i32) {
    %c0_i32 = arith.constant 0 : i32
    %c0_i32_0 = arith.constant 0 : i32
    %c0_i32_1 = arith.constant 0 : i32
    return %c0_i32, %c0_i32_0 : i32, i32
  }
  func.func @transform_2(%arg0: i32) -> (i32, i32) {
    %c0_i32 = arith.constant 0 : i32
    %c0_i32_0 = arith.constant 0 : i32
    %c0_i32_1 = arith.constant 0 : i32
    return %c0_i32, %c0_i32_0 : i32, i32
  }
  func.func @transform_3(%arg0: i32) -> (i32, i32) {
    %c0_i32 = arith.constant 0 : i32
    %c0_i32_0 = arith.constant 0 : i32
    return %c0_i32, %arg0 : i32, i32
  }
  func.func @transform_4(%arg0: i32) -> (i32, i32) {
    %c0_i32 = arith.constant 0 : i32
    %c0_i32_0 = arith.constant 0 : i32
    %c0_i32_1 = arith.constant 0 : i32
    return %c0_i32, %c0_i32_0 : i32, i32
  }
  func.func @transform_5(%arg0: i32) -> (i32, i32) {
    %c0_i32 = arith.constant 0 : i32
    %c0_i32_0 = arith.constant 0 : i32
    %c0_i32_1 = arith.constant 0 : i32
    return %c0_i32, %c0_i32_0 : i32, i32
  }
}

</mosaic_0001>

<bundles_post_ra>
// kernel: tpu_custom_call.1
= control target key start
LH: loop header
LB: loop body
LE: loop exit
PB: predicated region body
PF: predicated region fallthrough
CT: control target
= control target key end

     0   :  { %10 = vsyncpa [#allocation5], 0  ;;  %s6862_s0 = inlined_call_operand.hbm [shape: bf16[128,256], index: 0, kind: input, shape index: {}]   ;;  %s6863_s1 = inlined_call_operand.hbm [shape: bf16[128,48], index: 1, kind: input, shape index: {}]   ;;  %s6864_s2 = inlined_call_operand.hbm [shape: f32[128,128], index: 2, kind: input, shape index: {}]   ;;  %s6865_s3 = inlined_call_operand.hbm [shape: f32[8,256], index: 3, kind: input, shape index: {}]   ;;  %s6866_s4 = inlined_call_operand.hbm [shape: f32[1,48], index: 4, kind: input, shape index: {}]   ;;  %s6867_s5 = inlined_call_operand.hbm [shape: f32[128,48], index: 5, kind: output, shape index: {}]  }
   0x1   :  { %11 = vsyncpa [#allocation8], 0 }
   0x2   :  { %12 = vsyncpa [#allocation11], 0 }
   0x3   :  { %13 = vsyncpa [#allocation6], 0  ;;  %s4208_s18 = smov [#allocation7]   ;;  %s4068_s22 = scalar_lea.hbm %s6863_s1, 1024 }
   0x4   :  { %s31_s19 = sshll.u32 %s4208_s18, 4  ;;  %p4069_p0 = scmp.ne.s32.totalorder %s6863_s1, %s4068_s22  ;;  %s32_s19 = int_to_ptr.vmem [resolvable:$true] %s31_s19 }
   0x5   :  { %p4072_p1 = scmp.lt.u32.totalorder %s4068_s22, %s6863_s1 }
   0x7   :  { %p4074_p2 = pnand %p4072_p1, %p4069_p0 }
   0x9   :  { %4077 = shalt.err (!%p4074_p2)
}
   0xa   :  { %s4078_s27 = scalar_lea.vmem %s32_s19, 1024  ;;  %p4083_p4 = scmp.lt.s32.totalorder %s32_s19, %s32_s19 }
   0xb   :  { %p4079_p3 = scmp.ne.s32.totalorder %s32_s19, %s4078_s27  ;;  %p4084_p5 = scmp.lt.s32.totalorder %s4078_s27, %s4078_s27 }
   0xd   :  { %p4085_p6 = por %p4084_p5, %p4083_p4 }
   0xf   :  { %p4086_p7 = pnand %p4085_p6, %p4079_p3 }
  0x11   :  { %4089 = shalt.err (!%p4086_p7)
}
  0x12   :  { %s4209_s28 = smov 64   ;;  %s4210_s29 = smov 4  }
  0x13   :  { %37 = dma.hbm_to_vmem [thread:$0]  %s6863_s1, 1024, %s32_s19, [#allocation8], %s4209_s28, %s4209_s28, %s4210_s29  }
  0x14   :  { %s4211_s7 = smov [#allocation10]   ;;  %s4212_s9 = smov [#allocation4]  }
  0x15   :  { %s56_s8 = sshll.u32 %s4211_s7, 4  ;;  %s19_s10 = sshll.u32 %s4212_s9, 4  ;;  %s57_s8 = int_to_ptr.vmem [resolvable:$true] %s56_s8  ;;  %s20_s10 = int_to_ptr.vmem [resolvable:$true] %s19_s10 }
  0x16   :  { %s4090_s13 = scalar_lea.hbm %s6865_s3, 256 }
  0x17   :  { %p4091_p8 = scmp.ne.s32.totalorder %s6865_s3, %s4090_s13  ;;  %p4094_p9 = scmp.lt.u32.totalorder %s4090_s13, %s6865_s3 }
  0x19   :  { %p4096_p10 = pnand %p4094_p9, %p4091_p8 }
  0x1b   :  { %4099 = shalt.err (!%p4096_p10)
}
  0x1c   :  { %s4100_s1 = scalar_lea.vmem %s57_s8, 256  ;;  %p4105_p12 = scmp.lt.s32.totalorder %s57_s8, %s57_s8 }
  0x1d   :  { %p4101_p11 = scmp.ne.s32.totalorder %s57_s8, %s4100_s1  ;;  %p4106_p13 = scmp.lt.s32.totalorder %s4100_s1, %s4100_s1 }
  0x1f   :  { %p4107_p0 = por %p4106_p13, %p4105_p12 }
  0x21   :  { %p4108_p1 = pnand %p4107_p0, %p4101_p11 }
  0x23   :  { %4111 = shalt.err (!%p4108_p1)
}
  0x24   :  { %59 = dma.hbm_to_vmem [thread:$0]  %s6865_s3, 256, %s57_s8, [#allocation11]  }
  0x25   :  { %s4112_s22 = scalar_lea.hbm %s6862_s0, 2048 }
  0x26   :  { %p4113_p2 = scmp.ne.s32.totalorder %s6862_s0, %s4112_s22  ;;  %p4116_p3 = scmp.lt.u32.totalorder %s4112_s22, %s6862_s0 }
  0x28   :  { %p4118_p4 = pnand %p4116_p3, %p4113_p2 }
  0x2a   :  { %4121 = shalt.err (!%p4118_p4)
}
  0x2b   :  { %s4122_s27 = scalar_lea.vmem %s20_s10, 2048  ;;  %p4127_p6 = scmp.lt.s32.totalorder %s20_s10, %s20_s10 }
  0x2c   :  { %p4123_p5 = scmp.ne.s32.totalorder %s20_s10, %s4122_s27  ;;  %p4128_p7 = scmp.lt.s32.totalorder %s4122_s27, %s4122_s27 }
  0x2e   :  { %p4129_p8 = por %p4128_p7, %p4127_p6 }
  0x30   :  { %p4130_p9 = pnand %p4129_p8, %p4123_p5 }
  0x32   :  { %4133 = shalt.err (!%p4130_p9)
}
  0x33   :  { %s4213_s3 = smov 128   ;;  %s4214_s28 = smov 8  }
  0x34   :  { %25 = dma.hbm_to_vmem [thread:$0]  %s6862_s0, 2048, %s20_s10, [#allocation5], %s4213_s3, %s4213_s3, %s4214_s28  }
  0x35   :  { %s4215_s6 = smov [#allocation9]   ;;  %s4216_s8 = smov [#allocation12]  }
  0x36   :  { %s43_s7 = sshll.u32 %s4215_s6, 4  ;;  %s66_s9 = sshll.u32 %s4216_s8, 4  ;;  %s44_s7 = int_to_ptr.vmem [resolvable:$true] %s43_s7  ;;  %s67_s9 = int_to_ptr.vmem [resolvable:$true] %s66_s9 }
  0x37   :  { %s4134_s13 = scalar_lea.hbm %s6864_s2, 2048 }
  0x38   :  { %p4135_p10 = scmp.ne.s32.totalorder %s6864_s2, %s4134_s13  ;;  %p4138_p11 = scmp.lt.u32.totalorder %s4134_s13, %s6864_s2 }
  0x3a   :  { %p4140_p12 = pnand %p4138_p11, %p4135_p10 }
  0x3c   :  { %4143 = shalt.err (!%p4140_p12)
}
  0x3d   :  { %s4144_s0 = scalar_lea.vmem %s44_s7, 2048  ;;  %p4149_p0 = scmp.lt.s32.totalorder %s44_s7, %s44_s7 }
  0x3e   :  { %p4145_p13 = scmp.ne.s32.totalorder %s44_s7, %s4144_s0  ;;  %p4150_p1 = scmp.lt.s32.totalorder %s4144_s0, %s4144_s0 }
  0x40   :  { %p4151_p2 = por %p4150_p1, %p4149_p0 }
  0x42   :  { %p4152_p3 = pnand %p4151_p2, %p4145_p13 }
  0x44   :  { %4155 = shalt.err (!%p4152_p3)
}
  0x45   :  { %49 = dma.hbm_to_vmem [thread:$0]  %s6864_s2, 2048, %s44_s7, [#allocation8], %s4213_s3, %s4213_s3, %s4214_s28  }
  0x46   :  { %s4156_s20 = scalar_lea.hbm %s6866_s4, 16 }
  0x47   :  { %p4157_p4 = scmp.ne.s32.totalorder %s6866_s4, %s4156_s20  ;;  %p4160_p5 = scmp.lt.u32.totalorder %s4156_s20, %s6866_s4 }
  0x49   :  { %p4162_p6 = pnand %p4160_p5, %p4157_p4 }
  0x4b   :  { %4165 = shalt.err (!%p4162_p6)
}
  0x4c   :  { %s4166_s25 = scalar_lea.vmem %s67_s9, 16  ;;  %s4170_s26 = scalar_lea.vmem %s67_s9, 32 }
  0x4d   :  { %p4167_p7 = scmp.ne.s32.totalorder %s67_s9, %s4166_s25  ;;  %p4171_p8 = scmp.lt.s32.totalorder %s67_s9, %s67_s9 }
  0x4e   :  { %p4172_p9 = scmp.lt.s32.totalorder %s4170_s26, %s4166_s25 }
  0x50   :  { %p4173_p10 = por %p4172_p9, %p4171_p8 }
  0x52   :  { %p4174_p11 = pnand %p4173_p10, %p4167_p7 }
  0x54   :  { %4177 = shalt.err (!%p4174_p11)
}
  0x55   :  { %69 = dma.hbm_to_vmem [thread:$0]  %s6866_s4, 16, %s67_s9, [#allocation11]  }
  0x56   :  { %4200 = dma.done.wait [#allocation5], 2048  }
  0x57   :  { %4201 = vsyncadd [#allocation5], 4294965248 }
  0x58   :  { %4202 = dma.done.wait [#allocation8], 3072  }
  0x59   :  { %4203 = vsyncadd [#allocation8], 4294964224 }
  0x5a   :  { %4204 = dma.done.wait [#allocation11], 272  }
  0x5b   :  { %4205 = vsyncadd [#allocation11], 4294967024  ;;  %v6896_v0 = vmov 0   ;;  %v4324_v1 = vld [vmem:[#allocation9 + $0x10] sm:$0xff]  ;;  %v4326_v2 = vld [vmem:[#allocation9] sm:$0xff]  ;;  %v4218_v17 = vmov 1  }
  0x5c   :  { %3810 = vset.pattern.permute.xlu1 %v6896_v0  ;;  %3809 = vset.pattern.permute.xlu0 %v6896_v0  ;;  %v4330_v3 = vld [vmem:[#allocation9 + $0x18] sm:$0xff]  ;;  %v4332_v4 = vld [vmem:[#allocation9 + $0x8] sm:$0xff]  ;;  %v4338_v6 = vld [vmem:[#allocation9 + $0x20] sm:$0xff]  ;;  %v7131_v33 = vmov 0  ;;  %v7134_v34 = vmov 0  ;;  %v6915_v36 = vmov 0.0  }
  0x5d   :  { %493 = vperm.xlu1 %3810, %v4324_v1   ;;  %483 = vperm.xlu0 %3809, %v4326_v2   ;;  %v4336_v5 = vld [vmem:[#allocation9 + $0x28] sm:$0xff]  ;;  %v4340_v7 = vld [vmem:[#allocation9 + $0x38] sm:$0xff]  ;;  %v4344_v8 = vld [vmem:[#allocation9 + $0x30] sm:$0xff]  ;;  %v7139_v38 = vmov 0  ;;  %v4220_v42 = vmov 2   ;;  %v7144_v44 = vmov 0 }
  0x5e   :  { %v4348_v9 = vld [vmem:[#allocation9 + $0x48] sm:$0xff]  ;;  %v4350_v10 = vld [vmem:[#allocation9 + $0x40] sm:$0xff]  ;;  %v4354_v11 = vld [vmem:[#allocation9 + $0x58] sm:$0xff]  ;;  %v7147_v48 = vmov 0  ;;  %v7152_v54 = vmov 0  ;;  %v7154_v55 = vmov 0 }
  0x5f   :  { %v4356_v12 = vld [vmem:[#allocation9 + $0x50] sm:$0xff]  ;;  %v4360_v13 = vld [vmem:[#allocation9 + $0x68] sm:$0xff]  ;;  %v4362_v14 = vld [vmem:[#allocation9 + $0x60] sm:$0xff]  ;;  %s4221_s4 = smov 112   ;;  %s4222_s29 = smov 96  }
  0x60   :  { %v4366_v15 = vld [vmem:[#allocation9 + $0x78] sm:$0xff]  ;;  %v4368_v16 = vld [vmem:[#allocation9 + $0x70] sm:$0xff]  ;;  %v126_v18 = vld [vmem:[#allocation4] sm:$0xff]  ;;  %s4223_s30 = smov 16   ;;  %s4224_s6 = smov 32  }
  0x61   :  { %498 = vperm.xlu1 %3810, %v4330_v3   ;;  %488 = vperm.xlu0 %3809, %v4332_v4   ;;  %v127_v19 = vld [vmem:[#allocation4 + $0x8] sm:$0xff]  ;;  %vm142_vm0 = vcmp.ne.bf16.partialorder %v126_v18, 0  ;;  %v128_v20 = vld [vmem:[#allocation4 + $0x10] sm:$0xff]  ;;  %v129_v22 = vld [vmem:[#allocation4 + $0x18] sm:$0xff]  ;;  %s4225_s7 = smov [#allocation13]  }
  0x62   :  { %vm143_vm1 = vcmp.ne.bf16.partialorder %v127_v19, 0  ;;  %v158_v21 = vsel %vm142_vm0, 65537, %v6896_v0  ;;  %vm144_vm2 = vcmp.ne.bf16.partialorder %v128_v20, 0  ;;  %vm145_vm3 = vcmp.ne.bf16.partialorder %v129_v22, 0  ;;  %v130_v30 = vld [vmem:[#allocation4 + $0x20] sm:$0xff]  ;;  %v131_v43 = vld [vmem:[#allocation4 + $0x28] sm:$0xff] }
  0x63   :  { %v159_v23 = vsel %vm143_vm1, 65537, %v6896_v0  ;;  %v174_v24 = vunpack.c.l.b16 %v158_v21  ;;  %v160_v26 = vsel %vm144_vm2, 65537, %v6896_v0  ;;  %v175_v27 = vunpack.c.h.b16 %v158_v21  ;;  %v132_v53 = vld [vmem:[#allocation4 + $0x30] sm:$0xff]  ;;  %v133_v63 = vld [vmem:[#allocation4 + $0x38] sm:$0xff]  ;;  %v134_v20 = vld [vmem:[#allocation4 + $0x40] sm:$0xff]  ;;  %s3328_s8 = sshll.u32 %s4225_s7, 4  ;;  %s3329_s8 = int_to_ptr.vmem [resolvable:$true] %s3328_s8 }
  0x64   :  { %v176_v25 = vunpack.c.l.b16 %v159_v23  ;;  %v177_v28 = vunpack.c.h.b16 %v159_v23  ;;  %v161_v29 = vsel %vm145_vm3, 65537, %v6896_v0  ;;  %v178_v31 = vunpack.c.l.b16 %v160_v26  ;;  %s4178_s9 = scalar_lea.vmem %s3329_s8, 2048  ;;  %p4183_p13 = scmp.lt.s32.totalorder %s3329_s8, %s3329_s8 }
  0x65   :  { %508 = vperm.xlu1 %3810, %v4336_v5   ;;  %503 = vperm.xlu0 %3809, %v4338_v6   ;;  %v179_v32 = vunpack.c.h.b16 %v160_v26  ;;  %vm4392_vm4 = vcmp.ne.s32.totalorder %v174_v24, 0  ;;  %vm4400_vm6 = vcmp.ne.s32.totalorder %v175_v27, 0  ;;  %vm146_vm8 = vcmp.ne.bf16.partialorder %v130_v30, 0  ;;  %p4179_p12 = scmp.ne.s32.totalorder %s3329_s8, %s4178_s9  ;;  %p4184_p0 = scmp.lt.s32.totalorder %s4178_s9, %s4178_s9 }
  0x66   :  { %v7132_v33 = vsel %vm4392_vm4, 4294967295, %v7131_v33  ;;  %vm4396_vm5 = vcmp.ne.s32.totalorder %v176_v25, 0  ;;  %v4407_v37 = vsel %vm4392_vm4, 1.0, %v6915_v36  ;;  %vm4409_vm7 = vcmp.ne.s32.totalorder %v177_v28, 0  ;;  %v135_v28 = vld [vmem:[#allocation4 + $0x48] sm:$0xff] }
  0x67   :  { %7133 = vst [vmem:[#allocation18_spill] sm:$0xff] %v7132_v33  ;;  %v7135_v34 = vsel %vm4396_vm5, 4294967295, %v7134_v34  ;;  %7138 = vst [vmem:[#allocation19_spill] sm:$0xff] %v4407_v37  ;;  %v7140_v38 = vsel %vm4409_vm7, 4294967295, %v7139_v38  ;;  %v4416_v39 = vsel %vm4396_vm5, 1.0, %v6915_v36  ;;  %v4421_v40 = vsel %vm4400_vm6, 1.0, %v6915_v36  ;;  %p4185_p1 = por %p4184_p0, %p4183_p13 }
  0x68   :  { %7141 = vst [vmem:[#allocation20_spill] sm:$0xff] %v4416_v39  ;;  %7142 = vst [vmem:[#allocation21_spill] sm:$0xff] %v4421_v40  ;;  %v4426_v41 = vsel %vm4409_vm7, 1.0, %v6915_v36  ;;  %vm4430_vm9 = vcmp.ne.s32.totalorder %v178_v31, 0  ;;  %v180_v45 = vunpack.c.l.b16 %v161_v29  ;;  %v181_v46 = vunpack.c.h.b16 %v161_v29 }
  0x69   :  { %518 = vperm.xlu1 %3810, %v4340_v7   ;;  %513 = vperm.xlu0 %3809, %v4344_v8   ;;  %7143 = vst [vmem:[#allocation22_spill] sm:$0xff] %v4426_v41  ;;  %v7145_v44 = vsel %vm4430_vm9, 4294967295, %v7144_v44  ;;  %v302_v47 = vadd.f32 %v4416_v39, %v4407_v37  ;;  %vm4436_vm10 = vcmp.ne.s32.totalorder %v179_v32, 0  ;;  %v4443_v49 = vsel %vm4430_vm9, 1.0, %v6915_v36  ;;  %p4186_p2 = pnand %p4185_p1, %p4179_p12 }
  0x6a   :  { %7146 = vst [vmem:[#allocation23_spill] sm:$0xff] %v7145_v44  ;;  %v7148_v48 = vsel %vm4436_vm10, 4294967295, %v7147_v48  ;;  %7150 = vst [vmem:[#allocation25_spill] sm:$0xff] %v4443_v49  ;;  %v323_v50 = vadd.f32 %v4426_v41, %v4421_v40  ;;  %v162_v51 = vsel %vm146_vm8, 65537, %v6896_v0  ;;  %v4451_v52 = vsel %vm4436_vm10, 1.0, %v6915_v36 }
  0x6b   :  { %7149 = vst [vmem:[#allocation24_spill] sm:$0xff] %v7148_v48  ;;  %7151 = vst [vmem:[#allocation26_spill] sm:$0xff] %v4451_v52  ;;  %vm147_vm11 = vcmp.ne.bf16.partialorder %v131_v43, 0  ;;  %vm4455_vm12 = vcmp.ne.s32.totalorder %v180_v45, 0  ;;  %vm4459_vm13 = vcmp.ne.s32.totalorder %v181_v46, 0  ;;  %v303_v56 = vadd.f32 %v4443_v49, %v302_v47  ;;  %v136_v46 = vld [vmem:[#allocation4 + $0x50] sm:$0xff] }
  0x6c   :  { %v7153_v54 = vsel %vm4455_vm12, 4294967295, %v7152_v54  ;;  %v7155_v55 = vsel %vm4459_vm13, 4294967295, %v7154_v55  ;;  %v182_v57 = vunpack.c.l.b16 %v162_v51  ;;  %v4467_v58 = vsel %vm4455_vm12, 1.0, %v6915_v36 }
  0x6d   :  { %528 = vperm.xlu1 %3810, %v4348_v9   ;;  %523 = vperm.xlu0 %3809, %v4350_v10   ;;  %7156 = vst [vmem:[#allocation27_spill] sm:$0xff] %v4467_v58  ;;  %v324_v59 = vadd.f32 %v4451_v52, %v323_v50  ;;  %v163_v60 = vsel %vm147_vm11, 65537, %v6896_v0  ;;  %v183_v61 = vunpack.c.h.b16 %v162_v51  ;;  %v4474_v62 = vsel %vm4459_vm13, 1.0, %v6915_v36 }
  0x6e   :  { %7157 = vst [vmem:[#allocation28_spill] sm:$0xff] %v4474_v62  ;;  %vm148_vm14 = vcmp.ne.bf16.partialorder %v132_v53, 0  ;;  %vm4478_vm15 = vcmp.ne.s32.totalorder %v182_v57, 0  ;;  %vm149_vm1 = vcmp.ne.bf16.partialorder %v133_v63, 0  ;;  %v7166_v21 = vmov 0 }
  0x6f   :  { %vm4483_vm0 = vcmp.ne.s32.totalorder %v183_v61, 0  ;;  %v4490_v18 = vsel %vm4478_vm15, 1.0, %v6915_v36  ;;  %v7168_v22 = vmov 0  ;;  %vm150_vm8 = vcmp.ne.bf16.partialorder %v134_v20, 0  ;;  %v138_v20 = vld [vmem:[#allocation4 + $0x60] sm:$0xff] }
  0x70   :  { %7164 = vst [vmem:[#allocation31_spill] sm:$0xff] %v4490_v18  ;;  %v4497_v19 = vsel %vm4483_vm0, 1.0, %v6915_v36  ;;  %v7173_v32 = vmov 0  ;;  %v7176_v43 = vmov 0  ;;  %v7181_v47 = vmov 0 }
  0x71   :  { %538 = vperm.xlu1 %3810, %v4354_v11   ;;  %533 = vperm.xlu0 %3809, %v4356_v12   ;;  %7165 = vst [vmem:[#allocation32_spill] sm:$0xff] %v4497_v19  ;;  %v7184_v50 = vmov 0 }
  0x75   :  { %548 = vperm.xlu1 %3810, %v4360_v13   ;;  %543 = vperm.xlu0 %3809, %v4362_v14  }
  0x79   :  { %558 = vperm.xlu1 %3810, %v4366_v15   ;;  %553 = vperm.xlu0 %3809, %v4368_v16  }
  0x7d   :  { %3812 = vset.pattern.permute.xlu1 %v4218_v17  ;;  %3811 = vset.pattern.permute.xlu0 %v4218_v17  ;;  %v7161_v17 = vmov 0 }
  0x7e   :  { %1339 = vperm.xlu1 %3812, %v4332_v4   ;;  %1335 = vperm.xlu0 %3811, %v4326_v2   ;;  %v7162_v17 = vsel %vm4483_vm0, 4294967295, %v7161_v17 }
  0x7f   :  { %7163 = vst [vmem:[#allocation30_spill] sm:$0xff] %v7162_v17 }
  0x82   :  { %1343 = vperm.xlu1 %3812, %v4324_v1   ;;  %1347 = vperm.xlu0 %3811, %v4330_v3  }
  0x86   :  { %1351 = vperm.xlu1 %3812, %v4338_v6   ;;  %1355 = vperm.xlu0 %3811, %v4336_v5  }
  0x8a   :  { %1359 = vperm.xlu1 %3812, %v4344_v8   ;;  %1363 = vperm.xlu0 %3811, %v4340_v7  }
  0x8e   :  { %1367 = vperm.xlu1 %3812, %v4350_v10   ;;  %1371 = vperm.xlu0 %3811, %v4348_v9  }
  0x92   :  { %1375 = vperm.xlu1 %3812, %v4356_v12   ;;  %1379 = vperm.xlu0 %3811, %v4354_v11  }
  0x96   :  { %1383 = vperm.xlu1 %3812, %v4362_v14   ;;  %1387 = vperm.xlu0 %3811, %v4360_v13  }
  0x9a   :  { %1391 = vperm.xlu1 %3812, %v4368_v16   ;;  %1395 = vperm.xlu0 %3811, %v4366_v15  }
  0x9e   :  { %3813 = vset.pattern.permute.xlu1 %v4220_v42  ;;  %3814 = vset.pattern.permute.xlu0 %v4220_v42 }
  0x9f   :  { %2212 = vperm.xlu1 %3813, %v4326_v2   ;;  %2216 = vperm.xlu0 %3814, %v4332_v4   ;;  %v185_v2 = vunpack.c.h.b16 %v163_v60  ;;  %v7158_v4 = vmov 0 }
  0xa0   :  { %v7159_v4 = vsel %vm4478_vm15, 4294967295, %v7158_v4 }
  0xa1   :  { %7160 = vst [vmem:[#allocation29_spill] sm:$0xff] %v7159_v4  ;;  %vm4505_vm3 = vcmp.ne.s32.totalorder %v185_v2, 0  ;;  %v7189_v2 = vmov 0 }
  0xa2   :  { %v7169_v22 = vsel %vm4505_vm3, 4294967295, %v7168_v22  ;;  %v4520_v27 = vsel %vm4505_vm3, 1.0, %v6915_v36 }
  0xa3   :  { %2220 = vperm.xlu1 %3813, %v4324_v1   ;;  %2228 = vperm.xlu0 %3814, %v4338_v6   ;;  %v184_v1 = vunpack.c.l.b16 %v163_v60  ;;  %v304_v6 = vadd.f32 %v4467_v58, %v303_v56  ;;  %7170 = vst [vmem:[#allocation33_spill] sm:$0xff] %v7169_v22  ;;  %7172 = vst [vmem:[#allocation35_spill] sm:$0xff] %v4520_v27  ;;  %v137_v60 = vld [vmem:[#allocation4 + $0x58] sm:$0xff] }
  0xa5   :  { %vm4501_vm2 = vcmp.ne.s32.totalorder %v184_v1, 0  ;;  %v305_v23 = vadd.f32 %v4490_v18, %v304_v6 }
  0xa6   :  { %v7167_v21 = vsel %vm4501_vm2, 4294967295, %v7166_v21  ;;  %v4513_v25 = vsel %vm4501_vm2, 1.0, %v6915_v36 }
  0xa7   :  { %2224 = vperm.xlu1 %3813, %v4330_v3   ;;  %2236 = vperm.xlu0 %3814, %v4344_v8   ;;  %v325_v3 = vadd.f32 %v4474_v62, %v324_v59  ;;  %v164_v8 = vsel %vm148_vm14, 65537, %v6896_v0  ;;  %7171 = vst [vmem:[#allocation34_spill] sm:$0xff] %v4513_v25  ;;  %v306_v29 = vadd.f32 %v4513_v25, %v305_v23  ;;  %v7197_v23 = vmov 0 }
  0xa8   :  { %v186_v24 = vunpack.c.l.b16 %v164_v8  ;;  %v187_v26 = vunpack.c.h.b16 %v164_v8 }
  0xaa   :  { %vm4525_vm11 = vcmp.ne.s32.totalorder %v186_v24, 0  ;;  %vm4530_vm14 = vcmp.ne.s32.totalorder %v187_v26, 0  ;;  %v7200_v24 = vmov 0 }
  0xab   :  { %2232 = vperm.xlu1 %3813, %v4336_v5   ;;  %2244 = vperm.xlu0 %3814, %v4350_v10   ;;  %v326_v5 = vadd.f32 %v4497_v19, %v325_v3  ;;  %v165_v10 = vsel %vm149_vm1, 65537, %v6896_v0  ;;  %v7174_v32 = vsel %vm4525_vm11, 4294967295, %v7173_v32  ;;  %v7177_v43 = vsel %vm4530_vm14, 4294967295, %v7176_v43 }
  0xac   :  { %v188_v30 = vunpack.c.l.b16 %v165_v10  ;;  %v189_v31 = vunpack.c.h.b16 %v165_v10  ;;  %7175 = vst [vmem:[#allocation36_spill] sm:$0xff] %v7174_v32  ;;  %7178 = vst [vmem:[#allocation37_spill] sm:$0xff] %v7177_v43  ;;  %v4543_v45 = vsel %vm4530_vm14, 1.0, %v6915_v36  ;;  %vm151_vm1 = vcmp.ne.bf16.partialorder %v135_v28, 0 }
  0xad   :  { %v327_v42 = vadd.f32 %v4520_v27, %v326_v5  ;;  %7180 = vst [vmem:[#allocation39_spill] sm:$0xff] %v4543_v45  ;;  %v7192_v3 = vmov 0 }
  0xae   :  { %vm4547_vm0 = vcmp.ne.s32.totalorder %v188_v30, 0  ;;  %vm4551_vm15 = vcmp.ne.s32.totalorder %v189_v31, 0  ;;  %v139_v31 = vld [vmem:[#allocation4 + $0x68] sm:$0xff] }
  0xaf   :  { %2240 = vperm.xlu1 %3813, %v4340_v7   ;;  %2252 = vperm.xlu0 %3814, %v4356_v12   ;;  %v4537_v7 = vsel %vm4525_vm11, 1.0, %v6915_v36  ;;  %v166_v12 = vsel %vm150_vm8, 65537, %v6896_v0  ;;  %v7182_v47 = vsel %vm4547_vm0, 4294967295, %v7181_v47  ;;  %v7185_v50 = vsel %vm4551_vm15, 4294967295, %v7184_v50 }
  0xb0   :  { %7179 = vst [vmem:[#allocation38_spill] sm:$0xff] %v4537_v7  ;;  %7183 = vst [vmem:[#allocation40_spill] sm:$0xff] %v7182_v47  ;;  %v307_v51 = vadd.f32 %v4537_v7, %v306_v29  ;;  %v190_v53 = vunpack.c.l.b16 %v166_v12  ;;  %v4559_v56 = vsel %vm4547_vm0, 1.0, %v6915_v36  ;;  %v191_v57 = vunpack.c.h.b16 %v166_v12 }
  0xb1   :  { %7186 = vst [vmem:[#allocation41_spill] sm:$0xff] %v7185_v50  ;;  %7187 = vst [vmem:[#allocation42_spill] sm:$0xff] %v4559_v56  ;;  %v4566_v59 = vsel %vm4551_vm15, 1.0, %v6915_v36  ;;  %vm152_vm8 = vcmp.ne.bf16.partialorder %v136_v46, 0  ;;  %vm153_vm11 = vcmp.ne.bf16.partialorder %v137_v60, 0  ;;  %v140_v60 = vld [vmem:[#allocation4 + $0x70] sm:$0xff] }
  0xb2   :  { %7188 = vst [vmem:[#allocation43_spill] sm:$0xff] %v4566_v59  ;;  %v308_v61 = vadd.f32 %v4559_v56, %v307_v51  ;;  %vm4571_vm14 = vcmp.ne.s32.totalorder %v190_v53, 0  ;;  %v7205_v51 = vmov 0  ;;  %v4771_v56 = vld [vmem:[#allocation7 + $0x18] sm:$0xff]  }
  0xb3   :  { %2248 = vperm.xlu1 %3813, %v4348_v9   ;;  %2260 = vperm.xlu0 %3814, %v4362_v14   ;;  %v328_v9 = vadd.f32 %v4543_v45, %v327_v42  ;;  %v167_v14 = vsel %vm151_vm1, 65537, %v6896_v0  ;;  %v7190_v2 = vsel %vm4571_vm14, 4294967295, %v7189_v2  ;;  %vm4576_vm1 = vcmp.ne.s32.totalorder %v191_v57, 0 }
  0xb4   :  { %v192_v63 = vunpack.c.l.b16 %v167_v14  ;;  %v193_v1 = vunpack.c.h.b16 %v167_v14  ;;  %7191 = vst [vmem:[#allocation44_spill] sm:$0xff] %v7190_v2  ;;  %v7193_v3 = vsel %vm4576_vm1, 4294967295, %v7192_v3  ;;  %v4589_v8 = vsel %vm4576_vm1, 1.0, %v6915_v36 }
  0xb5   :  { %v329_v6 = vadd.f32 %v4566_v59, %v328_v9  ;;  %7194 = vst [vmem:[#allocation45_spill] sm:$0xff] %v7193_v3  ;;  %7196 = vst [vmem:[#allocation47_spill] sm:$0xff] %v4589_v8  ;;  %v7208_v9 = vmov 0 }
  0xb6   :  { %vm4592_vm15 = vcmp.ne.s32.totalorder %v192_v63, 0  ;;  %vm4596_vm0 = vcmp.ne.s32.totalorder %v193_v1, 0  ;;  %v7216_v63 = vmov 0 }
  0xb7   :  { %2256 = vperm.xlu1 %3813, %v4354_v11   ;;  %2268 = vperm.xlu0 %3814, %v4368_v16   ;;  %v4583_v11 = vsel %vm4571_vm14, 1.0, %v6915_v36  ;;  %v168_v16 = vsel %vm152_vm8, 65537, %v6896_v0  ;;  %v7198_v23 = vsel %vm4592_vm15, 4294967295, %v7197_v23  ;;  %v7201_v24 = vsel %vm4596_vm0, 4294967295, %v7200_v24 }
  0xb8   :  { %7195 = vst [vmem:[#allocation46_spill] sm:$0xff] %v4583_v11  ;;  %7199 = vst [vmem:[#allocation48_spill] sm:$0xff] %v7198_v23  ;;  %v309_v5 = vadd.f32 %v4583_v11, %v308_v61  ;;  %v194_v10 = vunpack.c.l.b16 %v168_v16  ;;  %v4604_v26 = vsel %vm4592_vm15, 1.0, %v6915_v36  ;;  %v330_v28 = vadd.f32 %v4589_v8, %v329_v6 }
  0xb9   :  { %7202 = vst [vmem:[#allocation49_spill] sm:$0xff] %v7201_v24  ;;  %7203 = vst [vmem:[#allocation50_spill] sm:$0xff] %v4604_v26  ;;  %v195_v29 = vunpack.c.h.b16 %v168_v16  ;;  %v4611_v30 = vsel %vm4596_vm0, 1.0, %v6915_v36  ;;  %vm154_vm8 = vcmp.ne.bf16.partialorder %v138_v20, 0  ;;  %vm155_vm14 = vcmp.ne.bf16.partialorder %v139_v31, 0 }
  0xba   :  { %7204 = vst [vmem:[#allocation51_spill] sm:$0xff] %v4611_v30  ;;  %v310_v42 = vadd.f32 %v4604_v26, %v309_v5  ;;  %vm4615_vm1 = vcmp.ne.s32.totalorder %v194_v10, 0  ;;  %v331_v53 = vadd.f32 %v4611_v30, %v330_v28  ;;  %v7213_v61 = vmov 0  ;;  %v4703_v30 = vld [vmem:[#allocation7] sm:$0xff]  }
  0xbb   :  { %2264 = vperm.xlu1 %3813, %v4360_v13   ;;  %v169_v13 = vsel %vm153_vm11, 65537, %v6896_v0  ;;  %v7206_v51 = vsel %vm4615_vm1, 4294967295, %v7205_v51  ;;  %vm4620_vm11 = vcmp.ne.s32.totalorder %v195_v29, 0  ;;  %v4627_v14 = vsel %vm4615_vm1, 1.0, %v6915_v36  ;;  %3647 = vmatprep.subr.bf16.mxu0 %v4703_v30 }
  0xbc   :  { %v196_v12 = vunpack.c.l.b16 %v169_v13  ;;  %v197_v46 = vunpack.c.h.b16 %v169_v13  ;;  %7207 = vst [vmem:[#allocation52_spill] sm:$0xff] %v7206_v51  ;;  %v7209_v9 = vsel %vm4620_vm11, 4294967295, %v7208_v9  ;;  %7211 = vst [vmem:[#allocation54_spill] sm:$0xff] %v4627_v14  ;;  %v4633_v57 = vsel %vm4620_vm11, 1.0, %v6915_v36  ;;  %v141_v13 = vld [vmem:[#allocation4 + $0x78] sm:$0xff]  ;;  %3648 = vmatpush3.bf16.msra.mxu0 %v4703_v30 }
  0xbd   :  { %7210 = vst [vmem:[#allocation53_spill] sm:$0xff] %v7209_v9  ;;  %7212 = vst [vmem:[#allocation55_spill] sm:$0xff] %v4633_v57  ;;  %v311_v1 = vadd.f32 %v4627_v14, %v310_v42  ;;  %v332_v20 = vadd.f32 %v4633_v57, %v331_v53  ;;  %v171_v5 = vsel %vm155_vm14, 65537, %v6896_v0  ;;  %v7224_v53 = vmov 0 }
  0xbe   :  { %vm4635_vm0 = vcmp.ne.s32.totalorder %v196_v12, 0  ;;  %vm4639_vm15 = vcmp.ne.s32.totalorder %v197_v46, 0  ;;  %v200_v31 = vunpack.c.l.b16 %v171_v5  ;;  %v201_v42 = vunpack.c.h.b16 %v171_v5 }
  0xbf   :  { %2272 = vperm.xlu1 %3813, %v4366_v15   ;;  %v170_v15 = vsel %vm154_vm8, 65537, %v6896_v0  ;;  %v7214_v61 = vsel %vm4635_vm0, 4294967295, %v7213_v61  ;;  %v7217_v63 = vsel %vm4639_vm15, 4294967295, %v7216_v63  ;;  %v4647_v16 = vsel %vm4635_vm0, 1.0, %v6915_v36 }
  0xc0   :  { %7215 = vst [vmem:[#allocation56_spill] sm:$0xff] %v7214_v61  ;;  %7218 = vst [vmem:[#allocation57_spill] sm:$0xff] %v7217_v63  ;;  %v198_v6 = vunpack.c.l.b16 %v170_v15  ;;  %v199_v10 = vunpack.c.h.b16 %v170_v15  ;;  %v4654_v28 = vsel %vm4639_vm15, 1.0, %v6915_v36  ;;  %vm156_vm8 = vcmp.ne.bf16.partialorder %v140_v60, 0 }
  0xc1   :  { %7219 = vst [vmem:[#allocation58_spill] sm:$0xff] %v4647_v16  ;;  %7220 = vst [vmem:[#allocation59_spill] sm:$0xff] %v4654_v28  ;;  %v312_v29 = vadd.f32 %v4647_v16, %v311_v1  ;;  %v7221_v12 = vmov 0  ;;  %v333_v46 = vadd.f32 %v4654_v28, %v332_v20  ;;  %v172_v60 = vsel %vm156_vm8, 65537, %v6896_v0 }
  0xc2   :  { %vm4657_vm11 = vcmp.ne.s32.totalorder %v198_v6, 0  ;;  %vm4662_vm1 = vcmp.ne.s32.totalorder %v199_v10, 0  ;;  %vm157_vm14 = vcmp.ne.bf16.partialorder %v141_v13, 0  ;;  %vm4677_vm15 = vcmp.ne.s32.totalorder %v200_v31, 0 }
  0xc3   :  { %v7222_v12 = vsel %vm4657_vm11, 4294967295, %v7221_v12  ;;  %v7225_v53 = vsel %vm4662_vm1, 4294967295, %v7224_v53  ;;  %v4669_v15 = vsel %vm4657_vm11, 1.0, %v6915_v36  ;;  %v4675_v1 = vsel %vm4662_vm1, 1.0, %v6915_v36  ;;  %1800 = vrot.lane.b32.xlu1 %v4703_v30, %s4221_s4 }
  0xc4   :  { %7223 = vst [vmem:[#allocation60_spill] sm:$0xff] %v7222_v12  ;;  %7226 = vst [vmem:[#allocation61_spill] sm:$0xff] %v7225_v53  ;;  %v7229_v6 = vmov 0  ;;  %vm4681_vm0 = vcmp.ne.s32.totalorder %v201_v42, 0  ;;  %v7232_v20 = vmov 0  ;;  %v313_v5 = vadd.f32 %v4669_v15, %v312_v29 }
  0xc5   :  { %7227 = vst [vmem:[#allocation62_spill] sm:$0xff] %v4669_v15  ;;  %7228 = vst [vmem:[#allocation63_spill] sm:$0xff] %v4675_v1  ;;  %v7230_v6 = vsel %vm4677_vm15, 4294967295, %v7229_v6  ;;  %v7233_v20 = vsel %vm4681_vm0, 4294967295, %v7232_v20  ;;  %v202_v10 = vunpack.c.l.b16 %v172_v60  ;;  %v4689_v0 = vsel %vm4677_vm15, 1.0, %v6915_v36 }
  0xc6   :  { %7231 = vst [vmem:[#allocation64_spill] sm:$0xff] %v7230_v6  ;;  %7234 = vst [vmem:[#allocation65_spill] sm:$0xff] %v7233_v20  ;;  %v334_v28 = vadd.f32 %v4675_v1, %v333_v46  ;;  %v7236_v16 = vmov 0   ;;  %v203_v31 = vunpack.c.h.b16 %v172_v60  ;;  %v561_v57 = vlaneseq }
  0xc7   :  { %7235 = vst [vmem:[#allocation66_spill] sm:$0xff] %v4689_v0  ;;  %v173_v13 = vsel %vm157_vm14, 65537, %v7236_v16  ;;  %v4696_v42 = vsel %vm4681_vm0, 1.0, %v6915_v36  ;;  %v314_v14 = vadd.f32 %v4689_v0, %v313_v5  ;;  %vm4699_vm8 = vcmp.ne.s32.totalorder %v202_v10, 0 }
  0xc8   :  { %7237 = vst [vmem:[#allocation67_spill] sm:$0xff] %v4696_v42  ;;  %v204_v29 = vunpack.c.l.b16 %v173_v13  ;;  %v7238_v15 = vmov 0  ;;  %v335_v46 = vadd.f32 %v4696_v42, %v334_v28  ;;  %v205_v1 = vunpack.c.h.b16 %v173_v13  ;;  %v4731_v13 = vld [vmem:[#allocation7 + $0x8] sm:$0xff]  }
  0xc9   :  { %v7239_v15 = vsel %vm4699_vm8, 4294967295, %v7238_v15  ;;  %vm4706_vm14 = vcmp.ne.s32.totalorder %v203_v31, 0  ;;  %v7241_v60 = vmov 0  ;;  %v4713_v26 = vsel %vm4699_vm8, 1.0, %v6915_v36  ;;  %1802 = vrot.lane.b32.xlu1 %v4731_v13, %s4221_s4  ;;  %3649 = vmatprep.subr.bf16.mxu0 %v4731_v13 }
  0xca   :  { %7240 = vst [vmem:[#allocation68_spill] sm:$0xff] %v7239_v15  ;;  %v7242_v60 = vsel %vm4706_vm14, 4294967295, %v7241_v60  ;;  %7244 = vst [vmem:[#allocation70_spill] sm:$0xff] %v4713_v26  ;;  %v4715_v5 = vshrl.u32 %v561_v57, 7  ;;  %v4720_v10 = vsel %vm4706_vm14, 1.0, %v6915_v36  ;;  %vm4726_vm1 = vcmp.ne.s32.totalorder %v204_v29, 0  ;;  %3650 = vmatpush3.bf16.msra.mxu0 %v4731_v13 }
  0xcb   :  { %7243 = vst [vmem:[#allocation69_spill] sm:$0xff] %v7242_v60  ;;  %7246 = vst [vmem:[#allocation72_spill] sm:$0xff] %v4720_v10  ;;  %v7247_v28 = vmov 0  ;;  %v315_v57 = vadd.f32 %v4713_v26, %v314_v14  ;;  %vm4733_vm8 = vcmp.ne.s32.totalorder %v205_v1, 0  ;;  %v7250_v31 = vmov 0  ;;  %v4752_v14 = vld [vmem:[#allocation10] sm:$0xff] }
  0xcc   :  { %7245 = vst [vmem:[#allocation71_spill] sm:$0xff] %v4715_v5  ;;  %v7248_v28 = vsel %vm4726_vm1, 4294967295, %v7247_v28  ;;  %v7251_v31 = vsel %vm4733_vm8, 4294967295, %v7250_v31  ;;  %v4740_v42 = vsel %vm4726_vm1, 1.0, %v6915_v36  ;;  %v336_v0 = vadd.f32 %v4720_v10, %v335_v46  ;;  %7255 = vst [vmem:[#allocation77_spill] sm:$0xff] %v4752_v14  ;;  %v4754_v1 = vld [vmem:[#allocation10 + $0x8] sm:$0xff] }
  0xcd   :  { %7249 = vst [vmem:[#allocation73_spill] sm:$0xff] %v7248_v28  ;;  %7252 = vst [vmem:[#allocation74_spill] sm:$0xff] %v7251_v31  ;;  %v563_v29 = vsub.s32 0, %v4715_v5  ;;  %v4747_v8 = vsel %vm4733_vm8, 1.0, %v6915_v36  ;;  %v316_v46 = vadd.f32 %v4740_v42, %v315_v57  ;;  %v4758_v10 = vld [vmem:[#allocation7 + $0x10] sm:$0xff]  }
  0xce   :  { %7253 = vst [vmem:[#allocation75_spill] sm:$0xff] %v4740_v42  ;;  %7254 = vst [vmem:[#allocation76_spill] sm:$0xff] %v4747_v8  ;;  %v337_v26 = vadd.f32 %v4747_v8, %v336_v0  ;;  %1804 = vrot.lane.b32.xlu1 %v4758_v10, %s4221_s4  ;;  %3651 = vmatprep.subr.bf16.mxu0 %v4758_v10 }
  0xcf   :  { %7256 = vst [vmem:[#allocation78_spill] sm:$0xff] %v4754_v1  ;;  %v4762_v36 = vrot.slane %v4752_v14, %v563_v29  ;;  %v4765_v11 = vrot.slane %v4754_v1, %v563_v29  ;;  %3652 = vmatpush3.bf16.msra.mxu0 %v4758_v10  ;;  %v317_v59 = vrot.slane %v316_v46, 4 }
  0xd0   :  { %v338_v45 = vrot.slane %v337_v26, 4  ;;  %3653 = vmatprep.subr.bf16.mxu0 %v4771_v56 }
  0xd1   :  { %v318_v18 = vadd.f32 %v317_v59, %v316_v46 }
  0xd2   :  { %1806 = vrot.lane.b32.xlu1 %v4771_v56, %s4221_s4  ;;  %v4781_v39 = vadd.f32 %v338_v45, %v337_v26 }
  0xd3   :  { %3654 = vmatpush3.bf16.msra.mxu0 %v4771_v56 }
  0xdc   :  { %v494_v57 = vpop.permute.xlu1 %493  ;;  %v484_v42 = vpop.permute.xlu0 %483 }
  0xdd   :  { %v573_v0 = vadd.f32 %v4762_v36, %v494_v57  ;;  %v574_v8 = vadd.f32 %v4765_v11, %v494_v57  ;;  %v569_v29 = vadd.f32 %v4762_v36, %v484_v42  ;;  %v570_v7 = vadd.f32 %v4765_v11, %v484_v42  ;;  %v3821_v57 = vld [vmem:[#allocation7 + $0x20] sm:$0xff]  }
  0xde   :  { %1808 = vrot.lane.b32.xlu1 %v3821_v57, %s4221_s4  ;;  %3655 = vmatprep.subr.bf16.mxu0 %v3821_v57 }
  0xdf   :  { %v605_v27 = vmul.f32 0.2, %v573_v0  ;;  %v606_v25 = vmul.f32 0.2, %v574_v8  ;;  %v601_v19 = vmul.f32 0.2, %v569_v29  ;;  %3656 = vmatpush3.bf16.msra.mxu0 %v3821_v57 }
  0xe0   :  { %v602_v62 = vmul.f32 0.2, %v570_v7  ;;  %v499_v58 = vpop.permute.xlu1 %498  ;;  %v489_v41 = vpop.permute.xlu0 %488 }
  0xe1   :  { %v637_v52 = vmax.f32 %v573_v0, %v605_v27  ;;  %v638_v49 = vmax.f32 %v574_v8, %v606_v25  ;;  %v633_v42 = vmax.f32 %v569_v29, %v601_v19  ;;  %v575_v40 = vadd.f32 %v4762_v36, %v499_v58 }
  0xe2   :  { %v576_v37 = vadd.f32 %v4765_v11, %v499_v58  ;;  %v571_v16 = vadd.f32 %v4762_v36, %v489_v41  ;;  %v572_v60 = vadd.f32 %v4765_v11, %v489_v41  ;;  %v319_v25 = vrot.slane %v318_v18, 2  ;;  %2677 = vrot.lane.b32.xlu1 %v4703_v30, %s4222_s29 }
  0xe3   :  { %v4790_v59 = vsel %vm4430_vm9, %v637_v52, -1e+30  ;;  %v4794_v45 = vsel %vm4436_vm10, %v638_v49, -1e+30  ;;  %v1400_v19 = vsub.s32 1, %v4715_v5  ;;  %v634_v27 = vmax.f32 %v570_v7, %v602_v62 }
  0xe4   :  { %7257 = vst [vmem:[#allocation79_spill] sm:$0xff] %v4790_v59  ;;  %7258 = vst [vmem:[#allocation80_spill] sm:$0xff] %v4794_v45  ;;  %v4799_v58 = vsel %vm4392_vm4, %v633_v42, -1e+30  ;;  %v607_v41 = vmul.f32 0.2, %v575_v40  ;;  %v509_v26 = vpop.permute.xlu1 %508  ;;  %v504_v46 = vpop.permute.xlu0 %503 }
  0xe5   :  { %7259 = vst [vmem:[#allocation81_spill] sm:$0xff] %v4799_v58  ;;  %v608_v8 = vmul.f32 0.2, %v576_v37  ;;  %v603_v52 = vmul.f32 0.2, %v571_v16  ;;  %v579_v29 = vadd.f32 %v4762_v36, %v509_v26  ;;  %v580_v5 = vadd.f32 %v4765_v11, %v509_v26 }
  0xe6   :  { %v604_v0 = vmul.f32 0.2, %v572_v60  ;;  %v639_v48 = vmax.f32 %v575_v40, %v607_v41  ;;  %v577_v62 = vadd.f32 %v4762_v36, %v504_v46  ;;  %v578_v57 = vadd.f32 %v4765_v11, %v504_v46  ;;  %2679 = vrot.lane.b32.xlu1 %v4731_v13, %s4222_s29 }
  0xe7   :  { %v640_v44 = vmax.f32 %v576_v37, %v608_v8  ;;  %v635_v7 = vmax.f32 %v571_v16, %v603_v52  ;;  %v611_v33 = vmul.f32 0.2, %v579_v29  ;;  %v4810_v31 = vsel %vm4400_vm6, %v634_v27, -1e+30 }
  0xe8   :  { %v636_v42 = vmax.f32 %v572_v60, %v604_v0  ;;  %7260 = vst [vmem:[#allocation82_spill] sm:$0xff] %v4810_v31  ;;  %v4814_v37 = vsel %vm4455_vm12, %v639_v48, -1e+30  ;;  %v612_v40 = vmul.f32 0.2, %v580_v5  ;;  %v519_v41 = vpop.permute.xlu1 %518  ;;  %v514_v8 = vpop.permute.xlu0 %513  ;;  %v4817_v26 = vrot.slane %v4752_v14, %v1400_v19 }
  0xe9   :  { %7261 = vst [vmem:[#allocation83_spill] sm:$0xff] %v4814_v37  ;;  %v4821_v30 = vsel %vm4459_vm13, %v640_v44, -1e+30  ;;  %v4825_v16 = vsel %vm4396_vm5, %v635_v7, -1e+30  ;;  %v4828_v27 = vrot.slane %v4754_v1, %v1400_v19  ;;  %v643_v46 = vmax.f32 %v579_v29, %v611_v33 }
  0xea   :  { %7262 = vst [vmem:[#allocation84_spill] sm:$0xff] %v4821_v30  ;;  %7263 = vst [vmem:[#allocation85_spill] sm:$0xff] %v4825_v16  ;;  %v609_v60 = vmul.f32 0.2, %v577_v62  ;;  %v4832_v48 = vsel %vm4409_vm7, %v636_v42, -1e+30  ;;  %v644_v52 = vmax.f32 %v580_v5, %v612_v40  ;;  %v583_v49 = vadd.f32 %v4762_v36, %v519_v41  ;;  %2681 = vrot.lane.b32.xlu1 %v4758_v10, %s4222_s29 }
  0xeb   :  { %7264 = vst [vmem:[#allocation86_spill] sm:$0xff] %v4832_v48  ;;  %v610_v0 = vmul.f32 0.2, %v578_v57  ;;  %v584_v7 = vadd.f32 %v4765_v11, %v519_v41  ;;  %v4838_v14 = vadd.f32 %v319_v25, %v318_v18  ;;  %v697_v19 = vmax.f32 %v4799_v58, %v4790_v59 }
  0xec   :  { %v641_v44 = vmax.f32 %v577_v62, %v609_v60  ;;  %v718_v42 = vmax.f32 %v4810_v31, %v4794_v45  ;;  %v698_v33 = vmax.f32 %v4825_v16, %v4814_v37  ;;  %v581_v5 = vadd.f32 %v4762_v36, %v514_v8  ;;  %v529_v29 = vpop.permute.xlu1 %528  ;;  %v524_v13 = vpop.permute.xlu0 %523 }
  0xed   :  { %v719_v62 = vmax.f32 %v4832_v48, %v4821_v30  ;;  %v642_v40 = vmax.f32 %v578_v57, %v610_v0  ;;  %v615_v41 = vmul.f32 0.2, %v583_v49  ;;  %v616_v18 = vmul.f32 0.2, %v584_v7 }
  0xee   :  { %v4851_v25 = vsel %vm4501_vm2, %v643_v46, -1e+30  ;;  %v4855_v60 = vsel %vm4505_vm3, %v644_v52, -1e+30  ;;  %v582_v37 = vadd.f32 %v4765_v11, %v514_v8  ;;  %v613_v59 = vmul.f32 0.2, %v581_v5  ;;  %2683 = vrot.lane.b32.xlu1 %v4771_v56, %s4222_s29 }
  0xef   :  { %7265 = vst [vmem:[#allocation87_spill] sm:$0xff] %v4851_v25  ;;  %7266 = vst [vmem:[#allocation88_spill] sm:$0xff] %v4855_v60  ;;  %vm7267_vm13 = vnez %v7159_v4  ;;  %v647_v57 = vmax.f32 %v583_v49, %v615_v41  ;;  %v648_v0 = vmax.f32 %v584_v7, %v616_v18  ;;  %v587_v58 = vadd.f32 %v4762_v36, %v529_v29 }
  0xf0   :  { %v4862_v16 = vsel %vm7267_vm13, %v641_v44, -1e+30  ;;  %v614_v46 = vmul.f32 0.2, %v582_v37  ;;  %v645_v30 = vmax.f32 %v581_v5, %v613_v59  ;;  %v588_v45 = vadd.f32 %v4765_v11, %v529_v29  ;;  %v539_v48 = vpop.permute.xlu1 %538  ;;  %v534_v8 = vpop.permute.xlu0 %533 }
  0xf1   :  { %7268 = vst [vmem:[#allocation89_spill] sm:$0xff] %v4862_v16  ;;  %v585_v52 = vadd.f32 %v4762_v36, %v524_v13  ;;  %v700_v31 = vmax.f32 %v698_v33, %v4851_v25  ;;  %vm7269_vm3 = vnez %v7162_v17  ;;  %v619_v44 = vmul.f32 0.2, %v587_v58  ;;  %v3822_v33 = vld [vmem:[#allocation7 + $0x28] sm:$0xff]  }
  0xf2   :  { %v4870_v10 = vsel %vm7269_vm3, %v642_v40, -1e+30  ;;  %v586_v49 = vadd.f32 %v4765_v11, %v524_v13  ;;  %v721_v7 = vmax.f32 %v719_v62, %v4855_v60  ;;  %vm7271_vm2 = vnez %v7182_v47  ;;  %1810 = vrot.lane.b32.xlu0 %v3822_v33, %s4221_s4  ;;  %3657 = vmatprep.subr.bf16.mxu0 %v3822_v33 }
  0xf3   :  { %7270 = vst [vmem:[#allocation90_spill] sm:$0xff] %v4870_v10  ;;  %v4876_v59 = vsel %vm7271_vm2, %v647_v57, -1e+30  ;;  %vm7273_vm13 = vnez %v7185_v50  ;;  %v646_v29 = vmax.f32 %v582_v37, %v614_v46  ;;  %v699_v40 = vmax.f32 %v697_v19, %v4862_v16  ;;  %3658 = vmatpush3.bf16.msra.mxu0 %v3822_v33 }
  0xf4   :  { %7272 = vst [vmem:[#allocation91_spill] sm:$0xff] %v4876_v59  ;;  %v4880_v5 = vsel %vm7273_vm13, %v648_v0, -1e+30  ;;  %vm7275_vm3 = vnez %v7174_v32  ;;  %v620_v62 = vmul.f32 0.2, %v588_v45  ;;  %v651_v18 = vmax.f32 %v587_v58, %v619_v44  ;;  %v549_v60 = vpop.permute.xlu1 %548  ;;  %v544_v37 = vpop.permute.xlu0 %543 }
  0xf5   :  { %7274 = vst [vmem:[#allocation92_spill] sm:$0xff] %v4880_v5  ;;  %v4887_v13 = vsel %vm7275_vm3, %v645_v30, -1e+30  ;;  %v617_v41 = vmul.f32 0.2, %v585_v52  ;;  %v591_v25 = vadd.f32 %v4762_v36, %v539_v48  ;;  %v592_v0 = vadd.f32 %v4765_v11, %v539_v48 }
  0xf6   :  { %7276 = vst [vmem:[#allocation93_spill] sm:$0xff] %v4887_v13  ;;  %v618_v57 = vmul.f32 0.2, %v586_v49  ;;  %v720_v56 = vmax.f32 %v718_v42, %v4870_v10  ;;  %vm7277_vm13 = vnez %v7177_v43  ;;  %v652_v30 = vmax.f32 %v588_v45, %v620_v62 }
  0xf7   :  { %v4895_v19 = vsel %vm7277_vm13, %v646_v29, -1e+30  ;;  %v649_v46 = vmax.f32 %v585_v52, %v617_v41  ;;  %v702_v58 = vmax.f32 %v700_v31, %v4876_v59  ;;  %v623_v16 = vmul.f32 0.2, %v591_v25 }
  0xf8   :  { %7278 = vst [vmem:[#allocation94_spill] sm:$0xff] %v4895_v19  ;;  %v650_v44 = vmax.f32 %v586_v49, %v618_v57  ;;  %v624_v1 = vmul.f32 0.2, %v592_v0  ;;  %v723_v48 = vmax.f32 %v721_v7, %v4880_v5  ;;  %v701_v50 = vmax.f32 %v699_v40, %v4887_v13  ;;  %v559_v49 = vpop.permute.xlu1 %558  ;;  %v554_v40 = vpop.permute.xlu0 %553 }
  0xf9   :  { %v589_v47 = vadd.f32 %v4762_v36, %v534_v8  ;;  %v590_v42 = vadd.f32 %v4765_v11, %v534_v8  ;;  %v722_v10 = vmax.f32 %v720_v56, %v4895_v19  ;;  %vm7279_vm2 = vnez %v7198_v23 }
  0xfa   :  { %v4905_v45 = vsel %vm7279_vm2, %v651_v18, -1e+30  ;;  %vm7281_vm13 = vnez %v7201_v24  ;;  %vm7283_vm3 = vnez %v7190_v2  ;;  %vm7285_vm12 = vnez %v7193_v3 }
  0xfb   :  { %7280 = vst [vmem:[#allocation95_spill] sm:$0xff] %v4905_v45  ;;  %v4909_v31 = vsel %vm7281_vm13, %v652_v30, -1e+30  ;;  %v4913_v52 = vsel %vm7283_vm3, %v649_v46, -1e+30  ;;  %v655_v8 = vmax.f32 %v591_v25, %v623_v16  ;;  %v656_v62 = vmax.f32 %v592_v0, %v624_v1 }
  0xfc   :  { %7282 = vst [vmem:[#allocation96_spill] sm:$0xff] %v4909_v31  ;;  %7284 = vst [vmem:[#allocation97_spill] sm:$0xff] %v4913_v52  ;;  %v4917_v7 = vsel %vm7285_vm12, %v650_v44, -1e+30  ;;  %v621_v29 = vmul.f32 0.2, %v589_v47  ;;  %v595_v41 = vadd.f32 %v4762_v36, %v549_v60  ;;  %v596_v18 = vadd.f32 %v4765_v11, %v549_v60 }
  0xfd   :  { %7286 = vst [vmem:[#allocation98_spill] sm:$0xff] %v4917_v7  ;;  %v622_v33 = vmul.f32 0.2, %v590_v42  ;;  %v593_v57 = vadd.f32 %v4762_v36, %v544_v37  ;;  %v704_v56 = vmax.f32 %v702_v58, %v4905_v45  ;;  %v725_v30 = vmax.f32 %v723_v48, %v4909_v31  ;;  %v1340_v58 = vpop.permute.xlu1 %1339 }
  0xfe   :  { %v703_v46 = vmax.f32 %v701_v50, %v4913_v52  ;;  %v653_v59 = vmax.f32 %v589_v47, %v621_v29  ;;  %v627_v13 = vmul.f32 0.2, %v595_v41  ;;  %v628_v16 = vmul.f32 0.2, %v596_v18 }
  0xff   :  { %v654_v44 = vmax.f32 %v590_v42, %v622_v33  ;;  %v594_v25 = vadd.f32 %v4765_v11, %v544_v37  ;;  %v724_v1 = vmax.f32 %v722_v10, %v4917_v7  ;;  %vm7287_vm13 = vnez %v7214_v61  ;;  %v1336_v33 = vpop.permute.xlu0 %1335 }
 0x100   :  { %v4929_v0 = vsel %vm7287_vm13, %v655_v8, -1e+30  ;;  %v625_v60 = vmul.f32 0.2, %v593_v57  ;;  %v599_v5 = vadd.f32 %v4762_v36, %v559_v49  ;;  %vm7289_vm2 = vnez %v7217_v63 }
 0x101   :  { %7288 = vst [vmem:[#allocation99_spill] sm:$0xff] %v4929_v0  ;;  %v4934_v48 = vsel %vm7289_vm2, %v656_v62, -1e+30  ;;  %vm7291_vm12 = vnez %v7206_v51  ;;  %v659_v50 = vmax.f32 %v595_v41, %v627_v13  ;;  %v660_v37 = vmax.f32 %v596_v18, %v628_v16  ;;  %v1344_v18 = vpop.permute.xlu1 %1343 }
 0x102   :  { %7290 = vst [vmem:[#allocation100_spill] sm:$0xff] %v4934_v48  ;;  %v4938_v47 = vsel %vm7291_vm12, %v653_v59, -1e+30  ;;  %v626_v42 = vmul.f32 0.2, %v594_v25  ;;  %v657_v10 = vmax.f32 %v593_v57, %v625_v60  ;;  %v600_v29 = vadd.f32 %v4765_v11, %v559_v49 }
 0x103   :  { %7292 = vst [vmem:[#allocation101_spill] sm:$0xff] %v4938_v47  ;;  %v631_v8 = vmul.f32 0.2, %v599_v5  ;;  %v706_v45 = vmax.f32 %v704_v56, %v4929_v0  ;;  %vm7293_vm13 = vnez %v7209_v9  ;;  %v597_v62 = vadd.f32 %v4762_v36, %v554_v40 }
 0x104   :  { %v4944_v52 = vsel %vm7293_vm13, %v654_v44, -1e+30  ;;  %v598_v31 = vadd.f32 %v4765_v11, %v554_v40  ;;  %v727_v59 = vmax.f32 %v725_v30, %v4934_v48  ;;  %v705_v13 = vmax.f32 %v703_v46, %v4938_v47 }
 0x105   :  { %7294 = vst [vmem:[#allocation102_spill] sm:$0xff] %v4944_v52  ;;  %v4952_v41 = vsel %vm4677_vm15, %v659_v50, -1e+30  ;;  %v658_v49 = vmax.f32 %v594_v25, %v626_v42  ;;  %v4956_v57 = vsel %vm4681_vm0, %v660_v37, -1e+30  ;;  %v663_v44 = vmax.f32 %v599_v5, %v631_v8  ;;  %v1352_v8 = vpop.permute.xlu1 %1351 }
 0x106   :  { %7295 = vst [vmem:[#allocation103_spill] sm:$0xff] %v4952_v41  ;;  %7296 = vst [vmem:[#allocation104_spill] sm:$0xff] %v4956_v57  ;;  %v632_v56 = vmul.f32 0.2, %v600_v29  ;;  %v629_v16 = vmul.f32 0.2, %v597_v62  ;;  %v726_v36 = vmax.f32 %v724_v1, %v4944_v52  ;;  %vm7298_vm2 = vnez %v7225_v53 }
 0x107   :  { %v4961_v11 = vsel %vm4657_vm11, %v657_v10, -1e+30  ;;  %v4965_v40 = vsel %vm7298_vm2, %v658_v49, -1e+30  ;;  %v630_v30 = vmul.f32 0.2, %v598_v31  ;;  %v1408_v5 = vadd.f32 %v4817_v26, %v1340_v58  ;;  %v1348_v10 = vpop.permute.xlu0 %1347 }
 0x108   :  { %7297 = vst [vmem:[#allocation105_spill] sm:$0xff] %v4961_v11  ;;  %7299 = vst [vmem:[#allocation106_spill] sm:$0xff] %v4965_v40  ;;  %v664_v46 = vmax.f32 %v600_v29, %v632_v56  ;;  %v4969_v25 = vsel %vm4726_vm1, %v663_v44, -1e+30  ;;  %v661_v60 = vmax.f32 %v597_v62, %v629_v16  ;;  %v708_v50 = vmax.f32 %v706_v45, %v4952_v41  ;;  %v3823_v49 = vld [vmem:[#allocation7 + $0x30] sm:$0xff]  }
 0x109   :  { %7300 = vst [vmem:[#allocation107_spill] sm:$0xff] %v4969_v25  ;;  %v729_v1 = vmax.f32 %v727_v59, %v4956_v57  ;;  %v662_v37 = vmax.f32 %v598_v31, %v630_v30  ;;  %v1409_v42 = vadd.f32 %v4828_v27, %v1340_v58  ;;  %v707_v0 = vmax.f32 %v705_v13, %v4961_v11 }
 0x10a   :  { %vm7301_vm0 = vnez %v7239_v15  ;;  %v1406_v62 = vadd.f32 %v4817_v26, %v1336_v33  ;;  %v1407_v56 = vadd.f32 %v4828_v27, %v1336_v33  ;;  %v728_v45 = vmax.f32 %v726_v36, %v4965_v40  ;;  %1812 = vrot.lane.b32.xlu0 %v3823_v49, %s4221_s4  ;;  %3659 = vmatprep.subr.bf16.mxu0 %v3823_v49 }
 0x10b   :  { %v4978_v29 = vsel %vm7301_vm0, %v661_v60, -1e+30  ;;  %v4985_v31 = vsel %vm4733_vm8, %v664_v46, -1e+30  ;;  %v710_v58 = vmax.f32 %v708_v50, %v4969_v25  ;;  %v4990_v16 = vsel %vm4706_vm14, %v662_v37, -1e+30  ;;  %3660 = vmatpush3.bf16.msra.mxu0 %v3823_v49  ;;  %v1356_v48 = vpop.permute.xlu0 %1355 }
 0x10c   :  { %7302 = vst [vmem:[#allocation108_spill] sm:$0xff] %v4978_v29  ;;  %7304 = vst [vmem:[#allocation109_spill] sm:$0xff] %v4985_v31  ;;  %v709_v13 = vmax.f32 %v707_v0, %v4978_v29  ;;  %v1440_v30 = vmul.f32 0.2, %v1408_v5  ;;  %v1438_v60 = vmul.f32 0.2, %v1406_v62  ;;  %v1410_v41 = vadd.f32 %v4817_v26, %v1344_v18  ;;  %v1360_v29 = vpop.permute.xlu1 %1359 }
 0x10d   :  { %7306 = vst [vmem:[#allocation110_spill] sm:$0xff] %v4990_v16  ;;  %v1439_v33 = vmul.f32 0.2, %v1407_v56  ;;  %v1441_v36 = vmul.f32 0.2, %v1409_v42  ;;  %v1411_v46 = vadd.f32 %v4828_v27, %v1344_v18  ;;  %v731_v50 = vmax.f32 %v729_v1, %v4985_v31 }
 0x10e   :  { %v321_v25 = vrot.slane %v4838_v14, 1  ;;  %v7307_v37 = vrot.slane %v4781_v39, 2  ;;  %v730_v0 = vmax.f32 %v728_v45, %v4990_v16  ;;  %v1470_v47 = vmax.f32 %v1406_v62, %v1438_v60 }
 0x10f   :  { %v1442_v57 = vmul.f32 0.2, %v1410_v41  ;;  %v1443_v49 = vmul.f32 0.2, %v1411_v46  ;;  %v1412_v40 = vadd.f32 %v4817_v26, %v1348_v10  ;;  %v711_v52 = vmax.f32 %v709_v13, %v710_v58 }
 0x110   :  { %v5001_v11 = vadd.f32 %v7307_v37, %v4781_v39  ;;  %v1472_v18 = vmax.f32 %v1408_v5, %v1440_v30  ;;  %v1471_v7 = vmax.f32 %v1407_v56, %v1439_v33  ;;  %v1413_v1 = vadd.f32 %v4828_v27, %v1348_v10  ;;  %v1368_v58 = vpop.permute.xlu1 %1367 }
 0x111   :  { %v1473_v31 = vmax.f32 %v1409_v42, %v1441_v36  ;;  %v1474_v19 = vmax.f32 %v1410_v41, %v1442_v57  ;;  %v1475_v44 = vmax.f32 %v1411_v46, %v1443_v49  ;;  %v1444_v28 = vmul.f32 0.2, %v1412_v40 }
 0x112   :  { %v732_v39 = vmax.f32 %v730_v0, %v731_v50  ;;  %v1445_v37 = vmul.f32 0.2, %v1413_v1  ;;  %v1414_v45 = vadd.f32 %v4817_v26, %v1352_v8  ;;  %v1415_v62 = vadd.f32 %v4828_v27, %v1352_v8 }
 0x113   :  { %v342_v60 = vrot.slane %v5001_v11, 1  ;;  %v5011_v59 = vsel %vm4392_vm4, %v1470_v47, -1e+30  ;;  %v5015_v56 = vsel %vm4430_vm9, %v1474_v19, -1e+30  ;;  %v1476_v42 = vmax.f32 %v1412_v40, %v1444_v28  ;;  %v7312_v47 = vld [vmem:[#allocation24_spill] sm:$0xff]  ;;  %v1364_v40 = vpop.permute.xlu0 %1363 }
 0x114   :  { %v712_v41 = vrot.slane %v711_v52, 4  ;;  %v5019_v57 = vsel %vm4396_vm5, %v1472_v18, -1e+30  ;;  %v5023_v10 = vsel %vm4400_vm6, %v1471_v7, -1e+30  ;;  %v1477_v8 = vmax.f32 %v1413_v1, %v1445_v37 }
 0x115   :  { %7310 = vst [vmem:[#allocation18_spill] sm:$0xff] %v5023_v10  ;;  %v5026_v13 = vadd.f32 %v321_v25, %v4838_v14  ;;  %v5030_v30 = vsel %vm4436_vm10, %v1475_v44, -1e+30  ;;  %v1446_v19 = vmul.f32 0.2, %v1414_v45  ;;  %v733_v33 = vrot.slane %v732_v39, 4 }
 0x116   :  { %7313 = vst [vmem:[#allocation24_spill] sm:$0xff] %v5030_v30  ;;  %v1447_v28 = vmul.f32 0.2, %v1415_v62  ;;  %v5034_v36 = vsel %vm4409_vm7, %v1473_v31, -1e+30  ;;  %v1534_v7 = vmax.f32 %v5011_v59, %v5015_v56  ;;  %v1416_v46 = vadd.f32 %v4817_v26, %v1356_v48 }
 0x117   :  { %7311 = vst [vmem:[#allocation23_spill] sm:$0xff] %v5026_v13  ;;  %7314 = vst [vmem:[#allocation111_spill] sm:$0xff] %v5034_v36  ;;  %vm7315_vm5 = vnez %v7153_v54  ;;  %vm7316_vm10 = vnez %v7155_v55  ;;  %v1478_v44 = vmax.f32 %v1414_v45, %v1446_v19  ;;  %v1555_v0 = vmax.f32 %v5023_v10, %v5030_v30 }
 0x118   :  { %v5041_v14 = vsel %vm7315_vm5, %v1476_v42, -1e+30  ;;  %v5045_v25 = vsel %vm7316_vm10, %v1477_v8, -1e+30  ;;  %v1479_v50 = vmax.f32 %v1415_v62, %v1447_v28  ;;  %v1417_v31 = vadd.f32 %v4828_v27, %v1356_v48 }
 0x119   :  { %7317 = vst [vmem:[#allocation112_spill] sm:$0xff] %v5045_v25  ;;  %v1448_v49 = vmul.f32 0.2, %v1416_v46  ;;  %v1418_v18 = vadd.f32 %v4817_v26, %v1360_v29  ;;  %v5051_v1 = vmax.f32 %v711_v52, %v712_v41  ;;  %vm7318_vm7 = vnez %v7159_v4  ;;  %v1376_v41 = vpop.permute.xlu1 %1375 }
 0x11a   :  { %v5055_v37 = vsel %vm7318_vm7, %v1478_v44, -1e+30  ;;  %vm7319_vm5 = vnez %v7162_v17  ;;  %v1419_v45 = vadd.f32 %v4828_v27, %v1360_v29  ;;  %v5062_v62 = vmax.f32 %v732_v39, %v733_v33  ;;  %v1372_v17 = vpop.permute.xlu0 %1371 }
 0x11b   :  { %v5059_v42 = vsel %vm7319_vm5, %v1479_v50, -1e+30  ;;  %v1535_v48 = vmax.f32 %v5019_v57, %v5041_v14  ;;  %v1556_v8 = vmax.f32 %v5034_v36, %v5045_v25  ;;  %v1449_v52 = vmul.f32 0.2, %v1417_v31 }
 0x11c   :  { %7320 = vst [vmem:[#allocation113_spill] sm:$0xff] %v5059_v42  ;;  %v1536_v19 = vmax.f32 %v1534_v7, %v5055_v37  ;;  %v1480_v28 = vmax.f32 %v1416_v46, %v1448_v49  ;;  %v1450_v44 = vmul.f32 0.2, %v1418_v18  ;;  %v1451_v4 = vmul.f32 0.2, %v1419_v45 }
 0x11d   :  { %v1557_v50 = vmax.f32 %v1555_v0, %v5059_v42  ;;  %v1481_v30 = vmax.f32 %v1417_v31, %v1449_v52  ;;  %v1420_v29 = vadd.f32 %v4817_v26, %v1364_v40  ;;  %v1421_v39 = vadd.f32 %v4828_v27, %v1364_v40  ;;  %v1384_v52 = vpop.permute.xlu1 %1383 }
 0x11e   :  { %v5073_v33 = vadd.f32 %v342_v60, %v5001_v11  ;;  %vm7322_vm5 = vnez %v7167_v21  ;;  %v1482_v36 = vmax.f32 %v1418_v18, %v1450_v44  ;;  %v1483_v7 = vmax.f32 %v1419_v45, %v1451_v4  ;;  %v1380_v46 = vpop.permute.xlu0 %1379 }
 0x11f   :  { %v5077_v25 = vsel %vm7322_vm5, %v1480_v28, -1e+30  ;;  %3825 = vrsqrt.f32 %v5026_v13  ;;  %vm7324_vm7 = vnez %v7169_v22  ;;  %v1452_v31 = vmul.f32 0.2, %v1420_v29  ;;  %v7333_v22 = vld [vmem:[#allocation41_spill] sm:$0xff] }
 0x120   :  { %7321 = vst [vmem:[#allocation114_spill] sm:$0xff] %v5073_v33  ;;  %7323 = vst [vmem:[#allocation115_spill] sm:$0xff] %v5077_v25  ;;  %v5083_v0 = vsel %vm7324_vm7, %v1481_v30, -1e+30  ;;  %v735_v40 = vrot.slane %v5062_v62, 2  ;;  %v1537_v11 = vmax.f32 %v1535_v48, %v5077_v25  ;;  %vm7326_vm10 = vnez %v7174_v32 }
 0x121   :  { %7325 = vst [vmem:[#allocation116_spill] sm:$0xff] %v5083_v0  ;;  %v5089_v60 = vsel %vm7326_vm10, %v1482_v36, -1e+30  ;;  %vm7328_vm5 = vnez %v7177_v43  ;;  %v1558_v49 = vmax.f32 %v1556_v8, %v5083_v0  ;;  %v1453_v45 = vmul.f32 0.2, %v1421_v39  ;;  %v1392_v25 = vpop.permute.xlu1 %1391 }
 0x122   :  { %7327 = vst [vmem:[#allocation117_spill] sm:$0xff] %v5089_v60  ;;  %v5093_v4 = vsel %vm7328_vm5, %v1483_v7, -1e+30  ;;  %v1538_v18 = vmax.f32 %v1536_v19, %v5089_v60  ;;  %v1484_v28 = vmax.f32 %v1420_v29, %v1452_v31  ;;  %v1422_v44 = vadd.f32 %v4817_v26, %v1368_v58  ;;  %v7330_v19 = vld [vmem:[#allocation40_spill] sm:$0xff] }
 0x123   :  { %7329 = vst [vmem:[#allocation118_spill] sm:$0xff] %v5093_v4  ;;  %v1559_v30 = vmax.f32 %v1557_v50, %v5093_v4  ;;  %v1423_v48 = vadd.f32 %v4828_v27, %v1368_v58  ;;  %v1424_v36 = vadd.f32 %v4817_v26, %v1372_v17  ;;  %v1485_v13 = vmax.f32 %v1421_v39, %v1453_v45 }
 0x124   :  { %v1425_v7 = vadd.f32 %v4828_v27, %v1372_v17  ;;  %v1426_v43 = vadd.f32 %v4817_v26, %v1376_v41  ;;  %v1427_v8 = vadd.f32 %v4828_v27, %v1376_v41  ;;  %vm7331_vm5 = vnez %v7330_v19 }
 0x125   :  { %v5106_v50 = vsel %vm7331_vm5, %v1484_v28, -1e+30  ;;  %v1454_v32 = vmul.f32 0.2, %v1422_v44  ;;  %v1455_v29 = vmul.f32 0.2, %v1423_v48  ;;  %v1428_v31 = vadd.f32 %v4817_v26, %v1380_v46 }
 0x126   :  { %7332 = vst [vmem:[#allocation119_spill] sm:$0xff] %v5106_v50  ;;  %vm7334_vm10 = vnez %v7333_v22  ;;  %v1539_v39 = vmax.f32 %v1537_v11, %v5106_v50  ;;  %v1456_v45 = vmul.f32 0.2, %v1424_v36  ;;  %v1457_v17 = vmul.f32 0.2, %v1425_v7 }
 0x127   :  { %v5111_v58 = vsel %vm7334_vm10, %v1485_v13, -1e+30  ;;  %v1486_v0 = vmax.f32 %v1422_v44, %v1454_v32  ;;  %v1487_v41 = vmax.f32 %v1423_v48, %v1455_v29  ;;  %v1458_v42 = vmul.f32 0.2, %v1426_v43 }
 0x128   :  { %v1560_v4 = vmax.f32 %v1558_v49, %v5111_v58  ;;  %v1488_v19 = vmax.f32 %v1424_v36, %v1456_v45  ;;  %v1489_v28 = vmax.f32 %v1425_v7, %v1457_v17  ;;  %v1459_v10 = vmul.f32 0.2, %v1427_v8  ;;  %v1388_v49 = vpop.permute.xlu0 %1387 }
 0x129   :  { %v1429_v60 = vadd.f32 %v4828_v27, %v1380_v46  ;;  %v5118_v22 = vsel %vm7283_vm3, %v1486_v0, -1e+30  ;;  %vm7335_vm10 = vnez %v7193_v3  ;;  %v1490_v11 = vmax.f32 %v1426_v43, %v1458_v42  ;;  %v5124_v32 = vpop.eup %3825 }
 0x12a   :  { %v5122_v13 = vsel %vm7335_vm10, %v1487_v41, -1e+30  ;;  %v1460_v50 = vmul.f32 0.2, %v1428_v31  ;;  %7336 = vst [vmem:[#allocation120_spill] sm:$0xff] %v5124_v32  ;;  %v736_v44 = vmax.f32 %v5062_v62, %v735_v40  ;;  %v1540_v48 = vmax.f32 %v1538_v18, %v5118_v22 }
 0x12b   :  { %vm7337_vm5 = vnez %v7198_v23  ;;  %vm7338_vm3 = vnez %v7201_v24  ;;  %v1561_v36 = vmax.f32 %v1559_v30, %v5122_v13  ;;  %v1491_v42 = vmax.f32 %v1427_v8, %v1459_v10 }
 0x12c   :  { %v5130_v46 = vsel %vm7337_vm5, %v1488_v19, -1e+30  ;;  %v5134_v0 = vsel %vm7338_vm3, %v1489_v28, -1e+30  ;;  %v5140_v7 = vsel %vm7291_vm12, %v1490_v11, -1e+30  ;;  %v1492_v18 = vmax.f32 %v1428_v31, %v1460_v50  ;;  %v2213_v31 = vpop.permute.xlu1 %2212 }
 0x12d   :  { %v1541_v43 = vmax.f32 %v1539_v39, %v5130_v46  ;;  %v1562_v62 = vmax.f32 %v1560_v4, %v5134_v0  ;;  %v1461_v40 = vmul.f32 0.2, %v1429_v60  ;;  %v1430_v19 = vadd.f32 %v4817_v26, %v1384_v52 }
 0x12e   :  { %v5146_v29 = vsel %vm7293_vm13, %v1491_v42, -1e+30  ;;  %v1431_v45 = vadd.f32 %v4828_v27, %v1384_v52  ;;  %v1432_v30 = vadd.f32 %v4817_v26, %v1388_v49  ;;  %v1433_v10 = vadd.f32 %v4828_v27, %v1388_v49  ;;  %v1396_v42 = vpop.permute.xlu0 %1395 }
 0x12f   :  { %v1542_v8 = vmax.f32 %v1540_v48, %v5140_v7  ;;  %v1493_v39 = vmax.f32 %v1429_v60, %v1461_v40  ;;  %vm7339_vm12 = vnez %v7214_v61  ;;  %v1462_v50 = vmul.f32 0.2, %v1430_v19 }
 0x130   :  { %v5154_v4 = vsel %vm7339_vm12, %v1492_v18, -1e+30  ;;  %v1563_v17 = vmax.f32 %v1561_v36, %v5146_v29  ;;  %v1463_v41 = vmul.f32 0.2, %v1431_v45  ;;  %v1464_v28 = vmul.f32 0.2, %v1432_v30 }
 0x131   :  { %v1465_v11 = vmul.f32 0.2, %v1433_v10  ;;  %vm7340_vm13 = vnez %v7217_v63  ;;  %v1494_v49 = vmax.f32 %v1430_v19, %v1462_v50  ;;  %v1434_v48 = vadd.f32 %v4817_v26, %v1392_v25 }
 0x132   :  { %v5159_v52 = vsel %vm7340_vm13, %v1493_v39, -1e+30  ;;  %v1435_v60 = vadd.f32 %v4828_v27, %v1392_v25  ;;  %v1543_v40 = vmax.f32 %v1541_v43, %v5154_v4  ;;  %v1495_v18 = vmax.f32 %v1431_v45, %v1463_v41 }
 0x133   :  { %v1496_v32 = vmax.f32 %v1432_v30, %v1464_v28  ;;  %v1497_v9 = vmax.f32 %v1433_v10, %v1465_v11  ;;  %v5166_v36 = vsel %vm4657_vm11, %v1494_v49, -1e+30  ;;  %v1466_v51 = vmul.f32 0.2, %v1434_v48  ;;  %v2221_v10 = vpop.permute.xlu1 %2220  ;;  %v7342_v11 = vld [vmem:[#allocation71_spill] sm:$0xff] }
 0x134   :  { %v1467_v61 = vmul.f32 0.2, %v1435_v60  ;;  %v1436_v63 = vadd.f32 %v4817_v26, %v1396_v42  ;;  %v737_v39 = vrot.slane %v736_v44, 1  ;;  %v1564_v19 = vmax.f32 %v1562_v62, %v5159_v52 }
 0x135   :  { %v5172_v50 = vsel %vm7298_vm2, %v1495_v18, -1e+30  ;;  %v5176_v25 = vsel %vm4677_vm15, %v1496_v32, -1e+30  ;;  %v1544_v43 = vmax.f32 %v1542_v8, %v5166_v36  ;;  %vm7341_vm11 = vnez %v7233_v20 }
 0x136   :  { %v1565_v45 = vmax.f32 %v1563_v17, %v5172_v50  ;;  %v5182_v30 = vsel %vm7341_vm11, %v1497_v9, -1e+30  ;;  %v1498_v26 = vmax.f32 %v1434_v48, %v1466_v51  ;;  %v1499_v41 = vmax.f32 %v1435_v60, %v1467_v61  ;;  %v2217_v51 = vpop.permute.xlu0 %2216 }
 0x137   :  { %v1437_v62 = vadd.f32 %v4828_v27, %v1396_v42  ;;  %v1468_v28 = vmul.f32 0.2, %v1436_v63  ;;  %v2277_v49 = vsub.s32 2, %v7342_v11  ;;  %3827 = vrsqrt.f32 %v5073_v33 }
 0x138   :  { %v1545_v32 = vmax.f32 %v1543_v40, %v5176_v25  ;;  %v5190_v8 = vsel %vm7301_vm0, %v1498_v26, -1e+30  ;;  %v7343_v17 = vrot.slane %v5051_v1, 2  ;;  %v5199_v61 = vsel %vm4706_vm14, %v1499_v41, -1e+30  ;;  %v7346_v40 = vld [vmem:[#allocation77_spill] sm:$0xff] }
 0x139   :  { %v1469_v27 = vmul.f32 0.2, %v1437_v62  ;;  %v1500_v42 = vmax.f32 %v1436_v63, %v1468_v28  ;;  %v1566_v48 = vmax.f32 %v1564_v19, %v5182_v30  ;;  %v1546_v60 = vmax.f32 %v1544_v43, %v5190_v8  ;;  %v7347_v26 = vld [vmem:[#allocation78_spill] sm:$0xff] }
 0x13a   :  { %v5195_v9 = vmax.f32 %v5051_v1, %v7343_v17  ;;  %v5204_v18 = vrot.slane %v7346_v40, %v2277_v49  ;;  %v5207_v11 = vrot.slane %v7347_v26, %v2277_v49  ;;  %v5209_v33 = vmax.f32 %v736_v44, %v737_v39  ;;  %v2225_v40 = vpop.permute.xlu1 %2224 }
 0x13b   :  { %v1567_v1 = vmax.f32 %v1565_v45, %v5199_v61  ;;  %v1501_v17 = vmax.f32 %v1437_v62, %v1469_v27  ;;  %v5214_v41 = vsel %vm4726_vm1, %v1500_v42, -1e+30  ;;  %vm7353_vm14 = vnez %v7312_v47 }
 0x13c   :  { %7344 = vst [vmem:[#allocation71_spill] sm:$0xff] %v5195_v9  ;;  %7348 = vst [vmem:[#allocation77_spill] sm:$0xff] %v5207_v11  ;;  %v1547_v63 = vmax.f32 %v1545_v32, %v5214_v41  ;;  %v2283_v19 = vadd.f32 %v5204_v18, %v2213_v31  ;;  %v2284_v43 = vadd.f32 %v5207_v11, %v2213_v31  ;;  %vm7354_vm0 = vnez %v7153_v54 }
 0x13d   :  { %7349 = vst [vmem:[#allocation78_spill] sm:$0xff] %v5209_v33  ;;  %v2287_v28 = vadd.f32 %v5204_v18, %v2221_v10  ;;  %v5222_v44 = vsel %vm4733_vm8, %v1501_v17, -1e+30  ;;  %v2288_v39 = vadd.f32 %v5207_v11, %v2221_v10  ;;  %v2289_v45 = vadd.f32 %v5204_v18, %v2225_v40 }
 0x13e   :  { %v2290_v62 = vadd.f32 %v5207_v11, %v2225_v40  ;;  %v1548_v27 = vmax.f32 %v1546_v60, %v1547_v63  ;;  %v1568_v32 = vmax.f32 %v1566_v48, %v5222_v44  ;;  %v2315_v42 = vmul.f32 0.2, %v2283_v19  ;;  %v2233_v5 = vpop.permute.xlu1 %2232 }
 0x13f   :  { %v2316_v26 = vmul.f32 0.2, %v2284_v43  ;;  %v2319_v31 = vmul.f32 0.2, %v2287_v28  ;;  %v2320_v15 = vmul.f32 0.2, %v2288_v39  ;;  %v2285_v9 = vadd.f32 %v5204_v18, %v2217_v51 }
 0x140   :  { %v2321_v33 = vmul.f32 0.2, %v2289_v45  ;;  %v1549_v49 = vrot.slane %v1548_v27, 4  ;;  %v1569_v17 = vmax.f32 %v1567_v1, %v1568_v32  ;;  %v2347_v53 = vmax.f32 %v2283_v19, %v2315_v42 }
 0x141   :  { %v2348_v12 = vmax.f32 %v2284_v43, %v2316_v26  ;;  %v2351_v10 = vmax.f32 %v2287_v28, %v2319_v31  ;;  %v2352_v20 = vmax.f32 %v2288_v39, %v2320_v15  ;;  %v2322_v6 = vmul.f32 0.2, %v2290_v62  ;;  %v5229_v40 = vpop.eup %3827 }
 0x142   :  { %v2353_v3 = vmax.f32 %v2289_v45, %v2321_v33  ;;  %7352 = vst [vmem:[#allocation121_spill] sm:$0xff] %v5229_v40  ;;  %v1550_v60 = vmax.f32 %v1548_v27, %v1549_v49  ;;  %v1570_v48 = vrot.slane %v1569_v17, 4  ;;  %v5233_v63 = vsel %vm4392_vm4, %v2347_v53, -1e+30 }
 0x143   :  { %v5237_v2 = vsel %vm4400_vm6, %v2348_v12, -1e+30  ;;  %v5241_v1 = vsel %vm4430_vm9, %v2351_v10, -1e+30  ;;  %v5245_v15 = vsel %vm7353_vm14, %v2352_v20, -1e+30  ;;  %v2354_v33 = vmax.f32 %v2290_v62, %v2322_v6 }
 0x144   :  { %v5249_v19 = vsel %vm7354_vm0, %v2353_v3, -1e+30  ;;  %v1551_v16 = vrot.slane %v1550_v60, 2  ;;  %v1571_v53 = vmax.f32 %v1569_v17, %v1570_v48  ;;  %vm7355_vm4 = vnez %v7155_v55  ;;  %v2229_v3 = vpop.permute.xlu0 %2228 }
 0x145   :  { %v5257_v43 = vsel %vm7355_vm4, %v2354_v33, -1e+30  ;;  %v2286_v20 = vadd.f32 %v5207_v11, %v2217_v51  ;;  %v2317_v6 = vmul.f32 0.2, %v2285_v9  ;;  %v2293_v54 = vadd.f32 %v5204_v18, %v2233_v5 }
 0x146   :  { %v1552_v47 = vmax.f32 %v1550_v60, %v1551_v16  ;;  %v1572_v28 = vrot.slane %v1571_v53, 2  ;;  %v5262_v49 = vadd.f32 %v5207_v11, %v2233_v5  ;;  %v5265_v39 = vadd.f32 %v5204_v18, %v2229_v3 }
 0x147   :  { %v2318_v45 = vmul.f32 0.2, %v2286_v20  ;;  %v2349_v62 = vmax.f32 %v2285_v9, %v2317_v6  ;;  %v2325_v27 = vmul.f32 0.2, %v2293_v54  ;;  %v5268_v55 = vadd.f32 %v5207_v11, %v2229_v3 }
 0x148   :  { %v1553_v32 = vrot.slane %v1552_v47, 1  ;;  %v1573_v51 = vmax.f32 %v1571_v53, %v1572_v28  ;;  %v5271_v42 = vmul.f32 0.2, %v5262_v49  ;;  %v5274_v26 = vmul.f32 0.2, %v5265_v39  ;;  %v7359_v28 = vld [vmem:[#allocation115_spill] sm:$0xff] }
 0x149   :  { %v2350_v31 = vmax.f32 %v2286_v20, %v2318_v45  ;;  %vm7356_vm6 = vnez %v7135_v34  ;;  %v2357_v10 = vmax.f32 %v2293_v54, %v2325_v27  ;;  %v5281_v9 = vmul.f32 0.2, %v5268_v55 }
 0x14a   :  { %v5278_v17 = vsel %vm7356_vm6, %v2349_v62, -1e+30  ;;  %v5283_v60 = vmax.f32 %v1552_v47, %v1553_v32  ;;  %v1574_v48 = vrot.slane %v1573_v51, 1  ;;  %vm7357_vm9 = vnez %v7140_v38  ;;  %v7360_v62 = vld [vmem:[#allocation117_spill] sm:$0xff] }
 0x14b   :  { %v5291_v53 = vsel %vm7357_vm9, %v2350_v31, -1e+30  ;;  %vm7358_vm0 = vnez %v7167_v21 }
 0x14c   :  { %v5295_v34 = vsel %vm7358_vm0, %v2357_v10, -1e+30  ;;  %v5301_v6 = vmax.f32 %v1573_v51, %v1574_v48  ;;  %v1576_v54 = vsub.f32 %v5011_v59, %v5283_v60  ;;  %v1578_v38 = vsub.f32 %v5019_v57, %v5283_v60  ;;  %v7361_v59 = vld [vmem:[#allocation18_spill] sm:$0xff]  ;;  %v7362_v57 = vld [vmem:[#allocation111_spill] sm:$0xff] }
 0x14d   :  { %v1580_v3 = vsub.f32 %v5015_v56, %v5283_v60  ;;  %v1582_v21 = vsub.f32 %v5041_v14, %v5283_v60  ;;  %v1584_v47 = vsub.f32 %v5055_v37, %v5283_v60  ;;  %v1586_v45 = vsub.f32 %v7359_v28, %v5283_v60  ;;  %v7363_v56 = vld [vmem:[#allocation24_spill] sm:$0xff]  ;;  %v7365_v37 = vld [vmem:[#allocation113_spill] sm:$0xff] }
 0x14e   :  { %v1588_v27 = vsub.f32 %v7360_v62, %v5283_v60  ;;  %v1577_v32 = vsub.f32 %v7361_v59, %v5301_v6  ;;  %v1579_v51 = vsub.f32 %v7362_v57, %v5301_v6  ;;  %v1581_v31 = vsub.f32 %v7363_v56, %v5301_v6  ;;  %v7364_v14 = vld [vmem:[#allocation112_spill] sm:$0xff]  ;;  %v7367_v62 = vld [vmem:[#allocation118_spill] sm:$0xff]  ;;  %v7368_v59 = vld [vmem:[#allocation119_spill] sm:$0xff] }
 0x14f   :  { %v1583_v10 = vsub.f32 %v7364_v14, %v5301_v6  ;;  %v1585_v48 = vsub.f32 %v7365_v37, %v5301_v6  ;;  %v7366_v28 = vld [vmem:[#allocation116_spill] sm:$0xff]  ;;  %v1589_v35 = vsub.f32 %v7367_v62, %v5301_v6  ;;  %v1590_v20 = vsub.f32 %v7368_v59, %v5283_v60 }
 0x150   :  { %v1587_v12 = vsub.f32 %v7366_v28, %v5301_v6  ;;  %v1591_v57 = vsub.f32 %v5111_v58, %v5301_v6  ;;  %v1592_v56 = vsub.f32 %v5118_v22, %v5283_v60  ;;  %v1593_v14 = vsub.f32 %v5122_v13, %v5301_v6 }
 0x151   :  { %v1594_v37 = vsub.f32 %v5130_v46, %v5283_v60  ;;  %v1595_v28 = vsub.f32 %v5134_v0, %v5301_v6  ;;  %v1596_v62 = vsub.f32 %v5140_v7, %v5283_v60  ;;  %v1597_v59 = vsub.f32 %v5146_v29, %v5301_v6 }
 0x152   :  { %v1598_v58 = vsub.f32 %v5154_v4, %v5283_v60  ;;  %v1599_v22 = vsub.f32 %v5159_v52, %v5301_v6  ;;  %v1600_v13 = vsub.f32 %v5166_v36, %v5283_v60  ;;  %v1601_v46 = vsub.f32 %v5172_v50, %v5301_v6 }
 0x153   :  { %v1602_v0 = vsub.f32 %v5176_v25, %v5283_v60  ;;  %v1603_v7 = vsub.f32 %v5182_v30, %v5301_v6  ;;  %v1604_v29 = vsub.f32 %v5190_v8, %v5283_v60  ;;  %v1605_v4 = vsub.f32 %v5199_v61, %v5301_v6 }
 0x154   :  { %v1606_v52 = vsub.f32 %v5214_v41, %v5283_v60  ;;  %v1607_v36 = vsub.f32 %v5222_v44, %v5301_v6  ;;  %v1608_v5 = vmul.f32 1.442695, %v1576_v54  ;;  %v1610_v50 = vmul.f32 1.442695, %v1577_v32 }
 0x155   :  { %v1612_v33 = vmul.f32 1.442695, %v1578_v38  ;;  %v1614_v16 = vmul.f32 1.442695, %v1579_v51  ;;  %v1616_v25 = vmul.f32 1.442695, %v1580_v3  ;;  %v2433_v30 = vmax.f32 %v5291_v53, %v5257_v43 }
 0x156   :  { %v1618_v40 = vmul.f32 1.442695, %v1581_v31  ;;  %3829 = vpow2.f32 %v1608_v5  ;;  %v1620_v8 = vmul.f32 1.442695, %v1582_v21  ;;  %v1622_v24 = vmul.f32 1.442695, %v1583_v10 }
 0x157   :  { %v1624_v23 = vmul.f32 1.442695, %v1584_v47  ;;  %3831 = vpow2.f32 %v1610_v50  ;;  %v1626_v61 = vmul.f32 1.442695, %v1585_v48  ;;  %v1628_v11 = vmul.f32 1.442695, %v1586_v45 }
 0x158   :  { %v1630_v41 = vmul.f32 1.442695, %v1587_v12  ;;  %3833 = vpow2.f32 %v1612_v33  ;;  %v1632_v60 = vmul.f32 1.442695, %v1588_v27  ;;  %v1634_v44 = vmul.f32 1.442695, %v1589_v35  ;;  %v2241_v35 = vpop.permute.xlu1 %2240 }
 0x159   :  { %v1636_v6 = vmul.f32 1.442695, %v1590_v20  ;;  %3835 = vpow2.f32 %v1614_v16  ;;  %v1638_v54 = vmul.f32 1.442695, %v1591_v57  ;;  %v1640_v38 = vmul.f32 1.442695, %v1592_v56 }
 0x15a   :  { %v5369_v3 = vmul.f32 1.442695, %v1593_v14  ;;  %3837 = vpow2.f32 %v1616_v25  ;;  %v5371_v32 = vmul.f32 1.442695, %v1594_v37  ;;  %v5373_v5 = vmul.f32 1.442695, %v1595_v28 }
 0x15b   :  { %v5375_v21 = vmul.f32 1.442695, %v1596_v62  ;;  %3839 = vpow2.f32 %v1618_v40  ;;  %v5377_v47 = vmul.f32 1.442695, %v1597_v59  ;;  %v5379_v12 = vmul.f32 1.442695, %v1598_v58 }
 0x15c   :  { %v5381_v33 = vmul.f32 1.442695, %v1599_v22  ;;  %3841 = vpow2.f32 %v1620_v8  ;;  %v5383_v16 = vmul.f32 1.442695, %v1600_v13  ;;  %v5385_v20 = vmul.f32 1.442695, %v1601_v46 }
 0x15d   :  { %v5387_v45 = vmul.f32 1.442695, %v1602_v0  ;;  %3843 = vpow2.f32 %v1622_v24  ;;  %v5389_v27 = vmul.f32 1.442695, %v1603_v7  ;;  %v5391_v51 = vmul.f32 1.442695, %v1604_v29  ;;  %v2249_v29 = vpop.permute.xlu1 %2248 }
 0x15e   :  { %v5393_v40 = vmul.f32 1.442695, %v1605_v4  ;;  %3845 = vpow2.f32 %v1624_v23  ;;  %v5395_v31 = vmul.f32 1.442695, %v1606_v52  ;;  %v5397_v10 = vmul.f32 1.442695, %v1607_v36 }
 0x15f   :  { %v7369_v48 = vmax.f32 %v5262_v49, %v5271_v42  ;;  %3847 = vpow2.f32 %v1626_v61  ;;  %v7371_v24 = vmax.f32 %v5278_v17, %v5249_v19  ;;  %v7372_v37 = vmax.f32 %v5265_v39, %v5274_v26  ;;  %v7373_v28 = vld [vmem:[#allocation29_spill] sm:$0xff]  ;;  %v7377_v59 = vld [vmem:[#allocation30_spill] sm:$0xff]  ;;  %v2237_v26 = vpop.permute.xlu0 %2236 }
 0x160   :  { %vm7374_vm14 = vnez %v7373_v28  ;;  %v5422_v42 = vpop.eup %3829  ;;  %3849 = vpow2.f32 %v1628_v11  ;;  %v7376_v62 = vmax.f32 %v5268_v55, %v5281_v9  ;;  %v7379_v22 = vmax.f32 %v5233_v63, %v5241_v1  ;;  %v7382_v9 = vld [vmem:[#allocation77_spill] sm:$0xff] }
 0x161   :  { %v5404_v56 = vsel %vm7324_vm7, %v7369_v48, -1e+30  ;;  %v5410_v14 = vmax.f32 %v7371_v24, %v5295_v34  ;;  %v5420_v49 = vsel %vm7374_vm14, %v7372_v37, -1e+30  ;;  %7375 = vst [vmem:[#allocation115_spill] sm:$0xff] %v5422_v42  ;;  %vm7378_vm7 = vnez %v7377_v59  ;;  %v5438_v46 = vpop.eup %3831  ;;  %v7388_v59 = vld [vmem:[#allocation40_spill] sm:$0xff] }
 0x162   :  { %v5413_v23 = vmax.f32 %v2433_v30, %v5404_v56  ;;  %v5429_v58 = vsel %vm7378_vm7, %v7376_v62, -1e+30  ;;  %v5435_v13 = vmax.f32 %v7379_v22, %v5420_v49  ;;  %v2297_v39 = vadd.f32 %v5204_v18, %v2241_v35  ;;  %7380 = vst [vmem:[#allocation117_spill] sm:$0xff] %v5438_v46  ;;  %v5448_v4 = vpop.eup %3833 }
 0x163   :  { %3851 = vpow2.f32 %v1630_v41  ;;  %v7381_v11 = vmax.f32 %v5237_v2, %v5245_v15  ;;  %v2298_v0 = vadd.f32 %v7382_v9, %v2241_v35  ;;  %v2295_v7 = vadd.f32 %v5204_v18, %v2237_v26  ;;  %7383 = vst [vmem:[#allocation18_spill] sm:$0xff] %v5448_v4  ;;  %v5454_v25 = vpop.eup %3835 }
 0x164   :  { %3853 = vpow2.f32 %v1632_v60  ;;  %v2329_v52 = vmul.f32 0.2, %v2297_v39  ;;  %v2296_v36 = vadd.f32 %v7382_v9, %v2237_v26  ;;  %v5452_v50 = vadd.f32 %v5204_v18, %v2249_v29  ;;  %7384 = vst [vmem:[#allocation111_spill] sm:$0xff] %v5454_v25  ;;  %v5458_v41 = vpop.eup %3837 }
 0x165   :  { %v5444_v55 = vmax.f32 %v7381_v11, %v5429_v58  ;;  %3855 = vpow2.f32 %v1634_v44  ;;  %v1672_v30 = vadd.f32 %v5448_v4, %v5422_v42  ;;  %v2330_v8 = vmul.f32 0.2, %v2298_v0  ;;  %7385 = vst [vmem:[#allocation24_spill] sm:$0xff] %v5458_v41  ;;  %v5462_v57 = vpop.eup %3839  ;;  %v7462_v4 = vld [vmem:[#allocation96_spill] sm:$0xff]  ;;  %v7463_v42 = vld [vmem:[#allocation102_spill] sm:$0xff] }
 0x166   :  { %v2327_v61 = vmul.f32 0.2, %v2295_v7  ;;  %3857 = vpow2.f32 %v1636_v6  ;;  %v1693_v60 = vadd.f32 %v5454_v25, %v5438_v46  ;;  %v2361_v35 = vmax.f32 %v2297_v39, %v2329_v52  ;;  %7386 = vst [vmem:[#allocation112_spill] sm:$0xff] %v5462_v57  ;;  %v5465_v28 = vpop.eup %3841  ;;  %v7391_v39 = vld [vmem:[#allocation41_spill] sm:$0xff]  ;;  %v7464_v25 = vld [vmem:[#allocation100_spill] sm:$0xff] }
 0x167   :  { %v2328_v48 = vmul.f32 0.2, %v2296_v36  ;;  %3859 = vpow2.f32 %v1638_v54  ;;  %v1673_v24 = vadd.f32 %v5458_v41, %v1672_v30  ;;  %v2362_v37 = vmax.f32 %v2298_v0, %v2330_v8  ;;  %7387 = vst [vmem:[#allocation113_spill] sm:$0xff] %v5465_v28  ;;  %v5472_v26 = vpop.eup %3843 }
 0x168   :  { %v2359_v44 = vmax.f32 %v2295_v7, %v2327_v61  ;;  %3861 = vpow2.f32 %v1640_v38  ;;  %v1694_v62 = vadd.f32 %v5462_v57, %v1693_v60  ;;  %vm7389_vm4 = vnez %v7388_v59  ;;  %7390 = vst [vmem:[#allocation116_spill] sm:$0xff] %v5472_v26  ;;  %v5482_v0 = vpop.eup %3845 }
 0x169   :  { %v5470_v6 = vsel %vm7389_vm4, %v2361_v35, -1e+30  ;;  %v2360_v22 = vmax.f32 %v2296_v36, %v2328_v48  ;;  %3863 = vpow2.f32 %v5369_v3  ;;  %v1674_v54 = vadd.f32 %v5465_v28, %v1673_v24  ;;  %7393 = vst [vmem:[#allocation118_spill] sm:$0xff] %v5482_v0  ;;  %v7394_v36 = vld [vmem:[#allocation36_spill] sm:$0xff]  ;;  %v5492_v30 = vpop.eup %3847  ;;  %v2245_v48 = vpop.permute.xlu0 %2244 }
 0x16a   :  { %vm7392_vm6 = vnez %v7391_v39  ;;  %v2416_v38 = vmax.f32 %v5410_v14, %v5470_v6  ;;  %3865 = vpow2.f32 %v5371_v32  ;;  %v1695_v7 = vadd.f32 %v5472_v26, %v1694_v62  ;;  %7396 = vst [vmem:[#allocation119_spill] sm:$0xff] %v5492_v30  ;;  %v7397_v14 = vld [vmem:[#allocation37_spill] sm:$0xff]  ;;  %v5502_v60 = vpop.eup %3849  ;;  %v7454_v26 = vld [vmem:[#allocation86_spill] sm:$0xff] }
 0x16b   :  { %v5478_v11 = vsel %vm7392_vm6, %v2362_v37, -1e+30  ;;  %vm7395_vm9 = vnez %v7394_v36  ;;  %3867 = vpow2.f32 %v5373_v5  ;;  %v1675_v8 = vadd.f32 %v5482_v0, %v1674_v54  ;;  %7399 = vst [vmem:[#allocation33_spill] sm:$0xff] %v5502_v60 }
 0x16c   :  { %v2437_v52 = vmax.f32 %v5413_v23, %v5478_v11  ;;  %v5490_v3 = vsel %vm7395_vm9, %v2359_v44, -1e+30  ;;  %vm7398_vm0 = vnez %v7397_v14  ;;  %3869 = vpow2.f32 %v5375_v21 }
 0x16d   :  { %v5498_v61 = vsel %vm7398_vm0, %v2360_v22, -1e+30  ;;  %v2415_v32 = vmax.f32 %v5435_v13, %v5490_v3  ;;  %v1696_v23 = vadd.f32 %v5492_v30, %v1695_v7  ;;  %v2302_v5 = vadd.f32 %v7382_v9, %v2249_v29  ;;  %v5509_v24 = vpop.eup %3851 }
 0x16e   :  { %v2436_v35 = vmax.f32 %v5444_v55, %v5498_v61  ;;  %7400 = vst [vmem:[#allocation29_spill] sm:$0xff] %v5509_v24  ;;  %3871 = vpow2.f32 %v5377_v47  ;;  %v1676_v37 = vadd.f32 %v5502_v60, %v1675_v8  ;;  %v2333_v13 = vmul.f32 0.2, %v5452_v50  ;;  %v5515_v62 = vpop.eup %3853 }
 0x16f   :  { %v2299_v44 = vadd.f32 %v5204_v18, %v2245_v48  ;;  %7401 = vst [vmem:[#allocation30_spill] sm:$0xff] %v5515_v62  ;;  %3873 = vpow2.f32 %v5379_v12  ;;  %v1697_v21 = vadd.f32 %v5509_v24, %v1696_v23  ;;  %v2334_v55 = vmul.f32 0.2, %v2302_v5  ;;  %v5520_v59 = vpop.eup %3855  ;;  %v7434_v24 = vld [vmem:[#allocation60_spill] sm:$0xff] }
 0x170   :  { %v2300_v29 = vadd.f32 %v7382_v9, %v2245_v48  ;;  %7402 = vst [vmem:[#allocation77_spill] sm:$0xff] %v5520_v59  ;;  %3875 = vpow2.f32 %v5381_v33  ;;  %v1677_v47 = vadd.f32 %v5515_v62, %v1676_v37  ;;  %v2365_v22 = vmax.f32 %v5452_v50, %v2333_v13  ;;  %v5525_v39 = vpop.eup %3857  ;;  %v2257_v48 = vpop.permute.xlu1 %2256 }
 0x171   :  { %v2331_v54 = vmul.f32 0.2, %v2299_v44  ;;  %7403 = vst [vmem:[#allocation40_spill] sm:$0xff] %v5525_v39  ;;  %3877 = vpow2.f32 %v5383_v16  ;;  %v1698_v12 = vadd.f32 %v5520_v59, %v1697_v21  ;;  %v2366_v7 = vmax.f32 %v2302_v5, %v2334_v55  ;;  %v5529_v8 = vpop.eup %3859 }
 0x172   :  { %v2332_v36 = vmul.f32 0.2, %v2300_v29  ;;  %7404 = vst [vmem:[#allocation41_spill] sm:$0xff] %v5529_v8  ;;  %3879 = vpow2.f32 %v5385_v20  ;;  %v1678_v14 = vadd.f32 %v5525_v39, %v1677_v47  ;;  %v5535_v23 = vsel %vm7337_vm5, %v2365_v22, -1e+30  ;;  %v5537_v37 = vpop.eup %3861 }
 0x173   :  { %v2363_v50 = vmax.f32 %v2299_v44, %v2331_v54  ;;  %7406 = vst [vmem:[#allocation36_spill] sm:$0xff] %v5537_v37  ;;  %3881 = vpow2.f32 %v5387_v45  ;;  %v1699_v16 = vadd.f32 %v5529_v8, %v1698_v12  ;;  %v5543_v13 = vsel %vm7338_vm3, %v2366_v7, -1e+30  ;;  %v5548_v21 = vpop.eup %3863  ;;  %v2253_v45 = vpop.permute.xlu0 %2252  ;;  %v7410_v12 = vld [vmem:[#allocation44_spill] sm:$0xff] }
 0x174   :  { %v5546_v20 = vmax.f32 %v2416_v38, %v5535_v23  ;;  %7408 = vst [vmem:[#allocation37_spill] sm:$0xff] %v5548_v21  ;;  %3883 = vpow2.f32 %v5389_v27  ;;  %v1679_v44 = vadd.f32 %v5537_v37, %v1678_v14  ;;  %v5553_v55 = vmax.f32 %v2437_v52, %v5543_v13  ;;  %v5555_v22 = vpop.eup %3865 }
 0x175   :  { %v2364_v47 = vmax.f32 %v2300_v29, %v2332_v36  ;;  %7409 = vst [vmem:[#allocation48_spill] sm:$0xff] %v5555_v22  ;;  %3885 = vpow2.f32 %v5391_v51  ;;  %v1700_v54 = vadd.f32 %v5548_v21, %v1699_v16  ;;  %vm7411_vm5 = vnez %v7410_v12  ;;  %v5564_v27 = vpop.eup %3867 }
 0x176   :  { %v5561_v38 = vsel %vm7411_vm5, %v2363_v50, -1e+30  ;;  %v2305_v7 = vadd.f32 %v5204_v18, %v2257_v48  ;;  %7412 = vst [vmem:[#allocation49_spill] sm:$0xff] %v5564_v27  ;;  %3887 = vpow2.f32 %v5393_v40  ;;  %v1680_v52 = vadd.f32 %v5555_v22, %v1679_v44  ;;  %v5575_v14 = vpop.eup %3869 }
 0x177   :  { %v5570_v36 = vsel %vm7335_vm10, %v2364_v47, -1e+30  ;;  %v5573_v51 = vmax.f32 %v2415_v32, %v5561_v38  ;;  %7414 = vst [vmem:[#allocation44_spill] sm:$0xff] %v5575_v14  ;;  %3889 = vpow2.f32 %v5395_v31  ;;  %v1701_v33 = vadd.f32 %v5564_v27, %v1700_v54  ;;  %v2265_v47 = vpop.permute.xlu1 %2264 }
 0x178   :  { %v5580_v50 = vmax.f32 %v2436_v35, %v5570_v36  ;;  %v2306_v40 = vadd.f32 %v7382_v9, %v2257_v48  ;;  %v5583_v16 = vpop.eup %3871  ;;  %3891 = vpow2.f32 %v5397_v10  ;;  %v1681_v5 = vadd.f32 %v5575_v14, %v1680_v52  ;;  %v2261_v14 = vpop.permute.xlu0 %2260 }
 0x179   :  { %7415 = vst [vmem:[#allocation45_spill] sm:$0xff] %v5583_v16  ;;  %v2337_v44 = vmul.f32 0.2, %v2305_v7  ;;  %v2303_v32 = vadd.f32 %v5204_v18, %v2253_v45  ;;  %v5588_v12 = vpop.eup %3873  ;;  %v1702_v31 = vadd.f32 %v5583_v16, %v1701_v33  ;;  %v2304_v35 = vadd.f32 %v7382_v9, %v2253_v45 }
 0x17a   :  { %7416 = vst [vmem:[#allocation122_spill] sm:$0xff] %v5588_v12  ;;  %v2338_v54 = vmul.f32 0.2, %v2306_v40  ;;  %v2309_v29 = vadd.f32 %v5204_v18, %v2265_v47  ;;  %v5593_v48 = vpop.eup %3875  ;;  %v1682_v22 = vadd.f32 %v5588_v12, %v1681_v5  ;;  %v2310_v52 = vadd.f32 %v7382_v9, %v2265_v47  ;;  %v7427_v12 = vld [vmem:[#allocation53_spill] sm:$0xff] }
 0x17b   :  { %7417 = vst [vmem:[#allocation123_spill] sm:$0xff] %v5593_v48  ;;  %v2369_v10 = vmax.f32 %v2305_v7, %v2337_v44  ;;  %v2335_v37 = vmul.f32 0.2, %v2303_v32  ;;  %v5597_v27 = vpop.eup %3877  ;;  %v1703_v21 = vadd.f32 %v5593_v48, %v1702_v31  ;;  %v2336_v33 = vmul.f32 0.2, %v2304_v35 }
 0x17c   :  { %7418 = vst [vmem:[#allocation124_spill] sm:$0xff] %v5597_v27  ;;  %v2370_v39 = vmax.f32 %v2306_v40, %v2338_v54  ;;  %v2341_v16 = vmul.f32 0.2, %v2309_v29  ;;  %v5600_v62 = vpop.eup %3879  ;;  %v1683_v45 = vadd.f32 %v5597_v27, %v1682_v22  ;;  %v2342_v5 = vmul.f32 0.2, %v2310_v52  ;;  %v7424_v22 = vld [vmem:[#allocation52_spill] sm:$0xff] }
 0x17d   :  { %7419 = vst [vmem:[#allocation125_spill] sm:$0xff] %v5600_v62  ;;  %v5605_v59 = vsel %vm7339_vm12, %v2369_v10, -1e+30  ;;  %v2367_v7 = vmax.f32 %v2303_v32, %v2335_v37  ;;  %v5607_v44 = vpop.eup %3881  ;;  %v1704_v47 = vadd.f32 %v5600_v62, %v1703_v21  ;;  %v2368_v54 = vmax.f32 %v2304_v35, %v2336_v33 }
 0x17e   :  { %7421 = vst [vmem:[#allocation56_spill] sm:$0xff] %v5607_v44  ;;  %v5612_v31 = vsel %vm7340_vm13, %v2370_v39, -1e+30  ;;  %v2420_v40 = vmax.f32 %v5546_v20, %v5605_v59  ;;  %v5616_v48 = vpop.eup %3883  ;;  %v1684_v8 = vadd.f32 %v5607_v44, %v1683_v45  ;;  %vm7425_vm10 = vnez %v7424_v22  ;;  %v2273_v45 = vpop.permute.xlu1 %2272 }
 0x17f   :  { %7423 = vst [vmem:[#allocation57_spill] sm:$0xff] %v5616_v48  ;;  %v2441_v37 = vmax.f32 %v5553_v55, %v5612_v31  ;;  %v5623_v32 = vsel %vm7425_vm10, %v2367_v7, -1e+30  ;;  %v2373_v21 = vmax.f32 %v2309_v29, %v2341_v16  ;;  %v5625_v10 = vpop.eup %3885  ;;  %v1705_v39 = vadd.f32 %v5616_v48, %v1704_v47 }
 0x180   :  { %7426 = vst [vmem:[#allocation52_spill] sm:$0xff] %v5625_v10  ;;  %vm7428_vm12 = vnez %v7427_v12  ;;  %v2419_v35 = vmax.f32 %v5573_v51, %v5623_v32  ;;  %v2374_v33 = vmax.f32 %v2310_v52, %v2342_v5  ;;  %v5634_v44 = vpop.eup %3887  ;;  %v1685_v55 = vadd.f32 %v5625_v10, %v1684_v8 }
 0x181   :  { %v5630_v20 = vsel %vm7428_vm12, %v2368_v54, -1e+30  ;;  %7429 = vst [vmem:[#allocation53_spill] sm:$0xff] %v5634_v44  ;;  %v5641_v7 = vsel %vm4677_vm15, %v2373_v21, -1e+30  ;;  %v2307_v47 = vadd.f32 %v5204_v18, %v2261_v14  ;;  %v2269_v54 = vpop.permute.xlu0 %2268  ;;  %v5644_v22 = vpop.eup %3889  ;;  %v1706_v51 = vadd.f32 %v5634_v44, %v1705_v39 }
 0x182   :  { %v2440_v16 = vmax.f32 %v5580_v50, %v5630_v20  ;;  %7431 = vst [vmem:[#allocation64_spill] sm:$0xff] %v5644_v22  ;;  %v5649_v5 = vsel %vm7341_vm11, %v2374_v33, -1e+30  ;;  %v2422_v8 = vmax.f32 %v2420_v40, %v5641_v7  ;;  %v2308_v12 = vadd.f32 %v7382_v9, %v2261_v14  ;;  %v5653_v50 = vpop.eup %3891 }
 0x183   :  { %7433 = vst [vmem:[#allocation65_spill] sm:$0xff] %v5653_v50  ;;  %v1686_v21 = vadd.f32 %v5644_v22, %v1685_v55  ;;  %v2443_v29 = vmax.f32 %v2441_v37, %v5649_v5  ;;  %v2339_v10 = vmul.f32 0.2, %v2307_v47  ;;  %v2313_v27 = vadd.f32 %v5204_v18, %v2273_v45 }
 0x184   :  { %v1707_v48 = vadd.f32 %v5653_v50, %v1706_v51  ;;  %v2340_v39 = vmul.f32 0.2, %v2308_v12  ;;  %v2314_v52 = vadd.f32 %v7382_v9, %v2273_v45  ;;  %v2311_v33 = vadd.f32 %v5204_v18, %v2269_v54 }
 0x185   :  { %v1687_v44 = vrot.slane %v1686_v21, 4  ;;  %v2371_v40 = vmax.f32 %v2307_v47, %v2339_v10  ;;  %v2345_v62 = vmul.f32 0.2, %v2313_v27  ;;  %v2312_v14 = vadd.f32 %v7382_v9, %v2269_v54 }
 0x186   :  { %v1708_v60 = vrot.slane %v1707_v48, 4  ;;  %v2372_v0 = vmax.f32 %v2308_v12, %v2340_v39  ;;  %v2346_v55 = vmul.f32 0.2, %v2314_v52  ;;  %v2343_v22 = vmul.f32 0.2, %v2311_v33 }
 0x187   :  { %v1688_v37 = vadd.f32 %v1687_v44, %v1686_v21  ;;  %vm7435_vm13 = vnez %v7434_v24  ;;  %v2377_v51 = vmax.f32 %v2313_v27, %v2345_v62  ;;  %v2344_v50 = vmul.f32 0.2, %v2312_v14  ;;  %v7440_v27 = vld [vmem:[#allocation78_spill] sm:$0xff] }
 0x188   :  { %v5664_v30 = vsel %vm7435_vm13, %v2371_v40, -1e+30  ;;  %v1709_v28 = vadd.f32 %v1708_v60, %v1707_v48  ;;  %v5668_v18 = vsel %vm7298_vm2, %v2372_v0, -1e+30  ;;  %v2378_v47 = vmax.f32 %v2314_v52, %v2346_v55  ;;  %v7441_v48 = vld [vmem:[#allocation110_spill] sm:$0xff] }
 0x189   :  { %v2421_v10 = vmax.f32 %v2419_v35, %v5664_v30  ;;  %v1689_v9 = vrot.slane %v1688_v37, 2  ;;  %v2442_v54 = vmax.f32 %v2440_v16, %v5668_v18  ;;  %v5674_v44 = vsel %vm4726_vm1, %v2377_v51, -1e+30  ;;  %v7442_v16 = vld [vmem:[#allocation68_spill] sm:$0xff] }
 0x18a   :  { %v2375_v24 = vmax.f32 %v2311_v33, %v2343_v22  ;;  %v1710_v21 = vrot.slane %v1709_v28, 2  ;;  %v5678_v62 = vsel %vm4733_vm8, %v2378_v47, -1e+30  ;;  %v2424_v60 = vmax.f32 %v2422_v8, %v5674_v44  ;;  %v7444_v22 = vld [vmem:[#allocation69_spill] sm:$0xff]  ;;  %v7446_v47 = vld [vmem:[#allocation23_spill] sm:$0xff] }
 0x18b   :  { %7439 = vst [vmem:[#allocation60_spill] sm:$0xff] %v5678_v62  ;;  %v2376_v0 = vmax.f32 %v2312_v14, %v2344_v50  ;;  %v768_v35 = vsub.f32 %v7441_v48, %v7440_v27  ;;  %v1690_v52 = vadd.f32 %v1689_v9, %v1688_v37  ;;  %v2445_v40 = vmax.f32 %v2443_v29, %v5678_v62  ;;  %v7447_v14 = vld [vmem:[#allocation114_spill] sm:$0xff]  ;;  %v7448_v37 = vld [vmem:[#allocation71_spill] sm:$0xff] }
 0x18c   :  { %vm7443_vm15 = vnez %v7442_v16  ;;  %v1711_v51 = vadd.f32 %v1710_v21, %v1709_v28  ;;  %vm7445_vm2 = vnez %v7444_v22  ;;  %vm441_vm3 = vcmp.gt.f32.partialorder %v7446_v47, 0.0  ;;  %v7449_v21 = vld [vmem:[#allocation120_spill] sm:$0xff]  ;;  %v7452_v47 = vld [vmem:[#allocation121_spill] sm:$0xff] }
 0x18d   :  { %v5686_v55 = vsel %vm7443_vm15, %v2375_v24, -1e+30  ;;  %v5690_v33 = vsel %vm7445_vm2, %v2376_v0, -1e+30  ;;  %v1691_v8 = vrot.slane %v1690_v52, 1  ;;  %vm442_vm1 = vcmp.gt.f32.partialorder %v7447_v14, 0.0 }
 0x18e   :  { %v2423_v45 = vmax.f32 %v2421_v10, %v5686_v55  ;;  %v2444_v50 = vmax.f32 %v2442_v54, %v5690_v33  ;;  %v716_v29 = vrot.slane %v7448_v37, 1  ;;  %v1712_v9 = vrot.slane %v1711_v51, 1  ;;  %v7451_v10 = vld [vmem:[#allocation82_spill] sm:$0xff] }
 0x18f   :  { %v829_v24 = vmul.f32 1.442695, %v768_v35  ;;  %v1692_v39 = vadd.f32 %v1691_v8, %v1690_v52  ;;  %v5698_v48 = vsel %vm441_vm3, %v7449_v21, 0.0  ;;  %v740_v22 = vsub.f32 %v7451_v10, %v7440_v27  ;;  %v7456_v8 = vld [vmem:[#allocation84_spill] sm:$0xff] }
 0x190   :  { %v2425_v12 = vmax.f32 %v2423_v45, %v2424_v60  ;;  %v2446_v28 = vmax.f32 %v2444_v50, %v2445_v40  ;;  %7450 = vst [vmem:[#allocation61_spill] sm:$0xff] %v5698_v48  ;;  %v1713_v0 = vadd.f32 %v1712_v9, %v1711_v51  ;;  %v5703_v41 = vsel %vm442_vm1, %v7452_v47, 0.0  ;;  %v7455_v40 = vld [vmem:[#allocation80_spill] sm:$0xff]  ;;  %v7457_v9 = vld [vmem:[#allocation90_spill] sm:$0xff] }
 0x191   :  { %7453 = vst [vmem:[#allocation73_spill] sm:$0xff] %v5703_v41  ;;  %v1714_v54 = vadd.f32 1e-16, %v1692_v39  ;;  %v742_v57 = vsub.f32 %v7454_v26, %v7440_v27  ;;  %v5708_v60 = vmax.f32 %v7448_v37, %v716_v29  ;;  %v744_v51 = vsub.f32 %v7455_v40, %v7440_v27  ;;  %v7458_v10 = vld [vmem:[#allocation88_spill] sm:$0xff]  ;;  %v7459_v37 = vld [vmem:[#allocation94_spill] sm:$0xff] }
 0x192   :  { %v2426_v16 = vrot.slane %v2425_v12, 4  ;;  %v2447_v14 = vrot.slane %v2446_v28, 4  ;;  %v1715_v35 = vadd.f32 1e-16, %v1713_v0  ;;  %3893 = vpow2.f32 %v829_v24 }
 0x193   :  { %v746_v50 = vsub.f32 %v7456_v8, %v7440_v27  ;;  %v748_v39 = vsub.f32 %v7457_v9, %v7440_v27  ;;  %v750_v26 = vsub.f32 %v7458_v10, %v7440_v27  ;;  %v752_v29 = vsub.f32 %v7459_v37, %v7440_v27 }
 0x194   :  { %v2427_v52 = vmax.f32 %v2425_v12, %v2426_v16  ;;  %v2448_v45 = vmax.f32 %v2446_v28, %v2447_v14  ;;  %v773_v0 = vmul.f32 1.442695, %v740_v22  ;;  %3895 = vrcp.f32 %v1714_v54  ;;  %v7460_v16 = vld [vmem:[#allocation92_spill] sm:$0xff]  ;;  %v7461_v14 = vld [vmem:[#allocation98_spill] sm:$0xff] }
 0x195   :  { %v754_v24 = vsub.f32 %v7460_v16, %v7440_v27  ;;  %v777_v28 = vmul.f32 1.442695, %v742_v57  ;;  %3897 = vrcp.f32 %v1715_v35  ;;  %v756_v40 = vsub.f32 %v7461_v14, %v7440_v27 }
 0x196   :  { %v2428_v21 = vrot.slane %v2427_v52, 2  ;;  %v2449_v12 = vrot.slane %v2448_v45, 2  ;;  %v781_v8 = vmul.f32 1.442695, %v744_v51  ;;  %v758_v10 = vsub.f32 %v7462_v4, %v7440_v27  ;;  %v7467_v4 = vld [vmem:[#allocation109_spill] sm:$0xff] }
 0x197   :  { %v760_v37 = vsub.f32 %v7463_v42, %v7440_v27  ;;  %v785_v22 = vmul.f32 1.442695, %v746_v50  ;;  %v762_v46 = vsub.f32 %v7464_v25, %v7440_v27  ;;  %3899 = vpow2.f32 %v773_v0  ;;  %v7468_v25 = vld [vmem:[#allocation81_spill] sm:$0xff] }
 0x198   :  { %v2429_v47 = vmax.f32 %v2427_v52, %v2428_v21  ;;  %v2450_v9 = vmax.f32 %v2448_v45, %v2449_v12  ;;  %v789_v57 = vmul.f32 1.442695, %v748_v39  ;;  %v7465_v52 = vld [vmem:[#allocation106_spill] sm:$0xff]  ;;  %3901 = vpow2.f32 %v777_v28  ;;  %v7466_v45 = vld [vmem:[#allocation104_spill] sm:$0xff] }
 0x199   :  { %v764_v21 = vsub.f32 %v7465_v52, %v7440_v27  ;;  %v793_v51 = vmul.f32 1.442695, %v750_v26  ;;  %v766_v12 = vsub.f32 %v7466_v45, %v7440_v27  ;;  %v770_v16 = vsub.f32 %v7467_v4, %v7440_v27  ;;  %v7473_v45 = vld [vmem:[#allocation87_spill] sm:$0xff]  ;;  %v7474_v4 = vld [vmem:[#allocation93_spill] sm:$0xff] }
 0x19a   :  { %v2430_v54 = vrot.slane %v2429_v47, 1  ;;  %v2451_v35 = vrot.slane %v2450_v9, 1  ;;  %3903 = vpow2.f32 %v781_v8  ;;  %v797_v42 = vmul.f32 1.442695, %v752_v29 }
 0x19b   :  { %3905 = vpow2.f32 %v785_v22  ;;  %v801_v50 = vmul.f32 1.442695, %v754_v24  ;;  %v805_v14 = vmul.f32 1.442695, %v756_v40  ;;  %v5742_v26 = vmul.f32 1.442695, %v758_v10 }
 0x19c   :  { %v5738_v0 = vmax.f32 %v2429_v47, %v2430_v54  ;;  %v5740_v62 = vmax.f32 %v2450_v9, %v2451_v35  ;;  %3907 = vpow2.f32 %v789_v57  ;;  %v5744_v28 = vpop.eup %3893  ;;  %v5746_v52 = vmul.f32 1.442695, %v760_v37  ;;  %v7469_v47 = vld [vmem:[#allocation85_spill] sm:$0xff]  ;;  %v7470_v10 = vld [vmem:[#allocation79_spill] sm:$0xff] }
 0x19d   :  { %3909 = vpow2.f32 %v793_v51  ;;  %v5748_v27 = vmul.f32 1.442695, %v762_v46  ;;  %v5750_v29 = vmul.f32 1.442695, %v764_v21  ;;  %v5752_v24 = vmul.f32 1.442695, %v766_v12 }
 0x19e   :  { %3911 = vpow2.f32 %v797_v42  ;;  %v5754_v40 = vmul.f32 1.442695, %v770_v16  ;;  %v3896_v9 = vpop.eup %3895  ;;  %v7471_v37 = vld [vmem:[#allocation83_spill] sm:$0xff]  ;;  %v7472_v46 = vld [vmem:[#allocation89_spill] sm:$0xff]  ;;  %v2453_v21 = vsub.f32 %v5233_v63, %v5738_v0  ;;  %v2454_v51 = vsub.f32 %v5237_v2, %v5740_v62 }
 0x19f   :  { %3913 = vpow2.f32 %v801_v50  ;;  %v3898_v35 = vpop.eup %3897  ;;  %v2455_v42 = vsub.f32 %v5278_v17, %v5738_v0  ;;  %v2456_v50 = vsub.f32 %v5291_v53, %v5740_v62  ;;  %v2457_v57 = vsub.f32 %v5241_v1, %v5738_v0 }
 0x1a0   :  { %v2459_v63 = vsub.f32 %v5249_v19, %v5738_v0  ;;  %v5783_v2 = vmul.f32 %v3896_v9, %v5698_v48  ;;  %v2458_v16 = vsub.f32 %v5245_v15, %v5740_v62  ;;  %v2460_v17 = vsub.f32 %v5257_v43, %v5740_v62 }
 0x1a1   :  { %v5780_v54 = vpop.eup %3899  ;;  %v2461_v53 = vsub.f32 %v5420_v49, %v5738_v0  ;;  %v5794_v1 = vmul.f32 %v3898_v35, %v5703_v41  ;;  %v2462_v19 = vsub.f32 %v5429_v58, %v5740_v62  ;;  %v2463_v9 = vsub.f32 %v5295_v34, %v5738_v0 }
 0x1a2   :  { %v5791_v12 = vpop.eup %3901  ;;  %v2464_v15 = vsub.f32 %v5404_v56, %v5740_v62  ;;  %v2465_v43 = vsub.f32 %v5490_v3, %v5738_v0  ;;  %v2466_v49 = vsub.f32 %v5498_v61, %v5740_v62  ;;  %v2485_v8 = vmul.f32 1.442695, %v2453_v21 }
 0x1a3   :  { %7475 = vst [vmem:[#allocation74_spill] sm:$0xff] %v5791_v12  ;;  %v2487_v35 = vmul.f32 1.442695, %v2454_v51  ;;  %v2467_v58 = vsub.f32 %v5470_v6, %v5738_v0  ;;  %v2489_v41 = vmul.f32 1.442695, %v2455_v42  ;;  %3915 = vpow2.f32 %v805_v14 }
 0x1a4   :  { %v5802_v22 = vpop.eup %3903  ;;  %v2491_v34 = vmul.f32 1.442695, %v2456_v50  ;;  %v2468_v56 = vsub.f32 %v5478_v11, %v5740_v62  ;;  %v2469_v3 = vsub.f32 %v5561_v38, %v5738_v0  ;;  %3917 = vpow2.f32 %v2485_v8 }
 0x1a5   :  { %7476 = vst [vmem:[#allocation78_spill] sm:$0xff] %v5802_v22  ;;  %v5808_v39 = vpop.eup %3905  ;;  %v2493_v61 = vmul.f32 1.442695, %v2457_v57  ;;  %v2470_v51 = vsub.f32 %v5570_v36, %v5740_v62  ;;  %v2471_v6 = vsub.f32 %v5535_v23, %v5738_v0  ;;  %3919 = vpow2.f32 %v2487_v35 }
 0x1a6   :  { %7477 = vst [vmem:[#allocation110_spill] sm:$0xff] %v5808_v39  ;;  %v5812_v48 = vpop.eup %3907  ;;  %v2495_v14 = vmul.f32 1.442695, %v2458_v16  ;;  %v2472_v11 = vsub.f32 %v5543_v13, %v5740_v62  ;;  %v2473_v38 = vsub.f32 %v5623_v32, %v5738_v0  ;;  %3921 = vpow2.f32 %v2489_v41 }
 0x1a7   :  { %7478 = vst [vmem:[#allocation68_spill] sm:$0xff] %v5812_v48  ;;  %v5818_v21 = vpop.eup %3909  ;;  %v2497_v8 = vmul.f32 1.442695, %v2459_v63  ;;  %v2474_v36 = vsub.f32 %v5630_v20, %v5740_v62  ;;  %v2475_v23 = vsub.f32 %v5605_v59, %v5738_v0  ;;  %3923 = vpow2.f32 %v2491_v34 }
 0x1a8   :  { %7479 = vst [vmem:[#allocation69_spill] sm:$0xff] %v5818_v21  ;;  %v5824_v42 = vpop.eup %3911  ;;  %v2499_v16 = vmul.f32 1.442695, %v2460_v17  ;;  %v2476_v50 = vsub.f32 %v5612_v31, %v5740_v62  ;;  %v2477_v13 = vsub.f32 %v5664_v30, %v5738_v0  ;;  %3925 = vpow2.f32 %v2493_v61 }
 0x1a9   :  { %7480 = vst [vmem:[#allocation23_spill] sm:$0xff] %v5824_v42  ;;  %v5830_v57 = vpop.eup %3913  ;;  %v2501_v32 = vmul.f32 1.442695, %v2461_v53  ;;  %v2478_v41 = vsub.f32 %v5668_v18, %v5740_v62  ;;  %v2479_v63 = vsub.f32 %v5641_v7, %v5738_v0  ;;  %3927 = vpow2.f32 %v2495_v14  ;;  %v7482_v7 = vld [vmem:[#allocation60_spill] sm:$0xff] }
 0x1aa   :  { %7481 = vst [vmem:[#allocation114_spill] sm:$0xff] %v5830_v57  ;;  %v2503_v20 = vmul.f32 1.442695, %v2462_v19  ;;  %v2480_v59 = vsub.f32 %v5649_v5, %v5740_v62  ;;  %v2481_v17 = vsub.f32 %v5686_v55, %v5738_v0  ;;  %3929 = vpow2.f32 %v2497_v8  ;;  %v5863_v8 = vld [vmem:[#allocation7 + $0x38] sm:$0xff]  }
 0x1ab   :  { %v2505_v31 = vmul.f32 1.442695, %v2463_v9  ;;  %v2482_v30 = vsub.f32 %v5690_v33, %v5740_v62  ;;  %v2483_v53 = vsub.f32 %v5674_v44, %v5738_v0  ;;  %3931 = vpow2.f32 %v2499_v16  ;;  %7484 = vst [vmem:[#allocation120_spill] sm:$0xff] %v5863_v8  ;;  %3661 = vmatprep.subr.bf16.mxu0 %v5863_v8 }
 0x1ac   :  { %v2507_v18 = vmul.f32 1.442695, %v2464_v15  ;;  %v2484_v35 = vsub.f32 %v7482_v7, %v5740_v62  ;;  %3933 = vpow2.f32 %v2501_v32  ;;  %v2509_v19 = vmul.f32 1.442695, %v2465_v43  ;;  %3662 = vmatpush3.bf16.msra.mxu0 %v5863_v8 }
 0x1ad   :  { %v2511_v34 = vmul.f32 1.442695, %v2466_v49  ;;  %v5854_v5 = vpop.eup %3915  ;;  %3935 = vpow2.f32 %v2503_v20  ;;  %v2513_v55 = vmul.f32 1.442695, %v2467_v58  ;;  %v2515_v61 = vmul.f32 1.442695, %v2468_v56 }
 0x1ae   :  { %7483 = vst [vmem:[#allocation71_spill] sm:$0xff] %v5854_v5  ;;  %v856_v9 = vadd.f32 %v5791_v12, %v5780_v54  ;;  %v5858_v33 = vpop.eup %3917  ;;  %3937 = vpow2.f32 %v2505_v31  ;;  %v2517_v44 = vmul.f32 1.442695, %v2469_v3  ;;  %v2519_v0 = vmul.f32 1.442695, %v2470_v51 }
 0x1af   :  { %v2521_v15 = vmul.f32 1.442695, %v2471_v6  ;;  %v5860_v14 = vpop.eup %3919  ;;  %3939 = vpow2.f32 %v2507_v18  ;;  %v2523_v62 = vmul.f32 1.442695, %v2472_v11  ;;  %v2525_v43 = vmul.f32 1.442695, %v2473_v38 }
 0x1b0   :  { %v857_v49 = vadd.f32 %v5802_v22, %v856_v9  ;;  %v5865_v58 = vpop.eup %3921  ;;  %3941 = vpow2.f32 %v2509_v19  ;;  %v2527_v56 = vmul.f32 1.442695, %v2474_v36  ;;  %v2529_v16 = vmul.f32 1.442695, %v2475_v23 }
 0x1b1   :  { %v2531_v32 = vmul.f32 1.442695, %v2476_v50  ;;  %v5867_v20 = vpop.eup %3923  ;;  %3943 = vpow2.f32 %v2511_v34  ;;  %v2533_v3 = vmul.f32 1.442695, %v2477_v13  ;;  %v2549_v51 = vadd.f32 %v5865_v58, %v5858_v33 }
 0x1b2   :  { %v858_v6 = vadd.f32 %v5808_v39, %v857_v49  ;;  %v5873_v11 = vpop.eup %3925  ;;  %3945 = vpow2.f32 %v2513_v55  ;;  %v2535_v38 = vmul.f32 1.442695, %v2478_v41  ;;  %v2537_v31 = vmul.f32 1.442695, %v2479_v63 }
 0x1b3   :  { %v2570_v36 = vadd.f32 %v5867_v20, %v5860_v14  ;;  %v5878_v23 = vpop.eup %3927  ;;  %3947 = vpow2.f32 %v2515_v61  ;;  %v2539_v50 = vmul.f32 1.442695, %v2480_v59  ;;  %v2550_v13 = vadd.f32 %v5873_v11, %v2549_v51 }
 0x1b4   :  { %v859_v18 = vadd.f32 %v5812_v48, %v858_v6  ;;  %v5882_v7 = vpop.eup %3929  ;;  %3949 = vpow2.f32 %v2517_v44  ;;  %v2541_v19 = vmul.f32 1.442695, %v2481_v17  ;;  %v2543_v34 = vmul.f32 1.442695, %v2482_v30  ;;  %v7485_v17 = vld [vmem:[#allocation91_spill] sm:$0xff] }
 0x1b5   :  { %v2571_v41 = vadd.f32 %v5878_v23, %v2570_v36  ;;  %v5885_v63 = vpop.eup %3931  ;;  %3951 = vpow2.f32 %v2519_v0  ;;  %v5887_v55 = vmul.f32 1.442695, %v2483_v53  ;;  %v2551_v9 = vadd.f32 %v5882_v7, %v2550_v13  ;;  %v7486_v0 = vld [vmem:[#allocation97_spill] sm:$0xff]  ;;  %v7487_v36 = vld [vmem:[#allocation95_spill] sm:$0xff] }
 0x1b6   :  { %v860_v59 = vadd.f32 %v5818_v21, %v859_v18  ;;  %v5891_v61 = vpop.eup %3933  ;;  %3953 = vpow2.f32 %v2521_v15  ;;  %v5893_v49 = vmul.f32 1.442695, %v2484_v35  ;;  %v7489_v13 = vsub.f32 %v7469_v47, %v5708_v60 }
 0x1b7   :  { %v2572_v44 = vadd.f32 %v5885_v63, %v2571_v41  ;;  %v5898_v51 = vpop.eup %3935  ;;  %3955 = vpow2.f32 %v2523_v62  ;;  %v2552_v53 = vadd.f32 %v5891_v61, %v2551_v9  ;;  %v7488_v41 = vsub.f32 %v7468_v25, %v5708_v60 }
 0x1b8   :  { %v5905_v18 = vpop.eup %3937  ;;  %3957 = vpow2.f32 %v2525_v43  ;;  %v861_v15 = vadd.f32 %v5824_v42, %v860_v59  ;;  %v5920_v6 = vmul.f32 1.442695, %v7489_v13  ;;  %v7490_v43 = vsub.f32 %v7470_v10, %v5708_v60 }
 0x1b9   :  { %v2573_v35 = vadd.f32 %v5898_v51, %v2572_v44  ;;  %v5912_v30 = vmul.f32 1.442695, %v7488_v41  ;;  %v5914_v62 = vpop.eup %3939  ;;  %3959 = vpow2.f32 %v2527_v56  ;;  %v2553_v9 = vadd.f32 %v5905_v18, %v2552_v53  ;;  %v7491_v41 = vld [vmem:[#allocation117_spill] sm:$0xff]  ;;  %v7492_v53 = vld [vmem:[#allocation111_spill] sm:$0xff] }
 0x1ba   :  { %v5925_v44 = vmul.f32 1.442695, %v7490_v43  ;;  %v5927_v59 = vpop.eup %3941  ;;  %3961 = vpow2.f32 %v2529_v16  ;;  %v1721_v56 = vmul.f32 %v7491_v41, %v5794_v1  ;;  %v1723_v8 = vmul.f32 %v7492_v53, %v5794_v1 }
 0x1bb   :  { %v2574_v25 = vadd.f32 %v5914_v62, %v2573_v35  ;;  %v5934_v42 = vpop.eup %3943  ;;  %3963 = vpow2.f32 %v2531_v32  ;;  %v2554_v47 = vadd.f32 %v5927_v59, %v2553_v9  ;;  %v7493_v10 = vsub.f32 %v7471_v37, %v5708_v60 }
 0x1bc   :  { %v7494_v16 = vsub.f32 %v7472_v46, %v5708_v60  ;;  %v5947_v43 = vpop.eup %3945  ;;  %3965 = vpow2.f32 %v2533_v3  ;;  %v862_v53 = vadd.f32 %v5830_v57, %v861_v15  ;;  %v5951_v32 = vpack.c.bf16 %v1723_v8, %v1721_v56  ;;  %v7497_v46 = vld [vmem:[#allocation18_spill] sm:$0xff]  ;;  %v7498_v15 = vld [vmem:[#allocation112_spill] sm:$0xff] }
 0x1bd   :  { %v5940_v13 = vmul.f32 1.442695, %v7493_v10  ;;  %v2575_v41 = vadd.f32 %v5934_v42, %v2574_v25  ;;  %v5953_v9 = vpop.eup %3947  ;;  %3967 = vpow2.f32 %v2535_v38  ;;  %v2555_v37 = vadd.f32 %v5947_v43, %v2554_v47  ;;  %v7496_v10 = vld [vmem:[#allocation115_spill] sm:$0xff]  ;;  %v7499_v25 = vld [vmem:[#allocation116_spill] sm:$0xff] }
 0x1be   :  { %v5945_v35 = vmul.f32 1.442695, %v7494_v16  ;;  %7495 = vst [vmem:[#allocation82_spill] sm:$0xff] %v5951_v32  ;;  %v1720_v21 = vmul.f32 %v7496_v10, %v5783_v2  ;;  %v1722_v16 = vmul.f32 %v7497_v46, %v5783_v2  ;;  %v5960_v48 = vpop.eup %3949  ;;  %3969 = vpow2.f32 %v2537_v31  ;;  %v7501_v46 = vld [vmem:[#allocation24_spill] sm:$0xff] }
 0x1bf   :  { %v2576_v3 = vadd.f32 %v5953_v9, %v2575_v41  ;;  %v1725_v8 = vmul.f32 %v7498_v15, %v5794_v1  ;;  %v1727_v56 = vmul.f32 %v7499_v25, %v5794_v1  ;;  %v5967_v38 = vpop.eup %3951  ;;  %3971 = vpow2.f32 %v2539_v50  ;;  %v7503_v15 = vld [vmem:[#allocation113_spill] sm:$0xff] }
 0x1c0   :  { %v2556_v47 = vadd.f32 %v5960_v48, %v2555_v37  ;;  %v5970_v10 = vpack.c.bf16 %v1722_v16, %v1720_v21  ;;  %v1724_v32 = vmul.f32 %v7501_v46, %v5783_v2  ;;  %v5974_v57 = vpop.eup %3953  ;;  %3973 = vpow2.f32 %v2541_v19  ;;  %v7504_v21 = vld [vmem:[#allocation119_spill] sm:$0xff]  ;;  %v7505_v16 = vld [vmem:[#allocation29_spill] sm:$0xff] }
 0x1c1   :  { %v2577_v31 = vadd.f32 %v5967_v38, %v2576_v3  ;;  %v5977_v41 = vpack.c.bf16 %v1727_v56, %v1725_v8  ;;  %v1726_v25 = vmul.f32 %v7503_v15, %v5783_v2  ;;  %v5981_v39 = vpop.eup %3955  ;;  %3975 = vpow2.f32 %v2543_v34  ;;  %v7507_v8 = vld [vmem:[#allocation118_spill] sm:$0xff] }
 0x1c2   :  { %7500 = vst [vmem:[#allocation121_spill] sm:$0xff] %v5970_v10  ;;  %v2557_v50 = vadd.f32 %v5974_v57, %v2556_v47  ;;  %v1729_v37 = vmul.f32 %v7504_v21, %v5794_v1  ;;  %v1731_v46 = vmul.f32 %v7505_v16, %v5794_v1  ;;  %v5988_v10 = vpop.eup %3957  ;;  %3977 = vpow2.f32 %v5887_v55  ;;  %v7509_v21 = vld [vmem:[#allocation33_spill] sm:$0xff] }
 0x1c3   :  { %7502 = vst [vmem:[#allocation86_spill] sm:$0xff] %v5977_v41  ;;  %v2578_v19 = vadd.f32 %v5981_v39, %v2577_v31  ;;  %v5992_v3 = vpack.c.bf16 %v1726_v25, %v1724_v32  ;;  %v1728_v56 = vmul.f32 %v7507_v8, %v5783_v2  ;;  %v5996_v34 = vpop.eup %3959  ;;  %3979 = vpow2.f32 %v5893_v49  ;;  %v7510_v32 = vld [vmem:[#allocation77_spill] sm:$0xff] }
 0x1c4   :  { %v2558_v47 = vadd.f32 %v5988_v10, %v2557_v50  ;;  %v6000_v15 = vpack.c.bf16 %v1731_v46, %v1729_v37  ;;  %v1730_v16 = vmul.f32 %v7509_v21, %v5783_v2  ;;  %v6004_v41 = vpop.eup %3961  ;;  %3981 = vpow2.f32 %v5742_v26  ;;  %v7511_v25 = vld [vmem:[#allocation41_spill] sm:$0xff] }
 0x1c5   :  { %7506 = vst [vmem:[#allocation80_spill] sm:$0xff] %v5992_v3  ;;  %v2579_v55 = vadd.f32 %v5996_v34, %v2578_v19  ;;  %v1733_v31 = vmul.f32 %v7510_v32, %v5794_v1  ;;  %v1735_v8 = vmul.f32 %v7511_v25, %v5794_v1  ;;  %v6012_v49 = vpop.eup %3963  ;;  %v7512_v37 = vsub.f32 %v7473_v45, %v5708_v60  ;;  %v7514_v19 = vld [vmem:[#allocation30_spill] sm:$0xff] }
 0x1c6   :  { %7508 = vst [vmem:[#allocation84_spill] sm:$0xff] %v6000_v15  ;;  %v2559_v50 = vadd.f32 %v6004_v41, %v2558_v47  ;;  %v6020_v21 = vpack.c.bf16 %v1730_v16, %v1728_v56  ;;  %v1732_v26 = vmul.f32 %v7514_v19, %v5783_v2  ;;  %v6024_v3 = vpop.eup %3965  ;;  %3983 = vpow2.f32 %v5746_v52  ;;  %v7516_v47 = vld [vmem:[#allocation40_spill] sm:$0xff]  ;;  %v7517_v16 = vld [vmem:[#allocation37_spill] sm:$0xff] }
 0x1c7   :  { %v6018_v46 = vmul.f32 1.442695, %v7512_v37  ;;  %v2580_v32 = vadd.f32 %v6012_v49, %v2579_v55  ;;  %v6028_v25 = vpack.c.bf16 %v1735_v8, %v1733_v31  ;;  %v1734_v15 = vmul.f32 %v7516_v47, %v5783_v2  ;;  %v6032_v22 = vpop.eup %3967  ;;  %v7518_v19 = vld [vmem:[#allocation49_spill] sm:$0xff]  ;;  %v7520_v8 = vld [vmem:[#allocation36_spill] sm:$0xff] }
 0x1c8   :  { %7513 = vst [vmem:[#allocation90_spill] sm:$0xff] %v6020_v21  ;;  %v2560_v45 = vadd.f32 %v6024_v3, %v2559_v50  ;;  %v863_v56 = vadd.f32 %v5854_v5, %v862_v53  ;;  %v1737_v37 = vmul.f32 %v7517_v16, %v5794_v1  ;;  %v1739_v21 = vmul.f32 %v7518_v19, %v5794_v1  ;;  %v6040_v55 = vpop.eup %3969  ;;  %v7522_v19 = vld [vmem:[#allocation48_spill] sm:$0xff] }
 0x1c9   :  { %7515 = vst [vmem:[#allocation88_spill] sm:$0xff] %v6028_v25  ;;  %v2581_v52 = vadd.f32 %v6032_v22, %v2580_v32  ;;  %3985 = vpow2.f32 %v5748_v27  ;;  %v6044_v31 = vpack.c.bf16 %v1734_v15, %v1732_v26  ;;  %v1736_v47 = vmul.f32 %v7520_v8, %v5783_v2  ;;  %v6048_v50 = vpop.eup %3971  ;;  %v7523_v15 = vld [vmem:[#allocation45_spill] sm:$0xff]  ;;  %v7524_v32 = vld [vmem:[#allocation123_spill] sm:$0xff] }
 0x1ca   :  { %v2561_v53 = vadd.f32 %v6040_v55, %v2560_v45  ;;  %3987 = vpow2.f32 %v5750_v29  ;;  %v6052_v16 = vpack.c.bf16 %v1739_v21, %v1737_v37  ;;  %v1738_v25 = vmul.f32 %v7522_v19, %v5783_v2  ;;  %v6056_v5 = vpop.eup %3973  ;;  %v7526_v37 = vld [vmem:[#allocation44_spill] sm:$0xff] }
 0x1cb   :  { %7519 = vst [vmem:[#allocation94_spill] sm:$0xff] %v6044_v31  ;;  %v2582_v27 = vadd.f32 %v6048_v50, %v2581_v52  ;;  %3989 = vpow2.f32 %v5912_v30  ;;  %v1741_v26 = vmul.f32 %v7523_v15, %v5794_v1  ;;  %v1743_v8 = vmul.f32 %v7524_v32, %v5794_v1  ;;  %v6064_v45 = vpop.eup %3975  ;;  %v7528_v32 = vld [vmem:[#allocation122_spill] sm:$0xff] }
 0x1cc   :  { %7521 = vst [vmem:[#allocation92_spill] sm:$0xff] %v6052_v16  ;;  %v2562_v29 = vadd.f32 %v6056_v5, %v2561_v53  ;;  %3991 = vpow2.f32 %v5920_v6  ;;  %v6068_v21 = vpack.c.bf16 %v1738_v25, %v1736_v47  ;;  %v1740_v19 = vmul.f32 %v7526_v37, %v5783_v2  ;;  %v6072_v52 = vpop.eup %3977  ;;  %v7529_v25 = vld [vmem:[#allocation125_spill] sm:$0xff] }
 0x1cd   :  { %v2583_v30 = vadd.f32 %v6064_v45, %v2582_v27  ;;  %3993 = vpow2.f32 %v5752_v24  ;;  %v6076_v15 = vpack.c.bf16 %v1743_v8, %v1741_v26  ;;  %v1742_v31 = vmul.f32 %v7528_v32, %v5783_v2  ;;  %v6080_v16 = vpop.eup %3979  ;;  %v7530_v53 = vld [vmem:[#allocation57_spill] sm:$0xff] }
 0x1ce   :  { %7525 = vst [vmem:[#allocation98_spill] sm:$0xff] %v6068_v21  ;;  %v2563_v6 = vadd.f32 %v6072_v52, %v2562_v29  ;;  %3995 = vpow2.f32 %v5925_v44  ;;  %v1745_v47 = vmul.f32 %v7529_v25, %v5794_v1  ;;  %v1747_v37 = vmul.f32 %v7530_v53, %v5794_v1  ;;  %v6088_v27 = vpop.eup %3981  ;;  %v7533_v29 = vld [vmem:[#allocation124_spill] sm:$0xff] }
 0x1cf   :  { %7527 = vst [vmem:[#allocation96_spill] sm:$0xff] %v6076_v15  ;;  %v2584_v24 = vadd.f32 %v6080_v16, %v2583_v30  ;;  %v7531_v26 = vsub.f32 %v7474_v4, %v5708_v60  ;;  %v6094_v32 = vpack.c.bf16 %v1742_v31, %v1740_v19  ;;  %v1744_v21 = vmul.f32 %v7533_v29, %v5783_v2  ;;  %v7535_v4 = vld [vmem:[#allocation56_spill] sm:$0xff]  ;;  %v7536_v31 = vld [vmem:[#allocation53_spill] sm:$0xff] }
 0x1d0   :  { %v2564_v44 = vrot.slane %v2563_v6, 4  ;;  %v864_v15 = vadd.f32 %v6088_v27, %v863_v56  ;;  %3997 = vpow2.f32 %v5940_v13  ;;  %v6100_v25 = vpack.c.bf16 %v1747_v37, %v1745_v47  ;;  %v6102_v53 = vpop.eup %3983  ;;  %v7537_v13 = vld [vmem:[#allocation65_spill] sm:$0xff] }
 0x1d1   :  { %v795_v8 = vmul.f32 1.442695, %v7531_v26  ;;  %7532 = vst [vmem:[#allocation102_spill] sm:$0xff] %v6094_v32  ;;  %v2585_v12 = vrot.slane %v2584_v24, 4  ;;  %3999 = vpow2.f32 %v5754_v40  ;;  %v1746_v30 = vmul.f32 %v7535_v4, %v5783_v2  ;;  %v7540_v4 = vld [vmem:[#allocation52_spill] sm:$0xff] }
 0x1d2   :  { %7534 = vst [vmem:[#allocation100_spill] sm:$0xff] %v6100_v25  ;;  %v1749_v19 = vmul.f32 %v7536_v31, %v5794_v1  ;;  %v2565_v26 = vadd.f32 %v2564_v44, %v2563_v6  ;;  %v865_v29 = vadd.f32 %v6102_v53, %v864_v15  ;;  %4001 = vpow2.f32 %v5945_v35 }
 0x1d3   :  { %v1751_v56 = vmul.f32 %v7537_v13, %v5794_v1  ;;  %v6113_v47 = vpop.eup %3985  ;;  %v2586_v37 = vadd.f32 %v2585_v12, %v2584_v24  ;;  %v7538_v40 = vsub.f32 %v7485_v17, %v5708_v60  ;;  %v6118_v25 = vpack.c.bf16 %v1746_v30, %v1744_v21  ;;  %v7542_v17 = vld [vmem:[#allocation101_spill] sm:$0xff]  ;;  %v7543_v21 = vld [vmem:[#allocation64_spill] sm:$0xff] }
 0x1d4   :  { %v1748_v31 = vmul.f32 %v7540_v4, %v5783_v2  ;;  %v6122_v6 = vpop.eup %3987  ;;  %v2566_v15 = vrot.slane %v2565_v26, 2  ;;  %v866_v35 = vadd.f32 %v6113_v47, %v865_v29  ;;  %4003 = vpow2.f32 %v6018_v46 }
 0x1d5   :  { %v799_v32 = vmul.f32 1.442695, %v7538_v40  ;;  %7539 = vst [vmem:[#allocation106_spill] sm:$0xff] %v6118_v25  ;;  %v6126_v1 = vpack.c.bf16 %v1751_v56, %v1749_v19  ;;  %v6128_v44 = vpop.eup %3989  ;;  %v2587_v12 = vrot.slane %v2586_v37, 2  ;;  %v759_v24 = vsub.f32 %v7542_v17, %v5708_v60  ;;  %v7546_v25 = vld [vmem:[#allocation99_spill] sm:$0xff] }
 0x1d6   :  { %v1750_v30 = vmul.f32 %v7543_v21, %v5783_v2  ;;  %v6134_v13 = vpop.eup %3991  ;;  %v2567_v40 = vadd.f32 %v2566_v15, %v2565_v26  ;;  %v867_v4 = vadd.f32 %v6122_v6, %v866_v35  ;;  %4005 = vpow2.f32 %v795_v8 }
 0x1d7   :  { %7541 = vst [vmem:[#allocation104_spill] sm:$0xff] %v6126_v1  ;;  %7544 = vst [vmem:[#allocation109_spill] sm:$0xff] %v6134_v13  ;;  %v7545_v46 = vsub.f32 %v7486_v0, %v5708_v60  ;;  %v6140_v29 = vpop.eup %3993  ;;  %v2588_v56 = vadd.f32 %v2587_v12, %v2586_v37  ;;  %v761_v1 = vsub.f32 %v7546_v25, %v5708_v60  ;;  %4007 = vpow2.f32 %v799_v32 }
 0x1d8   :  { %v835_v17 = vadd.f32 %v6134_v13, %v6128_v44  ;;  %v6146_v2 = vpack.c.bf16 %v1750_v30, %v1748_v31  ;;  %v6148_v21 = vpop.eup %3995  ;;  %v2568_v26 = vrot.slane %v2567_v40, 1  ;;  %v868_v8 = vadd.f32 %v6140_v29, %v867_v4  ;;  %v7550_v30 = vld [vmem:[#allocation105_spill] sm:$0xff]  ;;  %v7551_v4 = vld [vmem:[#allocation103_spill] sm:$0xff] }
 0x1d9   :  { %v803_v19 = vmul.f32 1.442695, %v7545_v46  ;;  %7548 = vst [vmem:[#allocation85_spill] sm:$0xff] %v6148_v21  ;;  %v7549_v0 = vsub.f32 %v7487_v36, %v5708_v60  ;;  %v2589_v35 = vrot.slane %v2588_v56, 1  ;;  %v811_v37 = vmul.f32 1.442695, %v759_v24 }
 0x1da   :  { %7547 = vst [vmem:[#allocation81_spill] sm:$0xff] %v6146_v2  ;;  %v836_v12 = vadd.f32 %v6148_v21, %v835_v17  ;;  %v6155_v25 = vpop.eup %3997  ;;  %v2569_v46 = vadd.f32 %v2568_v26, %v2567_v40  ;;  %v869_v31 = vadd.f32 %v5744_v28, %v868_v8  ;;  %v763_v2 = vsub.f32 %v7550_v30, %v5708_v60 }
 0x1db   :  { %v807_v15 = vmul.f32 1.442695, %v7549_v0  ;;  %4009 = vpow2.f32 %v803_v19  ;;  %v6160_v13 = vpop.eup %3999  ;;  %v2590_v32 = vadd.f32 %v2589_v35, %v2588_v56  ;;  %v765_v36 = vsub.f32 %v7551_v4, %v5708_v60  ;;  %v7553_v56 = vld [vmem:[#allocation108_spill] sm:$0xff] }
 0x1dc   :  { %v837_v0 = vadd.f32 %v6155_v25, %v836_v12  ;;  %v6165_v24 = vpop.eup %4001  ;;  %v2591_v17 = vadd.f32 1e-16, %v2569_v46  ;;  %v870_v21 = vadd.f32 %v6160_v13, %v869_v31  ;;  %v815_v40 = vmul.f32 1.442695, %v761_v1  ;;  %v7554_v1 = vld [vmem:[#allocation107_spill] sm:$0xff] }
 0x1dd   :  { %7552 = vst [vmem:[#allocation79_spill] sm:$0xff] %v6165_v24  ;;  %4011 = vpow2.f32 %v807_v15  ;;  %v2592_v26 = vadd.f32 1e-16, %v2590_v32  ;;  %v767_v35 = vsub.f32 %v7553_v56, %v5708_v60  ;;  %v819_v4 = vmul.f32 1.442695, %v763_v2 }
 0x1de   :  { %4013 = vpow2.f32 %v811_v37  ;;  %v838_v8 = vadd.f32 %v6165_v24, %v837_v0  ;;  %v6169_v19 = vpop.eup %4003  ;;  %v871_v30 = vrot.slane %v870_v21, 4  ;;  %v769_v15 = vsub.f32 %v7554_v1, %v5708_v60  ;;  %v7556_v1 = vld [vmem:[#allocation61_spill] sm:$0xff] }
 0x1df   :  { %4015 = vrcp.f32 %v2591_v17  ;;  %v823_v37 = vmul.f32 1.442695, %v765_v36  ;;  %v827_v24 = vmul.f32 1.442695, %v767_v35  ;;  %vm92_vm11 = vcmask 392192  }
 0x1e0   :  { %4017 = vrcp.f32 %v2592_v26  ;;  %v839_v12 = vadd.f32 %v6169_v19, %v838_v8  ;;  %v6174_v46 = vpop.eup %4005  ;;  %v872_v31 = vadd.f32 %v871_v30, %v870_v21  ;;  %v831_v8 = vmul.f32 1.442695, %v769_v15 }
 0x1e1   :  { %4019 = vpow2.f32 %v815_v40  ;;  %v6179_v0 = vpop.eup %4007  ;;  %vm109_vm8 = vcmask 7168  }
 0x1e2   :  { %v840_v32 = vadd.f32 %v6174_v46, %v839_v12  ;;  %v873_v56 = vrot.slane %v872_v31, 2  ;;  %4021 = vpow2.f32 %v819_v4 }
 0x1e3   :  { %4023 = vpow2.f32 %v823_v37  ;;  %v7558_v37 = vld [vmem:[#allocation73_spill] sm:$0xff] }
 0x1e4   :  { %v841_v2 = vadd.f32 %v6179_v0, %v840_v32  ;;  %v874_v26 = vadd.f32 %v873_v56, %v872_v31  ;;  %4025 = vpow2.f32 %v827_v24 }
 0x1e5   :  { %v6182_v17 = vpop.eup %4009  ;;  %4027 = vpow2.f32 %v831_v8 }
 0x1e6   :  { %7555 = vst [vmem:[#allocation83_spill] sm:$0xff] %v6182_v17  ;;  %v842_v21 = vadd.f32 %v6182_v17, %v841_v2  ;;  %v875_v60 = vrot.slane %v874_v26, 1  ;;  %v6198_v17 = vpop.permute.xlu1 %1800 }
 0x1e7   :  { %v6185_v30 = vpop.eup %4011  ;;  %7559 = vst [vmem:[#allocation87_spill] sm:$0xff] %v6198_v17  ;;  %3695 = vmatprep.subr.bf16.mxu0 %v6198_v17 }
 0x1e8   :  { %v6187_v36 = vpop.eup %4013  ;;  %v843_v40 = vadd.f32 %v6185_v30, %v842_v21  ;;  %v876_v12 = vadd.f32 %v875_v60, %v874_v26 }
 0x1e9   :  { %v4016_v35 = vpop.eup %4015 }
 0x1ea   :  { %v4018_v4 = vpop.eup %4017  ;;  %v6191_v32 = vmul.f32 %v4016_v35, %v7556_v1  ;;  %v844_v31 = vadd.f32 %v6187_v36, %v843_v40  ;;  %v878_v2 = vadd.f32 1e-16, %v876_v12 }
 0x1eb   :  { %v6194_v15 = vpop.eup %4019  ;;  %v2596_v56 = vmul.f32 %v4018_v4, %v7558_v37 }
 0x1ec   :  { %7557 = vst [vmem:[#allocation89_spill] sm:$0xff] %v6194_v15  ;;  %v845_v24 = vadd.f32 %v6194_v15, %v844_v31  ;;  %v2597_v21 = vmul.f32 %v5858_v33, %v6191_v32  ;;  %v2599_v26 = vmul.f32 %v5865_v58, %v6191_v32  ;;  %v2601_v8 = vmul.f32 %v5873_v11, %v6191_v32  ;;  %v6206_v60 = vpop.eup %4021 }
 0x1ed   :  { %4029 = vrcp.f32 %v878_v2  ;;  %v2598_v40 = vmul.f32 %v5860_v14, %v2596_v56  ;;  %v2600_v35 = vmul.f32 %v5867_v20, %v2596_v56  ;;  %v2602_v12 = vmul.f32 %v5878_v23, %v2596_v56  ;;  %v6216_v11 = vpop.eup %4023 }
 0x1ee   :  { %v846_v4 = vadd.f32 %v6206_v60, %v845_v24  ;;  %v2604_v33 = vmul.f32 %v5885_v63, %v2596_v56  ;;  %v2606_v58 = vmul.f32 %v5898_v51, %v2596_v56  ;;  %v2608_v31 = vmul.f32 %v5914_v62, %v2596_v56  ;;  %v6229_v51 = vpop.eup %4025 }
 0x1ef   :  { %v6218_v15 = vpack.c.bf16 %v2600_v35, %v2598_v40  ;;  %v2610_v2 = vmul.f32 %v5934_v42, %v2596_v56  ;;  %v2612_v14 = vmul.f32 %v5953_v9, %v2596_v56  ;;  %v2614_v20 = vmul.f32 %v5967_v38, %v2596_v56 }
 0x1f0   :  { %v847_v23 = vadd.f32 %v6216_v11, %v846_v4  ;;  %v6224_v17 = vpack.c.bf16 %v2604_v33, %v2602_v12  ;;  %v6226_v24 = vpack.c.bf16 %v2608_v31, %v2606_v58  ;;  %v2616_v63 = vmul.f32 %v5981_v39, %v2596_v56  ;;  %v6241_v33 = vpop.eup %4027 }
 0x1f1   :  { %v6231_v62 = vpack.c.bf16 %v2612_v14, %v2610_v2  ;;  %v2618_v40 = vmul.f32 %v5996_v34, %v2596_v56  ;;  %v2620_v42 = vmul.f32 %v6012_v49, %v2596_v56  ;;  %v2622_v9 = vmul.f32 %v6032_v22, %v2596_v56 }
 0x1f2   :  { %7560 = vst [vmem:[#allocation93_spill] sm:$0xff] %v6226_v24  ;;  %v848_v38 = vadd.f32 %v6229_v51, %v847_v23  ;;  %v6237_v35 = vpack.c.bf16 %v2616_v63, %v2614_v20  ;;  %v2624_v12 = vmul.f32 %v6048_v50, %v2596_v56  ;;  %v2626_v4 = vmul.f32 %v6064_v45, %v2596_v56 }
 0x1f3   :  { %7561 = vst [vmem:[#allocation60_spill] sm:$0xff] %v6231_v62  ;;  %v6243_v39 = vpack.c.bf16 %v2620_v42, %v2618_v40  ;;  %v2628_v58 = vmul.f32 %v6080_v16, %v2596_v56  ;;  %v6246_v31 = vpack.c.bf16 %v2599_v26, %v2597_v21  ;;  %v2603_v34 = vmul.f32 %v5882_v7, %v6191_v32 }
 0x1f4   :  { %7562 = vst [vmem:[#allocation91_spill] sm:$0xff] %v6237_v35  ;;  %v849_v22 = vadd.f32 %v6241_v33, %v848_v38  ;;  %v6251_v49 = vpack.c.bf16 %v2624_v12, %v2622_v9  ;;  %v2605_v50 = vmul.f32 %v5891_v61, %v6191_v32  ;;  %v2607_v45 = vmul.f32 %v5905_v18, %v6191_v32  ;;  %v7570_v9 = vld [vmem:[#allocation74_spill] sm:$0xff] }
 0x1f5   :  { %7563 = vst [vmem:[#allocation97_spill] sm:$0xff] %v6243_v39  ;;  %v6257_v2 = vpack.c.bf16 %v2628_v58, %v2626_v4  ;;  %v6259_v14 = vpack.c.bf16 %v2603_v34, %v2601_v8  ;;  %v2609_v16 = vmul.f32 %v5927_v59, %v6191_v32  ;;  %v2611_v7 = vmul.f32 %v5947_v43, %v6191_v32  ;;  %v7572_v4 = vld [vmem:[#allocation110_spill] sm:$0xff]  ;;  %v7573_v34 = vld [vmem:[#allocation68_spill] sm:$0xff] }
 0x1f6   :  { %7564 = vst [vmem:[#allocation95_spill] sm:$0xff] %v6251_v49  ;;  %v850_v56 = vrot.slane %v849_v22, 4  ;;  %v6265_v21 = vpack.c.bf16 %v2607_v45, %v2605_v50  ;;  %v2613_v26 = vmul.f32 %v5960_v48, %v6191_v32  ;;  %v2615_v61 = vmul.f32 %v5974_v57, %v6191_v32  ;;  %v7575_v45 = vld [vmem:[#allocation23_spill] sm:$0xff] }
 0x1f7   :  { %7565 = vst [vmem:[#allocation117_spill] sm:$0xff] %v6257_v2  ;;  %v4030_v18 = vpop.eup %4029  ;;  %v6271_v20 = vpack.c.bf16 %v2611_v7, %v2609_v16  ;;  %v2617_v8 = vmul.f32 %v5988_v10, %v6191_v32  ;;  %v2619_v59 = vmul.f32 %v6004_v41, %v6191_v32  ;;  %v2621_v43 = vmul.f32 %v6024_v3, %v6191_v32 }
 0x1f8   :  { %7566 = vst [vmem:[#allocation111_spill] sm:$0xff] %v6265_v21  ;;  %v882_v23 = vmul.f32 %v4030_v18, %v7558_v37  ;;  %v851_v63 = vadd.f32 %v850_v56, %v849_v22  ;;  %v6280_v40 = vpack.c.bf16 %v2615_v61, %v2613_v26  ;;  %v2623_v48 = vmul.f32 %v6040_v55, %v6191_v32  ;;  %v7571_v37 = vld [vmem:[#allocation78_spill] sm:$0xff]  ;;  %v7574_v55 = vld [vmem:[#allocation69_spill] sm:$0xff] }
 0x1f9   :  { %7567 = vst [vmem:[#allocation115_spill] sm:$0xff] %v6271_v20  ;;  %v6284_v57 = vpack.c.bf16 %v2619_v59, %v2617_v8  ;;  %v2625_v42 = vmul.f32 %v6056_v5, %v6191_v32  ;;  %v2627_v10 = vmul.f32 %v6072_v52, %v6191_v32  ;;  %v7576_v56 = vld [vmem:[#allocation114_spill] sm:$0xff]  ;;  %v7577_v52 = vld [vmem:[#allocation71_spill] sm:$0xff] }
 0x1fa   :  { %7568 = vst [vmem:[#allocation18_spill] sm:$0xff] %v6280_v40  ;;  %v884_v41 = vmul.f32 %v5780_v54, %v882_v23  ;;  %v886_v3 = vmul.f32 %v7570_v9, %v882_v23  ;;  %v852_v38 = vrot.slane %v851_v63, 2  ;;  %v888_v12 = vmul.f32 %v7571_v37, %v882_v23 }
 0x1fb   :  { %7569 = vst [vmem:[#allocation112_spill] sm:$0xff] %v6284_v57  ;;  %v890_v58 = vmul.f32 %v7572_v4, %v882_v23  ;;  %v892_v22 = vmul.f32 %v7573_v34, %v882_v23  ;;  %v894_v50 = vmul.f32 %v7574_v55, %v882_v23  ;;  %v896_v16 = vmul.f32 %v7575_v45, %v882_v23 }
 0x1fc   :  { %v916_v7 = vpack.c.bf16 %v886_v3, %v884_v41  ;;  %v853_v5 = vadd.f32 %v852_v38, %v851_v63  ;;  %v898_v26 = vmul.f32 %v7576_v56, %v882_v23  ;;  %v900_v32 = vmul.f32 %v7577_v52, %v882_v23  ;;  %v7584_v52 = vld [vmem:[#allocation89_spill] sm:$0xff] }
 0x1fd   :  { %v6299_v54 = vpack.c.bf16 %v890_v58, %v888_v12  ;;  %v6301_v61 = vpack.c.bf16 %v894_v50, %v892_v22  ;;  %v902_v18 = vmul.f32 %v6088_v27, %v882_v23  ;;  %v904_v8 = vmul.f32 %v6102_v53, %v882_v23  ;;  %v7582_v22 = vld [vmem:[#allocation79_spill] sm:$0xff] }
 0x1fe   :  { %947 = vxpose.xlu1.c.b16.start [1/8] %v916_v7, 128  ;;  %1220 = vmatprep.mubr.bf16.mxu1 %v916_v7  ;;  %v854_v59 = vrot.slane %v853_v5, 1  ;;  %v6305_v9 = vpack.c.bf16 %v898_v26, %v896_v16  ;;  %v906_v41 = vmul.f32 %v6113_v47, %v882_v23  ;;  %v908_v63 = vmul.f32 %v6122_v6, %v882_v23 }
 0x1ff   :  { %v6309_v3 = vpack.c.bf16 %v902_v18, %v900_v32  ;;  %v910_v38 = vmul.f32 %v6140_v29, %v882_v23  ;;  %v912_v37 = vmul.f32 %v5744_v28, %v882_v23  ;;  %v914_v12 = vmul.f32 %v6160_v13, %v882_v23 }
 0x200   :  { %v855_v27 = vadd.f32 %v854_v59, %v853_v5  ;;  %v6314_v4 = vpack.c.bf16 %v906_v41, %v904_v8  ;;  %v6316_v53 = vpack.c.bf16 %v2623_v48, %v2621_v43  ;;  %v6318_v58 = vpack.c.bf16 %v2627_v10, %v2625_v42  ;;  %v7580_v43 = vld [vmem:[#allocation109_spill] sm:$0xff] }
 0x201   :  { %v6320_v34 = vpack.c.bf16 %v910_v38, %v908_v63  ;;  %v6322_v47 = vpack.c.bf16 %v914_v12, %v912_v37  ;;  %v7581_v48 = vld [vmem:[#allocation85_spill] sm:$0xff]  ;;  %v7588_v63 = vld [vmem:[#allocation84_spill] sm:$0xff] }
 0x202   :  { %7578 = vst [vmem:[#allocation116_spill] sm:$0xff] %v6316_v53  ;;  %7579 = vst [vmem:[#allocation24_spill] sm:$0xff] %v6318_v58  ;;  %v877_v6 = vadd.f32 1e-16, %v855_v27  ;;  %948 = vxpose.xlu1.c.b16.cont [2/8] %v6299_v54, 128  ;;  %v7589_v38 = vld [vmem:[#allocation88_spill] sm:$0xff]  ;;  %v7592_v27 = vld [vmem:[#allocation121_spill] sm:$0xff] }
 0x203   :  { %v7590_v37 = vld [vmem:[#allocation92_spill] sm:$0xff] }
 0x204   :  { %4031 = vrcp.f32 %v877_v6  ;;  %v7591_v12 = vld [vmem:[#allocation96_spill] sm:$0xff] }
 0x205   :  { %v7593_v6 = vld [vmem:[#allocation100_spill] sm:$0xff] }
 0x206   :  { %949 = vxpose.xlu1.c.b16.cont [3/8] %v6301_v61, 128 }
 0x20a   :  { %950 = vxpose.xlu1.c.b16.cont [4/8] %v6305_v9, 128 }
 0x20e   :  { %v4032_v28 = vpop.eup %4031  ;;  %951 = vxpose.xlu1.c.b16.cont [5/8] %v6309_v3, 128 }
 0x20f   :  { %v881_v13 = vmul.f32 %v4032_v28, %v7556_v1  ;;  %v7594_v28 = vld [vmem:[#allocation80_spill] sm:$0xff] }
 0x211   :  { %v883_v29 = vmul.f32 %v6128_v44, %v881_v13  ;;  %v885_v23 = vmul.f32 %v7580_v43, %v881_v13  ;;  %v887_v42 = vmul.f32 %v7581_v48, %v881_v13  ;;  %v889_v10 = vmul.f32 %v6155_v25, %v881_v13  ;;  %v7583_v44 = vld [vmem:[#allocation83_spill] sm:$0xff]  ;;  %v7596_v43 = vld [vmem:[#allocation90_spill] sm:$0xff] }
 0x212   :  { %v891_v55 = vmul.f32 %v7582_v22, %v881_v13  ;;  %v893_v50 = vmul.f32 %v6169_v19, %v881_v13  ;;  %v895_v45 = vmul.f32 %v6174_v46, %v881_v13  ;;  %v897_v16 = vmul.f32 %v6179_v0, %v881_v13  ;;  %952 = vxpose.xlu1.c.b16.cont [6/8] %v6314_v4, 128  ;;  %v7597_v48 = vld [vmem:[#allocation94_spill] sm:$0xff] }
 0x213   :  { %v6338_v7 = vpack.c.bf16 %v885_v23, %v883_v29  ;;  %v6340_v1 = vpack.c.bf16 %v889_v10, %v887_v42  ;;  %v899_v5 = vmul.f32 %v7583_v44, %v881_v13  ;;  %v901_v56 = vmul.f32 %v6185_v30, %v881_v13  ;;  %v7595_v29 = vld [vmem:[#allocation104_spill] sm:$0xff]  ;;  %v7598_v42 = vld [vmem:[#allocation98_spill] sm:$0xff] }
 0x214   :  { %v6344_v26 = vpack.c.bf16 %v893_v50, %v891_v55  ;;  %v6346_v25 = vpack.c.bf16 %v897_v16, %v895_v45  ;;  %v903_v19 = vmul.f32 %v6187_v36, %v881_v13  ;;  %v905_v46 = vmul.f32 %v7584_v52, %v881_v13  ;;  %v7599_v22 = vld [vmem:[#allocation102_spill] sm:$0xff]  ;;  %v1811_v45 = vpop.permute.xlu0 %1810  ;;  %v7601_v16 = vld [vmem:[#allocation81_spill] sm:$0xff] }
 0x215   :  { %931 = vxpose.xlu0.c.b16.start [1/8] %v6338_v7, 128  ;;  %v6351_v0 = vpack.c.bf16 %v901_v56, %v899_v5  ;;  %v907_v32 = vmul.f32 %v6206_v60, %v881_v13  ;;  %v909_v18 = vmul.f32 %v6216_v11, %v881_v13  ;;  %v911_v8 = vmul.f32 %v6229_v51, %v881_v13  ;;  %v4065_v60 = vld [vmem:[#allocation7 + $0x20] sm:$0xff]   ;;  %v7586_v51 = vld [vmem:[#allocation82_spill] sm:$0xff]  ;;  %v4066_v52 = vld [vmem:[#allocation7 + $0x28] sm:$0xff]  }
 0x216   :  { %v6356_v59 = vpack.c.bf16 %v905_v46, %v903_v19  ;;  %953 = vxpose.xlu1.c.b16.cont [7/8] %v6320_v34, 128  ;;  %v913_v30 = vmul.f32 %v6241_v33, %v881_v13  ;;  %v7585_v11 = vld [vmem:[#allocation120_spill] sm:$0xff]  ;;  %v7587_v33 = vld [vmem:[#allocation86_spill] sm:$0xff]  ;;  %v1803_v13 = vpop.permute.xlu1 %1802 }
 0x217   :  { %v6360_v41 = vpack.c.bf16 %v909_v18, %v907_v32  ;;  %v7600_v50 = vld [vmem:[#allocation106_spill] sm:$0xff]  ;;  %v7602_v32 = vld [vmem:[#allocation87_spill] sm:$0xff] }
 0x218   :  { %v6362_v36 = vpack.c.bf16 %v913_v30, %v911_v8  ;;  %v1813_v5 = vpop.permute.xlu0 %1812  ;;  %v4067_v18 = vld [vmem:[#allocation7 + $0x30] sm:$0xff]   ;;  %v7603_v30 = vmov 0  }
 0x219   :  { %932 = vxpose.xlu0.c.b16.cont [2/8] %v6340_v1, 128 }
 0x21a   :  { %954 = vxpose.xlu1.c.b16.end [8/8] %v6322_v47, 128  ;;  %v1805_v23 = vpop.permute.xlu1 %1804 }
 0x21d   :  { %933 = vxpose.xlu0.c.b16.cont [3/8] %v6344_v26, 128 }
 0x21e   :  { %2685 = vrot.lane.b32.xlu1 %v4065_v60, %s4222_s29  ;;  %v1807_v10 = vpop.permute.xlu1 %1806 }
 0x221   :  { %934 = vxpose.xlu0.c.b16.cont [4/8] %v6346_v25, 128 }
 0x222   :  { %v1809_v55 = vpop.permute.xlu1 %1808 }
 0x225   :  { %935 = vxpose.xlu0.c.b16.cont [5/8] %v6351_v0, 128 }
 0x226   :  { %v6396_v44 = vpop.permute.xlu1 %2677 }
 0x229   :  { %936 = vxpose.xlu0.c.b16.cont [6/8] %v6356_v59, 128 }
 0x22a   :  { %v6400_v19 = vpop.permute.xlu1 %2679 }
 0x22d   :  { %937 = vxpose.xlu0.c.b16.cont [7/8] %v6360_v41, 128 }
 0x22e   :  { %v6406_v8 = vpop.permute.xlu1 %2681 }
 0x231   :  { %938 = vxpose.xlu0.c.b16.end [8/8] %v6362_v36, 128 }
 0x23a   :  { %1814 = vrot.lane.b32.xlu0 %v7585_v11, %s4221_s4 }
 0x241   :  { %1784 = vxpose.xlu1.c.b16.start [1/8] %v7586_v51, 128 }
 0x245   :  { %1785 = vxpose.xlu1.c.b16.cont [2/8] %v7587_v33, 128 }
 0x249   :  { %1786 = vxpose.xlu1.c.b16.cont [3/8] %v7588_v63, 128 }
 0x24d   :  { %1787 = vxpose.xlu1.c.b16.cont [4/8] %v7589_v38, 128 }
 0x251   :  { %1788 = vxpose.xlu1.c.b16.cont [5/8] %v7590_v37, 128 }
 0x255   :  { %1789 = vxpose.xlu1.c.b16.cont [6/8] %v7591_v12, 128 }
 0x258   :  { %1768 = vxpose.xlu0.c.b16.start [1/8] %v7592_v27, 128 }
 0x259   :  { %1790 = vxpose.xlu1.c.b16.cont [7/8] %v7593_v6, 128 }
 0x25c   :  { %1769 = vxpose.xlu0.c.b16.cont [2/8] %v7594_v28, 128 }
 0x25d   :  { %1791 = vxpose.xlu1.c.b16.end [8/8] %v7595_v29, 128 }
 0x260   :  { %1770 = vxpose.xlu0.c.b16.cont [3/8] %v7596_v43, 128 }
 0x261   :  { %2661 = vxpose.xlu1.c.b16.start [1/8] %v6218_v15, 128 }
 0x264   :  { %1771 = vxpose.xlu0.c.b16.cont [4/8] %v7597_v48, 128 }
 0x265   :  { %2662 = vxpose.xlu1.c.b16.cont [2/8] %v6224_v17, 128 }
 0x268   :  { %1772 = vxpose.xlu0.c.b16.cont [5/8] %v7598_v42, 128 }
 0x269   :  { %2663 = vxpose.xlu1.c.b16.cont [3/8] %v6226_v24, 128 }
 0x26c   :  { %1773 = vxpose.xlu0.c.b16.cont [6/8] %v7599_v22, 128 }
 0x26d   :  { %2664 = vxpose.xlu1.c.b16.cont [4/8] %v6231_v62, 128  ;;  %v7619_v62 = vld [vmem:[#allocation43_spill] sm:$0xff] }
 0x270   :  { %1774 = vxpose.xlu0.c.b16.cont [7/8] %v7600_v50, 128 }
 0x271   :  { %2665 = vxpose.xlu1.c.b16.cont [5/8] %v6237_v35, 128 }
 0x274   :  { %1775 = vxpose.xlu0.c.b16.end [8/8] %v7601_v16, 128 }
 0x275   :  { %2666 = vxpose.xlu1.c.b16.cont [6/8] %v6243_v39, 128  ;;  %v7612_v39 = vld [vmem:[#allocation31_spill] sm:$0xff] }
 0x279   :  { %2667 = vxpose.xlu1.c.b16.cont [7/8] %v6251_v49, 128 }
 0x27b   :  { %v939_v56 = vpop.trf.xlu0 }
 0x27c   :  { %3663 = vmatprep.mubr.bf16.mxu0 %v939_v56 }
 0x27d   :  { %2687 = vrot.lane.b32.xlu0 %v4066_v52, %s4222_s29  ;;  %2668 = vxpose.xlu1.c.b16.end [8/8] %v6257_v2, 128  ;;  %v6411_v52 = vpop.permute.xlu1 %2683 }
 0x27f   :  { %v940_v46 = vpop.trf.xlu0 }
 0x280   :  { %3664 = vmatmul.mubr.bf16.vlgmr.msra.gmra.mrb[0].mxu0 %v940_v46 }
 0x281   :  { %3696 = vmatpush3.bf16.msra.mxu0 %v7602_v32  ;;  %2689 = vrot.lane.b32.xlu0 %v4067_v18, %s4222_s29  ;;  %v955_v32 = vpop.trf.xlu1 }
 0x282   :  { %3697 = vmatprep.subr.bf16.mxu0 %v1803_v13  ;;  %3816 = vset.pattern.permute.xlu1 %v7603_v30 }
 0x283   :  { %v941_v60 = vpop.trf.xlu0 }
 0x284   :  { %3667 = vmatprep.mubr.bf16.mxu0 %v941_v60 }
 0x285   :  { %3698 = vmatpush3.bf16.msra.mxu0 %v1803_v13  ;;  %2691 = vrot.lane.b32.xlu0 %v7585_v11, %s4222_s29  ;;  %v956_v60 = vpop.trf.xlu1 }
 0x286   :  { %3699 = vmatprep.subr.bf16.mxu0 %v1805_v23 }
 0x287   :  { %v942_v56 = vpop.trf.xlu0 }
 0x288   :  { %3668 = vmatmul.mubr.bf16.gmra.mrb[4].mxu0 %v942_v56 }
 0x289   :  { %3700 = vmatpush3.bf16.msra.mxu0 %v1805_v23  ;;  %v957_v2 = vpop.trf.xlu1 }
 0x28a   :  { %3701 = vmatprep.subr.bf16.mxu0 %v1807_v10 }
 0x28b   :  { %v943_v46 = vpop.trf.xlu0 }
 0x28c   :  { %3671 = vmatprep.mubr.bf16.mxu0 %v943_v46 }
 0x28d   :  { %3702 = vmatpush3.bf16.msra.mxu0 %v1807_v10  ;;  %v958_v23 = vpop.trf.xlu1 }
 0x28e   :  { %3703 = vmatprep.subr.bf16.mxu0 %v1809_v55 }
 0x28f   :  { %v944_v18 = vpop.trf.xlu0 }
 0x290   :  { %3672 = vmatmul.mubr.bf16.gmra.mrb[8].mxu0 %v944_v18 }
 0x291   :  { %3704 = vmatpush3.bf16.msra.mxu0 %v1809_v55  ;;  %v959_v10 = vpop.trf.xlu1 }
 0x292   :  { %3705 = vmatprep.subr.bf16.mxu0 %v1811_v45 }
 0x293   :  { %v945_v13 = vpop.trf.xlu0 }
 0x294   :  { %3675 = vmatprep.mubr.bf16.mxu0 %v945_v13 }
 0x295   :  { %3706 = vmatpush3.bf16.msra.mxu0 %v1811_v45  ;;  %v960_v55 = vpop.trf.xlu1 }
 0x296   :  { %3707 = vmatprep.subr.bf16.mxu0 %v1813_v5 }
 0x297   :  { %v946_v11 = vpop.trf.xlu0 }
 0x298   :  { %3676 = vmatmul.mubr.bf16.gmra.mrb[12].mxu0 %v946_v11 }
 0x299   :  { %3708 = vmatpush3.bf16.msra.mxu0 %v1813_v5  ;;  %3679 = vmatprep.mubr.bf16.mxu0 %v955_v32  ;;  %v961_v5 = vpop.trf.xlu1 }
 0x2a0   :  { %3680 = vmatmul.mubr.bf16.gmra.mrb[16].mxu0 %v956_v60 }
 0x2a1   :  { %3683 = vmatprep.mubr.bf16.mxu0 %v957_v2  ;;  %v962_v2 = vpop.trf.xlu1 }
 0x2a3   :  { %2645 = vxpose.xlu0.c.b16.start [1/8] %v6246_v31, 128 }
 0x2a5   :  { %v2686_v60 = vpop.permute.xlu1 %2685 }
 0x2a7   :  { %2646 = vxpose.xlu0.c.b16.cont [2/8] %v6259_v14, 128 }
 0x2a8   :  { %3684 = vmatmul.mubr.bf16.gmra.mrb[20].mxu0 %v958_v23 }
 0x2a9   :  { %3687 = vmatprep.mubr.bf16.mxu0 %v959_v10  ;;  %v1792_v11 = vpop.trf.xlu1 }
 0x2ab   :  { %2647 = vxpose.xlu0.c.b16.cont [3/8] %v6265_v21, 128 }
 0x2ac   :  { %v1815_v45 = vpop.permute.xlu0 %1814 }
 0x2ad   :  { %3709 = vmatprep.subr.bf16.mxu0 %v1815_v45 }
 0x2ae   :  { %3710 = vmatpush3.bf16.msra.mxu0 %v1815_v45 }
 0x2af   :  { %2648 = vxpose.xlu0.c.b16.cont [4/8] %v6271_v20, 128  ;;  %3743 = vmatprep.subr.bf16.mxu0 %v6396_v44  ;;  %v7618_v20 = vld [vmem:[#allocation42_spill] sm:$0xff] }
 0x2b0   :  { %3688 = vmatmul.mubr.bf16.gmra.mrb[24].mxu0 %v960_v55 }
 0x2b1   :  { %3691 = vmatprep.mubr.bf16.mxu0 %v961_v5 }
 0x2b3   :  { %2649 = vxpose.xlu0.c.b16.cont [5/8] %v6280_v40, 128 }
 0x2b7   :  { %2650 = vxpose.xlu0.c.b16.cont [6/8] %v6284_v57, 128 }
 0x2b8   :  { %3692 = vmatmul.mubr.bf16.gmra.mrb[28].mxu0 %v962_v2 }
 0x2bb   :  { %2651 = vxpose.xlu0.c.b16.cont [7/8] %v6316_v53, 128  ;;  %v7609_v53 = vld [vmem:[#allocation22_spill] sm:$0xff] }
 0x2be   :  { %v1776_v56 = vpop.trf.xlu0 }
 0x2bf   :  { %2652 = vxpose.xlu0.c.b16.end [8/8] %v6318_v58, 128  ;;  %3711 = vmatprep.mubr.bf16.mxu0 %v1776_v56 }
 0x2c2   :  { %v1777_v46 = vpop.trf.xlu0 }
 0x2c3   :  { %3712 = vmatmul.mubr.bf16.vlgmr.msra.gmra.mrb[32].mxu0 %v1777_v46 }
 0x2c4   :  { %3744 = vmatpush3.bf16.msra.mxu0 %v6396_v44 }
 0x2c5   :  { %3745 = vmatprep.subr.bf16.mxu0 %v6400_v19 }
 0x2c6   :  { %v1778_v32 = vpop.trf.xlu0 }
 0x2c7   :  { %3715 = vmatprep.mubr.bf16.mxu0 %v1778_v32 }
 0x2c8   :  { %3746 = vmatpush3.bf16.msra.mxu0 %v6400_v19  ;;  %3815 = vset.pattern.permute.xlu0 %v7603_v30  ;;  %v1793_v19 = vpop.trf.xlu1 }
 0x2c9   :  { %3747 = vmatprep.subr.bf16.mxu0 %v6406_v8 }
 0x2ca   :  { %v1779_v18 = vpop.trf.xlu0 }
 0x2cb   :  { %3716 = vmatmul.mubr.bf16.gmra.mrb[36].mxu0 %v1779_v18 }
 0x2cc   :  { %3748 = vmatpush3.bf16.msra.mxu0 %v6406_v8  ;;  %v1794_v10 = vpop.trf.xlu1 }
 0x2cd   :  { %3749 = vmatprep.subr.bf16.mxu0 %v6411_v52 }
 0x2ce   :  { %v1780_v13 = vpop.trf.xlu0 }
 0x2cf   :  { %3719 = vmatprep.mubr.bf16.mxu0 %v1780_v13 }
 0x2d0   :  { %3750 = vmatpush3.bf16.msra.mxu0 %v6411_v52  ;;  %v1795_v55 = vpop.trf.xlu1 }
 0x2d1   :  { %3751 = vmatprep.subr.bf16.mxu0 %v2686_v60 }
 0x2d2   :  { %v1781_v44 = vpop.trf.xlu0 }
 0x2d3   :  { %3720 = vmatmul.mubr.bf16.gmra.mrb[40].mxu0 %v1781_v44 }
 0x2d4   :  { %3752 = vmatpush3.bf16.msra.mxu0 %v2686_v60  ;;  %v1796_v8 = vpop.trf.xlu1 }
 0x2d6   :  { %v1782_v30 = vpop.trf.xlu0 }
 0x2d7   :  { %3723 = vmatprep.mubr.bf16.mxu0 %v1782_v30 }
 0x2d8   :  { %v1797_v45 = vpop.trf.xlu1 }
 0x2da   :  { %v1783_v23 = vpop.trf.xlu0 }
 0x2db   :  { %3724 = vmatmul.mubr.bf16.gmra.mrb[44].mxu0 %v1783_v23 }
 0x2dc   :  { %3727 = vmatprep.mubr.bf16.mxu0 %v1792_v11  ;;  %v1798_v52 = vpop.trf.xlu1 }
 0x2e0   :  { %v1799_v46 = vpop.trf.xlu1 }
 0x2e3   :  { %3728 = vmatmul.mubr.bf16.gmra.mrb[48].mxu0 %v1793_v19 }
 0x2e4   :  { %3731 = vmatprep.mubr.bf16.mxu0 %v1794_v10  ;;  %v2669_v11 = vpop.trf.xlu1 }
 0x2e8   :  { %v2670_v30 = vpop.trf.xlu1 }
 0x2eb   :  { %3732 = vmatmul.mubr.bf16.gmra.mrb[52].mxu0 %v1795_v55 }
 0x2ec   :  { %3735 = vmatprep.mubr.bf16.mxu0 %v1796_v8  ;;  %v2671_v10 = vpop.trf.xlu1 }
 0x2ef   :  { %v2688_v5 = vpop.permute.xlu0 %2687 }
 0x2f0   :  { %3753 = vmatprep.subr.bf16.mxu0 %v2688_v5  ;;  %v2672_v8 = vpop.trf.xlu1 }
 0x2f1   :  { %3754 = vmatpush3.bf16.msra.mxu0 %v2688_v5 }
 0x2f3   :  { %3736 = vmatmul.mubr.bf16.gmra.mrb[56].mxu0 %v1797_v45  ;;  %v2690_v2 = vpop.permute.xlu0 %2689 }
 0x2f4   :  { %3755 = vmatprep.subr.bf16.mxu0 %v2690_v2  ;;  %3739 = vmatprep.mubr.bf16.mxu0 %v1798_v52  ;;  %v2673_v45 = vpop.trf.xlu1 }
 0x2f5   :  { %3756 = vmatpush3.bf16.msra.mxu0 %v2690_v2 }
 0x2f7   :  { %v2692_v56 = vpop.permute.xlu0 %2691 }
 0x2f8   :  { %3757 = vmatprep.subr.bf16.mxu0 %v2692_v56  ;;  %v2674_v5 = vpop.trf.xlu1 }
 0x2f9   :  { %3758 = vmatpush3.bf16.msra.mxu0 %v2692_v56 }
 0x2fb   :  { %3740 = vmatmul.mubr.bf16.gmra.mrb[60].mxu0 %v1799_v46 }
 0x2fc   :  { %v2675_v52 = vpop.trf.xlu1 }
 0x300   :  { %v2676_v2 = vpop.trf.xlu1 }
 0x309   :  { %v2653_v32 = vpop.trf.xlu0 }
 0x30a   :  { %3759 = vmatprep.mubr.bf16.mxu0 %v2653_v32 }
 0x30d   :  { %v2654_v18 = vpop.trf.xlu0 }
 0x30e   :  { %3760 = vmatmul.mubr.bf16.vlgmr.msra.gmra.mrb[64].mxu0 %v2654_v18 }
 0x311   :  { %v2655_v60 = vpop.trf.xlu0 }
 0x312   :  { %3763 = vmatprep.mubr.bf16.mxu0 %v2655_v60 }
 0x315   :  { %v2656_v13 = vpop.trf.xlu0 }
 0x316   :  { %3764 = vmatmul.mubr.bf16.gmra.mrb[68].mxu0 %v2656_v13 }
 0x319   :  { %v2657_v44 = vpop.trf.xlu0 }
 0x31a   :  { %3767 = vmatprep.mubr.bf16.mxu0 %v2657_v44 }
 0x31d   :  { %v2658_v19 = vpop.trf.xlu0 }
 0x31e   :  { %3768 = vmatmul.mubr.bf16.gmra.mrb[72].mxu0 %v2658_v19 }
 0x321   :  { %v2659_v23 = vpop.trf.xlu0 }
 0x322   :  { %3771 = vmatprep.mubr.bf16.mxu0 %v2659_v23 }
 0x325   :  { %v2660_v55 = vpop.trf.xlu0 }
 0x326   :  { %3772 = vmatmul.mubr.bf16.gmra.mrb[76].mxu0 %v2660_v55  ;;  %v7604_v55 = vld [vmem:[#allocation19_spill] sm:$0xff] }
 0x327   :  { %3775 = vmatprep.mubr.bf16.mxu0 %v2669_v11 }
 0x32e   :  { %3776 = vmatmul.mubr.bf16.gmra.mrb[80].mxu0 %v2670_v30  ;;  %v7608_v30 = vld [vmem:[#allocation20_spill] sm:$0xff] }
 0x32f   :  { %3779 = vmatprep.mubr.bf16.mxu0 %v2671_v10 }
 0x336   :  { %3780 = vmatmul.mubr.bf16.gmra.mrb[84].mxu0 %v2672_v8  ;;  %v7605_v8 = vld [vmem:[#allocation21_spill] sm:$0xff] }
 0x337   :  { %3783 = vmatprep.mubr.bf16.mxu0 %v2673_v45  ;;  %v360_v45 = vadd.f32 %v7605_v8, %v7604_v55  ;;  %v7610_v55 = vld [vmem:[#allocation27_spill] sm:$0xff]  ;;  %v7611_v8 = vld [vmem:[#allocation28_spill] sm:$0xff] }
 0x339   :  { %361 = vadd.xlane.f32.xlu1 %v360_v45  ;;  %v369_v45 = vadd.f32 %v7611_v8, %v7610_v55  ;;  %v7616_v55 = vld [vmem:[#allocation38_spill] sm:$0xff]  ;;  %v7617_v8 = vld [vmem:[#allocation39_spill] sm:$0xff] }
 0x33a   :  { %v378_v40 = vadd.f32 %v7617_v8, %v7616_v55  ;;  %v7625_v55 = vld [vmem:[#allocation55_spill] sm:$0xff] }
 0x33e   :  { %3784 = vmatmul.mubr.bf16.gmra.mrb[88].mxu0 %v2674_v5 }
 0x33f   :  { %3787 = vmatprep.mubr.bf16.mxu0 %v2675_v52 }
 0x346   :  { %3788 = vmatmul.mubr.bf16.gmra.mrb[92].mxu0 %v2676_v2 }
 0x353   :  { %v3665_v56 = vpop.f32.mrb[0].mxu0 }
 0x354   :  { %v1045_v46 = vpop.f32.mrb[1].mxu0 }
 0x355   :  { %v3666_v32 = vpop.f32.mrb[2].mxu0 }
 0x356   :  { %v1173_v18 = vpack.c.bf16 %v3666_v32, %v3665_v56  ;;  %v1048_v60 = vpop.f32.mrb[3].mxu0  ;;  %v7606_v32 = vld [vmem:[#allocation25_spill] sm:$0xff] }
 0x357   :  { %v1172_v13 = vpack.c.bf16 %v1048_v60, %v1045_v46  ;;  %v7607_v60 = vld [vmem:[#allocation26_spill] sm:$0xff] }
 0x358   :  { %v366_v58 = vadd.f32 %v7607_v60, %v7606_v32 }
 0x35a   :  { %367 = vadd.xlane.f32.xlu1 %v366_v58  ;;  %v7615_v58 = vld [vmem:[#allocation35_spill] sm:$0xff] }
 0x35b   :  { %v6430_v44 = vpop.f32.mrb[4].mxu0 }
 0x35c   :  { %v1061_v11 = vpop.f32.mrb[5].mxu0 }
 0x35d   :  { %v6432_v19 = vpop.f32.mrb[6].mxu0 }
 0x35e   :  { %v1064_v23 = vpop.f32.mrb[7].mxu0  ;;  %370 = vadd.xlane.f32.xlu1 %v369_v45 }
 0x35f   :  { %v1174_v10 = vpack.c.bf16 %v1064_v23, %v1061_v11  ;;  %v363_v11 = vadd.f32 %v7609_v53, %v7608_v30  ;;  %v7613_v53 = vld [vmem:[#allocation32_spill] sm:$0xff] }
 0x360   :  { %v372_v30 = vadd.f32 %v7613_v53, %v7612_v39  ;;  %v7620_v39 = vld [vmem:[#allocation46_spill] sm:$0xff]  ;;  %v7621_v53 = vld [vmem:[#allocation47_spill] sm:$0xff] }
 0x361   :  { %364 = vadd.xlane.f32.xlu0 %v363_v11 }
 0x362   :  { %373 = vadd.xlane.f32.xlu1 %v372_v30 }
 0x363   :  { %v6438_v5 = vpop.f32.mrb[8].mxu0 }
 0x364   :  { %v6440_v52 = vpop.f32.mrb[9].mxu0 }
 0x365   :  { %v6442_v2 = vpop.f32.mrb[10].mxu0 }
 0x366   :  { %v1080_v46 = vpop.f32.mrb[11].mxu0  ;;  %379 = vadd.xlane.f32.xlu1 %v378_v40 }
 0x367   :  { %v1176_v23 = vpack.c.bf16 %v1080_v46, %v6440_v52  ;;  %v7614_v52 = vld [vmem:[#allocation34_spill] sm:$0xff] }
 0x368   :  { %v375_v46 = vadd.f32 %v7615_v58, %v7614_v52  ;;  %v384_v52 = vadd.f32 %v7621_v53, %v7620_v39  ;;  %v7622_v58 = vld [vmem:[#allocation50_spill] sm:$0xff] }
 0x36a   :  { %376 = vadd.xlane.f32.xlu0 %v375_v46  ;;  %385 = vadd.xlane.f32.xlu1 %v384_v52  ;;  %v7624_v46 = vld [vmem:[#allocation54_spill] sm:$0xff] }
 0x36b   :  { %v6453_v49 = vpop.f32.mrb[12].mxu0  ;;  %v390_v8 = vadd.f32 %v7625_v55, %v7624_v46 }
 0x36c   :  { %v6455_v57 = vpop.f32.mrb[13].mxu0 }
 0x36d   :  { %v6457_v56 = vpop.f32.mrb[14].mxu0 }
 0x36e   :  { %v1179_v32 = vpack.c.bf16 %v6457_v56, %v6453_v49  ;;  %v1096_v60 = vpop.f32.mrb[15].mxu0  ;;  %v381_v49 = vadd.f32 %v7619_v62, %v7618_v20  ;;  %391 = vadd.xlane.f32.xlu1 %v390_v8  ;;  %v7626_v20 = vld [vmem:[#allocation58_spill] sm:$0xff] }
 0x36f   :  { %v1178_v11 = vpack.c.bf16 %v1096_v60, %v6455_v57  ;;  %v7623_v57 = vld [vmem:[#allocation51_spill] sm:$0xff] }
 0x370   :  { %382 = vadd.xlane.f32.xlu0 %v381_v49  ;;  %v387_v60 = vadd.f32 %v7623_v57, %v7622_v58  ;;  %v7630_v58 = vld [vmem:[#allocation66_spill] sm:$0xff]  ;;  %v7631_v57 = vld [vmem:[#allocation67_spill] sm:$0xff] }
 0x373   :  { %v3681_v45 = vpop.f32.mrb[16].mxu0 }
 0x374   :  { %v1109_v35 = vpop.f32.mrb[17].mxu0  ;;  %388 = vadd.xlane.f32.xlu0 %v387_v60 }
 0x375   :  { %v3682_v56 = vpop.f32.mrb[18].mxu0 }
 0x376   :  { %v1181_v21 = vpack.c.bf16 %v3682_v56, %v3681_v45  ;;  %v1112_v24 = vpop.f32.mrb[19].mxu0  ;;  %v7627_v45 = vld [vmem:[#allocation59_spill] sm:$0xff] }
 0x377   :  { %v1180_v30 = vpack.c.bf16 %v1112_v24, %v1109_v35  ;;  %v393_v49 = vadd.f32 %v7627_v45, %v7626_v20  ;;  %v7628_v24 = vld [vmem:[#allocation62_spill] sm:$0xff]  ;;  %v7629_v35 = vld [vmem:[#allocation63_spill] sm:$0xff] }
 0x378   :  { %v396_v52 = vadd.f32 %v7629_v35, %v7628_v24 }
 0x379   :  { %3407 = vmatprep.subr.bf16.mxu1 %v1180_v30  ;;  %394 = vadd.xlane.f32.xlu0 %v393_v49  ;;  %v399_v30 = vadd.f32 %v7631_v57, %v7630_v58 }
 0x37a   :  { %3408 = vmatpush3.bf16.msra.mxu1 %v1172_v13  ;;  %397 = vadd.xlane.f32.xlu1 %v396_v52 }
 0x37b   :  { %v3685_v40 = vpop.f32.mrb[20].mxu0  ;;  %3409 = vmatprep.subr.bf16.mxu1 %v1181_v21 }
 0x37c   :  { %v1125_v62 = vpop.f32.mrb[21].mxu0 }
 0x37d   :  { %v3686_v56 = vpop.f32.mrb[22].mxu0  ;;  %400 = vadd.xlane.f32.xlu0 %v399_v30 }
 0x37e   :  { %v1183_v39 = vpack.c.bf16 %v3686_v56, %v3685_v40  ;;  %v1128_v53 = vpop.f32.mrb[23].mxu0  ;;  %3410 = vmatpush3.bf16.msra.mxu1 %v1173_v18  ;;  %v7632_v18 = vpack.c.bf16 %v6432_v19, %v6430_v44  ;;  %v7633_v56 = vpack.c.bf16 %v6442_v2, %v6438_v5 }
 0x37f   :  { %v1182_v13 = vpack.c.bf16 %v1128_v53, %v1125_v62 }
 0x381   :  { %3411 = vmatprep.subr.bf16.mxu1 %v1182_v13 }
 0x382   :  { %3412 = vmatpush3.bf16.msra.mxu1 %v1174_v10 }
 0x383   :  { %v3689_v21 = vpop.f32.mrb[24].mxu0  ;;  %3413 = vmatprep.subr.bf16.mxu1 %v1183_v39 }
 0x384   :  { %v1141_v60 = vpop.f32.mrb[25].mxu0 }
 0x385   :  { %v3690_v46 = vpop.f32.mrb[26].mxu0 }
 0x386   :  { %v1185_v55 = vpack.c.bf16 %v3690_v46, %v3689_v21  ;;  %v1144_v8 = vpop.f32.mrb[27].mxu0  ;;  %3414 = vmatpush3.bf16.msra.mxu1 %v7632_v18 }
 0x387   :  { %v1184_v40 = vpack.c.bf16 %v1144_v8, %v1141_v60 }
 0x389   :  { %3415 = vmatprep.subr.bf16.mxu1 %v1184_v40 }
 0x38a   :  { %3416 = vmatpush3.bf16.msra.mxu1 %v1176_v23 }
 0x38b   :  { %v3693_v20 = vpop.f32.mrb[28].mxu0  ;;  %3417 = vmatprep.subr.bf16.mxu1 %v1185_v55 }
 0x38c   :  { %v1157_v62 = vpop.f32.mrb[29].mxu0 }
 0x38d   :  { %v3694_v45 = vpop.f32.mrb[30].mxu0 }
 0x38e   :  { %v1187_v49 = vpack.c.bf16 %v3694_v45, %v3693_v20  ;;  %v1160_v10 = vpop.f32.mrb[31].mxu0  ;;  %3418 = vmatpush3.bf16.msra.mxu1 %v7633_v56 }
 0x38f   :  { %v1186_v39 = vpack.c.bf16 %v1160_v10, %v1157_v62 }
 0x391   :  { %3419 = vmatprep.subr.bf16.mxu1 %v1186_v39 }
 0x392   :  { %3420 = vmatpush3.bf16.msra.mxu1 %v1178_v11 }
 0x393   :  { %3421 = vmatprep.subr.bf16.mxu1 %v1187_v49 }
 0x396   :  { %3422 = vmatpush3.bf16.msra.mxu1 %v1179_v32  ;;  %v3713_v44 = vpop.f32.mrb[32].mxu0 }
 0x397   :  { %v1858_v19 = vpop.f32.mrb[33].mxu0 }
 0x398   :  { %v3714_v53 = vpop.f32.mrb[34].mxu0 }
 0x399   :  { %1221 = vmatmul.mubr.bf16.vlgmr.msra.gmra.mrb[0].mxu1 %v6338_v7  ;;  %v1986_v23 = vpack.c.bf16 %v3714_v53, %v3713_v44  ;;  %v1861_v24 = vpop.f32.mrb[35].mxu0 }
 0x39a   :  { %1228 = vmatprep.mubr.bf16.mxu1 %v6299_v54  ;;  %v1985_v35 = vpack.c.bf16 %v1861_v24, %v1858_v19 }
 0x39e   :  { %v3717_v52 = vpop.f32.mrb[36].mxu0 }
 0x39f   :  { %v1874_v58 = vpop.f32.mrb[37].mxu0 }
 0x3a0   :  { %v3718_v57 = vpop.f32.mrb[38].mxu0 }
 0x3a1   :  { %1229 = vmatmul.mubr.bf16.gmra.mrb[4].mxu1 %v6340_v1  ;;  %v1988_v5 = vpack.c.bf16 %v3718_v57, %v3717_v52  ;;  %v1877_v2 = vpop.f32.mrb[39].mxu0 }
 0x3a2   :  { %1236 = vmatprep.mubr.bf16.mxu1 %v6301_v61  ;;  %v1987_v32 = vpack.c.bf16 %v1877_v2, %v1874_v58 }
 0x3a6   :  { %v3721_v11 = vpop.f32.mrb[40].mxu0 }
 0x3a7   :  { %v1890_v30 = vpop.f32.mrb[41].mxu0 }
 0x3a8   :  { %v3722_v13 = vpop.f32.mrb[42].mxu0 }
 0x3a9   :  { %1237 = vmatmul.mubr.bf16.gmra.mrb[8].mxu1 %v6344_v26  ;;  %v1990_v7 = vpack.c.bf16 %v3722_v13, %v3721_v11  ;;  %v1893_v21 = vpop.f32.mrb[43].mxu0  ;;  %v7634_v11 = vmov 0.0  }
 0x3aa   :  { %1244 = vmatprep.mubr.bf16.mxu1 %v6305_v9  ;;  %v1989_v54 = vpack.c.bf16 %v1893_v21, %v1890_v30  ;;  %93 = vst.msk [vmem:[#allocation2] sm:$0xff] %vm92_vm11, %v7634_v11  ;;  %94 = vst.msk [vmem:[#allocation2 + $0x8] sm:$0xff] %vm92_vm11, %v7634_v11 }
 0x3ab   :  { %95 = vst.msk [vmem:[#allocation2 + $0x10] sm:$0xff] %vm92_vm11, %v7634_v11  ;;  %96 = vst.msk [vmem:[#allocation2 + $0x18] sm:$0xff] %vm92_vm11, %v7634_v11 }
 0x3ac   :  { %97 = vst.msk [vmem:[#allocation2 + $0x20] sm:$0xff] %vm92_vm11, %v7634_v11  ;;  %98 = vst.msk [vmem:[#allocation2 + $0x28] sm:$0xff] %vm92_vm11, %v7634_v11 }
 0x3ad   :  { %99 = vst.msk [vmem:[#allocation2 + $0x30] sm:$0xff] %vm92_vm11, %v7634_v11  ;;  %100 = vst.msk [vmem:[#allocation2 + $0x38] sm:$0xff] %vm92_vm11, %v7634_v11 }
 0x3ae   :  { %v3725_v60 = vpop.f32.mrb[44].mxu0  ;;  %101 = vst.msk [vmem:[#allocation2 + $0x40] sm:$0xff] %vm92_vm11, %v7634_v11  ;;  %102 = vst.msk [vmem:[#allocation2 + $0x48] sm:$0xff] %vm92_vm11, %v7634_v11 }
 0x3af   :  { %v1906_v46 = vpop.f32.mrb[45].mxu0  ;;  %103 = vst.msk [vmem:[#allocation2 + $0x50] sm:$0xff] %vm92_vm11, %v7634_v11  ;;  %104 = vst.msk [vmem:[#allocation2 + $0x58] sm:$0xff] %vm92_vm11, %v7634_v11 }
 0x3b0   :  { %v3726_v55 = vpop.f32.mrb[46].mxu0  ;;  %105 = vst.msk [vmem:[#allocation2 + $0x60] sm:$0xff] %vm92_vm11, %v7634_v11  ;;  %106 = vst.msk [vmem:[#allocation2 + $0x68] sm:$0xff] %vm92_vm11, %v7634_v11 }
 0x3b1   :  { %1245 = vmatmul.mubr.bf16.gmra.mrb[12].mxu1 %v6346_v25  ;;  %v1992_v1 = vpack.c.bf16 %v3726_v55, %v3725_v60  ;;  %v1909_v8 = vpop.f32.mrb[47].mxu0  ;;  %107 = vst.msk [vmem:[#allocation2 + $0x70] sm:$0xff] %vm92_vm11, %v7634_v11  ;;  %108 = vst.msk [vmem:[#allocation2 + $0x78] sm:$0xff] %vm92_vm11, %v7634_v11 }
 0x3b2   :  { %1252 = vmatprep.mubr.bf16.mxu1 %v6309_v3  ;;  %v1991_v61 = vpack.c.bf16 %v1909_v8, %v1906_v46  ;;  %110 = vst.msk [vmem:[#allocation3] sm:$0xff] %vm109_vm8, %v7634_v11  ;;  %111 = vst.msk [vmem:[#allocation3 + $0x8] sm:$0xff] %vm109_vm8, %v7634_v11 }
 0x3b3   :  { %112 = vst.msk [vmem:[#allocation3 + $0x10] sm:$0xff] %vm109_vm8, %v7634_v11  ;;  %113 = vst.msk [vmem:[#allocation3 + $0x18] sm:$0xff] %vm109_vm8, %v7634_v11 }
 0x3b4   :  { %114 = vst.msk [vmem:[#allocation3 + $0x20] sm:$0xff] %vm109_vm8, %v7634_v11  ;;  %115 = vst.msk [vmem:[#allocation3 + $0x28] sm:$0xff] %vm109_vm8, %v7634_v11 }
 0x3b5   :  { %116 = vst.msk [vmem:[#allocation3 + $0x30] sm:$0xff] %vm109_vm8, %v7634_v11  ;;  %117 = vst.msk [vmem:[#allocation3 + $0x38] sm:$0xff] %vm109_vm8, %v7634_v11 }
 0x3b6   :  { %v3729_v18 = vpop.f32.mrb[48].mxu0  ;;  %118 = vst.msk [vmem:[#allocation3 + $0x40] sm:$0xff] %vm109_vm8, %v7634_v11  ;;  %119 = vst.msk [vmem:[#allocation3 + $0x48] sm:$0xff] %vm109_vm8, %v7634_v11 }
 0x3b7   :  { %v1922_v40 = vpop.f32.mrb[49].mxu0  ;;  %120 = vst.msk [vmem:[#allocation3 + $0x50] sm:$0xff] %vm109_vm8, %v7634_v11  ;;  %121 = vst.msk [vmem:[#allocation3 + $0x58] sm:$0xff] %vm109_vm8, %v7634_v11 }
 0x3b8   :  { %v3730_v20 = vpop.f32.mrb[50].mxu0  ;;  %122 = vst.msk [vmem:[#allocation3 + $0x60] sm:$0xff] %vm109_vm8, %v7634_v11  ;;  %123 = vst.msk [vmem:[#allocation3 + $0x68] sm:$0xff] %vm109_vm8, %v7634_v11 }
 0x3b9   :  { %v1994_v62 = vpack.c.bf16 %v3730_v20, %v3729_v18  ;;  %1253 = vmatmul.mubr.bf16.gmra.mrb[16].mxu1 %v6351_v0  ;;  %v1925_v26 = vpop.f32.mrb[51].mxu0  ;;  %124 = vst.msk [vmem:[#allocation3 + $0x70] sm:$0xff] %vm109_vm8, %v7634_v11  ;;  %125 = vst.msk [vmem:[#allocation3 + $0x78] sm:$0xff] %vm109_vm8, %v7634_v11  ;;  %v7635_v18 = vld [vmem:[#allocation75_spill] sm:$0xff] }
 0x3ba   :  { %v1993_v45 = vpack.c.bf16 %v1925_v26, %v1922_v40  ;;  %1260 = vmatprep.mubr.bf16.mxu1 %v6314_v4  ;;  %v346_v8 = vld [vmem:[#allocation3 + $0x10] sm:$0xff]  ;;  %v7636_v40 = vld [vmem:[#allocation76_spill] sm:$0xff] }
 0x3bb   :  { %v405_v20 = vadd.f32 %v7636_v40, %v7635_v18 }
 0x3bc   :  { %3495 = vmatprep.subr.bf16.mxu1 %v1993_v45 }
 0x3bd   :  { %3496 = vmatpush3.bf16.msra.mxu1 %v1985_v35  ;;  %406 = vadd.xlane.f32.xlu0 %v405_v20 }
 0x3be   :  { %v3733_v9 = vpop.f32.mrb[52].mxu0  ;;  %3497 = vmatprep.subr.bf16.mxu1 %v1994_v62 }
 0x3bf   :  { %v1938_v25 = vpop.f32.mrb[53].mxu0 }
 0x3c0   :  { %v3734_v49 = vpop.f32.mrb[54].mxu0 }
 0x3c1   :  { %v1996_v10 = vpack.c.bf16 %v3734_v49, %v3733_v9  ;;  %1261 = vmatmul.mubr.bf16.gmra.mrb[20].mxu1 %v6356_v59  ;;  %v1941_v3 = vpop.f32.mrb[55].mxu0 }
 0x3c2   :  { %v1995_v56 = vpack.c.bf16 %v1941_v3, %v1938_v25  ;;  %3498 = vmatpush3.bf16.msra.mxu1 %v1986_v23  ;;  %1268 = vmatprep.mubr.bf16.mxu1 %v6320_v34  ;;  %v347_v25 = vld [vmem:[#allocation3 + $0x18] sm:$0xff] }
 0x3c3   :  { %v7637_v3 = vld [vmem:[#allocation70_spill] sm:$0xff] }
 0x3c4   :  { %3499 = vmatprep.subr.bf16.mxu1 %v1995_v56  ;;  %v7638_v56 = vld [vmem:[#allocation72_spill] sm:$0xff] }
 0x3c6   :  { %3500 = vmatpush3.bf16.msra.mxu1 %v1987_v32  ;;  %v3737_v0 = vpop.f32.mrb[56].mxu0  ;;  %v362_v30 = vpop.xlane.xlu1 %361 }
 0x3c7   :  { %v1954_v39 = vpop.f32.mrb[57].mxu0  ;;  %3501 = vmatprep.subr.bf16.mxu1 %v1996_v10 }
 0x3c8   :  { %v3738_v4 = vpop.f32.mrb[58].mxu0 }
 0x3c9   :  { %v1998_v44 = vpack.c.bf16 %v3738_v4, %v3737_v0  ;;  %1269 = vmatmul.mubr.bf16.gmra.mrb[24].mxu1 %v6360_v41  ;;  %v1957_v19 = vpop.f32.mrb[59].mxu0  ;;  %v402_v0 = vadd.f32 %v7638_v56, %v7637_v3 }
 0x3ca   :  { %v1997_v53 = vpack.c.bf16 %v1957_v19, %v1954_v39  ;;  %3502 = vmatpush3.bf16.msra.mxu1 %v1988_v5  ;;  %1276 = vmatprep.mubr.bf16.mxu1 %v6322_v47  ;;  %v348_v39 = vld [vmem:[#allocation3 + $0x20] sm:$0xff] }
 0x3cb   :  { %403 = vadd.xlane.f32.xlu1 %v402_v0 }
 0x3cc   :  { %3503 = vmatprep.subr.bf16.mxu1 %v1997_v53 }
 0x3ce   :  { %3504 = vmatpush3.bf16.msra.mxu1 %v1989_v54  ;;  %v3741_v59 = vpop.f32.mrb[60].mxu0 }
 0x3cf   :  { %v1970_v23 = vpop.f32.mrb[61].mxu0  ;;  %3505 = vmatprep.subr.bf16.mxu1 %v1998_v44 }
 0x3d0   :  { %v3742_v34 = vpop.f32.mrb[62].mxu0 }
 0x3d1   :  { %v2000_v24 = vpack.c.bf16 %v3742_v34, %v3741_v59  ;;  %1277 = vmatmul.mubr.bf16.gmra.mrb[28].mxu1 %v6362_v36  ;;  %v1973_v35 = vpop.f32.mrb[63].mxu0  ;;  %v350_v34 = vld [vmem:[#allocation3 + $0x30] sm:$0xff] }
 0x3d2   :  { %v1999_v52 = vpack.c.bf16 %v1973_v35, %v1970_v23  ;;  %3506 = vmatpush3.bf16.msra.mxu1 %v1990_v7  ;;  %2033 = vmatprep.mubr.bf16.mxu1 %v7586_v51  ;;  %v349_v23 = vld [vmem:[#allocation3 + $0x28] sm:$0xff] }
 0x3d4   :  { %3507 = vmatprep.subr.bf16.mxu1 %v1999_v52 }
 0x3d6   :  { %3508 = vmatpush3.bf16.msra.mxu1 %v1991_v61  ;;  %v345_v61 = vld [vmem:[#allocation3 + $0x8] sm:$0xff] }
 0x3d7   :  { %3509 = vmatprep.subr.bf16.mxu1 %v2000_v24 }
 0x3da   :  { %3510 = vmatpush3.bf16.msra.mxu1 %v1992_v1  ;;  %v344_v1 = vld [vmem:[#allocation3] sm:$0xff] }
 0x3dd   :  { %2034 = vmatmul.mubr.bf16.vlgmr.msra.gmra.mrb[32].mxu1 %v7592_v27 }
 0x3de   :  { %2041 = vmatprep.mubr.bf16.mxu1 %v7587_v33 }
 0x3e1   :  { %v6506_v47 = vpop.f32.mrb[64].mxu0 }
 0x3e2   :  { %v6508_v41 = vpop.f32.mrb[65].mxu0 }
 0x3e3   :  { %v6510_v58 = vpop.f32.mrb[66].mxu0 }
 0x3e4   :  { %v2863_v36 = vpack.c.bf16 %v6510_v58, %v6506_v47  ;;  %v6514_v57 = vpop.f32.mrb[67].mxu0 }
 0x3e5   :  { %2042 = vmatmul.mubr.bf16.gmra.mrb[36].mxu1 %v7594_v28  ;;  %v2862_v51 = vpack.c.bf16 %v6514_v57, %v6508_v41  ;;  %v355_v57 = vld [vmem:[#allocation3 + $0x58] sm:$0xff] }
 0x3e6   :  { %2049 = vmatprep.mubr.bf16.mxu1 %v7588_v63 }
 0x3e7   :  { %v368_v54 = vpop.xlane.xlu1 %367 }
 0x3e8   :  { %v410_v45 = vadd.f32 %v368_v54, %v346_v8 }
 0x3e9   :  { %v6520_v27 = vpop.f32.mrb[68].mxu0 }
 0x3ea   :  { %v6522_v33 = vpop.f32.mrb[69].mxu0  ;;  %427 = vst.msk [vmem:[#allocation3 + $0x10] sm:$0xff] %vm109_vm8, %v410_v45 }
 0x3eb   :  { %v6524_v5 = vpop.f32.mrb[70].mxu0  ;;  %v371_v62 = vpop.xlane.xlu1 %370 }
 0x3ec   :  { %v2865_v2 = vpack.c.bf16 %v6524_v5, %v6520_v27  ;;  %v6528_v32 = vpop.f32.mrb[71].mxu0  ;;  %v411_v10 = vadd.f32 %v371_v62, %v347_v25 }
 0x3ed   :  { %2050 = vmatmul.mubr.bf16.gmra.mrb[40].mxu1 %v7596_v43  ;;  %v2864_v28 = vpack.c.bf16 %v6528_v32, %v6522_v33 }
 0x3ee   :  { %2057 = vmatprep.mubr.bf16.mxu1 %v7589_v38  ;;  %v365_v60 = vpop.xlane.xlu0 %364  ;;  %428 = vst.msk [vmem:[#allocation3 + $0x18] sm:$0xff] %vm109_vm8, %v411_v10 }
 0x3ef   :  { %v409_v9 = vadd.f32 %v365_v60, %v345_v61  ;;  %v374_v44 = vpop.xlane.xlu1 %373  ;;  %v351_v60 = vld [vmem:[#allocation3 + $0x38] sm:$0xff] }
 0x3f0   :  { %v412_v19 = vadd.f32 %v374_v44, %v348_v39  ;;  %v356_v39 = vld [vmem:[#allocation3 + $0x60] sm:$0xff] }
 0x3f1   :  { %v6566_v63 = vpop.f32.mrb[72].mxu0  ;;  %426 = vst.msk [vmem:[#allocation3 + $0x8] sm:$0xff] %vm109_vm8, %v409_v9 }
 0x3f2   :  { %v6568_v43 = vpop.f32.mrb[73].mxu0  ;;  %429 = vst.msk [vmem:[#allocation3 + $0x20] sm:$0xff] %vm109_vm8, %v412_v19  ;;  %v3093_v19 = vld [vmem:[#allocation3 + $0x10] sm:$0xff] }
 0x3f3   :  { %v6570_v13 = vpop.f32.mrb[74].mxu0  ;;  %v380_v52 = vpop.xlane.xlu1 %379  ;;  %vm3109_vm4 = vcmp.gt.f32.partialorder %v3093_v19, 0.0 }
 0x3f4   :  { %v2867_v38 = vpack.c.bf16 %v6570_v13, %v6566_v63  ;;  %v6606_v7 = vpop.f32.mrb[75].mxu0  ;;  %v414_v54 = vadd.f32 %v380_v52, %v350_v34 }
 0x3f5   :  { %2058 = vmatmul.mubr.bf16.gmra.mrb[44].mxu1 %v7597_v48  ;;  %v2866_v21 = vpack.c.bf16 %v6606_v7, %v6568_v43  ;;  %v408_v48 = vadd.f32 %v362_v30, %v344_v1  ;;  %v352_v1 = vld [vmem:[#allocation3 + $0x40] sm:$0xff] }
 0x3f6   :  { %2065 = vmatprep.mubr.bf16.mxu1 %v7590_v37  ;;  %431 = vst.msk [vmem:[#allocation3 + $0x30] sm:$0xff] %vm109_vm8, %v414_v54 }
 0x3f7   :  { %425 = vst.msk [vmem:[#allocation3] sm:$0xff] %vm109_vm8, %v408_v48  ;;  %v377_v59 = vpop.xlane.xlu0 %376  ;;  %v386_v18 = vpop.xlane.xlu1 %385  ;;  %v354_v48 = vld [vmem:[#allocation3 + $0x50] sm:$0xff] }
 0x3f8   :  { %v413_v35 = vadd.f32 %v377_v59, %v349_v23  ;;  %v416_v40 = vadd.f32 %v386_v18, %v352_v1  ;;  %v3092_v10 = vld [vmem:[#allocation3 + $0x8] sm:$0xff] }
 0x3f9   :  { %v6612_v46 = vpop.f32.mrb[76].mxu0  ;;  %4033 = vrcp.f32 %v3092_v10  ;;  %v357_v59 = vld [vmem:[#allocation3 + $0x68] sm:$0xff]  ;;  %v3095_v23 = vld [vmem:[#allocation3 + $0x20] sm:$0xff]  ;;  %vm3108_vm14 = vcmp.gt.f32.partialorder %v3092_v10, 0.0 }
 0x3fa   :  { %v6614_v55 = vpop.f32.mrb[77].mxu0  ;;  %430 = vst.msk [vmem:[#allocation3 + $0x28] sm:$0xff] %vm109_vm8, %v413_v35  ;;  %433 = vst.msk [vmem:[#allocation3 + $0x40] sm:$0xff] %vm109_vm8, %v416_v40  ;;  %vm3111_vm9 = vcmp.gt.f32.partialorder %v3095_v23, 0.0 }
 0x3fb   :  { %v6618_v26 = vpop.f32.mrb[78].mxu0  ;;  %v392_v25 = vpop.xlane.xlu1 %391 }
 0x3fc   :  { %v2869_v37 = vpack.c.bf16 %v6618_v26, %v6612_v46  ;;  %v6622_v49 = vpop.f32.mrb[79].mxu0  ;;  %v418_v41 = vadd.f32 %v392_v25, %v354_v48 }
 0x3fd   :  { %2066 = vmatmul.mubr.bf16.gmra.mrb[48].mxu1 %v7598_v42  ;;  %v2868_v4 = vpack.c.bf16 %v6622_v49, %v6614_v55  ;;  %v383_v8 = vpop.xlane.xlu0 %382 }
 0x3fe   :  { %2073 = vmatprep.mubr.bf16.mxu1 %v7591_v12  ;;  %v415_v61 = vadd.f32 %v383_v8, %v351_v60  ;;  %435 = vst.msk [vmem:[#allocation3 + $0x50] sm:$0xff] %vm109_vm8, %v418_v41 }
 0x400   :  { %432 = vst.msk [vmem:[#allocation3 + $0x38] sm:$0xff] %vm109_vm8, %v415_v61 }
 0x401   :  { %v3777_v53 = vpop.f32.mrb[80].mxu0  ;;  %v389_v62 = vpop.xlane.xlu0 %388  ;;  %v3096_v33 = vld [vmem:[#allocation3 + $0x28] sm:$0xff] }
 0x402   :  { %v2799_v42 = vpop.f32.mrb[81].mxu0  ;;  %vm3112_vm0 = vcmp.gt.f32.partialorder %v3096_v33, 0.0 }
 0x403   :  { %v3778_v24 = vpop.f32.mrb[82].mxu0 }
 0x404   :  { %v2871_v11 = vpack.c.bf16 %v3778_v24, %v3777_v53  ;;  %v2802_v30 = vpop.f32.mrb[83].mxu0 }
 0x405   :  { %2074 = vmatmul.mubr.bf16.gmra.mrb[52].mxu1 %v7599_v22  ;;  %v2870_v12 = vpack.c.bf16 %v2802_v30, %v2799_v42 }
 0x406   :  { %2081 = vmatprep.mubr.bf16.mxu1 %v7593_v6  ;;  %v353_v6 = vld [vmem:[#allocation3 + $0x48] sm:$0xff]  ;;  %v395_v44 = vpop.xlane.xlu0 %394 }
 0x407   :  { %3583 = vmatprep.subr.bf16.mxu1 %v2870_v12  ;;  %v417_v9 = vadd.f32 %v389_v62, %v353_v6  ;;  %v419_v47 = vadd.f32 %v395_v44, %v355_v57  ;;  %v398_v58 = vpop.xlane.xlu1 %397  ;;  %v3098_v27 = vld [vmem:[#allocation3 + $0x38] sm:$0xff]  ;;  %v3099_v12 = vld [vmem:[#allocation3 + $0x40] sm:$0xff] }
 0x408   :  { %3584 = vmatpush3.bf16.msra.mxu1 %v2862_v51  ;;  %v3091_v51 = vld [vmem:[#allocation3] sm:$0xff]  ;;  %vm3114_vm10 = vcmp.gt.f32.partialorder %v3098_v27, 0.0  ;;  %vm3115_vm12 = vcmp.gt.f32.partialorder %v3099_v12, 0.0 }
 0x409   :  { %v3781_v20 = vpop.f32.mrb[84].mxu0  ;;  %3585 = vmatprep.subr.bf16.mxu1 %v2871_v11  ;;  %434 = vst.msk [vmem:[#allocation3 + $0x48] sm:$0xff] %vm109_vm8, %v417_v9  ;;  %4035 = vrcp.f32 %v3091_v51  ;;  %436 = vst.msk [vmem:[#allocation3 + $0x58] sm:$0xff] %vm109_vm8, %v419_v47  ;;  %vm3107_vm7 = vcmp.gt.f32.partialorder %v3091_v51, 0.0  ;;  %v3097_v11 = vld [vmem:[#allocation3 + $0x30] sm:$0xff]  ;;  %v7640_v51 = vld [vmem:[#allocation111_spill] sm:$0xff] }
 0x40a   :  { %v2815_v22 = vpop.f32.mrb[85].mxu0  ;;  %4037 = vrcp.f32 %v3093_v19  ;;  %v401_v42 = vpop.xlane.xlu0 %400  ;;  %vm3113_vm5 = vcmp.gt.f32.partialorder %v3097_v11, 0.0  ;;  %v7643_v44 = vld [vmem:[#allocation91_spill] sm:$0xff]  ;;  %v7644_v19 = vld [vmem:[#allocation18_spill] sm:$0xff]  ;;  %v7645_v47 = vld [vmem:[#allocation97_spill] sm:$0xff] }
 0x40b   :  { %v3782_v45 = vpop.f32.mrb[86].mxu0  ;;  %v421_v24 = vadd.f32 %v401_v42, %v357_v59  ;;  %v1285_v59 = vld [vmem:[#allocation2] sm:$0xff] }
 0x40c   :  { %v2873_v3 = vpack.c.bf16 %v3782_v45, %v3781_v20  ;;  %v2818_v56 = vpop.f32.mrb[87].mxu0  ;;  %3586 = vmatpush3.bf16.msra.mxu1 %v2863_v36  ;;  %v3094_v36 = vld [vmem:[#allocation3 + $0x18] sm:$0xff] }
 0x40d   :  { %2082 = vmatmul.mubr.bf16.gmra.mrb[56].mxu1 %v7600_v50  ;;  %v2872_v0 = vpack.c.bf16 %v2818_v56, %v2815_v22  ;;  %v420_v50 = vadd.f32 %v398_v58, %v356_v39  ;;  %4039 = vrcp.f32 %v3094_v36  ;;  %438 = vst.msk [vmem:[#allocation3 + $0x68] sm:$0xff] %vm109_vm8, %v421_v24  ;;  %vm3110_vm6 = vcmp.gt.f32.partialorder %v3094_v36, 0.0  ;;  %v3101_v22 = vld [vmem:[#allocation3 + $0x50] sm:$0xff]  ;;  %v7642_v39 = vld [vmem:[#allocation115_spill] sm:$0xff]  ;;  %v7646_v58 = vld [vmem:[#allocation112_spill] sm:$0xff] }
 0x40e   :  { %2089 = vmatprep.mubr.bf16.mxu1 %v7595_v29  ;;  %4041 = vrcp.f32 %v3095_v23  ;;  %vm3117_vm15 = vcmp.gt.f32.partialorder %v3101_v22, 0.0  ;;  %v7649_v36 = vld [vmem:[#allocation117_spill] sm:$0xff] }
 0x40f   :  { %3587 = vmatprep.subr.bf16.mxu1 %v2872_v0  ;;  %437 = vst.msk [vmem:[#allocation3 + $0x60] sm:$0xff] %vm109_vm8, %v420_v50  ;;  %4043 = vrcp.f32 %v3096_v33  ;;  %v7641_v0 = vld [vmem:[#allocation60_spill] sm:$0xff] }
 0x410   :  { %3588 = vmatpush3.bf16.msra.mxu1 %v2864_v28  ;;  %v4034_v28 = vpop.eup %4033  ;;  %4045 = vrcp.f32 %v3097_v11  ;;  %v3100_v7 = vld [vmem:[#allocation3 + $0x48] sm:$0xff]  ;;  %v3102_v13 = vld [vmem:[#allocation3 + $0x58] sm:$0xff] }
 0x411   :  { %v3785_v53 = vpop.f32.mrb[88].mxu0  ;;  %3589 = vmatprep.subr.bf16.mxu1 %v2873_v3  ;;  %v3156_v54 = vsel %vm3108_vm14, %v4034_v28, 0.0  ;;  %4047 = vrcp.f32 %v3098_v27  ;;  %vm3116_vm13 = vcmp.gt.f32.partialorder %v3100_v7, 0.0  ;;  %vm3118_vm2 = vcmp.gt.f32.partialorder %v3102_v13, 0.0  ;;  %v7648_v50 = vld [vmem:[#allocation116_spill] sm:$0xff] }
 0x412   :  { %v2831_v29 = vpop.f32.mrb[89].mxu0  ;;  %3194 = vperm.xlu1 %3816, %v3156_v54   ;;  %4049 = vrcp.f32 %v3099_v12  ;;  %vm1317_vm14 = vcmask 130048  }
 0x413   :  { %v3786_v34 = vpop.f32.mrb[90].mxu0  ;;  %v4036_v30 = vpop.eup %4035  ;;  %4051 = vrcp.f32 %v3100_v7  ;;  %v1290_v7 = vld [vmem:[#allocation2 + $0x28] sm:$0xff] }
 0x414   :  { %v2875_v35 = vpack.c.bf16 %v3786_v34, %v3785_v53  ;;  %v2834_v52 = vpop.f32.mrb[91].mxu0  ;;  %3590 = vmatpush3.bf16.msra.mxu1 %v2865_v2  ;;  %v4038_v5 = vpop.eup %4037  ;;  %4053 = vrcp.f32 %v3101_v22  ;;  %v3104_v49 = vld [vmem:[#allocation3 + $0x68] sm:$0xff] }
 0x415   :  { %2090 = vmatmul.mubr.bf16.gmra.mrb[60].mxu1 %v7601_v16  ;;  %v2874_v32 = vpack.c.bf16 %v2834_v52, %v2831_v29  ;;  %v3155_v16 = vsel %vm3107_vm7, %v4036_v30, 0.0  ;;  %v3157_v60 = vsel %vm3109_vm4, %v4038_v5, 0.0  ;;  %4055 = vrcp.f32 %v3102_v13  ;;  %v7650_v53 = vld [vmem:[#allocation24_spill] sm:$0xff]  ;;  %v1287_v30 = vld [vmem:[#allocation2 + $0x10] sm:$0xff]  ;;  %v1288_v5 = vld [vmem:[#allocation2 + $0x18] sm:$0xff] }
 0x416   :  { %2910 = vmatprep.mubr.bf16.mxu1 %v6218_v15  ;;  %3189 = vperm.xlu0 %3815, %v3155_v16   ;;  %v3103_v48 = vld [vmem:[#allocation3 + $0x60] sm:$0xff]  ;;  %vm3120_vm1 = vcmp.gt.f32.partialorder %v3104_v49, 0.0 }
 0x417   :  { %3591 = vmatprep.subr.bf16.mxu1 %v2874_v32  ;;  %v4040_v1 = vpop.eup %4039  ;;  %3199 = vperm.xlu1 %3816, %v3157_v60   ;;  %4057 = vrcp.f32 %v3103_v48  ;;  %vm3119_vm3 = vcmp.gt.f32.partialorder %v3103_v48, 0.0  ;;  %v1292_v48 = vld [vmem:[#allocation2 + $0x38] sm:$0xff] }
 0x418   :  { %3592 = vmatpush3.bf16.msra.mxu1 %v2866_v21  ;;  %v3158_v43 = vsel %vm3110_vm6, %v4040_v1, 0.0  ;;  %v4042_v21 = vpop.eup %4041  ;;  %4059 = vrcp.f32 %v3104_v49  ;;  %vm3071_vm6 = vcmask 392448  }
 0x419   :  { %v3789_v2 = vpop.f32.mrb[92].mxu0  ;;  %3593 = vmatprep.subr.bf16.mxu1 %v2875_v35  ;;  %v3159_v20 = vsel %vm3111_vm9, %v4042_v21, 0.0  ;;  %v4044_v62 = vpop.eup %4043  ;;  %v1286_v35 = vld [vmem:[#allocation2 + $0x8] sm:$0xff] }
 0x41a   :  { %v2847_v15 = vpop.f32.mrb[93].mxu0  ;;  %3204 = vperm.xlu0 %3815, %v3158_v43   ;;  %v3160_v63 = vsel %vm3112_vm0, %v4044_v62, 0.0 }
 0x41b   :  { %v3790_v8 = vpop.f32.mrb[94].mxu0  ;;  %3209 = vperm.xlu1 %3816, %v3159_v20  }
 0x41c   :  { %v2877_v61 = vpack.c.bf16 %v3790_v8, %v3789_v2  ;;  %v2850_v18 = vpop.f32.mrb[95].mxu0  ;;  %3594 = vmatpush3.bf16.msra.mxu1 %v2867_v38  ;;  %v4046_v38 = vpop.eup %4045  ;;  %v1289_v8 = vld [vmem:[#allocation2 + $0x20] sm:$0xff] }
 0x41d   :  { %v2876_v40 = vpack.c.bf16 %v2850_v18, %v2847_v15  ;;  %v3161_v6 = vsel %vm3113_vm5, %v4046_v38, 0.0  ;;  %v4048_v45 = vpop.eup %4047 }
 0x41e   :  { %3214 = vperm.xlu0 %3815, %v3160_v63   ;;  %v3162_v55 = vsel %vm3114_vm10, %v4048_v45, 0.0  ;;  %v1291_v63 = vld [vmem:[#allocation2 + $0x30] sm:$0xff]  ;;  %v359_v45 = vld [vmem:[#allocation3 + $0x78] sm:$0xff] }
 0x41f   :  { %3595 = vmatprep.subr.bf16.mxu1 %v2876_v40  ;;  %3219 = vperm.xlu1 %3816, %v3161_v6  }
 0x420   :  { %3596 = vmatpush3.bf16.msra.mxu1 %v2868_v4  ;;  %v4050_v4 = vpop.eup %4049 }
 0x421   :  { %3597 = vmatprep.subr.bf16.mxu1 %v2877_v61  ;;  %v3163_v9 = vsel %vm3115_vm12, %v4050_v4, 0.0  ;;  %v4052_v25 = vpop.eup %4051  ;;  %v358_v4 = vld [vmem:[#allocation3 + $0x70] sm:$0xff] }
 0x422   :  { %3224 = vperm.xlu0 %3815, %v3162_v55   ;;  %v3164_v10 = vsel %vm3116_vm13, %v4052_v25, 0.0  ;;  %v4054_v3 = vpop.eup %4053 }
 0x423   :  { %3229 = vperm.xlu1 %3816, %v3163_v9   ;;  %v3165_v46 = vsel %vm3117_vm15, %v4054_v3, 0.0  ;;  %v4056_v26 = vpop.eup %4055 }
 0x424   :  { %3598 = vmatpush3.bf16.msra.mxu1 %v2869_v37  ;;  %v3166_v37 = vsel %vm3118_vm2, %v4056_v26, 0.0  ;;  %v4058_v56 = vpop.eup %4057 }
 0x425   :  { %v3167_v41 = vsel %vm3119_vm3, %v4058_v56, 0.0  ;;  %v4060_v57 = vpop.eup %4059  ;;  %v1293_v56 = vld [vmem:[#allocation2 + $0x40] sm:$0xff] }
 0x426   :  { %3234 = vperm.xlu0 %3815, %v3164_v10  }
 0x427   :  { %2911 = vmatmul.mubr.bf16.vlgmr.msra.gmra.mrb[64].mxu1 %v6246_v31  ;;  %3239 = vperm.xlu1 %3816, %v3165_v46   ;;  %v7639_v31 = vld [vmem:[#allocation93_spill] sm:$0xff] }
 0x428   :  { %2918 = vmatprep.mubr.bf16.mxu1 %v6224_v17  ;;  %v3168_v17 = vsel %vm3120_vm1, %v4060_v57, 0.0 }
 0x42a   :  { %3244 = vperm.xlu0 %3815, %v3166_v37  }
 0x42b   :  { %3249 = vperm.xlu1 %3816, %v3167_v41  }
 0x42e   :  { %3254 = vperm.xlu0 %3815, %v3168_v17   ;;  %v1294_v17 = vld [vmem:[#allocation2 + $0x48] sm:$0xff] }
 0x42f   :  { %2919 = vmatmul.mubr.bf16.gmra.mrb[68].mxu1 %v6259_v14  ;;  %v7647_v14 = vld [vmem:[#allocation95_spill] sm:$0xff] }
 0x430   :  { %2926 = vmatprep.mubr.bf16.mxu1 %v7639_v31 }
 0x437   :  { %2927 = vmatmul.mubr.bf16.gmra.mrb[72].mxu1 %v7640_v51 }
 0x438   :  { %2934 = vmatprep.mubr.bf16.mxu1 %v7641_v0 }
 0x43f   :  { %2935 = vmatmul.mubr.bf16.gmra.mrb[76].mxu1 %v7642_v39 }
 0x440   :  { %2942 = vmatprep.mubr.bf16.mxu1 %v7643_v44 }
 0x447   :  { %2943 = vmatmul.mubr.bf16.gmra.mrb[80].mxu1 %v7644_v19 }
 0x448   :  { %2950 = vmatprep.mubr.bf16.mxu1 %v7645_v47  ;;  %v1295_v47 = vld [vmem:[#allocation2 + $0x50] sm:$0xff] }
 0x44a   :  { %v407_v9 = vpop.xlane.xlu0 %406 }
 0x44b   :  { %v423_v10 = vadd.f32 %v407_v9, %v359_v45 }
 0x44d   :  { %440 = vst.msk [vmem:[#allocation3 + $0x78] sm:$0xff] %vm109_vm8, %v423_v10 }
 0x44f   :  { %2951 = vmatmul.mubr.bf16.gmra.mrb[84].mxu1 %v7646_v58 }
 0x450   :  { %2958 = vmatprep.mubr.bf16.mxu1 %v7647_v14 }
 0x457   :  { %2959 = vmatmul.mubr.bf16.gmra.mrb[88].mxu1 %v7648_v50 }
 0x458   :  { %2966 = vmatprep.mubr.bf16.mxu1 %v7649_v36  ;;  %v404_v3 = vpop.xlane.xlu1 %403  ;;  %v1296_v36 = vld [vmem:[#allocation2 + $0x58] sm:$0xff] }
 0x459   :  { %v422_v26 = vadd.f32 %v404_v3, %v358_v4 }
 0x45b   :  { %439 = vst.msk [vmem:[#allocation3 + $0x70] sm:$0xff] %vm109_vm8, %v422_v26  ;;  %vm2194_vm8 = vcmask 261248  }
 0x45f   :  { %2967 = vmatmul.mubr.bf16.gmra.mrb[92].mxu1 %v7650_v53 }
 0x46c   :  { %v3423_v29 = vpop.f32.mrb[0].mxu1 }
 0x46d   :  { %v3424_v42 = vpop.f32.mrb[1].mxu1 }
 0x46e   :  { %v3425_v23 = vadd.f32 %v3424_v42, %v3423_v29  ;;  %v3426_v34 = vpop.f32.mrb[2].mxu1 }
 0x46f   :  { %v3427_v24 = vpop.f32.mrb[3].mxu1 }
 0x470   :  { %v1301_v52 = vadd.f32 %v3425_v23, %v1285_v59  ;;  %v3428_v33 = vadd.f32 %v3427_v24, %v3426_v34  ;;  %v1297_v34 = vld [vmem:[#allocation2 + $0x60] sm:$0xff] }
 0x472   :  { %1318 = vst.msk [vmem:[#allocation2] sm:$0xff] %vm1317_vm14, %v1301_v52  ;;  %v1302_v32 = vadd.f32 %v3428_v33, %v1286_v35  ;;  %v1298_v33 = vld [vmem:[#allocation2 + $0x68] sm:$0xff] }
 0x474   :  { %1319 = vst.msk [vmem:[#allocation2 + $0x8] sm:$0xff] %vm1317_vm14, %v1302_v32  ;;  %v3429_v28 = vpop.f32.mrb[4].mxu1 }
 0x475   :  { %v3430_v11 = vpop.f32.mrb[5].mxu1 }
 0x476   :  { %v3431_v54 = vadd.f32 %v3430_v11, %v3429_v28  ;;  %v3432_v16 = vpop.f32.mrb[6].mxu1 }
 0x477   :  { %v3433_v27 = vpop.f32.mrb[7].mxu1 }
 0x478   :  { %v1303_v2 = vadd.f32 %v3431_v54, %v1287_v30  ;;  %v3434_v15 = vadd.f32 %v3433_v27, %v3432_v16  ;;  %v1299_v16 = vld [vmem:[#allocation2 + $0x70] sm:$0xff] }
 0x47a   :  { %1320 = vst.msk [vmem:[#allocation2 + $0x10] sm:$0xff] %vm1317_vm14, %v1303_v2  ;;  %v1304_v60 = vadd.f32 %v3434_v15, %v1288_v5  ;;  %v1300_v15 = vld [vmem:[#allocation2 + $0x78] sm:$0xff] }
 0x47c   :  { %1321 = vst.msk [vmem:[#allocation2 + $0x18] sm:$0xff] %vm1317_vm14, %v1304_v60  ;;  %v3435_v12 = vpop.f32.mrb[8].mxu1 }
 0x47d   :  { %v3436_v1 = vpop.f32.mrb[9].mxu1 }
 0x47e   :  { %v3437_v61 = vadd.f32 %v3436_v1, %v3435_v12  ;;  %v3438_v18 = vpop.f32.mrb[10].mxu1 }
 0x47f   :  { %v3439_v43 = vpop.f32.mrb[11].mxu1 }
 0x480   :  { %v1305_v21 = vadd.f32 %v3437_v61, %v1289_v8  ;;  %v3440_v40 = vadd.f32 %v3439_v43, %v3438_v18 }
 0x482   :  { %1322 = vst.msk [vmem:[#allocation2 + $0x20] sm:$0xff] %vm1317_vm14, %v1305_v21  ;;  %v1306_v20 = vadd.f32 %v3440_v40, %v1290_v7 }
 0x484   :  { %1323 = vst.msk [vmem:[#allocation2 + $0x28] sm:$0xff] %vm1317_vm14, %v1306_v20  ;;  %v3441_v22 = vpop.f32.mrb[12].mxu1 }
 0x485   :  { %v3442_v62 = vpop.f32.mrb[13].mxu1 }
 0x486   :  { %v3443_v13 = vadd.f32 %v3442_v62, %v3441_v22  ;;  %v3444_v38 = vpop.f32.mrb[14].mxu1 }
 0x487   :  { %v3445_v6 = vpop.f32.mrb[15].mxu1 }
 0x488   :  { %v1307_v55 = vadd.f32 %v3443_v13, %v1291_v63  ;;  %v3446_v49 = vadd.f32 %v3445_v6, %v3444_v38 }
 0x48a   :  { %1324 = vst.msk [vmem:[#allocation2 + $0x30] sm:$0xff] %vm1317_vm14, %v1307_v55  ;;  %v1308_v25 = vadd.f32 %v3446_v49, %v1292_v48 }
 0x48c   :  { %1325 = vst.msk [vmem:[#allocation2 + $0x38] sm:$0xff] %vm1317_vm14, %v1308_v25  ;;  %v3447_v46 = vpop.f32.mrb[16].mxu1 }
 0x48d   :  { %v3448_v37 = vpop.f32.mrb[17].mxu1 }
 0x48e   :  { %v3449_v41 = vadd.f32 %v3448_v37, %v3447_v46  ;;  %v3450_v57 = vpop.f32.mrb[18].mxu1 }
 0x48f   :  { %v3451_v31 = vpop.f32.mrb[19].mxu1 }
 0x490   :  { %v1309_v51 = vadd.f32 %v3449_v41, %v1293_v56  ;;  %v3452_v0 = vadd.f32 %v3451_v31, %v3450_v57 }
 0x492   :  { %1326 = vst.msk [vmem:[#allocation2 + $0x40] sm:$0xff] %vm1317_vm14, %v1309_v51  ;;  %v1310_v39 = vadd.f32 %v3452_v0, %v1294_v17 }
 0x494   :  { %1327 = vst.msk [vmem:[#allocation2 + $0x48] sm:$0xff] %vm1317_vm14, %v1310_v39  ;;  %v3453_v44 = vpop.f32.mrb[20].mxu1 }
 0x495   :  { %v3454_v19 = vpop.f32.mrb[21].mxu1 }
 0x496   :  { %v3455_v58 = vadd.f32 %v3454_v19, %v3453_v44  ;;  %v3456_v14 = vpop.f32.mrb[22].mxu1 }
 0x497   :  { %v3457_v50 = vpop.f32.mrb[23].mxu1 }
 0x498   :  { %v1311_v53 = vadd.f32 %v3455_v58, %v1295_v47  ;;  %v3458_v29 = vadd.f32 %v3457_v50, %v3456_v14 }
 0x49a   :  { %1328 = vst.msk [vmem:[#allocation2 + $0x50] sm:$0xff] %vm1317_vm14, %v1311_v53  ;;  %v1312_v42 = vadd.f32 %v3458_v29, %v1296_v36 }
 0x49c   :  { %1329 = vst.msk [vmem:[#allocation2 + $0x58] sm:$0xff] %vm1317_vm14, %v1312_v42  ;;  %v3459_v59 = vpop.f32.mrb[24].mxu1 }
 0x49d   :  { %v3460_v23 = vpop.f32.mrb[25].mxu1 }
 0x49e   :  { %v3461_v24 = vadd.f32 %v3460_v23, %v3459_v59  ;;  %v3462_v35 = vpop.f32.mrb[26].mxu1 }
 0x49f   :  { %v3463_v52 = vpop.f32.mrb[27].mxu1 }
 0x4a0   :  { %v1313_v32 = vadd.f32 %v3461_v24, %v1297_v34  ;;  %v3464_v28 = vadd.f32 %v3463_v52, %v3462_v35 }
 0x4a2   :  { %1330 = vst.msk [vmem:[#allocation2 + $0x60] sm:$0xff] %vm1317_vm14, %v1313_v32  ;;  %v1314_v11 = vadd.f32 %v3464_v28, %v1298_v33  ;;  %v6723_v28 = vpop.permute.xlu1 %3194 }
 0x4a4   :  { %1331 = vst.msk [vmem:[#allocation2 + $0x68] sm:$0xff] %vm1317_vm14, %v1314_v11  ;;  %v3465_v30 = vpop.f32.mrb[28].mxu1 }
 0x4a5   :  { %v3466_v54 = vpop.f32.mrb[29].mxu1 }
 0x4a6   :  { %v3467_v27 = vadd.f32 %v3466_v54, %v3465_v30  ;;  %v3468_v5 = vpop.f32.mrb[30].mxu1  ;;  %v6726_v54 = vpop.permute.xlu0 %3189 }
 0x4a7   :  { %v3469_v2 = vpop.f32.mrb[31].mxu1 }
 0x4a8   :  { %v1315_v60 = vadd.f32 %v3467_v27, %v1299_v16  ;;  %v3470_v12 = vadd.f32 %v3469_v2, %v3468_v5  ;;  %v6729_v27 = vpop.permute.xlu1 %3199 }
 0x4aa   :  { %1332 = vst.msk [vmem:[#allocation2 + $0x70] sm:$0xff] %vm1317_vm14, %v1315_v60  ;;  %v1316_v1 = vadd.f32 %v3470_v12, %v1300_v15  ;;  %v6731_v60 = vpop.permute.xlu0 %3204 }
 0x4ac   :  { %1333 = vst.msk [vmem:[#allocation2 + $0x78] sm:$0xff] %vm1317_vm14, %v1316_v1 }
 0x4b0   :  { %v3511_v8 = vpop.f32.mrb[32].mxu1 }
 0x4b1   :  { %v3512_v61 = vpop.f32.mrb[33].mxu1 }
 0x4b2   :  { %v3513_v18 = vadd.f32 %v3512_v61, %v3511_v8  ;;  %v3514_v43 = vpop.f32.mrb[34].mxu1  ;;  %v6735_v8 = vpop.permute.xlu1 %3209 }
 0x4b3   :  { %v3515_v7 = vpop.f32.mrb[35].mxu1 }
 0x4b4   :  { %v3516_v21 = vadd.f32 %v3515_v7, %v3514_v43  ;;  %2130 = vrot.lane.b32.xlu1 %v3513_v18, %s4223_s30  ;;  %v6737_v18 = vpop.permute.xlu0 %3214 }
 0x4b6   :  { %2132 = vrot.lane.b32.xlu0 %v3516_v21, %s4223_s30 }
 0x4b8   :  { %v3517_v40 = vpop.f32.mrb[36].mxu1 }
 0x4b9   :  { %v3518_v20 = vpop.f32.mrb[37].mxu1 }
 0x4ba   :  { %v3519_v22 = vadd.f32 %v3518_v20, %v3517_v40  ;;  %v3520_v62 = vpop.f32.mrb[38].mxu1 }
 0x4bb   :  { %v3521_v63 = vpop.f32.mrb[39].mxu1 }
 0x4bc   :  { %v3522_v13 = vadd.f32 %v3521_v63, %v3520_v62  ;;  %2134 = vrot.lane.b32.xlu1 %v3519_v22, %s4223_s30  ;;  %v6740_v22 = vpop.permute.xlu1 %3219  ;;  %v6743_v62 = vpop.permute.xlu0 %3224 }
 0x4c0   :  { %v3523_v38 = vpop.f32.mrb[40].mxu1  ;;  %2136 = vrot.lane.b32.xlu1 %v3522_v13, %s4223_s30 }
 0x4c1   :  { %v3524_v6 = vpop.f32.mrb[41].mxu1 }
 0x4c2   :  { %v3525_v48 = vadd.f32 %v3524_v6, %v3523_v38  ;;  %v3526_v45 = vpop.f32.mrb[42].mxu1 }
 0x4c3   :  { %v3527_v55 = vpop.f32.mrb[43].mxu1 }
 0x4c4   :  { %v3528_v49 = vadd.f32 %v3527_v55, %v3526_v45  ;;  %2138 = vrot.lane.b32.xlu0 %v3525_v48, %s4223_s30  ;;  %v6745_v48 = vpop.permute.xlu1 %3229 }
 0x4c6   :  { %2140 = vrot.lane.b32.xlu1 %v3528_v49, %s4223_s30  ;;  %v6748_v49 = vpop.permute.xlu0 %3234 }
 0x4c8   :  { %v3529_v4 = vpop.f32.mrb[44].mxu1 }
 0x4c9   :  { %v3530_v9 = vpop.f32.mrb[45].mxu1 }
 0x4ca   :  { %v3531_v25 = vadd.f32 %v3530_v9, %v3529_v4  ;;  %v3532_v10 = vpop.f32.mrb[46].mxu1  ;;  %v6751_v9 = vpop.permute.xlu1 %3239 }
 0x4cb   :  { %v3533_v3 = vpop.f32.mrb[47].mxu1 }
 0x4cc   :  { %v3534_v46 = vadd.f32 %v3533_v3, %v3532_v10  ;;  %2142 = vrot.lane.b32.xlu0 %v3531_v25, %s4223_s30 }
 0x4ce   :  { %2144 = vrot.lane.b32.xlu1 %v3534_v46, %s4223_s30  ;;  %v6753_v46 = vpop.permute.xlu0 %3244 }
 0x4d0   :  { %v3535_v26 = vpop.f32.mrb[48].mxu1 }
 0x4d1   :  { %v3536_v37 = vpop.f32.mrb[49].mxu1 }
 0x4d2   :  { %v3537_v56 = vadd.f32 %v3536_v37, %v3535_v26  ;;  %v3538_v41 = vpop.f32.mrb[50].mxu1 }
 0x4d3   :  { %v3539_v57 = vpop.f32.mrb[51].mxu1 }
 0x4d4   :  { %v3540_v31 = vadd.f32 %v3539_v57, %v3538_v41  ;;  %2146 = vrot.lane.b32.xlu0 %v3537_v56, %s4223_s30  ;;  %v6757_v56 = vpop.permute.xlu1 %3249  ;;  %v6759_v57 = vpop.permute.xlu0 %3254 }
 0x4d6   :  { %2148 = vrot.lane.b32.xlu1 %v3540_v31, %s4223_s30 }
 0x4d8   :  { %v3541_v17 = vpop.f32.mrb[52].mxu1 }
 0x4d9   :  { %v3542_v51 = vpop.f32.mrb[53].mxu1 }
 0x4da   :  { %v3543_v0 = vadd.f32 %v3542_v51, %v3541_v17  ;;  %v3544_v39 = vpop.f32.mrb[54].mxu1 }
 0x4db   :  { %v3545_v44 = vpop.f32.mrb[55].mxu1 }
 0x4dc   :  { %v3546_v19 = vadd.f32 %v3545_v44, %v3544_v39  ;;  %2150 = vrot.lane.b32.xlu0 %v3543_v0, %s4223_s30 }
 0x4de   :  { %2152 = vrot.lane.b32.xlu1 %v3546_v19, %s4223_s30  ;;  %v2098_v19 = vld [vmem:[#allocation2] sm:$0xff] }
 0x4e0   :  { %v3547_v47 = vpop.f32.mrb[56].mxu1 }
 0x4e1   :  { %v3548_v58 = vpop.f32.mrb[57].mxu1 }
 0x4e2   :  { %v3549_v14 = vadd.f32 %v3548_v58, %v3547_v47  ;;  %v3550_v50 = vpop.f32.mrb[58].mxu1 }
 0x4e3   :  { %v3551_v36 = vpop.f32.mrb[59].mxu1 }
 0x4e4   :  { %v3552_v53 = vadd.f32 %v3551_v36, %v3550_v50  ;;  %2154 = vrot.lane.b32.xlu0 %v3549_v14, %s4223_s30  ;;  %v2099_v14 = vld [vmem:[#allocation2 + $0x8] sm:$0xff]  ;;  %v3106_v36 = vld [vmem:[#allocation3 + $0x78] sm:$0xff] }
 0x4e5   :  { %4061 = vrcp.f32 %v3106_v36  ;;  %vm3122_vm7 = vcmp.gt.f32.partialorder %v3106_v36, 0.0 }
 0x4e6   :  { %2156 = vrot.lane.b32.xlu1 %v3552_v53, %s4223_s30 }
 0x4e8   :  { %v3553_v29 = vpop.f32.mrb[60].mxu1 }
 0x4e9   :  { %v3554_v42 = vpop.f32.mrb[61].mxu1 }
 0x4ea   :  { %v3555_v59 = vadd.f32 %v3554_v42, %v3553_v29  ;;  %v3556_v23 = vpop.f32.mrb[62].mxu1  ;;  %v3105_v42 = vld [vmem:[#allocation3 + $0x70] sm:$0xff] }
 0x4eb   :  { %v3557_v34 = vpop.f32.mrb[63].mxu1  ;;  %4063 = vrcp.f32 %v3105_v42  ;;  %vm3121_vm4 = vcmp.gt.f32.partialorder %v3105_v42, 0.0 }
 0x4ec   :  { %v3558_v24 = vadd.f32 %v3557_v34, %v3556_v23  ;;  %2158 = vrot.lane.b32.xlu0 %v3555_v59, %s4223_s30 }
 0x4ee   :  { %2160 = vrot.lane.b32.xlu1 %v3558_v24, %s4223_s30 }
 0x4fa   :  { %v3599_v35 = vpop.f32.mrb[64].mxu1 }
 0x4fb   :  { %v3600_v52 = vpop.f32.mrb[65].mxu1 }
 0x4fc   :  { %v3601_v33 = vadd.f32 %v3600_v52, %v3599_v35  ;;  %v3602_v32 = vpop.f32.mrb[66].mxu1  ;;  %v2100_v52 = vld [vmem:[#allocation2 + $0x10] sm:$0xff] }
 0x4fd   :  { %v3603_v11 = vpop.f32.mrb[67].mxu1 }
 0x4fe   :  { %v3604_v30 = vadd.f32 %v3603_v11, %v3602_v32  ;;  %3007 = vrot.lane.b32.xlu0 %v3601_v33, %s4224_s6  ;;  %v2101_v11 = vld [vmem:[#allocation2 + $0x18] sm:$0xff] }
 0x500   :  { %3009 = vrot.lane.b32.xlu1 %v3604_v30, %s4224_s6 }
 0x502   :  { %v3605_v16 = vpop.f32.mrb[68].mxu1 }
 0x503   :  { %v3606_v5 = vpop.f32.mrb[69].mxu1 }
 0x504   :  { %v3607_v2 = vadd.f32 %v3606_v5, %v3605_v16  ;;  %v3608_v15 = vpop.f32.mrb[70].mxu1 }
 0x505   :  { %v3609_v12 = vpop.f32.mrb[71].mxu1 }
 0x506   :  { %v3610_v1 = vadd.f32 %v3609_v12, %v3608_v15  ;;  %3011 = vrot.lane.b32.xlu0 %v3607_v2, %s4224_s6 }
 0x508   :  { %3013 = vrot.lane.b32.xlu1 %v3610_v1, %s4224_s6  ;;  %v4062_v1 = vpop.eup %4061 }
 0x50a   :  { %v3611_v61 = vpop.f32.mrb[72].mxu1 }
 0x50b   :  { %v3612_v43 = vpop.f32.mrb[73].mxu1 }
 0x50c   :  { %v3613_v7 = vadd.f32 %v3612_v43, %v3611_v61  ;;  %v3614_v21 = vpop.f32.mrb[74].mxu1 }
 0x50d   :  { %v3615_v40 = vpop.f32.mrb[75].mxu1 }
 0x50e   :  { %v3616_v20 = vadd.f32 %v3615_v40, %v3614_v21  ;;  %3015 = vrot.lane.b32.xlu0 %v3613_v7, %s4224_s6  ;;  %v2102_v7 = vld [vmem:[#allocation2 + $0x20] sm:$0xff]  ;;  %v4064_v40 = vpop.eup %4063 }
 0x510   :  { %3017 = vrot.lane.b32.xlu1 %v3616_v20, %s4224_s6 }
 0x512   :  { %v3617_v63 = vpop.f32.mrb[76].mxu1 }
 0x513   :  { %v3618_v13 = vpop.f32.mrb[77].mxu1 }
 0x514   :  { %v3619_v38 = vadd.f32 %v3618_v13, %v3617_v63  ;;  %v3620_v6 = vpop.f32.mrb[78].mxu1  ;;  %v2103_v63 = vld [vmem:[#allocation2 + $0x28] sm:$0xff] }
 0x515   :  { %v3621_v45 = vpop.f32.mrb[79].mxu1 }
 0x516   :  { %v3622_v55 = vadd.f32 %v3621_v45, %v3620_v6  ;;  %3019 = vrot.lane.b32.xlu0 %v3619_v38, %s4224_s6  ;;  %v3170_v38 = vsel %vm3122_vm7, %v4062_v1, 0.0  ;;  %v3169_v6 = vsel %vm3121_vm4, %v4064_v40, 0.0  ;;  %v6785_v1 = vld [vmem:[#allocation12] ss:$0 sm:$0xff] }
 0x518   :  { %3021 = vrot.lane.b32.xlu1 %v3622_v55, %s4224_s6  ;;  %v2104_v55 = vld [vmem:[#allocation2 + $0x30] sm:$0xff] }
 0x51a   :  { %v3623_v4 = vpop.f32.mrb[80].mxu1 }
 0x51b   :  { %v3624_v25 = vpop.f32.mrb[81].mxu1 }
 0x51c   :  { %v3625_v10 = vadd.f32 %v3624_v25, %v3623_v4  ;;  %v3626_v3 = vpop.f32.mrb[82].mxu1 }
 0x51d   :  { %v3627_v26 = vpop.f32.mrb[83].mxu1 }
 0x51e   :  { %v3628_v37 = vadd.f32 %v3627_v26, %v3626_v3  ;;  %3023 = vrot.lane.b32.xlu0 %v3625_v10, %s4224_s6  ;;  %v2105_v10 = vld [vmem:[#allocation2 + $0x38] sm:$0xff] }
 0x520   :  { %3025 = vrot.lane.b32.xlu1 %v3628_v37, %s4224_s6  ;;  %v2106_v37 = vld [vmem:[#allocation2 + $0x40] sm:$0xff] }
 0x522   :  { %v3629_v41 = vpop.f32.mrb[84].mxu1 }
 0x523   :  { %v3630_v31 = vpop.f32.mrb[85].mxu1 }
 0x524   :  { %v3631_v17 = vadd.f32 %v3630_v31, %v3629_v41  ;;  %v3632_v51 = vpop.f32.mrb[86].mxu1 }
 0x525   :  { %v3633_v0 = vpop.f32.mrb[87].mxu1 }
 0x526   :  { %v3634_v39 = vadd.f32 %v3633_v0, %v3632_v51  ;;  %v2131_v44 = vpop.permute.xlu1 %2130  ;;  %3027 = vrot.lane.b32.xlu0 %v3631_v17, %s4224_s6  ;;  %v2107_v17 = vld [vmem:[#allocation2 + $0x48] sm:$0xff] }
 0x527   :  { %v2178_v47 = vadd.f32 %v2131_v44, %v2098_v19 }
 0x528   :  { %v2133_v58 = vpop.permute.xlu0 %2132  ;;  %3029 = vrot.lane.b32.xlu1 %v3634_v39, %s4224_s6  ;;  %v2108_v39 = vld [vmem:[#allocation2 + $0x50] sm:$0xff] }
 0x529   :  { %2195 = vst.msk [vmem:[#allocation2] sm:$0xff] %vm2194_vm8, %v2178_v47  ;;  %v2179_v50 = vadd.f32 %v2133_v58, %v2099_v14  ;;  %v2109_v47 = vld [vmem:[#allocation2 + $0x58] sm:$0xff] }
 0x52a   :  { %v3635_v53 = vpop.f32.mrb[88].mxu1 }
 0x52b   :  { %2196 = vst.msk [vmem:[#allocation2 + $0x8] sm:$0xff] %vm2194_vm8, %v2179_v50  ;;  %v3636_v29 = vpop.f32.mrb[89].mxu1  ;;  %v2110_v50 = vld [vmem:[#allocation2 + $0x60] sm:$0xff] }
 0x52c   :  { %v3637_v59 = vadd.f32 %v3636_v29, %v3635_v53  ;;  %v3638_v23 = vpop.f32.mrb[90].mxu1  ;;  %v2111_v29 = vld [vmem:[#allocation2 + $0x68] sm:$0xff] }
 0x52d   :  { %v3639_v34 = vpop.f32.mrb[91].mxu1 }
 0x52e   :  { %v3640_v24 = vadd.f32 %v3639_v34, %v3638_v23  ;;  %v2135_v35 = vpop.permute.xlu1 %2134  ;;  %3031 = vrot.lane.b32.xlu0 %v3637_v59, %s4224_s6  ;;  %v2112_v23 = vld [vmem:[#allocation2 + $0x70] sm:$0xff] }
 0x52f   :  { %v2180_v33 = vadd.f32 %v2135_v35, %v2100_v52  ;;  %v2113_v35 = vld [vmem:[#allocation2 + $0x78] sm:$0xff] }
 0x530   :  { %3033 = vrot.lane.b32.xlu1 %v3640_v24, %s4224_s6 }
 0x531   :  { %2197 = vst.msk [vmem:[#allocation2 + $0x10] sm:$0xff] %vm2194_vm8, %v2180_v33 }
 0x532   :  { %v2137_v32 = vpop.permute.xlu1 %2136  ;;  %v3641_v30 = vpop.f32.mrb[92].mxu1 }
 0x533   :  { %v2181_v16 = vadd.f32 %v2137_v32, %v2101_v11  ;;  %v3642_v5 = vpop.f32.mrb[93].mxu1  ;;  %v2975_v32 = vld [vmem:[#allocation2] sm:$0xff] }
 0x534   :  { %v3643_v2 = vadd.f32 %v3642_v5, %v3641_v30  ;;  %v3644_v15 = vpop.f32.mrb[94].mxu1 }
 0x535   :  { %2198 = vst.msk [vmem:[#allocation2 + $0x18] sm:$0xff] %vm2194_vm8, %v2181_v16  ;;  %v3645_v12 = vpop.f32.mrb[95].mxu1  ;;  %v2976_v16 = vld [vmem:[#allocation2 + $0x8] sm:$0xff] }
 0x536   :  { %v3646_v61 = vadd.f32 %v3645_v12, %v3644_v15  ;;  %v2139_v43 = vpop.permute.xlu0 %2138  ;;  %3035 = vrot.lane.b32.xlu0 %v3643_v2, %s4224_s6 }
 0x537   :  { %v2182_v21 = vadd.f32 %v2139_v43, %v2102_v7 }
 0x538   :  { %v2141_v20 = vpop.permute.xlu1 %2140  ;;  %3037 = vrot.lane.b32.xlu1 %v3646_v61, %s4224_s6  ;;  %v2977_v15 = vld [vmem:[#allocation2 + $0x10] sm:$0xff] }
 0x539   :  { %2199 = vst.msk [vmem:[#allocation2 + $0x20] sm:$0xff] %vm2194_vm8, %v2182_v21  ;;  %v2183_v13 = vadd.f32 %v2141_v20, %v2103_v63 }
 0x53a   :  { %3264 = vperm.xlu0 %3815, %v3170_v38  }
 0x53b   :  { %2200 = vst.msk [vmem:[#allocation2 + $0x28] sm:$0xff] %vm2194_vm8, %v2183_v13 }
 0x53c   :  { %3259 = vperm.xlu1 %3816, %v3169_v6   ;;  %v2978_v7 = vld [vmem:[#allocation2 + $0x18] sm:$0xff] }
 0x53e   :  { %v2143_v45 = vpop.permute.xlu0 %2142 }
 0x53f   :  { %v2184_v4 = vadd.f32 %v2143_v45, %v2104_v55 }
 0x540   :  { %v2145_v25 = vpop.permute.xlu1 %2144  ;;  %v2979_v45 = vld [vmem:[#allocation2 + $0x20] sm:$0xff] }
 0x541   :  { %2201 = vst.msk [vmem:[#allocation2 + $0x30] sm:$0xff] %vm2194_vm8, %v2184_v4  ;;  %v2185_v3 = vadd.f32 %v2145_v25, %v2105_v10 }
 0x542   :  { %v2980_v25 = vld [vmem:[#allocation2 + $0x28] sm:$0xff] }
 0x543   :  { %2202 = vst.msk [vmem:[#allocation2 + $0x38] sm:$0xff] %vm2194_vm8, %v2185_v3 }
 0x546   :  { %v2147_v26 = vpop.permute.xlu0 %2146 }
 0x547   :  { %v2186_v41 = vadd.f32 %v2147_v26, %v2106_v37 }
 0x548   :  { %v2149_v31 = vpop.permute.xlu1 %2148 }
 0x549   :  { %2203 = vst.msk [vmem:[#allocation2 + $0x40] sm:$0xff] %vm2194_vm8, %v2186_v41  ;;  %v2187_v51 = vadd.f32 %v2149_v31, %v2107_v17  ;;  %v2981_v17 = vld [vmem:[#allocation2 + $0x30] sm:$0xff] }
 0x54b   :  { %2204 = vst.msk [vmem:[#allocation2 + $0x48] sm:$0xff] %vm2194_vm8, %v2187_v51 }
 0x54e   :  { %v2151_v0 = vpop.permute.xlu0 %2150 }
 0x54f   :  { %v2188_v44 = vadd.f32 %v2151_v0, %v2108_v39  ;;  %v2982_v39 = vld [vmem:[#allocation2 + $0x38] sm:$0xff] }
 0x550   :  { %v2153_v19 = vpop.permute.xlu1 %2152 }
 0x551   :  { %2205 = vst.msk [vmem:[#allocation2 + $0x50] sm:$0xff] %vm2194_vm8, %v2188_v44  ;;  %v2189_v58 = vadd.f32 %v2153_v19, %v2109_v47 }
 0x553   :  { %2206 = vst.msk [vmem:[#allocation2 + $0x58] sm:$0xff] %vm2194_vm8, %v2189_v58 }
 0x556   :  { %v2155_v14 = vpop.permute.xlu0 %2154 }
 0x557   :  { %v2190_v36 = vadd.f32 %v2155_v14, %v2110_v50 }
 0x558   :  { %v2157_v53 = vpop.permute.xlu1 %2156 }
 0x559   :  { %2207 = vst.msk [vmem:[#allocation2 + $0x60] sm:$0xff] %vm2194_vm8, %v2190_v36  ;;  %v2191_v42 = vadd.f32 %v2157_v53, %v2111_v29  ;;  %v2983_v36 = vld [vmem:[#allocation2 + $0x40] sm:$0xff] }
 0x55b   :  { %2208 = vst.msk [vmem:[#allocation2 + $0x68] sm:$0xff] %vm2194_vm8, %v2191_v42  ;;  %v2984_v42 = vld [vmem:[#allocation2 + $0x48] sm:$0xff] }
 0x55e   :  { %v2159_v59 = vpop.permute.xlu0 %2158 }
 0x55f   :  { %v2192_v34 = vadd.f32 %v2159_v59, %v2112_v23 }
 0x560   :  { %v2161_v24 = vpop.permute.xlu1 %2160 }
 0x561   :  { %2209 = vst.msk [vmem:[#allocation2 + $0x70] sm:$0xff] %vm2194_vm8, %v2192_v34  ;;  %v2193_v52 = vadd.f32 %v2161_v24, %v2113_v35 }
 0x563   :  { %2210 = vst.msk [vmem:[#allocation2 + $0x78] sm:$0xff] %vm2194_vm8, %v2193_v52 }
 0x570   :  { %v3008_v33 = vpop.permute.xlu0 %3007 }
 0x571   :  { %v3055_v11 = vadd.f32 %v3008_v33, %v2975_v32  ;;  %v2985_v33 = vld [vmem:[#allocation2 + $0x50] sm:$0xff] }
 0x572   :  { %v3010_v30 = vpop.permute.xlu1 %3009 }
 0x573   :  { %3072 = vst.msk [vmem:[#allocation2] sm:$0xff] %vm3071_vm6, %v3055_v11  ;;  %v3056_v5 = vadd.f32 %v3010_v30, %v2976_v16  ;;  %v2986_v30 = vld [vmem:[#allocation2 + $0x58] sm:$0xff] }
 0x575   :  { %3073 = vst.msk [vmem:[#allocation2 + $0x8] sm:$0xff] %vm3071_vm6, %v3056_v5 }
 0x578   :  { %v3012_v2 = vpop.permute.xlu0 %3011 }
 0x579   :  { %v3057_v12 = vadd.f32 %v3012_v2, %v2977_v15 }
 0x57a   :  { %v3171_v61 = vld [vmem:[#allocation2] sm:$0xff]  ;;  %v3014_v43 = vpop.permute.xlu1 %3013 }
 0x57b   :  { %v3267_v21 = vmul.f32 %v6726_v54, %v3171_v61  ;;  %3074 = vst.msk [vmem:[#allocation2 + $0x10] sm:$0xff] %vm3071_vm6, %v3057_v12  ;;  %v3058_v40 = vadd.f32 %v3014_v43, %v2978_v7  ;;  %v2987_v43 = vld [vmem:[#allocation2 + $0x60] sm:$0xff] }
 0x57c   :  { %v3172_v20 = vld [vmem:[#allocation2 + $0x8] sm:$0xff] }
 0x57d   :  { %v3290_v63 = vadd.f32 %v6785_v1, %v3267_v21  ;;  %v3268_v13 = vmul.f32 %v6723_v28, %v3172_v20  ;;  %3075 = vst.msk [vmem:[#allocation2 + $0x18] sm:$0xff] %vm3071_vm6, %v3058_v40  ;;  %v2988_v40 = vld [vmem:[#allocation2 + $0x68] sm:$0xff] }
 0x57f   :  { %3307 = vst.msk [vmem:[#allocation13] sm:$0xff] %vm92_vm11, %v3290_v63  ;;  %v3291_v38 = vadd.f32 %v6785_v1, %v3268_v13 }
 0x580   :  { %v3016_v6 = vpop.permute.xlu0 %3015 }
 0x581   :  { %3308 = vst.msk [vmem:[#allocation13 + $0x8] sm:$0xff] %vm92_vm11, %v3291_v38  ;;  %v3059_v55 = vadd.f32 %v3016_v6, %v2979_v45 }
 0x582   :  { %v3173_v54 = vld [vmem:[#allocation2 + $0x10] sm:$0xff]  ;;  %v3018_v4 = vpop.permute.xlu1 %3017 }
 0x583   :  { %v3269_v10 = vmul.f32 %v6729_v27, %v3173_v54  ;;  %3076 = vst.msk [vmem:[#allocation2 + $0x20] sm:$0xff] %vm3071_vm6, %v3059_v55  ;;  %v3060_v3 = vadd.f32 %v3018_v4, %v2980_v25  ;;  %v2989_v55 = vld [vmem:[#allocation2 + $0x70] sm:$0xff]  ;;  %v2990_v25 = vld [vmem:[#allocation2 + $0x78] sm:$0xff] }
 0x584   :  { %v3174_v28 = vld [vmem:[#allocation2 + $0x18] sm:$0xff] }
 0x585   :  { %v3292_v26 = vadd.f32 %v6785_v1, %v3269_v10  ;;  %v3270_v37 = vmul.f32 %v6731_v60, %v3174_v28  ;;  %3077 = vst.msk [vmem:[#allocation2 + $0x28] sm:$0xff] %vm3071_vm6, %v3060_v3 }
 0x587   :  { %3309 = vst.msk [vmem:[#allocation13 + $0x10] sm:$0xff] %vm92_vm11, %v3292_v26  ;;  %v3293_v41 = vadd.f32 %v6785_v1, %v3270_v37 }
 0x588   :  { %v3020_v31 = vpop.permute.xlu0 %3019 }
 0x589   :  { %3310 = vst.msk [vmem:[#allocation13 + $0x18] sm:$0xff] %vm92_vm11, %v3293_v41  ;;  %v3061_v51 = vadd.f32 %v3020_v31, %v2981_v17 }
 0x58a   :  { %v3175_v27 = vld [vmem:[#allocation2 + $0x20] sm:$0xff]  ;;  %v3022_v0 = vpop.permute.xlu1 %3021 }
 0x58b   :  { %v3271_v44 = vmul.f32 %v6735_v8, %v3175_v27  ;;  %3078 = vst.msk [vmem:[#allocation2 + $0x30] sm:$0xff] %vm3071_vm6, %v3061_v51  ;;  %v3062_v19 = vadd.f32 %v3022_v0, %v2982_v39 }
 0x58c   :  { %v3176_v60 = vld [vmem:[#allocation2 + $0x28] sm:$0xff] }
 0x58d   :  { %v3294_v47 = vadd.f32 %v6785_v1, %v3271_v44  ;;  %v3272_v58 = vmul.f32 %v6737_v18, %v3176_v60  ;;  %3079 = vst.msk [vmem:[#allocation2 + $0x38] sm:$0xff] %vm3071_vm6, %v3062_v19 }
 0x58f   :  { %3311 = vst.msk [vmem:[#allocation13 + $0x20] sm:$0xff] %vm92_vm11, %v3294_v47  ;;  %v3295_v14 = vadd.f32 %v6785_v1, %v3272_v58 }
 0x590   :  { %v3024_v50 = vpop.permute.xlu0 %3023 }
 0x591   :  { %3312 = vst.msk [vmem:[#allocation13 + $0x28] sm:$0xff] %vm92_vm11, %v3295_v14  ;;  %v3063_v53 = vadd.f32 %v3024_v50, %v2983_v36 }
 0x592   :  { %v3177_v8 = vld [vmem:[#allocation2 + $0x30] sm:$0xff]  ;;  %v3026_v29 = vpop.permute.xlu1 %3025 }
 0x593   :  { %v3273_v59 = vmul.f32 %v6740_v22, %v3177_v8  ;;  %3080 = vst.msk [vmem:[#allocation2 + $0x40] sm:$0xff] %vm3071_vm6, %v3063_v53  ;;  %v3064_v23 = vadd.f32 %v3026_v29, %v2984_v42 }
 0x594   :  { %v3178_v18 = vld [vmem:[#allocation2 + $0x38] sm:$0xff] }
 0x595   :  { %v3296_v34 = vadd.f32 %v6785_v1, %v3273_v59  ;;  %v3274_v24 = vmul.f32 %v6743_v62, %v3178_v18  ;;  %3081 = vst.msk [vmem:[#allocation2 + $0x48] sm:$0xff] %vm3071_vm6, %v3064_v23 }
 0x597   :  { %3313 = vst.msk [vmem:[#allocation13 + $0x30] sm:$0xff] %vm92_vm11, %v3296_v34  ;;  %v3297_v35 = vadd.f32 %v6785_v1, %v3274_v24 }
 0x598   :  { %v3028_v52 = vpop.permute.xlu0 %3027 }
 0x599   :  { %3314 = vst.msk [vmem:[#allocation13 + $0x38] sm:$0xff] %vm92_vm11, %v3297_v35  ;;  %v3065_v32 = vadd.f32 %v3028_v52, %v2985_v33 }
 0x59a   :  { %v3179_v22 = vld [vmem:[#allocation2 + $0x40] sm:$0xff]  ;;  %v3030_v11 = vpop.permute.xlu1 %3029 }
 0x59b   :  { %v3275_v16 = vmul.f32 %v6745_v48, %v3179_v22  ;;  %3082 = vst.msk [vmem:[#allocation2 + $0x50] sm:$0xff] %vm3071_vm6, %v3065_v32  ;;  %v3066_v5 = vadd.f32 %v3030_v11, %v2986_v30 }
 0x59c   :  { %v3180_v62 = vld [vmem:[#allocation2 + $0x48] sm:$0xff] }
 0x59d   :  { %v3298_v2 = vadd.f32 %v6785_v1, %v3275_v16  ;;  %v3276_v15 = vmul.f32 %v6748_v49, %v3180_v62  ;;  %3083 = vst.msk [vmem:[#allocation2 + $0x58] sm:$0xff] %vm3071_vm6, %v3066_v5 }
 0x59f   :  { %3315 = vst.msk [vmem:[#allocation13 + $0x40] sm:$0xff] %vm92_vm11, %v3298_v2  ;;  %v3299_v12 = vadd.f32 %v6785_v1, %v3276_v15 }
 0x5a0   :  { %v3032_v61 = vpop.permute.xlu0 %3031 }
 0x5a1   :  { %3316 = vst.msk [vmem:[#allocation13 + $0x48] sm:$0xff] %vm92_vm11, %v3299_v12  ;;  %v3067_v7 = vadd.f32 %v3032_v61, %v2987_v43 }
 0x5a2   :  { %v3181_v48 = vld [vmem:[#allocation2 + $0x50] sm:$0xff]  ;;  %v3034_v21 = vpop.permute.xlu1 %3033 }
 0x5a3   :  { %v3277_v20 = vmul.f32 %v6751_v9, %v3181_v48  ;;  %3084 = vst.msk [vmem:[#allocation2 + $0x60] sm:$0xff] %vm3071_vm6, %v3067_v7  ;;  %v3068_v63 = vadd.f32 %v3034_v21, %v2988_v40 }
 0x5a4   :  { %v3182_v49 = vld [vmem:[#allocation2 + $0x58] sm:$0xff] }
 0x5a5   :  { %v3300_v13 = vadd.f32 %v6785_v1, %v3277_v20  ;;  %v3278_v38 = vmul.f32 %v6753_v46, %v3182_v49  ;;  %3085 = vst.msk [vmem:[#allocation2 + $0x68] sm:$0xff] %vm3071_vm6, %v3068_v63 }
 0x5a7   :  { %3317 = vst.msk [vmem:[#allocation13 + $0x50] sm:$0xff] %vm92_vm11, %v3300_v13  ;;  %v3301_v6 = vadd.f32 %v6785_v1, %v3278_v38 }
 0x5a8   :  { %v3036_v45 = vpop.permute.xlu0 %3035 }
 0x5a9   :  { %3318 = vst.msk [vmem:[#allocation13 + $0x58] sm:$0xff] %vm92_vm11, %v3301_v6  ;;  %v3069_v54 = vadd.f32 %v3036_v45, %v2989_v55 }
 0x5aa   :  { %v3183_v9 = vld [vmem:[#allocation2 + $0x60] sm:$0xff]  ;;  %v3038_v4 = vpop.permute.xlu1 %3037 }
 0x5ab   :  { %v3279_v10 = vmul.f32 %v6757_v56, %v3183_v9  ;;  %3086 = vst.msk [vmem:[#allocation2 + $0x70] sm:$0xff] %vm3071_vm6, %v3069_v54  ;;  %v3070_v3 = vadd.f32 %v3038_v4, %v2990_v25 }
 0x5ac   :  { %v3184_v46 = vld [vmem:[#allocation2 + $0x68] sm:$0xff] }
 0x5ad   :  { %v3302_v28 = vadd.f32 %v6785_v1, %v3279_v10  ;;  %v3280_v26 = vmul.f32 %v6759_v57, %v3184_v46  ;;  %3087 = vst.msk [vmem:[#allocation2 + $0x78] sm:$0xff] %vm3071_vm6, %v3070_v3 }
 0x5af   :  { %3319 = vst.msk [vmem:[#allocation13 + $0x60] sm:$0xff] %vm92_vm11, %v3302_v28  ;;  %v3303_v37 = vadd.f32 %v6785_v1, %v3280_v26 }
 0x5b1   :  { %3320 = vst.msk [vmem:[#allocation13 + $0x68] sm:$0xff] %vm92_vm11, %v3303_v37 }
 0x5b2   :  { %v3185_v51 = vld [vmem:[#allocation2 + $0x70] sm:$0xff] }
 0x5b4   :  { %v3186_v31 = vld [vmem:[#allocation2 + $0x78] sm:$0xff] }
 0x5b9   :  { %v3265_v41 = vpop.permute.xlu0 %3264 }
 0x5ba   :  { %v3282_v17 = vmul.f32 %v3265_v41, %v3186_v31 }
 0x5bb   :  { %v3260_v56 = vpop.permute.xlu1 %3259 }
 0x5bc   :  { %v3305_v27 = vadd.f32 %v6785_v1, %v3282_v17  ;;  %v3281_v0 = vmul.f32 %v3260_v56, %v3185_v51 }
 0x5be   :  { %3322 = vst.msk [vmem:[#allocation13 + $0x78] sm:$0xff] %vm92_vm11, %v3305_v27  ;;  %v3304_v57 = vadd.f32 %v6785_v1, %v3281_v0 }
 0x5c0   :  { %3321 = vst.msk [vmem:[#allocation13 + $0x70] sm:$0xff] %vm92_vm11, %v3304_v57 }
 0x5c1   :  { %4189 = shalt.err (!%p4186_p2)
}
 0x5c2   :  { %s4190_s13 = scalar_lea.hbm %s6867_s5, 2048 }
 0x5c3   :  { %p4191_p3 = scmp.ne.s32.totalorder %s6867_s5, %s4190_s13  ;;  %p4194_p4 = scmp.lt.u32.totalorder %s4190_s13, %s6867_s5 }
 0x5c5   :  { %p4196_p5 = pnand %p4194_p4, %p4191_p3 }
 0x5c7   :  { %4199 = shalt.err (!%p4196_p5)
}
 0x5c8   :  { %3334 = dma.vmem_to_hbm [thread:$0]  %s3329_s8, 2048, %s6867_s5, [#allocation6], %s4213_s3, %s4213_s3, %s4214_s28  }
 0x5c9   :  { %4206 = dma.done.wait [#allocation6], 2048  }
 0x5ca   :  { %4207 = vsyncadd [#allocation6], 4294965248 }
 0x5cb   :  { %3338 = vsyncpa [#allocation5], 1 }
 0x5cc   :  { %3339 = vsyncpa [#allocation8], 1 }
 0x5cd   :  { %3340 = vsyncpa [#allocation11], 1 }
 0x5ce   :  { %3341 = vsyncpa [#allocation6], 1 }

// kernel: tpu_custom_call.1
= control target key start
LH: loop header
LB: loop body
LE: loop exit
PB: predicated region body
PF: predicated region fallthrough
CT: control target
= control target key end

     0   :  { %10 = vsyncpa [#allocation5], 0  ;;  %s6862_s0 = inlined_call_operand.hbm [shape: bf16[128,256], index: 0, kind: input, shape index: {}]   ;;  %s6863_s1 = inlined_call_operand.hbm [shape: bf16[128,48], index: 1, kind: input, shape index: {}]   ;;  %s6864_s2 = inlined_call_operand.hbm [shape: f32[128,128], index: 2, kind: input, shape index: {}]   ;;  %s6865_s3 = inlined_call_operand.hbm [shape: f32[8,256], index: 3, kind: input, shape index: {}]   ;;  %s6866_s4 = inlined_call_operand.hbm [shape: f32[1,48], index: 4, kind: input, shape index: {}]   ;;  %s6867_s5 = inlined_call_operand.hbm [shape: f32[128,48], index: 5, kind: output, shape index: {}]  }
   0x1   :  { %11 = vsyncpa [#allocation8], 0 }
   0x2   :  { %12 = vsyncpa [#allocation11], 0 }
   0x3   :  { %13 = vsyncpa [#allocation6], 0  ;;  %s4208_s18 = smov [#allocation7]   ;;  %s4068_s22 = scalar_lea.hbm %s6863_s1, 1024 }
   0x4   :  { %s31_s19 = sshll.u32 %s4208_s18, 4  ;;  %p4069_p0 = scmp.ne.s32.totalorder %s6863_s1, %s4068_s22  ;;  %s32_s19 = int_to_ptr.vmem [resolvable:$true] %s31_s19 }
   0x5   :  { %p4072_p1 = scmp.lt.u32.totalorder %s4068_s22, %s6863_s1 }
   0x7   :  { %p4074_p2 = pnand %p4072_p1, %p4069_p0 }
   0x9   :  { %4077 = shalt.err (!%p4074_p2)
}
   0xa   :  { %s4078_s27 = scalar_lea.vmem %s32_s19, 1024  ;;  %p4083_p4 = scmp.lt.s32.totalorder %s32_s19, %s32_s19 }
   0xb   :  { %p4079_p3 = scmp.ne.s32.totalorder %s32_s19, %s4078_s27  ;;  %p4084_p5 = scmp.lt.s32.totalorder %s4078_s27, %s4078_s27 }
   0xd   :  { %p4085_p6 = por %p4084_p5, %p4083_p4 }
   0xf   :  { %p4086_p7 = pnand %p4085_p6, %p4079_p3 }
  0x11   :  { %4089 = shalt.err (!%p4086_p7)
}
  0x12   :  { %s4209_s28 = smov 64   ;;  %s4210_s29 = smov 4  }
  0x13   :  { %37 = dma.hbm_to_vmem [thread:$0]  %s6863_s1, 1024, %s32_s19, [#allocation8], %s4209_s28, %s4209_s28, %s4210_s29  }
  0x14   :  { %s4211_s7 = smov [#allocation10]   ;;  %s4212_s9 = smov [#allocation4]  }
  0x15   :  { %s56_s8 = sshll.u32 %s4211_s7, 4  ;;  %s19_s10 = sshll.u32 %s4212_s9, 4  ;;  %s57_s8 = int_to_ptr.vmem [resolvable:$true] %s56_s8  ;;  %s20_s10 = int_to_ptr.vmem [resolvable:$true] %s19_s10 }
  0x16   :  { %s4090_s13 = scalar_lea.hbm %s6865_s3, 256 }
  0x17   :  { %p4091_p8 = scmp.ne.s32.totalorder %s6865_s3, %s4090_s13  ;;  %p4094_p9 = scmp.lt.u32.totalorder %s4090_s13, %s6865_s3 }
  0x19   :  { %p4096_p10 = pnand %p4094_p9, %p4091_p8 }
  0x1b   :  { %4099 = shalt.err (!%p4096_p10)
}
  0x1c   :  { %s4100_s1 = scalar_lea.vmem %s57_s8, 256  ;;  %p4105_p12 = scmp.lt.s32.totalorder %s57_s8, %s57_s8 }
  0x1d   :  { %p4101_p11 = scmp.ne.s32.totalorder %s57_s8, %s4100_s1  ;;  %p4106_p13 = scmp.lt.s32.totalorder %s4100_s1, %s4100_s1 }
  0x1f   :  { %p4107_p0 = por %p4106_p13, %p4105_p12 }
  0x21   :  { %p4108_p1 = pnand %p4107_p0, %p4101_p11 }
  0x23   :  { %4111 = shalt.err (!%p4108_p1)
}
  0x24   :  { %59 = dma.hbm_to_vmem [thread:$0]  %s6865_s3, 256, %s57_s8, [#allocation11]  }
  0x25   :  { %s4112_s22 = scalar_lea.hbm %s6862_s0, 2048 }
  0x26   :  { %p4113_p2 = scmp.ne.s32.totalorder %s6862_s0, %s4112_s22  ;;  %p4116_p3 = scmp.lt.u32.totalorder %s4112_s22, %s6862_s0 }
  0x28   :  { %p4118_p4 = pnand %p4116_p3, %p4113_p2 }
  0x2a   :  { %4121 = shalt.err (!%p4118_p4)
}
  0x2b   :  { %s4122_s27 = scalar_lea.vmem %s20_s10, 2048  ;;  %p4127_p6 = scmp.lt.s32.totalorder %s20_s10, %s20_s10 }
  0x2c   :  { %p4123_p5 = scmp.ne.s32.totalorder %s20_s10, %s4122_s27  ;;  %p4128_p7 = scmp.lt.s32.totalorder %s4122_s27, %s4122_s27 }
  0x2e   :  { %p4129_p8 = por %p4128_p7, %p4127_p6 }
  0x30   :  { %p4130_p9 = pnand %p4129_p8, %p4123_p5 }
  0x32   :  { %4133 = shalt.err (!%p4130_p9)
}
  0x33   :  { %s4213_s3 = smov 128   ;;  %s4214_s28 = smov 8  }
  0x34   :  { %25 = dma.hbm_to_vmem [thread:$0]  %s6862_s0, 2048, %s20_s10, [#allocation5], %s4213_s3, %s4213_s3, %s4214_s28  }
  0x35   :  { %s4215_s6 = smov [#allocation9]   ;;  %s4216_s8 = smov [#allocation12]  }
  0x36   :  { %s43_s7 = sshll.u32 %s4215_s6, 4  ;;  %s66_s9 = sshll.u32 %s4216_s8, 4  ;;  %s44_s7 = int_to_ptr.vmem [resolvable:$true] %s43_s7  ;;  %s67_s9 = int_to_ptr.vmem [resolvable:$true] %s66_s9 }
  0x37   :  { %s4134_s13 = scalar_lea.hbm %s6864_s2, 2048 }
  0x38   :  { %p4135_p10 = scmp.ne.s32.totalorder %s6864_s2, %s4134_s13  ;;  %p4138_p11 = scmp.lt.u32.totalorder %s4134_s13, %s6864_s2 }
  0x3a   :  { %p4140_p12 = pnand %p4138_p11, %p4135_p10 }
  0x3c   :  { %4143 = shalt.err (!%p4140_p12)
}
  0x3d   :  { %s4144_s0 = scalar_lea.vmem %s44_s7, 2048  ;;  %p4149_p0 = scmp.lt.s32.totalorder %s44_s7, %s44_s7 }
  0x3e   :  { %p4145_p13 = scmp.ne.s32.totalorder %s44_s7, %s4144_s0  ;;  %p4150_p1 = scmp.lt.s32.totalorder %s4144_s0, %s4144_s0 }
  0x40   :  { %p4151_p2 = por %p4150_p1, %p4149_p0 }
  0x42   :  { %p4152_p3 = pnand %p4151_p2, %p4145_p13 }
  0x44   :  { %4155 = shalt.err (!%p4152_p3)
}
  0x45   :  { %49 = dma.hbm_to_vmem [thread:$0]  %s6864_s2, 2048, %s44_s7, [#allocation8], %s4213_s3, %s4213_s3, %s4214_s28  }
  0x46   :  { %s4156_s20 = scalar_lea.hbm %s6866_s4, 16 }
  0x47   :  { %p4157_p4 = scmp.ne.s32.totalorder %s6866_s4, %s4156_s20  ;;  %p4160_p5 = scmp.lt.u32.totalorder %s4156_s20, %s6866_s4 }
  0x49   :  { %p4162_p6 = pnand %p4160_p5, %p4157_p4 }
  0x4b   :  { %4165 = shalt.err (!%p4162_p6)
}
  0x4c   :  { %s4166_s25 = scalar_lea.vmem %s67_s9, 16  ;;  %s4170_s26 = scalar_lea.vmem %s67_s9, 32 }
  0x4d   :  { %p4167_p7 = scmp.ne.s32.totalorder %s67_s9, %s4166_s25  ;;  %p4171_p8 = scmp.lt.s32.totalorder %s67_s9, %s67_s9 }
  0x4e   :  { %p4172_p9 = scmp.lt.s32.totalorder %s4170_s26, %s4166_s25 }
  0x50   :  { %p4173_p10 = por %p4172_p9, %p4171_p8 }
  0x52   :  { %p4174_p11 = pnand %p4173_p10, %p4167_p7 }
  0x54   :  { %4177 = shalt.err (!%p4174_p11)
}
  0x55   :  { %69 = dma.hbm_to_vmem [thread:$0]  %s6866_s4, 16, %s67_s9, [#allocation11]  }
  0x56   :  { %4200 = dma.done.wait [#allocation5], 2048  }
  0x57   :  { %4201 = vsyncadd [#allocation5], 4294965248 }
  0x58   :  { %4202 = dma.done.wait [#allocation8], 3072  }
  0x59   :  { %4203 = vsyncadd [#allocation8], 4294964224 }
  0x5a   :  { %4204 = dma.done.wait [#allocation11], 272  }
  0x5b   :  { %4205 = vsyncadd [#allocation11], 4294967024  ;;  %v6896_v0 = vmov 0   ;;  %v4324_v1 = vld [vmem:[#allocation9 + $0x10] sm:$0xff]  ;;  %v4326_v2 = vld [vmem:[#allocation9] sm:$0xff]  ;;  %v4218_v17 = vmov 1  }
  0x5c   :  { %3810 = vset.pattern.permute.xlu1 %v6896_v0  ;;  %3809 = vset.pattern.permute.xlu0 %v6896_v0  ;;  %v4330_v3 = vld [vmem:[#allocation9 + $0x18] sm:$0xff]  ;;  %v4332_v4 = vld [vmem:[#allocation9 + $0x8] sm:$0xff]  ;;  %v4338_v6 = vld [vmem:[#allocation9 + $0x20] sm:$0xff]  ;;  %v7131_v33 = vmov 0  ;;  %v7134_v34 = vmov 0  ;;  %v6915_v36 = vmov 0.0  }
  0x5d   :  { %493 = vperm.xlu1 %3810, %v4324_v1   ;;  %483 = vperm.xlu0 %3809, %v4326_v2   ;;  %v4336_v5 = vld [vmem:[#allocation9 + $0x28] sm:$0xff]  ;;  %v4340_v7 = vld [vmem:[#allocation9 + $0x38] sm:$0xff]  ;;  %v4344_v8 = vld [vmem:[#allocation9 + $0x30] sm:$0xff]  ;;  %v7139_v38 = vmov 0  ;;  %v4220_v42 = vmov 2   ;;  %v7144_v44 = vmov 0 }
  0x5e   :  { %v4348_v9 = vld [vmem:[#allocation9 + $0x48] sm:$0xff]  ;;  %v4350_v10 = vld [vmem:[#allocation9 + $0x40] sm:$0xff]  ;;  %v4354_v11 = vld [vmem:[#allocation9 + $0x58] sm:$0xff]  ;;  %v7147_v48 = vmov 0  ;;  %v7152_v54 = vmov 0  ;;  %v7154_v55 = vmov 0 }
  0x5f   :  { %v4356_v12 = vld [vmem:[#allocation9 + $0x50] sm:$0xff]  ;;  %v4360_v13 = vld [vmem:[#allocation9 + $0x68] sm:$0xff]  ;;  %v4362_v14 = vld [vmem:[#allocation9 + $0x60] sm:$0xff]  ;;  %s4221_s4 = smov 112   ;;  %s4222_s29 = smov 96  }
  0x60   :  { %v4366_v15 = vld [vmem:[#allocation9 + $0x78] sm:$0xff]  ;;  %v4368_v16 = vld [vmem:[#allocation9 + $0x70] sm:$0xff]  ;;  %v126_v18 = vld [vmem:[#allocation4] sm:$0xff]  ;;  %s4223_s30 = smov 16   ;;  %s4224_s6 = smov 32  }
  0x61   :  { %498 = vperm.xlu1 %3810, %v4330_v3   ;;  %488 = vperm.xlu0 %3809, %v4332_v4   ;;  %v127_v19 = vld [vmem:[#allocation4 + $0x8] sm:$0xff]  ;;  %vm142_vm0 = vcmp.ne.bf16.partialorder %v126_v18, 0  ;;  %v128_v20 = vld [vmem:[#allocation4 + $0x10] sm:$0xff]  ;;  %v129_v22 = vld [vmem:[#allocation4 + $0x18] sm:$0xff]  ;;  %s4225_s7 = smov [#allocation13]  }
  0x62   :  { %vm143_vm1 = vcmp.ne.bf16.partialorder %v127_v19, 0  ;;  %v158_v21 = vsel %vm142_vm0, 65537, %v6896_v0  ;;  %vm144_vm2 = vcmp.ne.bf16.partialorder %v128_v20, 0  ;;  %vm145_vm3 = vcmp.ne.bf16.partialorder %v129_v22, 0  ;;  %v130_v30 = vld [vmem:[#allocation4 + $0x20] sm:$0xff]  ;;  %v131_v43 = vld [vmem:[#allocation4 + $0x28] sm:$0xff] }
  0x63   :  { %v159_v23 = vsel %vm143_vm1, 65537, %v6896_v0  ;;  %v174_v24 = vunpack.c.l.b16 %v158_v21  ;;  %v160_v26 = vsel %vm144_vm2, 65537, %v6896_v0  ;;  %v175_v27 = vunpack.c.h.b16 %v158_v21  ;;  %v132_v53 = vld [vmem:[#allocation4 + $0x30] sm:$0xff]  ;;  %v133_v63 = vld [vmem:[#allocation4 + $0x38] sm:$0xff]  ;;  %v134_v20 = vld [vmem:[#allocation4 + $0x40] sm:$0xff]  ;;  %s3328_s8 = sshll.u32 %s4225_s7, 4  ;;  %s3329_s8 = int_to_ptr.vmem [resolvable:$true] %s3328_s8 }
  0x64   :  { %v176_v25 = vunpack.c.l.b16 %v159_v23  ;;  %v177_v28 = vunpack.c.h.b16 %v159_v23  ;;  %v161_v29 = vsel %vm145_vm3, 65537, %v6896_v0  ;;  %v178_v31 = vunpack.c.l.b16 %v160_v26  ;;  %s4178_s9 = scalar_lea.vmem %s3329_s8, 2048  ;;  %p4183_p13 = scmp.lt.s32.totalorder %s3329_s8, %s3329_s8 }
  0x65   :  { %508 = vperm.xlu1 %3810, %v4336_v5   ;;  %503 = vperm.xlu0 %3809, %v4338_v6   ;;  %v179_v32 = vunpack.c.h.b16 %v160_v26  ;;  %vm4392_vm4 = vcmp.ne.s32.totalorder %v174_v24, 0  ;;  %vm4400_vm6 = vcmp.ne.s32.totalorder %v175_v27, 0  ;;  %vm146_vm8 = vcmp.ne.bf16.partialorder %v130_v30, 0  ;;  %p4179_p12 = scmp.ne.s32.totalorder %s3329_s8, %s4178_s9  ;;  %p4184_p0 = scmp.lt.s32.totalorder %s4178_s9, %s4178_s9 }
  0x66   :  { %v7132_v33 = vsel %vm4392_vm4, 4294967295, %v7131_v33  ;;  %vm4396_vm5 = vcmp.ne.s32.totalorder %v176_v25, 0  ;;  %v4407_v37 = vsel %vm4392_vm4, 1.0, %v6915_v36  ;;  %vm4409_vm7 = vcmp.ne.s32.totalorder %v177_v28, 0  ;;  %v135_v28 = vld [vmem:[#allocation4 + $0x48] sm:$0xff] }
  0x67   :  { %7133 = vst [vmem:[#allocation18_spill] sm:$0xff] %v7132_v33  ;;  %v7135_v34 = vsel %vm4396_vm5, 4294967295, %v7134_v34  ;;  %7138 = vst [vmem:[#allocation19_spill] sm:$0xff] %v4407_v37  ;;  %v7140_v38 = vsel %vm4409_vm7, 4294967295, %v7139_v38  ;;  %v4416_v39 = vsel %vm4396_vm5, 1.0, %v6915_v36  ;;  %v4421_v40 = vsel %vm4400_vm6, 1.0, %v6915_v36  ;;  %p4185_p1 = por %p4184_p0, %p4183_p13 }
  0x68   :  { %7141 = vst [vmem:[#allocation20_spill] sm:$0xff] %v4416_v39  ;;  %7142 = vst [vmem:[#allocation21_spill] sm:$0xff] %v4421_v40  ;;  %v4426_v41 = vsel %vm4409_vm7, 1.0, %v6915_v36  ;;  %vm4430_vm9 = vcmp.ne.s32.totalorder %v178_v31, 0  ;;  %v180_v45 = vunpack.c.l.b16 %v161_v29  ;;  %v181_v46 = vunpack.c.h.b16 %v161_v29 }
  0x69   :  { %518 = vperm.xlu1 %3810, %v4340_v7   ;;  %513 = vperm.xlu0 %3809, %v4344_v8   ;;  %7143 = vst [vmem:[#allocation22_spill] sm:$0xff] %v4426_v41  ;;  %v7145_v44 = vsel %vm4430_vm9, 4294967295, %v7144_v44  ;;  %v302_v47 = vadd.f32 %v4416_v39, %v4407_v37  ;;  %vm4436_vm10 = vcmp.ne.s32.totalorder %v179_v32, 0  ;;  %v4443_v49 = vsel %vm4430_vm9, 1.0, %v6915_v36  ;;  %p4186_p2 = pnand %p4185_p1, %p4179_p12 }
  0x6a   :  { %7146 = vst [vmem:[#allocation23_spill] sm:$0xff] %v7145_v44  ;;  %v7148_v48 = vsel %vm4436_vm10, 4294967295, %v7147_v48  ;;  %7150 = vst [vmem:[#allocation25_spill] sm:$0xff] %v4443_v49  ;;  %v323_v50 = vadd.f32 %v4426_v41, %v4421_v40  ;;  %v162_v51 = vsel %vm146_vm8, 65537, %v6896_v0  ;;  %v4451_v52 = vsel %vm4436_vm10, 1.0, %v6915_v36 }
  0x6b   :  { %7149 = vst [vmem:[#allocation24_spill] sm:$0xff] %v7148_v48  ;;  %7151 = vst [vmem:[#allocation26_spill] sm:$0xff] %v4451_v52  ;;  %vm147_vm11 = vcmp.ne.bf16.partialorder %v131_v43, 0  ;;  %vm4455_vm12 = vcmp.ne.s32.totalorder %v180_v45, 0  ;;  %vm4459_vm13 = vcmp.ne.s32.totalorder %v181_v46, 0  ;;  %v303_v56 = vadd.f32 %v4443_v49, %v302_v47  ;;  %v136_v46 = vld [vmem:[#allocation4 + $0x50] sm:$0xff] }
  0x6c   :  { %v7153_v54 = vsel %vm4455_vm12, 4294967295, %v7152_v54  ;;  %v7155_v55 = vsel %vm4459_vm13, 4294967295, %v7154_v55  ;;  %v182_v57 = vunpack.c.l.b16 %v162_v51  ;;  %v4467_v58 = vsel %vm4455_vm12, 1.0, %v6915_v36 }
  0x6d   :  { %528 = vperm.xlu1 %3810, %v4348_v9   ;;  %523 = vperm.xlu0 %3809, %v4350_v10   ;;  %7156 = vst [vmem:[#allocation27_spill] sm:$0xff] %v4467_v58  ;;  %v324_v59 = vadd.f32 %v4451_v52, %v323_v50  ;;  %v163_v60 = vsel %vm147_vm11, 65537, %v6896_v0  ;;  %v183_v61 = vunpack.c.h.b16 %v162_v51  ;;  %v4474_v62 = vsel %vm4459_vm13, 1.0, %v6915_v36 }
  0x6e   :  { %7157 = vst [vmem:[#allocation28_spill] sm:$0xff] %v4474_v62  ;;  %vm148_vm14 = vcmp.ne.bf16.partialorder %v132_v53, 0  ;;  %vm4478_vm15 = vcmp.ne.s32.totalorder %v182_v57, 0  ;;  %vm149_vm1 = vcmp.ne.bf16.partialorder %v133_v63, 0  ;;  %v7166_v21 = vmov 0 }
  0x6f   :  { %vm4483_vm0 = vcmp.ne.s32.totalorder %v183_v61, 0  ;;  %v4490_v18 = vsel %vm4478_vm15, 1.0, %v6915_v36  ;;  %v7168_v22 = vmov 0  ;;  %vm150_vm8 = vcmp.ne.bf16.partialorder %v134_v20, 0  ;;  %v138_v20 = vld [vmem:[#allocation4 + $0x60] sm:$0xff] }
  0x70   :  { %7164 = vst [vmem:[#allocation31_spill] sm:$0xff] %v4490_v18  ;;  %v4497_v19 = vsel %vm4483_vm0, 1.0, %v6915_v36  ;;  %v7173_v32 = vmov 0  ;;  %v7176_v43 = vmov 0  ;;  %v7181_v47 = vmov 0 }
  0x71   :  { %538 = vperm.xlu1 %3810, %v4354_v11   ;;  %533 = vperm.xlu0 %3809, %v4356_v12   ;;  %7165 = vst [vmem:[#allocation32_spill] sm:$0xff] %v4497_v19  ;;  %v7184_v50 = vmov 0 }
  0x75   :  { %548 = vperm.xlu1 %3810, %v4360_v13   ;;  %543 = vperm.xlu0 %3809, %v4362_v14  }
  0x79   :  { %558 = vperm.xlu1 %3810, %v4366_v15   ;;  %553 = vperm.xlu0 %3809, %v4368_v16  }
  0x7d   :  { %3812 = vset.pattern.permute.xlu1 %v4218_v17  ;;  %3811 = vset.pattern.permute.xlu0 %v4218_v17  ;;  %v7161_v17 = vmov 0 }
  0x7e   :  { %1339 = vperm.xlu1 %3812, %v4332_v4   ;;  %1335 = vperm.xlu0 %3811, %v4326_v2   ;;  %v7162_v17 = vsel %vm4483_vm0, 4294967295, %v7161_v17 }
  0x7f   :  { %7163 = vst [vmem:[#allocation30_spill] sm:$0xff] %v7162_v17 }
  0x82   :  { %1343 = vperm.xlu1 %3812, %v4324_v1   ;;  %1347 = vperm.xlu0 %3811, %v4330_v3  }
  0x86   :  { %1351 = vperm.xlu1 %3812, %v4338_v6   ;;  %1355 = vperm.xlu0 %3811, %v4336_v5  }
  0x8a   :  { %1359 = vperm.xlu1 %3812, %v4344_v8   ;;  %1363 = vperm.xlu0 %3811, %v4340_v7  }
  0x8e   :  { %1367 = vperm.xlu1 %3812, %v4350_v10   ;;  %1371 = vperm.xlu0 %3811, %v4348_v9  }
  0x92   :  { %1375 = vperm.xlu1 %3812, %v4356_v12   ;;  %1379 = vperm.xlu0 %3811, %v4354_v11  }
  0x96   :  { %1383 = vperm.xlu1 %3812, %v4362_v14   ;;  %1387 = vperm.xlu0 %3811, %v4360_v13  }
  0x9a   :  { %1391 = vperm.xlu1 %3812, %v4368_v16   ;;  %1395 = vperm.xlu0 %3811, %v4366_v15  }
  0x9e   :  { %3813 = vset.pattern.permute.xlu1 %v4220_v42  ;;  %3814 = vset.pattern.permute.xlu0 %v4220_v42 }
  0x9f   :  { %2212 = vperm.xlu1 %3813, %v4326_v2   ;;  %2216 = vperm.xlu0 %3814, %v4332_v4   ;;  %v185_v2 = vunpack.c.h.b16 %v163_v60  ;;  %v7158_v4 = vmov 0 }
  0xa0   :  { %v7159_v4 = vsel %vm4478_vm15, 4294967295, %v7158_v4 }
  0xa1   :  { %7160 = vst [vmem:[#allocation29_spill] sm:$0xff] %v7159_v4  ;;  %vm4505_vm3 = vcmp.ne.s32.totalorder %v185_v2, 0  ;;  %v7189_v2 = vmov 0 }
  0xa2   :  { %v7169_v22 = vsel %vm4505_vm3, 4294967295, %v7168_v22  ;;  %v4520_v27 = vsel %vm4505_vm3, 1.0, %v6915_v36 }
  0xa3   :  { %2220 = vperm.xlu1 %3813, %v4324_v1   ;;  %2228 = vperm.xlu0 %3814, %v4338_v6   ;;  %v184_v1 = vunpack.c.l.b16 %v163_v60  ;;  %v304_v6 = vadd.f32 %v4467_v58, %v303_v56  ;;  %7170 = vst [vmem:[#allocation33_spill] sm:$0xff] %v7169_v22  ;;  %7172 = vst [vmem:[#allocation35_spill] sm:$0xff] %v4520_v27  ;;  %v137_v60 = vld [vmem:[#allocation4 + $0x58] sm:$0xff] }
  0xa5   :  { %vm4501_vm2 = vcmp.ne.s32.totalorder %v184_v1, 0  ;;  %v305_v23 = vadd.f32 %v4490_v18, %v304_v6 }
  0xa6   :  { %v7167_v21 = vsel %vm4501_vm2, 4294967295, %v7166_v21  ;;  %v4513_v25 = vsel %vm4501_vm2, 1.0, %v6915_v36 }
  0xa7   :  { %2224 = vperm.xlu1 %3813, %v4330_v3   ;;  %2236 = vperm.xlu0 %3814, %v4344_v8   ;;  %v325_v3 = vadd.f32 %v4474_v62, %v324_v59  ;;  %v164_v8 = vsel %vm148_vm14, 65537, %v6896_v0  ;;  %7171 = vst [vmem:[#allocation34_spill] sm:$0xff] %v4513_v25  ;;  %v306_v29 = vadd.f32 %v4513_v25, %v305_v23  ;;  %v7197_v23 = vmov 0 }
  0xa8   :  { %v186_v24 = vunpack.c.l.b16 %v164_v8  ;;  %v187_v26 = vunpack.c.h.b16 %v164_v8 }
  0xaa   :  { %vm4525_vm11 = vcmp.ne.s32.totalorder %v186_v24, 0  ;;  %vm4530_vm14 = vcmp.ne.s32.totalorder %v187_v26, 0  ;;  %v7200_v24 = vmov 0 }
  0xab   :  { %2232 = vperm.xlu1 %3813, %v4336_v5   ;;  %2244 = vperm.xlu0 %3814, %v4350_v10   ;;  %v326_v5 = vadd.f32 %v4497_v19, %v325_v3  ;;  %v165_v10 = vsel %vm149_vm1, 65537, %v6896_v0  ;;  %v7174_v32 = vsel %vm4525_vm11, 4294967295, %v7173_v32  ;;  %v7177_v43 = vsel %vm4530_vm14, 4294967295, %v7176_v43 }
  0xac   :  { %v188_v30 = vunpack.c.l.b16 %v165_v10  ;;  %v189_v31 = vunpack.c.h.b16 %v165_v10  ;;  %7175 = vst [vmem:[#allocation36_spill] sm:$0xff] %v7174_v32  ;;  %7178 = vst [vmem:[#allocation37_spill] sm:$0xff] %v7177_v43  ;;  %v4543_v45 = vsel %vm4530_vm14, 1.0, %v6915_v36  ;;  %vm151_vm1 = vcmp.ne.bf16.partialorder %v135_v28, 0 }
  0xad   :  { %v327_v42 = vadd.f32 %v4520_v27, %v326_v5  ;;  %7180 = vst [vmem:[#allocation39_spill] sm:$0xff] %v4543_v45  ;;  %v7192_v3 = vmov 0 }
  0xae   :  { %vm4547_vm0 = vcmp.ne.s32.totalorder %v188_v30, 0  ;;  %vm4551_vm15 = vcmp.ne.s32.totalorder %v189_v31, 0  ;;  %v139_v31 = vld [vmem:[#allocation4 + $0x68] sm:$0xff] }
  0xaf   :  { %2240 = vperm.xlu1 %3813, %v4340_v7   ;;  %2252 = vperm.xlu0 %3814, %v4356_v12   ;;  %v4537_v7 = vsel %vm4525_vm11, 1.0, %v6915_v36  ;;  %v166_v12 = vsel %vm150_vm8, 65537, %v6896_v0  ;;  %v7182_v47 = vsel %vm4547_vm0, 4294967295, %v7181_v47  ;;  %v7185_v50 = vsel %vm4551_vm15, 4294967295, %v7184_v50 }
  0xb0   :  { %7179 = vst [vmem:[#allocation38_spill] sm:$0xff] %v4537_v7  ;;  %7183 = vst [vmem:[#allocation40_spill] sm:$0xff] %v7182_v47  ;;  %v307_v51 = vadd.f32 %v4537_v7, %v306_v29  ;;  %v190_v53 = vunpack.c.l.b16 %v166_v12  ;;  %v4559_v56 = vsel %vm4547_vm0, 1.0, %v6915_v36  ;;  %v191_v57 = vunpack.c.h.b16 %v166_v12 }
  0xb1   :  { %7186 = vst [vmem:[#allocation41_spill] sm:$0xff] %v7185_v50  ;;  %7187 = vst [vmem:[#allocation42_spill] sm:$0xff] %v4559_v56  ;;  %v4566_v59 = vsel %vm4551_vm15, 1.0, %v6915_v36  ;;  %vm152_vm8 = vcmp.ne.bf16.partialorder %v136_v46, 0  ;;  %vm153_vm11 = vcmp.ne.bf16.partialorder %v137_v60, 0  ;;  %v140_v60 = vld [vmem:[#allocation4 + $0x70] sm:$0xff] }
  0xb2   :  { %7188 = vst [vmem:[#allocation43_spill] sm:$0xff] %v4566_v59  ;;  %v308_v61 = vadd.f32 %v4559_v56, %v307_v51  ;;  %vm4571_vm14 = vcmp.ne.s32.totalorder %v190_v53, 0  ;;  %v7205_v51 = vmov 0  ;;  %v4771_v56 = vld [vmem:[#allocation7 + $0x18] sm:$0xff]  }
  0xb3   :  { %2248 = vperm.xlu1 %3813, %v4348_v9   ;;  %2260 = vperm.xlu0 %3814, %v4362_v14   ;;  %v328_v9 = vadd.f32 %v4543_v45, %v327_v42  ;;  %v167_v14 = vsel %vm151_vm1, 65537, %v6896_v0  ;;  %v7190_v2 = vsel %vm4571_vm14, 4294967295, %v7189_v2  ;;  %vm4576_vm1 = vcmp.ne.s32.totalorder %v191_v57, 0 }
  0xb4   :  { %v192_v63 = vunpack.c.l.b16 %v167_v14  ;;  %v193_v1 = vunpack.c.h.b16 %v167_v14  ;;  %7191 = vst [vmem:[#allocation44_spill] sm:$0xff] %v7190_v2  ;;  %v7193_v3 = vsel %vm4576_vm1, 4294967295, %v7192_v3  ;;  %v4589_v8 = vsel %vm4576_vm1, 1.0, %v6915_v36 }
  0xb5   :  { %v329_v6 = vadd.f32 %v4566_v59, %v328_v9  ;;  %7194 = vst [vmem:[#allocation45_spill] sm:$0xff] %v7193_v3  ;;  %7196 = vst [vmem:[#allocation47_spill] sm:$0xff] %v4589_v8  ;;  %v7208_v9 = vmov 0 }
  0xb6   :  { %vm4592_vm15 = vcmp.ne.s32.totalorder %v192_v63, 0  ;;  %vm4596_vm0 = vcmp.ne.s32.totalorder %v193_v1, 0  ;;  %v7216_v63 = vmov 0 }
  0xb7   :  { %2256 = vperm.xlu1 %3813, %v4354_v11   ;;  %2268 = vperm.xlu0 %3814, %v4368_v16   ;;  %v4583_v11 = vsel %vm4571_vm14, 1.0, %v6915_v36  ;;  %v168_v16 = vsel %vm152_vm8, 65537, %v6896_v0  ;;  %v7198_v23 = vsel %vm4592_vm15, 4294967295, %v7197_v23  ;;  %v7201_v24 = vsel %vm4596_vm0, 4294967295, %v7200_v24 }
  0xb8   :  { %7195 = vst [vmem:[#allocation46_spill] sm:$0xff] %v4583_v11  ;;  %7199 = vst [vmem:[#allocation48_spill] sm:$0xff] %v7198_v23  ;;  %v309_v5 = vadd.f32 %v4583_v11, %v308_v61  ;;  %v194_v10 = vunpack.c.l.b16 %v168_v16  ;;  %v4604_v26 = vsel %vm4592_vm15, 1.0, %v6915_v36  ;;  %v330_v28 = vadd.f32 %v4589_v8, %v329_v6 }
  0xb9   :  { %7202 = vst [vmem:[#allocation49_spill] sm:$0xff] %v7201_v24  ;;  %7203 = vst [vmem:[#allocation50_spill] sm:$0xff] %v4604_v26  ;;  %v195_v29 = vunpack.c.h.b16 %v168_v16  ;;  %v4611_v30 = vsel %vm4596_vm0, 1.0, %v6915_v36  ;;  %vm154_vm8 = vcmp.ne.bf16.partialorder %v138_v20, 0  ;;  %vm155_vm14 = vcmp.ne.bf16.partialorder %v139_v31, 0 }
  0xba   :  { %7204 = vst [vmem:[#allocation51_spill] sm:$0xff] %v4611_v30  ;;  %v310_v42 = vadd.f32 %v4604_v26, %v309_v5  ;;  %vm4615_vm1 = vcmp.ne.s32.totalorder %v194_v10, 0  ;;  %v331_v53 = vadd.f32 %v4611_v30, %v330_v28  ;;  %v7213_v61 = vmov 0  ;;  %v4703_v30 = vld [vmem:[#allocation7] sm:$0xff]  }
  0xbb   :  { %2264 = vperm.xlu1 %3813, %v4360_v13   ;;  %v169_v13 = vsel %vm153_vm11, 65537, %v6896_v0  ;;  %v7206_v51 = vsel %vm4615_vm1, 4294967295, %v7205_v51  ;;  %vm4620_vm11 = vcmp.ne.s32.totalorder %v195_v29, 0  ;;  %v4627_v14 = vsel %vm4615_vm1, 1.0, %v6915_v36  ;;  %3647 = vmatprep.subr.bf16.mxu0 %v4703_v30 }
  0xbc   :  { %v196_v12 = vunpack.c.l.b16 %v169_v13  ;;  %v197_v46 = vunpack.c.h.b16 %v169_v13  ;;  %7207 = vst [vmem:[#allocation52_spill] sm:$0xff] %v7206_v51  ;;  %v7209_v9 = vsel %vm4620_vm11, 4294967295, %v7208_v9  ;;  %7211 = vst [vmem:[#allocation54_spill] sm:$0xff] %v4627_v14  ;;  %v4633_v57 = vsel %vm4620_vm11, 1.0, %v6915_v36  ;;  %v141_v13 = vld [vmem:[#allocation4 + $0x78] sm:$0xff]  ;;  %3648 = vmatpush3.bf16.msra.mxu0 %v4703_v30 }
  0xbd   :  { %7210 = vst [vmem:[#allocation53_spill] sm:$0xff] %v7209_v9  ;;  %7212 = vst [vmem:[#allocation55_spill] sm:$0xff] %v4633_v57  ;;  %v311_v1 = vadd.f32 %v4627_v14, %v310_v42  ;;  %v332_v20 = vadd.f32 %v4633_v57, %v331_v53  ;;  %v171_v5 = vsel %vm155_vm14, 65537, %v6896_v0  ;;  %v7224_v53 = vmov 0 }
  0xbe   :  { %vm4635_vm0 = vcmp.ne.s32.totalorder %v196_v12, 0  ;;  %vm4639_vm15 = vcmp.ne.s32.totalorder %v197_v46, 0  ;;  %v200_v31 = vunpack.c.l.b16 %v171_v5  ;;  %v201_v42 = vunpack.c.h.b16 %v171_v5 }
  0xbf   :  { %2272 = vperm.xlu1 %3813, %v4366_v15   ;;  %v170_v15 = vsel %vm154_vm8, 65537, %v6896_v0  ;;  %v7214_v61 = vsel %vm4635_vm0, 4294967295, %v7213_v61  ;;  %v7217_v63 = vsel %vm4639_vm15, 4294967295, %v7216_v63  ;;  %v4647_v16 = vsel %vm4635_vm0, 1.0, %v6915_v36 }
  0xc0   :  { %7215 = vst [vmem:[#allocation56_spill] sm:$0xff] %v7214_v61  ;;  %7218 = vst [vmem:[#allocation57_spill] sm:$0xff] %v7217_v63  ;;  %v198_v6 = vunpack.c.l.b16 %v170_v15  ;;  %v199_v10 = vunpack.c.h.b16 %v170_v15  ;;  %v4654_v28 = vsel %vm4639_vm15, 1.0, %v6915_v36  ;;  %vm156_vm8 = vcmp.ne.bf16.partialorder %v140_v60, 0 }
  0xc1   :  { %7219 = vst [vmem:[#allocation58_spill] sm:$0xff] %v4647_v16  ;;  %7220 = vst [vmem:[#allocation59_spill] sm:$0xff] %v4654_v28  ;;  %v312_v29 = vadd.f32 %v4647_v16, %v311_v1  ;;  %v7221_v12 = vmov 0  ;;  %v333_v46 = vadd.f32 %v4654_v28, %v332_v20  ;;  %v172_v60 = vsel %vm156_vm8, 65537, %v6896_v0 }
  0xc2   :  { %vm4657_vm11 = vcmp.ne.s32.totalorder %v198_v6, 0  ;;  %vm4662_vm1 = vcmp.ne.s32.totalorder %v199_v10, 0  ;;  %vm157_vm14 = vcmp.ne.bf16.partialorder %v141_v13, 0  ;;  %vm4677_vm15 = vcmp.ne.s32.totalorder %v200_v31, 0 }
  0xc3   :  { %v7222_v12 = vsel %vm4657_vm11, 4294967295, %v7221_v12  ;;  %v7225_v53 = vsel %vm4662_vm1, 4294967295, %v7224_v53  ;;  %v4669_v15 = vsel %vm4657_vm11, 1.0, %v6915_v36  ;;  %v4675_v1 = vsel %vm4662_vm1, 1.0, %v6915_v36  ;;  %1800 = vrot.lane.b32.xlu1 %v4703_v30, %s4221_s4 }
  0xc4   :  { %7223 = vst [vmem:[#allocation60_spill] sm:$0xff] %v7222_v12  ;;  %7226 = vst [vmem:[#allocation61_spill] sm:$0xff] %v7225_v53  ;;  %v7229_v6 = vmov 0  ;;  %vm4681_vm0 = vcmp.ne.s32.totalorder %v201_v42, 0  ;;  %v7232_v20 = vmov 0  ;;  %v313_v5 = vadd.f32 %v4669_v15, %v312_v29 }
  0xc5   :  { %7227 = vst [vmem:[#allocation62_spill] sm:$0xff] %v4669_v15  ;;  %7228 = vst [vmem:[#allocation63_spill] sm:$0xff] %v4675_v1  ;;  %v7230_v6 = vsel %vm4677_vm15, 4294967295, %v7229_v6  ;;  %v7233_v20 = vsel %vm4681_vm0, 4294967295, %v7232_v20  ;;  %v202_v10 = vunpack.c.l.b16 %v172_v60  ;;  %v4689_v0 = vsel %vm4677_vm15, 1.0, %v6915_v36 }
  0xc6   :  { %7231 = vst [vmem:[#allocation64_spill] sm:$0xff] %v7230_v6  ;;  %7234 = vst [vmem:[#allocation65_spill] sm:$0xff] %v7233_v20  ;;  %v334_v28 = vadd.f32 %v4675_v1, %v333_v46  ;;  %v7236_v16 = vmov 0   ;;  %v203_v31 = vunpack.c.h.b16 %v172_v60  ;;  %v561_v57 = vlaneseq }
  0xc7   :  { %7235 = vst [vmem:[#allocation66_spill] sm:$0xff] %v4689_v0  ;;  %v173_v13 = vsel %vm157_vm14, 65537, %v7236_v16  ;;  %v4696_v42 = vsel %vm4681_vm0, 1.0, %v6915_v36  ;;  %v314_v14 = vadd.f32 %v4689_v0, %v313_v5  ;;  %vm4699_vm8 = vcmp.ne.s32.totalorder %v202_v10, 0 }
  0xc8   :  { %7237 = vst [vmem:[#allocation67_spill] sm:$0xff] %v4696_v42  ;;  %v204_v29 = vunpack.c.l.b16 %v173_v13  ;;  %v7238_v15 = vmov 0  ;;  %v335_v46 = vadd.f32 %v4696_v42, %v334_v28  ;;  %v205_v1 = vunpack.c.h.b16 %v173_v13  ;;  %v4731_v13 = vld [vmem:[#allocation7 + $0x8] sm:$0xff]  }
  0xc9   :  { %v7239_v15 = vsel %vm4699_vm8, 4294967295, %v7238_v15  ;;  %vm4706_vm14 = vcmp.ne.s32.totalorder %v203_v31, 0  ;;  %v7241_v60 = vmov 0  ;;  %v4713_v26 = vsel %vm4699_vm8, 1.0, %v6915_v36  ;;  %1802 = vrot.lane.b32.xlu1 %v4731_v13, %s4221_s4  ;;  %3649 = vmatprep.subr.bf16.mxu0 %v4731_v13 }
  0xca   :  { %7240 = vst [vmem:[#allocation68_spill] sm:$0xff] %v7239_v15  ;;  %v7242_v60 = vsel %vm4706_vm14, 4294967295, %v7241_v60  ;;  %7244 = vst [vmem:[#allocation70_spill] sm:$0xff] %v4713_v26  ;;  %v4715_v5 = vshrl.u32 %v561_v57, 7  ;;  %v4720_v10 = vsel %vm4706_vm14, 1.0, %v6915_v36  ;;  %vm4726_vm1 = vcmp.ne.s32.totalorder %v204_v29, 0  ;;  %3650 = vmatpush3.bf16.msra.mxu0 %v4731_v13 }
  0xcb   :  { %7243 = vst [vmem:[#allocation69_spill] sm:$0xff] %v7242_v60  ;;  %7246 = vst [vmem:[#allocation72_spill] sm:$0xff] %v4720_v10  ;;  %v7247_v28 = vmov 0  ;;  %v315_v57 = vadd.f32 %v4713_v26, %v314_v14  ;;  %vm4733_vm8 = vcmp.ne.s32.totalorder %v205_v1, 0  ;;  %v7250_v31 = vmov 0  ;;  %v4752_v14 = vld [vmem:[#allocation10] sm:$0xff] }
  0xcc   :  { %7245 = vst [vmem:[#allocation71_spill] sm:$0xff] %v4715_v5  ;;  %v7248_v28 = vsel %vm4726_vm1, 4294967295, %v7247_v28  ;;  %v7251_v31 = vsel %vm4733_vm8, 4294967295, %v7250_v31  ;;  %v4740_v42 = vsel %vm4726_vm1, 1.0, %v6915_v36  ;;  %v336_v0 = vadd.f32 %v4720_v10, %v335_v46  ;;  %7255 = vst [vmem:[#allocation77_spill] sm:$0xff] %v4752_v14  ;;  %v4754_v1 = vld [vmem:[#allocation10 + $0x8] sm:$0xff] }
  0xcd   :  { %7249 = vst [vmem:[#allocation73_spill] sm:$0xff] %v7248_v28  ;;  %7252 = vst [vmem:[#allocation74_spill] sm:$0xff] %v7251_v31  ;;  %v563_v29 = vsub.s32 0, %v4715_v5  ;;  %v4747_v8 = vsel %vm4733_vm8, 1.0, %v6915_v36  ;;  %v316_v46 = vadd.f32 %v4740_v42, %v315_v57  ;;  %v4758_v10 = vld [vmem:[#allocation7 + $0x10] sm:$0xff]  }
  0xce   :  { %7253 = vst [vmem:[#allocation75_spill] sm:$0xff] %v4740_v42  ;;  %7254 = vst [vmem:[#allocation76_spill] sm:$0xff] %v4747_v8  ;;  %v337_v26 = vadd.f32 %v4747_v8, %v336_v0  ;;  %1804 = vrot.lane.b32.xlu1 %v4758_v10, %s4221_s4  ;;  %3651 = vmatprep.subr.bf16.mxu0 %v4758_v10 }
  0xcf   :  { %7256 = vst [vmem:[#allocation78_spill] sm:$0xff] %v4754_v1  ;;  %v4762_v36 = vrot.slane %v4752_v14, %v563_v29  ;;  %v4765_v11 = vrot.slane %v4754_v1, %v563_v29  ;;  %3652 = vmatpush3.bf16.msra.mxu0 %v4758_v10  ;;  %v317_v59 = vrot.slane %v316_v46, 4 }
  0xd0   :  { %v338_v45 = vrot.slane %v337_v26, 4  ;;  %3653 = vmatprep.subr.bf16.mxu0 %v4771_v56 }
  0xd1   :  { %v318_v18 = vadd.f32 %v317_v59, %v316_v46 }
  0xd2   :  { %1806 = vrot.lane.b32.xlu1 %v4771_v56, %s4221_s4  ;;  %v4781_v39 = vadd.f32 %v338_v45, %v337_v26 }
  0xd3   :  { %3654 = vmatpush3.bf16.msra.mxu0 %v4771_v56 }
  0xdc   :  { %v494_v57 = vpop.permute.xlu1 %493  ;;  %v484_v42 = vpop.permute.xlu0 %483 }
  0xdd   :  { %v573_v0 = vadd.f32 %v4762_v36, %v494_v57  ;;  %v574_v8 = vadd.f32 %v4765_v11, %v494_v57  ;;  %v569_v29 = vadd.f32 %v4762_v36, %v484_v42  ;;  %v570_v7 = vadd.f32 %v4765_v11, %v484_v42  ;;  %v3821_v57 = vld [vmem:[#allocation7 + $0x20] sm:$0xff]  }
  0xde   :  { %1808 = vrot.lane.b32.xlu1 %v3821_v57, %s4221_s4  ;;  %3655 = vmatprep.subr.bf16.mxu0 %v3821_v57 }
  0xdf   :  { %v605_v27 = vmul.f32 0.2, %v573_v0  ;;  %v606_v25 = vmul.f32 0.2, %v574_v8  ;;  %v601_v19 = vmul.f32 0.2, %v569_v29  ;;  %3656 = vmatpush3.bf16.msra.mxu0 %v3821_v57 }
  0xe0   :  { %v602_v62 = vmul.f32 0.2, %v570_v7  ;;  %v499_v58 = vpop.permute.xlu1 %498  ;;  %v489_v41 = vpop.permute.xlu0 %488 }
  0xe1   :  { %v637_v52 = vmax.f32 %v573_v0, %v605_v27  ;;  %v638_v49 = vmax.f32 %v574_v8, %v606_v25  ;;  %v633_v42 = vmax.f32 %v569_v29, %v601_v19  ;;  %v575_v40 = vadd.f32 %v4762_v36, %v499_v58 }
  0xe2   :  { %v576_v37 = vadd.f32 %v4765_v11, %v499_v58  ;;  %v571_v16 = vadd.f32 %v4762_v36, %v489_v41  ;;  %v572_v60 = vadd.f32 %v4765_v11, %v489_v41  ;;  %v319_v25 = vrot.slane %v318_v18, 2  ;;  %2677 = vrot.lane.b32.xlu1 %v4703_v30, %s4222_s29 }
  0xe3   :  { %v4790_v59 = vsel %vm4430_vm9, %v637_v52, -1e+30  ;;  %v4794_v45 = vsel %vm4436_vm10, %v638_v49, -1e+30  ;;  %v1400_v19 = vsub.s32 1, %v4715_v5  ;;  %v634_v27 = vmax.f32 %v570_v7, %v602_v62 }
  0xe4   :  { %7257 = vst [vmem:[#allocation79_spill] sm:$0xff] %v4790_v59  ;;  %7258 = vst [vmem:[#allocation80_spill] sm:$0xff] %v4794_v45  ;;  %v4799_v58 = vsel %vm4392_vm4, %v633_v42, -1e+30  ;;  %v607_v41 = vmul.f32 0.2, %v575_v40  ;;  %v509_v26 = vpop.permute.xlu1 %508  ;;  %v504_v46 = vpop.permute.xlu0 %503 }
  0xe5   :  { %7259 = vst [vmem:[#allocation81_spill] sm:$0xff] %v4799_v58  ;;  %v608_v8 = vmul.f32 0.2, %v576_v37  ;;  %v603_v52 = vmul.f32 0.2, %v571_v16  ;;  %v579_v29 = vadd.f32 %v4762_v36, %v509_v26  ;;  %v580_v5 = vadd.f32 %v4765_v11, %v509_v26 }
  0xe6   :  { %v604_v0 = vmul.f32 0.2, %v572_v60  ;;  %v639_v48 = vmax.f32 %v575_v40, %v607_v41  ;;  %v577_v62 = vadd.f32 %v4762_v36, %v504_v46  ;;  %v578_v57 = vadd.f32 %v4765_v11, %v504_v46  ;;  %2679 = vrot.lane.b32.xlu1 %v4731_v13, %s4222_s29 }
  0xe7   :  { %v640_v44 = vmax.f32 %v576_v37, %v608_v8  ;;  %v635_v7 = vmax.f32 %v571_v16, %v603_v52  ;;  %v611_v33 = vmul.f32 0.2, %v579_v29  ;;  %v4810_v31 = vsel %vm4400_vm6, %v634_v27, -1e+30 }
  0xe8   :  { %v636_v42 = vmax.f32 %v572_v60, %v604_v0  ;;  %7260 = vst [vmem:[#allocation82_spill] sm:$0xff] %v4810_v31  ;;  %v4814_v37 = vsel %vm4455_vm12, %v639_v48, -1e+30  ;;  %v612_v40 = vmul.f32 0.2, %v580_v5  ;;  %v519_v41 = vpop.permute.xlu1 %518  ;;  %v514_v8 = vpop.permute.xlu0 %513  ;;  %v4817_v26 = vrot.slane %v4752_v14, %v1400_v19 }
  0xe9   :  { %7261 = vst [vmem:[#allocation83_spill] sm:$0xff] %v4814_v37  ;;  %v4821_v30 = vsel %vm4459_vm13, %v640_v44, -1e+30  ;;  %v4825_v16 = vsel %vm4396_vm5, %v635_v7, -1e+30  ;;  %v4828_v27 = vrot.slane %v4754_v1, %v1400_v19  ;;  %v643_v46 = vmax.f32 %v579_v29, %v611_v33 }
  0xea   :  { %7262 = vst [vmem:[#allocation84_spill] sm:$0xff] %v4821_v30  ;;  %7263 = vst [vmem:[#allocation85_spill] sm:$0xff] %v4825_v16  ;;  %v609_v60 = vmul.f32 0.2, %v577_v62  ;;  %v4832_v48 = vsel %vm4409_vm7, %v636_v42, -1e+30  ;;  %v644_v52 = vmax.f32 %v580_v5, %v612_v40  ;;  %v583_v49 = vadd.f32 %v4762_v36, %v519_v41  ;;  %2681 = vrot.lane.b32.xlu1 %v4758_v10, %s4222_s29 }
  0xeb   :  { %7264 = vst [vmem:[#allocation86_spill] sm:$0xff] %v4832_v48  ;;  %v610_v0 = vmul.f32 0.2, %v578_v57  ;;  %v584_v7 = vadd.f32 %v4765_v11, %v519_v41  ;;  %v4838_v14 = vadd.f32 %v319_v25, %v318_v18  ;;  %v697_v19 = vmax.f32 %v4799_v58, %v4790_v59 }
  0xec   :  { %v641_v44 = vmax.f32 %v577_v62, %v609_v60  ;;  %v718_v42 = vmax.f32 %v4810_v31, %v4794_v45  ;;  %v698_v33 = vmax.f32 %v4825_v16, %v4814_v37  ;;  %v581_v5 = vadd.f32 %v4762_v36, %v514_v8  ;;  %v529_v29 = vpop.permute.xlu1 %528  ;;  %v524_v13 = vpop.permute.xlu0 %523 }
  0xed   :  { %v719_v62 = vmax.f32 %v4832_v48, %v4821_v30  ;;  %v642_v40 = vmax.f32 %v578_v57, %v610_v0  ;;  %v615_v41 = vmul.f32 0.2, %v583_v49  ;;  %v616_v18 = vmul.f32 0.2, %v584_v7 }
  0xee   :  { %v4851_v25 = vsel %vm4501_vm2, %v643_v46, -1e+30  ;;  %v4855_v60 = vsel %vm4505_vm3, %v644_v52, -1e+30  ;;  %v582_v37 = vadd.f32 %v4765_v11, %v514_v8  ;;  %v613_v59 = vmul.f32 0.2, %v581_v5  ;;  %2683 = vrot.lane.b32.xlu1 %v4771_v56, %s4222_s29 }
  0xef   :  { %7265 = vst [vmem:[#allocation87_spill] sm:$0xff] %v4851_v25  ;;  %7266 = vst [vmem:[#allocation88_spill] sm:$0xff] %v4855_v60  ;;  %vm7267_vm13 = vnez %v7159_v4  ;;  %v647_v57 = vmax.f32 %v583_v49, %v615_v41  ;;  %v648_v0 = vmax.f32 %v584_v7, %v616_v18  ;;  %v587_v58 = vadd.f32 %v4762_v36, %v529_v29 }
  0xf0   :  { %v4862_v16 = vsel %vm7267_vm13, %v641_v44, -1e+30  ;;  %v614_v46 = vmul.f32 0.2, %v582_v37  ;;  %v645_v30 = vmax.f32 %v581_v5, %v613_v59  ;;  %v588_v45 = vadd.f32 %v4765_v11, %v529_v29  ;;  %v539_v48 = vpop.permute.xlu1 %538  ;;  %v534_v8 = vpop.permute.xlu0 %533 }
  0xf1   :  { %7268 = vst [vmem:[#allocation89_spill] sm:$0xff] %v4862_v16  ;;  %v585_v52 = vadd.f32 %v4762_v36, %v524_v13  ;;  %v700_v31 = vmax.f32 %v698_v33, %v4851_v25  ;;  %vm7269_vm3 = vnez %v7162_v17  ;;  %v619_v44 = vmul.f32 0.2, %v587_v58  ;;  %v3822_v33 = vld [vmem:[#allocation7 + $0x28] sm:$0xff]  }
  0xf2   :  { %v4870_v10 = vsel %vm7269_vm3, %v642_v40, -1e+30  ;;  %v586_v49 = vadd.f32 %v4765_v11, %v524_v13  ;;  %v721_v7 = vmax.f32 %v719_v62, %v4855_v60  ;;  %vm7271_vm2 = vnez %v7182_v47  ;;  %1810 = vrot.lane.b32.xlu0 %v3822_v33, %s4221_s4  ;;  %3657 = vmatprep.subr.bf16.mxu0 %v3822_v33 }
  0xf3   :  { %7270 = vst [vmem:[#allocation90_spill] sm:$0xff] %v4870_v10  ;;  %v4876_v59 = vsel %vm7271_vm2, %v647_v57, -1e+30  ;;  %vm7273_vm13 = vnez %v7185_v50  ;;  %v646_v29 = vmax.f32 %v582_v37, %v614_v46  ;;  %v699_v40 = vmax.f32 %v697_v19, %v4862_v16  ;;  %3658 = vmatpush3.bf16.msra.mxu0 %v3822_v33 }
  0xf4   :  { %7272 = vst [vmem:[#allocation91_spill] sm:$0xff] %v4876_v59  ;;  %v4880_v5 = vsel %vm7273_vm13, %v648_v0, -1e+30  ;;  %vm7275_vm3 = vnez %v7174_v32  ;;  %v620_v62 = vmul.f32 0.2, %v588_v45  ;;  %v651_v18 = vmax.f32 %v587_v58, %v619_v44  ;;  %v549_v60 = vpop.permute.xlu1 %548  ;;  %v544_v37 = vpop.permute.xlu0 %543 }
  0xf5   :  { %7274 = vst [vmem:[#allocation92_spill] sm:$0xff] %v4880_v5  ;;  %v4887_v13 = vsel %vm7275_vm3, %v645_v30, -1e+30  ;;  %v617_v41 = vmul.f32 0.2, %v585_v52  ;;  %v591_v25 = vadd.f32 %v4762_v36, %v539_v48  ;;  %v592_v0 = vadd.f32 %v4765_v11, %v539_v48 }
  0xf6   :  { %7276 = vst [vmem:[#allocation93_spill] sm:$0xff] %v4887_v13  ;;  %v618_v57 = vmul.f32 0.2, %v586_v49  ;;  %v720_v56 = vmax.f32 %v718_v42, %v4870_v10  ;;  %vm7277_vm13 = vnez %v7177_v43  ;;  %v652_v30 = vmax.f32 %v588_v45, %v620_v62 }
  0xf7   :  { %v4895_v19 = vsel %vm7277_vm13, %v646_v29, -1e+30  ;;  %v649_v46 = vmax.f32 %v585_v52, %v617_v41  ;;  %v702_v58 = vmax.f32 %v700_v31, %v4876_v59  ;;  %v623_v16 = vmul.f32 0.2, %v591_v25 }
  0xf8   :  { %7278 = vst [vmem:[#allocation94_spill] sm:$0xff] %v4895_v19  ;;  %v650_v44 = vmax.f32 %v586_v49, %v618_v57  ;;  %v624_v1 = vmul.f32 0.2, %v592_v0  ;;  %v723_v48 = vmax.f32 %v721_v7, %v4880_v5  ;;  %v701_v50 = vmax.f32 %v699_v40, %v4887_v13  ;;  %v559_v49 = vpop.permute.xlu1 %558  ;;  %v554_v40 = vpop.permute.xlu0 %553 }
  0xf9   :  { %v589_v47 = vadd.f32 %v4762_v36, %v534_v8  ;;  %v590_v42 = vadd.f32 %v4765_v11, %v534_v8  ;;  %v722_v10 = vmax.f32 %v720_v56, %v4895_v19  ;;  %vm7279_vm2 = vnez %v7198_v23 }
  0xfa   :  { %v4905_v45 = vsel %vm7279_vm2, %v651_v18, -1e+30  ;;  %vm7281_vm13 = vnez %v7201_v24  ;;  %vm7283_vm3 = vnez %v7190_v2  ;;  %vm7285_vm12 = vnez %v7193_v3 }
  0xfb   :  { %7280 = vst [vmem:[#allocation95_spill] sm:$0xff] %v4905_v45  ;;  %v4909_v31 = vsel %vm7281_vm13, %v652_v30, -1e+30  ;;  %v4913_v52 = vsel %vm7283_vm3, %v649_v46, -1e+30  ;;  %v655_v8 = vmax.f32 %v591_v25, %v623_v16  ;;  %v656_v62 = vmax.f32 %v592_v0, %v624_v1 }
  0xfc   :  { %7282 = vst [vmem:[#allocation96_spill] sm:$0xff] %v4909_v31  ;;  %7284 = vst [vmem:[#allocation97_spill] sm:$0xff] %v4913_v52  ;;  %v4917_v7 = vsel %vm7285_vm12, %v650_v44, -1e+30  ;;  %v621_v29 = vmul.f32 0.2, %v589_v47  ;;  %v595_v41 = vadd.f32 %v4762_v36, %v549_v60  ;;  %v596_v18 = vadd.f32 %v4765_v11, %v549_v60 }
  0xfd   :  { %7286 = vst [vmem:[#allocation98_spill] sm:$0xff] %v4917_v7  ;;  %v622_v33 = vmul.f32 0.2, %v590_v42  ;;  %v593_v57 = vadd.f32 %v4762_v36, %v544_v37  ;;  %v704_v56 = vmax.f32 %v702_v58, %v4905_v45  ;;  %v725_v30 = vmax.f32 %v723_v48, %v4909_v31  ;;  %v1340_v58 = vpop.permute.xlu1 %1339 }
  0xfe   :  { %v703_v46 = vmax.f32 %v701_v50, %v4913_v52  ;;  %v653_v59 = vmax.f32 %v589_v47, %v621_v29  ;;  %v627_v13 = vmul.f32 0.2, %v595_v41  ;;  %v628_v16 = vmul.f32 0.2, %v596_v18 }
  0xff   :  { %v654_v44 = vmax.f32 %v590_v42, %v622_v33  ;;  %v594_v25 = vadd.f32 %v4765_v11, %v544_v37  ;;  %v724_v1 = vmax.f32 %v722_v10, %v4917_v7  ;;  %vm7287_vm13 = vnez %v7214_v61  ;;  %v1336_v33 = vpop.permute.xlu0 %1335 }
 0x100   :  { %v4929_v0 = vsel %vm7287_vm13, %v655_v8, -1e+30  ;;  %v625_v60 = vmul.f32 0.2, %v593_v57  ;;  %v599_v5 = vadd.f32 %v4762_v36, %v559_v49  ;;  %vm7289_vm2 = vnez %v7217_v63 }
 0x101   :  { %7288 = vst [vmem:[#allocation99_spill] sm:$0xff] %v4929_v0  ;;  %v4934_v48 = vsel %vm7289_vm2, %v656_v62, -1e+30  ;;  %vm7291_vm12 = vnez %v7206_v51  ;;  %v659_v50 = vmax.f32 %v595_v41, %v627_v13  ;;  %v660_v37 = vmax.f32 %v596_v18, %v628_v16  ;;  %v1344_v18 = vpop.permute.xlu1 %1343 }
 0x102   :  { %7290 = vst [vmem:[#allocation100_spill] sm:$0xff] %v4934_v48  ;;  %v4938_v47 = vsel %vm7291_vm12, %v653_v59, -1e+30  ;;  %v626_v42 = vmul.f32 0.2, %v594_v25  ;;  %v657_v10 = vmax.f32 %v593_v57, %v625_v60  ;;  %v600_v29 = vadd.f32 %v4765_v11, %v559_v49 }
 0x103   :  { %7292 = vst [vmem:[#allocation101_spill] sm:$0xff] %v4938_v47  ;;  %v631_v8 = vmul.f32 0.2, %v599_v5  ;;  %v706_v45 = vmax.f32 %v704_v56, %v4929_v0  ;;  %vm7293_vm13 = vnez %v7209_v9  ;;  %v597_v62 = vadd.f32 %v4762_v36, %v554_v40 }
 0x104   :  { %v4944_v52 = vsel %vm7293_vm13, %v654_v44, -1e+30  ;;  %v598_v31 = vadd.f32 %v4765_v11, %v554_v40  ;;  %v727_v59 = vmax.f32 %v725_v30, %v4934_v48  ;;  %v705_v13 = vmax.f32 %v703_v46, %v4938_v47 }
 0x105   :  { %7294 = vst [vmem:[#allocation102_spill] sm:$0xff] %v4944_v52  ;;  %v4952_v41 = vsel %vm4677_vm15, %v659_v50, -1e+30  ;;  %v658_v49 = vmax.f32 %v594_v25, %v626_v42  ;;  %v4956_v57 = vsel %vm4681_vm0, %v660_v37, -1e+30  ;;  %v663_v44 = vmax.f32 %v599_v5, %v631_v8  ;;  %v1352_v8 = vpop.permute.xlu1 %1351 }
 0x106   :  { %7295 = vst [vmem:[#allocation103_spill] sm:$0xff] %v4952_v41  ;;  %7296 = vst [vmem:[#allocation104_spill] sm:$0xff] %v4956_v57  ;;  %v632_v56 = vmul.f32 0.2, %v600_v29  ;;  %v629_v16 = vmul.f32 0.2, %v597_v62  ;;  %v726_v36 = vmax.f32 %v724_v1, %v4944_v52  ;;  %vm7298_vm2 = vnez %v7225_v53 }
 0x107   :  { %v4961_v11 = vsel %vm4657_vm11, %v657_v10, -1e+30  ;;  %v4965_v40 = vsel %vm7298_vm2, %v658_v49, -1e+30  ;;  %v630_v30 = vmul.f32 0.2, %v598_v31  ;;  %v1408_v5 = vadd.f32 %v4817_v26, %v1340_v58  ;;  %v1348_v10 = vpop.permute.xlu0 %1347 }
 0x108   :  { %7297 = vst [vmem:[#allocation105_spill] sm:$0xff] %v4961_v11  ;;  %7299 = vst [vmem:[#allocation106_spill] sm:$0xff] %v4965_v40  ;;  %v664_v46 = vmax.f32 %v600_v29, %v632_v56  ;;  %v4969_v25 = vsel %vm4726_vm1, %v663_v44, -1e+30  ;;  %v661_v60 = vmax.f32 %v597_v62, %v629_v16  ;;  %v708_v50 = vmax.f32 %v706_v45, %v4952_v41  ;;  %v3823_v49 = vld [vmem:[#allocation7 + $0x30] sm:$0xff]  }
 0x109   :  { %7300 = vst [vmem:[#allocation107_spill] sm:$0xff] %v4969_v25  ;;  %v729_v1 = vmax.f32 %v727_v59, %v4956_v57  ;;  %v662_v37 = vmax.f32 %v598_v31, %v630_v30  ;;  %v1409_v42 = vadd.f32 %v4828_v27, %v1340_v58  ;;  %v707_v0 = vmax.f32 %v705_v13, %v4961_v11 }
 0x10a   :  { %vm7301_vm0 = vnez %v7239_v15  ;;  %v1406_v62 = vadd.f32 %v4817_v26, %v1336_v33  ;;  %v1407_v56 = vadd.f32 %v4828_v27, %v1336_v33  ;;  %v728_v45 = vmax.f32 %v726_v36, %v4965_v40  ;;  %1812 = vrot.lane.b32.xlu0 %v3823_v49, %s4221_s4  ;;  %3659 = vmatprep.subr.bf16.mxu0 %v3823_v49 }
 0x10b   :  { %v4978_v29 = vsel %vm7301_vm0, %v661_v60, -1e+30  ;;  %v4985_v31 = vsel %vm4733_vm8, %v664_v46, -1e+30  ;;  %v710_v58 = vmax.f32 %v708_v50, %v4969_v25  ;;  %v4990_v16 = vsel %vm4706_vm14, %v662_v37, -1e+30  ;;  %3660 = vmatpush3.bf16.msra.mxu0 %v3823_v49  ;;  %v1356_v48 = vpop.permute.xlu0 %1355 }
 0x10c   :  { %7302 = vst [vmem:[#allocation108_spill] sm:$0xff] %v4978_v29  ;;  %7304 = vst [vmem:[#allocation109_spill] sm:$0xff] %v4985_v31  ;;  %v709_v13 = vmax.f32 %v707_v0, %v4978_v29  ;;  %v1440_v30 = vmul.f32 0.2, %v1408_v5  ;;  %v1438_v60 = vmul.f32 0.2, %v1406_v62  ;;  %v1410_v41 = vadd.f32 %v4817_v26, %v1344_v18  ;;  %v1360_v29 = vpop.permute.xlu1 %1359 }
 0x10d   :  { %7306 = vst [vmem:[#allocation110_spill] sm:$0xff] %v4990_v16  ;;  %v1439_v33 = vmul.f32 0.2, %v1407_v56  ;;  %v1441_v36 = vmul.f32 0.2, %v1409_v42  ;;  %v1411_v46 = vadd.f32 %v4828_v27, %v1344_v18  ;;  %v731_v50 = vmax.f32 %v729_v1, %v4985_v31 }
 0x10e   :  { %v321_v25 = vrot.slane %v4838_v14, 1  ;;  %v7307_v37 = vrot.slane %v4781_v39, 2  ;;  %v730_v0 = vmax.f32 %v728_v45, %v4990_v16  ;;  %v1470_v47 = vmax.f32 %v1406_v62, %v1438_v60 }
 0x10f   :  { %v1442_v57 = vmul.f32 0.2, %v1410_v41  ;;  %v1443_v49 = vmul.f32 0.2, %v1411_v46  ;;  %v1412_v40 = vadd.f32 %v4817_v26, %v1348_v10  ;;  %v711_v52 = vmax.f32 %v709_v13, %v710_v58 }
 0x110   :  { %v5001_v11 = vadd.f32 %v7307_v37, %v4781_v39  ;;  %v1472_v18 = vmax.f32 %v1408_v5, %v1440_v30  ;;  %v1471_v7 = vmax.f32 %v1407_v56, %v1439_v33  ;;  %v1413_v1 = vadd.f32 %v4828_v27, %v1348_v10  ;;  %v1368_v58 = vpop.permute.xlu1 %1367 }
 0x111   :  { %v1473_v31 = vmax.f32 %v1409_v42, %v1441_v36  ;;  %v1474_v19 = vmax.f32 %v1410_v41, %v1442_v57  ;;  %v1475_v44 = vmax.f32 %v1411_v46, %v1443_v49  ;;  %v1444_v28 = vmul.f32 0.2, %v1412_v40 }
 0x112   :  { %v732_v39 = vmax.f32 %v730_v0, %v731_v50  ;;  %v1445_v37 = vmul.f32 0.2, %v1413_v1  ;;  %v1414_v45 = vadd.f32 %v4817_v26, %v1352_v8  ;;  %v1415_v62 = vadd.f32 %v4828_v27, %v1352_v8 }
 0x113   :  { %v342_v60 = vrot.slane %v5001_v11, 1  ;;  %v5011_v59 = vsel %vm4392_vm4, %v1470_v47, -1e+30  ;;  %v5015_v56 = vsel %vm4430_vm9, %v1474_v19, -1e+30  ;;  %v1476_v42 = vmax.f32 %v1412_v40, %v1444_v28  ;;  %v7312_v47 = vld [vmem:[#allocation24_spill] sm:$0xff]  ;;  %v1364_v40 = vpop.permute.xlu0 %1363 }
 0x114   :  { %v712_v41 = vrot.slane %v711_v52, 4  ;;  %v5019_v57 = vsel %vm4396_vm5, %v1472_v18, -1e+30  ;;  %v5023_v10 = vsel %vm4400_vm6, %v1471_v7, -1e+30  ;;  %v1477_v8 = vmax.f32 %v1413_v1, %v1445_v37 }
 0x115   :  { %7310 = vst [vmem:[#allocation18_spill] sm:$0xff] %v5023_v10  ;;  %v5026_v13 = vadd.f32 %v321_v25, %v4838_v14  ;;  %v5030_v30 = vsel %vm4436_vm10, %v1475_v44, -1e+30  ;;  %v1446_v19 = vmul.f32 0.2, %v1414_v45  ;;  %v733_v33 = vrot.slane %v732_v39, 4 }
 0x116   :  { %7313 = vst [vmem:[#allocation24_spill] sm:$0xff] %v5030_v30  ;;  %v1447_v28 = vmul.f32 0.2, %v1415_v62  ;;  %v5034_v36 = vsel %vm4409_vm7, %v1473_v31, -1e+30  ;;  %v1534_v7 = vmax.f32 %v5011_v59, %v5015_v56  ;;  %v1416_v46 = vadd.f32 %v4817_v26, %v1356_v48 }
 0x117   :  { %7311 = vst [vmem:[#allocation23_spill] sm:$0xff] %v5026_v13  ;;  %7314 = vst [vmem:[#allocation111_spill] sm:$0xff] %v5034_v36  ;;  %vm7315_vm5 = vnez %v7153_v54  ;;  %vm7316_vm10 = vnez %v7155_v55  ;;  %v1478_v44 = vmax.f32 %v1414_v45, %v1446_v19  ;;  %v1555_v0 = vmax.f32 %v5023_v10, %v5030_v30 }
 0x118   :  { %v5041_v14 = vsel %vm7315_vm5, %v1476_v42, -1e+30  ;;  %v5045_v25 = vsel %vm7316_vm10, %v1477_v8, -1e+30  ;;  %v1479_v50 = vmax.f32 %v1415_v62, %v1447_v28  ;;  %v1417_v31 = vadd.f32 %v4828_v27, %v1356_v48 }
 0x119   :  { %7317 = vst [vmem:[#allocation112_spill] sm:$0xff] %v5045_v25  ;;  %v1448_v49 = vmul.f32 0.2, %v1416_v46  ;;  %v1418_v18 = vadd.f32 %v4817_v26, %v1360_v29  ;;  %v5051_v1 = vmax.f32 %v711_v52, %v712_v41  ;;  %vm7318_vm7 = vnez %v7159_v4  ;;  %v1376_v41 = vpop.permute.xlu1 %1375 }
 0x11a   :  { %v5055_v37 = vsel %vm7318_vm7, %v1478_v44, -1e+30  ;;  %vm7319_vm5 = vnez %v7162_v17  ;;  %v1419_v45 = vadd.f32 %v4828_v27, %v1360_v29  ;;  %v5062_v62 = vmax.f32 %v732_v39, %v733_v33  ;;  %v1372_v17 = vpop.permute.xlu0 %1371 }
 0x11b   :  { %v5059_v42 = vsel %vm7319_vm5, %v1479_v50, -1e+30  ;;  %v1535_v48 = vmax.f32 %v5019_v57, %v5041_v14  ;;  %v1556_v8 = vmax.f32 %v5034_v36, %v5045_v25  ;;  %v1449_v52 = vmul.f32 0.2, %v1417_v31 }
 0x11c   :  { %7320 = vst [vmem:[#allocation113_spill] sm:$0xff] %v5059_v42  ;;  %v1536_v19 = vmax.f32 %v1534_v7, %v5055_v37  ;;  %v1480_v28 = vmax.f32 %v1416_v46, %v1448_v49  ;;  %v1450_v44 = vmul.f32 0.2, %v1418_v18  ;;  %v1451_v4 = vmul.f32 0.2, %v1419_v45 }
 0x11d   :  { %v1557_v50 = vmax.f32 %v1555_v0, %v5059_v42  ;;  %v1481_v30 = vmax.f32 %v1417_v31, %v1449_v52  ;;  %v1420_v29 = vadd.f32 %v4817_v26, %v1364_v40  ;;  %v1421_v39 = vadd.f32 %v4828_v27, %v1364_v40  ;;  %v1384_v52 = vpop.permute.xlu1 %1383 }
 0x11e   :  { %v5073_v33 = vadd.f32 %v342_v60, %v5001_v11  ;;  %vm7322_vm5 = vnez %v7167_v21  ;;  %v1482_v36 = vmax.f32 %v1418_v18, %v1450_v44  ;;  %v1483_v7 = vmax.f32 %v1419_v45, %v1451_v4  ;;  %v1380_v46 = vpop.permute.xlu0 %1379 }
 0x11f   :  { %v5077_v25 = vsel %vm7322_vm5, %v1480_v28, -1e+30  ;;  %3825 = vrsqrt.f32 %v5026_v13  ;;  %vm7324_vm7 = vnez %v7169_v22  ;;  %v1452_v31 = vmul.f32 0.2, %v1420_v29  ;;  %v7333_v22 = vld [vmem:[#allocation41_spill] sm:$0xff] }
 0x120   :  { %7321 = vst [vmem:[#allocation114_spill] sm:$0xff] %v5073_v33  ;;  %7323 = vst [vmem:[#allocation115_spill] sm:$0xff] %v5077_v25  ;;  %v5083_v0 = vsel %vm7324_vm7, %v1481_v30, -1e+30  ;;  %v735_v40 = vrot.slane %v5062_v62, 2  ;;  %v1537_v11 = vmax.f32 %v1535_v48, %v5077_v25  ;;  %vm7326_vm10 = vnez %v7174_v32 }
 0x121   :  { %7325 = vst [vmem:[#allocation116_spill] sm:$0xff] %v5083_v0  ;;  %v5089_v60 = vsel %vm7326_vm10, %v1482_v36, -1e+30  ;;  %vm7328_vm5 = vnez %v7177_v43  ;;  %v1558_v49 = vmax.f32 %v1556_v8, %v5083_v0  ;;  %v1453_v45 = vmul.f32 0.2, %v1421_v39  ;;  %v1392_v25 = vpop.permute.xlu1 %1391 }
 0x122   :  { %7327 = vst [vmem:[#allocation117_spill] sm:$0xff] %v5089_v60  ;;  %v5093_v4 = vsel %vm7328_vm5, %v1483_v7, -1e+30  ;;  %v1538_v18 = vmax.f32 %v1536_v19, %v5089_v60  ;;  %v1484_v28 = vmax.f32 %v1420_v29, %v1452_v31  ;;  %v1422_v44 = vadd.f32 %v4817_v26, %v1368_v58  ;;  %v7330_v19 = vld [vmem:[#allocation40_spill] sm:$0xff] }
 0x123   :  { %7329 = vst [vmem:[#allocation118_spill] sm:$0xff] %v5093_v4  ;;  %v1559_v30 = vmax.f32 %v1557_v50, %v5093_v4  ;;  %v1423_v48 = vadd.f32 %v4828_v27, %v1368_v58  ;;  %v1424_v36 = vadd.f32 %v4817_v26, %v1372_v17  ;;  %v1485_v13 = vmax.f32 %v1421_v39, %v1453_v45 }
 0x124   :  { %v1425_v7 = vadd.f32 %v4828_v27, %v1372_v17  ;;  %v1426_v43 = vadd.f32 %v4817_v26, %v1376_v41  ;;  %v1427_v8 = vadd.f32 %v4828_v27, %v1376_v41  ;;  %vm7331_vm5 = vnez %v7330_v19 }
 0x125   :  { %v5106_v50 = vsel %vm7331_vm5, %v1484_v28, -1e+30  ;;  %v1454_v32 = vmul.f32 0.2, %v1422_v44  ;;  %v1455_v29 = vmul.f32 0.2, %v1423_v48  ;;  %v1428_v31 = vadd.f32 %v4817_v26, %v1380_v46 }
 0x126   :  { %7332 = vst [vmem:[#allocation119_spill] sm:$0xff] %v5106_v50  ;;  %vm7334_vm10 = vnez %v7333_v22  ;;  %v1539_v39 = vmax.f32 %v1537_v11, %v5106_v50  ;;  %v1456_v45 = vmul.f32 0.2, %v1424_v36  ;;  %v1457_v17 = vmul.f32 0.2, %v1425_v7 }
 0x127   :  { %v5111_v58 = vsel %vm7334_vm10, %v1485_v13, -1e+30  ;;  %v1486_v0 = vmax.f32 %v1422_v44, %v1454_v32  ;;  %v1487_v41 = vmax.f32 %v1423_v48, %v1455_v29  ;;  %v1458_v42 = vmul.f32 0.2, %v1426_v43 }
 0x128   :  { %v1560_v4 = vmax.f32 %v1558_v49, %v5111_v58  ;;  %v1488_v19 = vmax.f32 %v1424_v36, %v1456_v45  ;;  %v1489_v28 = vmax.f32 %v1425_v7, %v1457_v17  ;;  %v1459_v10 = vmul.f32 0.2, %v1427_v8  ;;  %v1388_v49 = vpop.permute.xlu0 %1387 }
 0x129   :  { %v1429_v60 = vadd.f32 %v4828_v27, %v1380_v46  ;;  %v5118_v22 = vsel %vm7283_vm3, %v1486_v0, -1e+30  ;;  %vm7335_vm10 = vnez %v7193_v3  ;;  %v1490_v11 = vmax.f32 %v1426_v43, %v1458_v42  ;;  %v5124_v32 = vpop.eup %3825 }
 0x12a   :  { %v5122_v13 = vsel %vm7335_vm10, %v1487_v41, -1e+30  ;;  %v1460_v50 = vmul.f32 0.2, %v1428_v31  ;;  %7336 = vst [vmem:[#allocation120_spill] sm:$0xff] %v5124_v32  ;;  %v736_v44 = vmax.f32 %v5062_v62, %v735_v40  ;;  %v1540_v48 = vmax.f32 %v1538_v18, %v5118_v22 }
 0x12b   :  { %vm7337_vm5 = vnez %v7198_v23  ;;  %vm7338_vm3 = vnez %v7201_v24  ;;  %v1561_v36 = vmax.f32 %v1559_v30, %v5122_v13  ;;  %v1491_v42 = vmax.f32 %v1427_v8, %v1459_v10 }
 0x12c   :  { %v5130_v46 = vsel %vm7337_vm5, %v1488_v19, -1e+30  ;;  %v5134_v0 = vsel %vm7338_vm3, %v1489_v28, -1e+30  ;;  %v5140_v7 = vsel %vm7291_vm12, %v1490_v11, -1e+30  ;;  %v1492_v18 = vmax.f32 %v1428_v31, %v1460_v50  ;;  %v2213_v31 = vpop.permute.xlu1 %2212 }
 0x12d   :  { %v1541_v43 = vmax.f32 %v1539_v39, %v5130_v46  ;;  %v1562_v62 = vmax.f32 %v1560_v4, %v5134_v0  ;;  %v1461_v40 = vmul.f32 0.2, %v1429_v60  ;;  %v1430_v19 = vadd.f32 %v4817_v26, %v1384_v52 }
 0x12e   :  { %v5146_v29 = vsel %vm7293_vm13, %v1491_v42, -1e+30  ;;  %v1431_v45 = vadd.f32 %v4828_v27, %v1384_v52  ;;  %v1432_v30 = vadd.f32 %v4817_v26, %v1388_v49  ;;  %v1433_v10 = vadd.f32 %v4828_v27, %v1388_v49  ;;  %v1396_v42 = vpop.permute.xlu0 %1395 }
 0x12f   :  { %v1542_v8 = vmax.f32 %v1540_v48, %v5140_v7  ;;  %v1493_v39 = vmax.f32 %v1429_v60, %v1461_v40  ;;  %vm7339_vm12 = vnez %v7214_v61  ;;  %v1462_v50 = vmul.f32 0.2, %v1430_v19 }
 0x130   :  { %v5154_v4 = vsel %vm7339_vm12, %v1492_v18, -1e+30  ;;  %v1563_v17 = vmax.f32 %v1561_v36, %v5146_v29  ;;  %v1463_v41 = vmul.f32 0.2, %v1431_v45  ;;  %v1464_v28 = vmul.f32 0.2, %v1432_v30 }
 0x131   :  { %v1465_v11 = vmul.f32 0.2, %v1433_v10  ;;  %vm7340_vm13 = vnez %v7217_v63  ;;  %v1494_v49 = vmax.f32 %v1430_v19, %v1462_v50  ;;  %v1434_v48 = vadd.f32 %v4817_v26, %v1392_v25 }
 0x132   :  { %v5159_v52 = vsel %vm7340_vm13, %v1493_v39, -1e+30  ;;  %v1435_v60 = vadd.f32 %v4828_v27, %v1392_v25  ;;  %v1543_v40 = vmax.f32 %v1541_v43, %v5154_v4  ;;  %v1495_v18 = vmax.f32 %v1431_v45, %v1463_v41 }
 0x133   :  { %v1496_v32 = vmax.f32 %v1432_v30, %v1464_v28  ;;  %v1497_v9 = vmax.f32 %v1433_v10, %v1465_v11  ;;  %v5166_v36 = vsel %vm4657_vm11, %v1494_v49, -1e+30  ;;  %v1466_v51 = vmul.f32 0.2, %v1434_v48  ;;  %v2221_v10 = vpop.permute.xlu1 %2220  ;;  %v7342_v11 = vld [vmem:[#allocation71_spill] sm:$0xff] }
 0x134   :  { %v1467_v61 = vmul.f32 0.2, %v1435_v60  ;;  %v1436_v63 = vadd.f32 %v4817_v26, %v1396_v42  ;;  %v737_v39 = vrot.slane %v736_v44, 1  ;;  %v1564_v19 = vmax.f32 %v1562_v62, %v5159_v52 }
 0x135   :  { %v5172_v50 = vsel %vm7298_vm2, %v1495_v18, -1e+30  ;;  %v5176_v25 = vsel %vm4677_vm15, %v1496_v32, -1e+30  ;;  %v1544_v43 = vmax.f32 %v1542_v8, %v5166_v36  ;;  %vm7341_vm11 = vnez %v7233_v20 }
 0x136   :  { %v1565_v45 = vmax.f32 %v1563_v17, %v5172_v50  ;;  %v5182_v30 = vsel %vm7341_vm11, %v1497_v9, -1e+30  ;;  %v1498_v26 = vmax.f32 %v1434_v48, %v1466_v51  ;;  %v1499_v41 = vmax.f32 %v1435_v60, %v1467_v61  ;;  %v2217_v51 = vpop.permute.xlu0 %2216 }
 0x137   :  { %v1437_v62 = vadd.f32 %v4828_v27, %v1396_v42  ;;  %v1468_v28 = vmul.f32 0.2, %v1436_v63  ;;  %v2277_v49 = vsub.s32 2, %v7342_v11  ;;  %3827 = vrsqrt.f32 %v5073_v33 }
 0x138   :  { %v1545_v32 = vmax.f32 %v1543_v40, %v5176_v25  ;;  %v5190_v8 = vsel %vm7301_vm0, %v1498_v26, -1e+30  ;;  %v7343_v17 = vrot.slane %v5051_v1, 2  ;;  %v5199_v61 = vsel %vm4706_vm14, %v1499_v41, -1e+30  ;;  %v7346_v40 = vld [vmem:[#allocation77_spill] sm:$0xff] }
 0x139   :  { %v1469_v27 = vmul.f32 0.2, %v1437_v62  ;;  %v1500_v42 = vmax.f32 %v1436_v63, %v1468_v28  ;;  %v1566_v48 = vmax.f32 %v1564_v19, %v5182_v30  ;;  %v1546_v60 = vmax.f32 %v1544_v43, %v5190_v8  ;;  %v7347_v26 = vld [vmem:[#allocation78_spill] sm:$0xff] }
 0x13a   :  { %v5195_v9 = vmax.f32 %v5051_v1, %v7343_v17  ;;  %v5204_v18 = vrot.slane %v7346_v40, %v2277_v49  ;;  %v5207_v11 = vrot.slane %v7347_v26, %v2277_v49  ;;  %v5209_v33 = vmax.f32 %v736_v44, %v737_v39  ;;  %v2225_v40 = vpop.permute.xlu1 %2224 }
 0x13b   :  { %v1567_v1 = vmax.f32 %v1565_v45, %v5199_v61  ;;  %v1501_v17 = vmax.f32 %v1437_v62, %v1469_v27  ;;  %v5214_v41 = vsel %vm4726_vm1, %v1500_v42, -1e+30  ;;  %vm7353_vm14 = vnez %v7312_v47 }
 0x13c   :  { %7344 = vst [vmem:[#allocation71_spill] sm:$0xff] %v5195_v9  ;;  %7348 = vst [vmem:[#allocation77_spill] sm:$0xff] %v5207_v11  ;;  %v1547_v63 = vmax.f32 %v1545_v32, %v5214_v41  ;;  %v2283_v19 = vadd.f32 %v5204_v18, %v2213_v31  ;;  %v2284_v43 = vadd.f32 %v5207_v11, %v2213_v31  ;;  %vm7354_vm0 = vnez %v7153_v54 }
 0x13d   :  { %7349 = vst [vmem:[#allocation78_spill] sm:$0xff] %v5209_v33  ;;  %v2287_v28 = vadd.f32 %v5204_v18, %v2221_v10  ;;  %v5222_v44 = vsel %vm4733_vm8, %v1501_v17, -1e+30  ;;  %v2288_v39 = vadd.f32 %v5207_v11, %v2221_v10  ;;  %v2289_v45 = vadd.f32 %v5204_v18, %v2225_v40 }
 0x13e   :  { %v2290_v62 = vadd.f32 %v5207_v11, %v2225_v40  ;;  %v1548_v27 = vmax.f32 %v1546_v60, %v1547_v63  ;;  %v1568_v32 = vmax.f32 %v1566_v48, %v5222_v44  ;;  %v2315_v42 = vmul.f32 0.2, %v2283_v19  ;;  %v2233_v5 = vpop.permute.xlu1 %2232 }
 0x13f   :  { %v2316_v26 = vmul.f32 0.2, %v2284_v43  ;;  %v2319_v31 = vmul.f32 0.2, %v2287_v28  ;;  %v2320_v15 = vmul.f32 0.2, %v2288_v39  ;;  %v2285_v9 = vadd.f32 %v5204_v18, %v2217_v51 }
 0x140   :  { %v2321_v33 = vmul.f32 0.2, %v2289_v45  ;;  %v1549_v49 = vrot.slane %v1548_v27, 4  ;;  %v1569_v17 = vmax.f32 %v1567_v1, %v1568_v32  ;;  %v2347_v53 = vmax.f32 %v2283_v19, %v2315_v42 }
 0x141   :  { %v2348_v12 = vmax.f32 %v2284_v43, %v2316_v26  ;;  %v2351_v10 = vmax.f32 %v2287_v28, %v2319_v31  ;;  %v2352_v20 = vmax.f32 %v2288_v39, %v2320_v15  ;;  %v2322_v6 = vmul.f32 0.2, %v2290_v62  ;;  %v5229_v40 = vpop.eup %3827 }
 0x142   :  { %v2353_v3 = vmax.f32 %v2289_v45, %v2321_v33  ;;  %7352 = vst [vmem:[#allocation121_spill] sm:$0xff] %v5229_v40  ;;  %v1550_v60 = vmax.f32 %v1548_v27, %v1549_v49  ;;  %v1570_v48 = vrot.slane %v1569_v17, 4  ;;  %v5233_v63 = vsel %vm4392_vm4, %v2347_v53, -1e+30 }
 0x143   :  { %v5237_v2 = vsel %vm4400_vm6, %v2348_v12, -1e+30  ;;  %v5241_v1 = vsel %vm4430_vm9, %v2351_v10, -1e+30  ;;  %v5245_v15 = vsel %vm7353_vm14, %v2352_v20, -1e+30  ;;  %v2354_v33 = vmax.f32 %v2290_v62, %v2322_v6 }
 0x144   :  { %v5249_v19 = vsel %vm7354_vm0, %v2353_v3, -1e+30  ;;  %v1551_v16 = vrot.slane %v1550_v60, 2  ;;  %v1571_v53 = vmax.f32 %v1569_v17, %v1570_v48  ;;  %vm7355_vm4 = vnez %v7155_v55  ;;  %v2229_v3 = vpop.permute.xlu0 %2228 }
 0x145   :  { %v5257_v43 = vsel %vm7355_vm4, %v2354_v33, -1e+30  ;;  %v2286_v20 = vadd.f32 %v5207_v11, %v2217_v51  ;;  %v2317_v6 = vmul.f32 0.2, %v2285_v9  ;;  %v2293_v54 = vadd.f32 %v5204_v18, %v2233_v5 }
 0x146   :  { %v1552_v47 = vmax.f32 %v1550_v60, %v1551_v16  ;;  %v1572_v28 = vrot.slane %v1571_v53, 2  ;;  %v5262_v49 = vadd.f32 %v5207_v11, %v2233_v5  ;;  %v5265_v39 = vadd.f32 %v5204_v18, %v2229_v3 }
 0x147   :  { %v2318_v45 = vmul.f32 0.2, %v2286_v20  ;;  %v2349_v62 = vmax.f32 %v2285_v9, %v2317_v6  ;;  %v2325_v27 = vmul.f32 0.2, %v2293_v54  ;;  %v5268_v55 = vadd.f32 %v5207_v11, %v2229_v3 }
 0x148   :  { %v1553_v32 = vrot.slane %v1552_v47, 1  ;;  %v1573_v51 = vmax.f32 %v1571_v53, %v1572_v28  ;;  %v5271_v42 = vmul.f32 0.2, %v5262_v49  ;;  %v5274_v26 = vmul.f32 0.2, %v5265_v39  ;;  %v7359_v28 = vld [vmem:[#allocation115_spill] sm:$0xff] }
 0x149   :  { %v2350_v31 = vmax.f32 %v2286_v20, %v2318_v45  ;;  %vm7356_vm6 = vnez %v7135_v34  ;;  %v2357_v10 = vmax.f32 %v2293_v54, %v2325_v27  ;;  %v5281_v9 = vmul.f32 0.2, %v5268_v55 }
 0x14a   :  { %v5278_v17 = vsel %vm7356_vm6, %v2349_v62, -1e+30  ;;  %v5283_v60 = vmax.f32 %v1552_v47, %v1553_v32  ;;  %v1574_v48 = vrot.slane %v1573_v51, 1  ;;  %vm7357_vm9 = vnez %v7140_v38  ;;  %v7360_v62 = vld [vmem:[#allocation117_spill] sm:$0xff] }
 0x14b   :  { %v5291_v53 = vsel %vm7357_vm9, %v2350_v31, -1e+30  ;;  %vm7358_vm0 = vnez %v7167_v21 }
 0x14c   :  { %v5295_v34 = vsel %vm7358_vm0, %v2357_v10, -1e+30  ;;  %v5301_v6 = vmax.f32 %v1573_v51, %v1574_v48  ;;  %v1576_v54 = vsub.f32 %v5011_v59, %v5283_v60  ;;  %v1578_v38 = vsub.f32 %v5019_v57, %v5283_v60  ;;  %v7361_v59 = vld [vmem:[#allocation18_spill] sm:$0xff]  ;;  %v7362_v57 = vld [vmem:[#allocation111_spill] sm:$0xff] }
 0x14d   :  { %v1580_v3 = vsub.f32 %v5015_v56, %v5283_v60  ;;  %v1582_v21 = vsub.f32 %v5041_v14, %v5283_v60  ;;  %v1584_v47 = vsub.f32 %v5055_v37, %v5283_v60  ;;  %v1586_v45 = vsub.f32 %v7359_v28, %v5283_v60  ;;  %v7363_v56 = vld [vmem:[#allocation24_spill] sm:$0xff]  ;;  %v7365_v37 = vld [vmem:[#allocation113_spill] sm:$0xff] }
 0x14e   :  { %v1588_v27 = vsub.f32 %v7360_v62, %v5283_v60  ;;  %v1577_v32 = vsub.f32 %v7361_v59, %v5301_v6  ;;  %v1579_v51 = vsub.f32 %v7362_v57, %v5301_v6  ;;  %v1581_v31 = vsub.f32 %v7363_v56, %v5301_v6  ;;  %v7364_v14 = vld [vmem:[#allocation112_spill] sm:$0xff]  ;;  %v7367_v62 = vld [vmem:[#allocation118_spill] sm:$0xff]  ;;  %v7368_v59 = vld [vmem:[#allocation119_spill] sm:$0xff] }
 0x14f   :  { %v1583_v10 = vsub.f32 %v7364_v14, %v5301_v6  ;;  %v1585_v48 = vsub.f32 %v7365_v37, %v5301_v6  ;;  %v7366_v28 = vld [vmem:[#allocation116_spill] sm:$0xff]  ;;  %v1589_v35 = vsub.f32 %v7367_v62, %v5301_v6  ;;  %v1590_v20 = vsub.f32 %v7368_v59, %v5283_v60 }
 0x150   :  { %v1587_v12 = vsub.f32 %v7366_v28, %v5301_v6  ;;  %v1591_v57 = vsub.f32 %v5111_v58, %v5301_v6  ;;  %v1592_v56 = vsub.f32 %v5118_v22, %v5283_v60  ;;  %v1593_v14 = vsub.f32 %v5122_v13, %v5301_v6 }
 0x151   :  { %v1594_v37 = vsub.f32 %v5130_v46, %v5283_v60  ;;  %v1595_v28 = vsub.f32 %v5134_v0, %v5301_v6  ;;  %v1596_v62 = vsub.f32 %v5140_v7, %v5283_v60  ;;  %v1597_v59 = vsub.f32 %v5146_v29, %v5301_v6 }
 0x152   :  { %v1598_v58 = vsub.f32 %v5154_v4, %v5283_v60  ;;  %v1599_v22 = vsub.f32 %v5159_v52, %v5301_v6  ;;  %v1600_v13 = vsub.f32 %v5166_v36, %v5283_v60  ;;  %v1601_v46 = vsub.f32 %v5172_v50, %v5301_v6 }
 0x153   :  { %v1602_v0 = vsub.f32 %v5176_v25, %v5283_v60  ;;  %v1603_v7 = vsub.f32 %v5182_v30, %v5301_v6  ;;  %v1604_v29 = vsub.f32 %v5190_v8, %v5283_v60  ;;  %v1605_v4 = vsub.f32 %v5199_v61, %v5301_v6 }
 0x154   :  { %v1606_v52 = vsub.f32 %v5214_v41, %v5283_v60  ;;  %v1607_v36 = vsub.f32 %v5222_v44, %v5301_v6  ;;  %v1608_v5 = vmul.f32 1.442695, %v1576_v54  ;;  %v1610_v50 = vmul.f32 1.442695, %v1577_v32 }
 0x155   :  { %v1612_v33 = vmul.f32 1.442695, %v1578_v38  ;;  %v1614_v16 = vmul.f32 1.442695, %v1579_v51  ;;  %v1616_v25 = vmul.f32 1.442695, %v1580_v3  ;;  %v2433_v30 = vmax.f32 %v5291_v53, %v5257_v43 }
 0x156   :  { %v1618_v40 = vmul.f32 1.442695, %v1581_v31  ;;  %3829 = vpow2.f32 %v1608_v5  ;;  %v1620_v8 = vmul.f32 1.442695, %v1582_v21  ;;  %v1622_v24 = vmul.f32 1.442695, %v1583_v10 }
 0x157   :  { %v1624_v23 = vmul.f32 1.442695, %v1584_v47  ;;  %3831 = vpow2.f32 %v1610_v50  ;;  %v1626_v61 = vmul.f32 1.442695, %v1585_v48  ;;  %v1628_v11 = vmul.f32 1.442695, %v1586_v45 }
 0x158   :  { %v1630_v41 = vmul.f32 1.442695, %v1587_v12  ;;  %3833 = vpow2.f32 %v1612_v33  ;;  %v1632_v60 = vmul.f32 1.442695, %v1588_v27  ;;  %v1634_v44 = vmul.f32 1.442695, %v1589_v35  ;;  %v2241_v35 = vpop.permute.xlu1 %2240 }
 0x159   :  { %v1636_v6 = vmul.f32 1.442695, %v1590_v20  ;;  %3835 = vpow2.f32 %v1614_v16  ;;  %v1638_v54 = vmul.f32 1.442695, %v1591_v57  ;;  %v1640_v38 = vmul.f32 1.442695, %v1592_v56 }
 0x15a   :  { %v5369_v3 = vmul.f32 1.442695, %v1593_v14  ;;  %3837 = vpow2.f32 %v1616_v25  ;;  %v5371_v32 = vmul.f32 1.442695, %v1594_v37  ;;  %v5373_v5 = vmul.f32 1.442695, %v1595_v28 }
 0x15b   :  { %v5375_v21 = vmul.f32 1.442695, %v1596_v62  ;;  %3839 = vpow2.f32 %v1618_v40  ;;  %v5377_v47 = vmul.f32 1.442695, %v1597_v59  ;;  %v5379_v12 = vmul.f32 1.442695, %v1598_v58 }
 0x15c   :  { %v5381_v33 = vmul.f32 1.442695, %v1599_v22  ;;  %3841 = vpow2.f32 %v1620_v8  ;;  %v5383_v16 = vmul.f32 1.442695, %v1600_v13  ;;  %v5385_v20 = vmul.f32 1.442695, %v1601_v46 }
 0x15d   :  { %v5387_v45 = vmul.f32 1.442695, %v1602_v0  ;;  %3843 = vpow2.f32 %v1622_v24  ;;  %v5389_v27 = vmul.f32 1.442695, %v1603_v7  ;;  %v5391_v51 = vmul.f32 1.442695, %v1604_v29  ;;  %v2249_v29 = vpop.permute.xlu1 %2248 }
 0x15e   :  { %v5393_v40 = vmul.f32 1.442695, %v1605_v4  ;;  %3845 = vpow2.f32 %v1624_v23  ;;  %v5395_v31 = vmul.f32 1.442695, %v1606_v52  ;;  %v5397_v10 = vmul.f32 1.442695, %v1607_v36 }
 0x15f   :  { %v7369_v48 = vmax.f32 %v5262_v49, %v5271_v42  ;;  %3847 = vpow2.f32 %v1626_v61  ;;  %v7371_v24 = vmax.f32 %v5278_v17, %v5249_v19  ;;  %v7372_v37 = vmax.f32 %v5265_v39, %v5274_v26  ;;  %v7373_v28 = vld [vmem:[#allocation29_spill] sm:$0xff]  ;;  %v7377_v59 = vld [vmem:[#allocation30_spill] sm:$0xff]  ;;  %v2237_v26 = vpop.permute.xlu0 %2236 }
 0x160   :  { %vm7374_vm14 = vnez %v7373_v28  ;;  %v5422_v42 = vpop.eup %3829  ;;  %3849 = vpow2.f32 %v1628_v11  ;;  %v7376_v62 = vmax.f32 %v5268_v55, %v5281_v9  ;;  %v7379_v22 = vmax.f32 %v5233_v63, %v5241_v1  ;;  %v7382_v9 = vld [vmem:[#allocation77_spill] sm:$0xff] }
 0x161   :  { %v5404_v56 = vsel %vm7324_vm7, %v7369_v48, -1e+30  ;;  %v5410_v14 = vmax.f32 %v7371_v24, %v5295_v34  ;;  %v5420_v49 = vsel %vm7374_vm14, %v7372_v37, -1e+30  ;;  %7375 = vst [vmem:[#allocation115_spill] sm:$0xff] %v5422_v42  ;;  %vm7378_vm7 = vnez %v7377_v59  ;;  %v5438_v46 = vpop.eup %3831  ;;  %v7388_v59 = vld [vmem:[#allocation40_spill] sm:$0xff] }
 0x162   :  { %v5413_v23 = vmax.f32 %v2433_v30, %v5404_v56  ;;  %v5429_v58 = vsel %vm7378_vm7, %v7376_v62, -1e+30  ;;  %v5435_v13 = vmax.f32 %v7379_v22, %v5420_v49  ;;  %v2297_v39 = vadd.f32 %v5204_v18, %v2241_v35  ;;  %7380 = vst [vmem:[#allocation117_spill] sm:$0xff] %v5438_v46  ;;  %v5448_v4 = vpop.eup %3833 }
 0x163   :  { %3851 = vpow2.f32 %v1630_v41  ;;  %v7381_v11 = vmax.f32 %v5237_v2, %v5245_v15  ;;  %v2298_v0 = vadd.f32 %v7382_v9, %v2241_v35  ;;  %v2295_v7 = vadd.f32 %v5204_v18, %v2237_v26  ;;  %7383 = vst [vmem:[#allocation18_spill] sm:$0xff] %v5448_v4  ;;  %v5454_v25 = vpop.eup %3835 }
 0x164   :  { %3853 = vpow2.f32 %v1632_v60  ;;  %v2329_v52 = vmul.f32 0.2, %v2297_v39  ;;  %v2296_v36 = vadd.f32 %v7382_v9, %v2237_v26  ;;  %v5452_v50 = vadd.f32 %v5204_v18, %v2249_v29  ;;  %7384 = vst [vmem:[#allocation111_spill] sm:$0xff] %v5454_v25  ;;  %v5458_v41 = vpop.eup %3837 }
 0x165   :  { %v5444_v55 = vmax.f32 %v7381_v11, %v5429_v58  ;;  %3855 = vpow2.f32 %v1634_v44  ;;  %v1672_v30 = vadd.f32 %v5448_v4, %v5422_v42  ;;  %v2330_v8 = vmul.f32 0.2, %v2298_v0  ;;  %7385 = vst [vmem:[#allocation24_spill] sm:$0xff] %v5458_v41  ;;  %v5462_v57 = vpop.eup %3839  ;;  %v7462_v4 = vld [vmem:[#allocation96_spill] sm:$0xff]  ;;  %v7463_v42 = vld [vmem:[#allocation102_spill] sm:$0xff] }
 0x166   :  { %v2327_v61 = vmul.f32 0.2, %v2295_v7  ;;  %3857 = vpow2.f32 %v1636_v6  ;;  %v1693_v60 = vadd.f32 %v5454_v25, %v5438_v46  ;;  %v2361_v35 = vmax.f32 %v2297_v39, %v2329_v52  ;;  %7386 = vst [vmem:[#allocation112_spill] sm:$0xff] %v5462_v57  ;;  %v5465_v28 = vpop.eup %3841  ;;  %v7391_v39 = vld [vmem:[#allocation41_spill] sm:$0xff]  ;;  %v7464_v25 = vld [vmem:[#allocation100_spill] sm:$0xff] }
 0x167   :  { %v2328_v48 = vmul.f32 0.2, %v2296_v36  ;;  %3859 = vpow2.f32 %v1638_v54  ;;  %v1673_v24 = vadd.f32 %v5458_v41, %v1672_v30  ;;  %v2362_v37 = vmax.f32 %v2298_v0, %v2330_v8  ;;  %7387 = vst [vmem:[#allocation113_spill] sm:$0xff] %v5465_v28  ;;  %v5472_v26 = vpop.eup %3843 }
 0x168   :  { %v2359_v44 = vmax.f32 %v2295_v7, %v2327_v61  ;;  %3861 = vpow2.f32 %v1640_v38  ;;  %v1694_v62 = vadd.f32 %v5462_v57, %v1693_v60  ;;  %vm7389_vm4 = vnez %v7388_v59  ;;  %7390 = vst [vmem:[#allocation116_spill] sm:$0xff] %v5472_v26  ;;  %v5482_v0 = vpop.eup %3845 }
 0x169   :  { %v5470_v6 = vsel %vm7389_vm4, %v2361_v35, -1e+30  ;;  %v2360_v22 = vmax.f32 %v2296_v36, %v2328_v48  ;;  %3863 = vpow2.f32 %v5369_v3  ;;  %v1674_v54 = vadd.f32 %v5465_v28, %v1673_v24  ;;  %7393 = vst [vmem:[#allocation118_spill] sm:$0xff] %v5482_v0  ;;  %v7394_v36 = vld [vmem:[#allocation36_spill] sm:$0xff]  ;;  %v5492_v30 = vpop.eup %3847  ;;  %v2245_v48 = vpop.permute.xlu0 %2244 }
 0x16a   :  { %vm7392_vm6 = vnez %v7391_v39  ;;  %v2416_v38 = vmax.f32 %v5410_v14, %v5470_v6  ;;  %3865 = vpow2.f32 %v5371_v32  ;;  %v1695_v7 = vadd.f32 %v5472_v26, %v1694_v62  ;;  %7396 = vst [vmem:[#allocation119_spill] sm:$0xff] %v5492_v30  ;;  %v7397_v14 = vld [vmem:[#allocation37_spill] sm:$0xff]  ;;  %v5502_v60 = vpop.eup %3849  ;;  %v7454_v26 = vld [vmem:[#allocation86_spill] sm:$0xff] }
 0x16b   :  { %v5478_v11 = vsel %vm7392_vm6, %v2362_v37, -1e+30  ;;  %vm7395_vm9 = vnez %v7394_v36  ;;  %3867 = vpow2.f32 %v5373_v5  ;;  %v1675_v8 = vadd.f32 %v5482_v0, %v1674_v54  ;;  %7399 = vst [vmem:[#allocation33_spill] sm:$0xff] %v5502_v60 }
 0x16c   :  { %v2437_v52 = vmax.f32 %v5413_v23, %v5478_v11  ;;  %v5490_v3 = vsel %vm7395_vm9, %v2359_v44, -1e+30  ;;  %vm7398_vm0 = vnez %v7397_v14  ;;  %3869 = vpow2.f32 %v5375_v21 }
 0x16d   :  { %v5498_v61 = vsel %vm7398_vm0, %v2360_v22, -1e+30  ;;  %v2415_v32 = vmax.f32 %v5435_v13, %v5490_v3  ;;  %v1696_v23 = vadd.f32 %v5492_v30, %v1695_v7  ;;  %v2302_v5 = vadd.f32 %v7382_v9, %v2249_v29  ;;  %v5509_v24 = vpop.eup %3851 }
 0x16e   :  { %v2436_v35 = vmax.f32 %v5444_v55, %v5498_v61  ;;  %7400 = vst [vmem:[#allocation29_spill] sm:$0xff] %v5509_v24  ;;  %3871 = vpow2.f32 %v5377_v47  ;;  %v1676_v37 = vadd.f32 %v5502_v60, %v1675_v8  ;;  %v2333_v13 = vmul.f32 0.2, %v5452_v50  ;;  %v5515_v62 = vpop.eup %3853 }
 0x16f   :  { %v2299_v44 = vadd.f32 %v5204_v18, %v2245_v48  ;;  %7401 = vst [vmem:[#allocation30_spill] sm:$0xff] %v5515_v62  ;;  %3873 = vpow2.f32 %v5379_v12  ;;  %v1697_v21 = vadd.f32 %v5509_v24, %v1696_v23  ;;  %v2334_v55 = vmul.f32 0.2, %v2302_v5  ;;  %v5520_v59 = vpop.eup %3855  ;;  %v7434_v24 = vld [vmem:[#allocation60_spill] sm:$0xff] }
 0x170   :  { %v2300_v29 = vadd.f32 %v7382_v9, %v2245_v48  ;;  %7402 = vst [vmem:[#allocation77_spill] sm:$0xff] %v5520_v59  ;;  %3875 = vpow2.f32 %v5381_v33  ;;  %v1677_v47 = vadd.f32 %v5515_v62, %v1676_v37  ;;  %v2365_v22 = vmax.f32 %v5452_v50, %v2333_v13  ;;  %v5525_v39 = vpop.eup %3857  ;;  %v2257_v48 = vpop.permute.xlu1 %2256 }
 0x171   :  { %v2331_v54 = vmul.f32 0.2, %v2299_v44  ;;  %7403 = vst [vmem:[#allocation40_spill] sm:$0xff] %v5525_v39  ;;  %3877 = vpow2.f32 %v5383_v16  ;;  %v1698_v12 = vadd.f32 %v5520_v59, %v1697_v21  ;;  %v2366_v7 = vmax.f32 %v2302_v5, %v2334_v55  ;;  %v5529_v8 = vpop.eup %3859 }
 0x172   :  { %v2332_v36 = vmul.f32 0.2, %v2300_v29  ;;  %7404 = vst [vmem:[#allocation41_spill] sm:$0xff] %v5529_v8  ;;  %3879 = vpow2.f32 %v5385_v20  ;;  %v1678_v14 = vadd.f32 %v5525_v39, %v1677_v47  ;;  %v5535_v23 = vsel %vm7337_vm5, %v2365_v22, -1e+30  ;;  %v5537_v37 = vpop.eup %3861 }
 0x173   :  { %v2363_v50 = vmax.f32 %v2299_v44, %v2331_v54  ;;  %7406 = vst [vmem:[#allocation36_spill] sm:$0xff] %v5537_v37  ;;  %3881 = vpow2.f32 %v5387_v45  ;;  %v1699_v16 = vadd.f32 %v5529_v8, %v1698_v12  ;;  %v5543_v13 = vsel %vm7338_vm3, %v2366_v7, -1e+30  ;;  %v5548_v21 = vpop.eup %3863  ;;  %v2253_v45 = vpop.permute.xlu0 %2252  ;;  %v7410_v12 = vld [vmem:[#allocation44_spill] sm:$0xff] }
 0x174   :  { %v5546_v20 = vmax.f32 %v2416_v38, %v5535_v23  ;;  %7408 = vst [vmem:[#allocation37_spill] sm:$0xff] %v5548_v21  ;;  %3883 = vpow2.f32 %v5389_v27  ;;  %v1679_v44 = vadd.f32 %v5537_v37, %v1678_v14  ;;  %v5553_v55 = vmax.f32 %v2437_v52, %v5543_v13  ;;  %v5555_v22 = vpop.eup %3865 }
 0x175   :  { %v2364_v47 = vmax.f32 %v2300_v29, %v2332_v36  ;;  %7409 = vst [vmem:[#allocation48_spill] sm:$0xff] %v5555_v22  ;;  %3885 = vpow2.f32 %v5391_v51  ;;  %v1700_v54 = vadd.f32 %v5548_v21, %v1699_v16  ;;  %vm7411_vm5 = vnez %v7410_v12  ;;  %v5564_v27 = vpop.eup %3867 }
 0x176   :  { %v5561_v38 = vsel %vm7411_vm5, %v2363_v50, -1e+30  ;;  %v2305_v7 = vadd.f32 %v5204_v18, %v2257_v48  ;;  %7412 = vst [vmem:[#allocation49_spill] sm:$0xff] %v5564_v27  ;;  %3887 = vpow2.f32 %v5393_v40  ;;  %v1680_v52 = vadd.f32 %v5555_v22, %v1679_v44  ;;  %v5575_v14 = vpop.eup %3869 }
 0x177   :  { %v5570_v36 = vsel %vm7335_vm10, %v2364_v47, -1e+30  ;;  %v5573_v51 = vmax.f32 %v2415_v32, %v5561_v38  ;;  %7414 = vst [vmem:[#allocation44_spill] sm:$0xff] %v5575_v14  ;;  %3889 = vpow2.f32 %v5395_v31  ;;  %v1701_v33 = vadd.f32 %v5564_v27, %v1700_v54  ;;  %v2265_v47 = vpop.permute.xlu1 %2264 }
 0x178   :  { %v5580_v50 = vmax.f32 %v2436_v35, %v5570_v36  ;;  %v2306_v40 = vadd.f32 %v7382_v9, %v2257_v48  ;;  %v5583_v16 = vpop.eup %3871  ;;  %3891 = vpow2.f32 %v5397_v10  ;;  %v1681_v5 = vadd.f32 %v5575_v14, %v1680_v52  ;;  %v2261_v14 = vpop.permute.xlu0 %2260 }
 0x179   :  { %7415 = vst [vmem:[#allocation45_spill] sm:$0xff] %v5583_v16  ;;  %v2337_v44 = vmul.f32 0.2, %v2305_v7  ;;  %v2303_v32 = vadd.f32 %v5204_v18, %v2253_v45  ;;  %v5588_v12 = vpop.eup %3873  ;;  %v1702_v31 = vadd.f32 %v5583_v16, %v1701_v33  ;;  %v2304_v35 = vadd.f32 %v7382_v9, %v2253_v45 }
 0x17a   :  { %7416 = vst [vmem:[#allocation122_spill] sm:$0xff] %v5588_v12  ;;  %v2338_v54 = vmul.f32 0.2, %v2306_v40  ;;  %v2309_v29 = vadd.f32 %v5204_v18, %v2265_v47  ;;  %v5593_v48 = vpop.eup %3875  ;;  %v1682_v22 = vadd.f32 %v5588_v12, %v1681_v5  ;;  %v2310_v52 = vadd.f32 %v7382_v9, %v2265_v47  ;;  %v7427_v12 = vld [vmem:[#allocation53_spill] sm:$0xff] }
 0x17b   :  { %7417 = vst [vmem:[#allocation123_spill] sm:$0xff] %v5593_v48  ;;  %v2369_v10 = vmax.f32 %v2305_v7, %v2337_v44  ;;  %v2335_v37 = vmul.f32 0.2, %v2303_v32  ;;  %v5597_v27 = vpop.eup %3877  ;;  %v1703_v21 = vadd.f32 %v5593_v48, %v1702_v31  ;;  %v2336_v33 = vmul.f32 0.2, %v2304_v35 }
 0x17c   :  { %7418 = vst [vmem:[#allocation124_spill] sm:$0xff] %v5597_v27  ;;  %v2370_v39 = vmax.f32 %v2306_v40, %v2338_v54  ;;  %v2341_v16 = vmul.f32 0.2, %v2309_v29  ;;  %v5600_v62 = vpop.eup %3879  ;;  %v1683_v45 = vadd.f32 %v5597_v27, %v1682_v22  ;;  %v2342_v5 = vmul.f32 0.2, %v2310_v52  ;;  %v7424_v22 = vld [vmem:[#allocation52_spill] sm:$0xff] }
 0x17d   :  { %7419 = vst [vmem:[#allocation125_spill] sm:$0xff] %v5600_v62  ;;  %v5605_v59 = vsel %vm7339_vm12, %v2369_v10, -1e+30  ;;  %v2367_v7 = vmax.f32 %v2303_v32, %v2335_v37  ;;  %v5607_v44 = vpop.eup %3881  ;;  %v1704_v47 = vadd.f32 %v5600_v62, %v1703_v21  ;;  %v2368_v54 = vmax.f32 %v2304_v35, %v2336_v33 }
 0x17e   :  { %7421 = vst [vmem:[#allocation56_spill] sm:$0xff] %v5607_v44  ;;  %v5612_v31 = vsel %vm7340_vm13, %v2370_v39, -1e+30  ;;  %v2420_v40 = vmax.f32 %v5546_v20, %v5605_v59  ;;  %v5616_v48 = vpop.eup %3883  ;;  %v1684_v8 = vadd.f32 %v5607_v44, %v1683_v45  ;;  %vm7425_vm10 = vnez %v7424_v22  ;;  %v2273_v45 = vpop.permute.xlu1 %2272 }
 0x17f   :  { %7423 = vst [vmem:[#allocation57_spill] sm:$0xff] %v5616_v48  ;;  %v2441_v37 = vmax.f32 %v5553_v55, %v5612_v31  ;;  %v5623_v32 = vsel %vm7425_vm10, %v2367_v7, -1e+30  ;;  %v2373_v21 = vmax.f32 %v2309_v29, %v2341_v16  ;;  %v5625_v10 = vpop.eup %3885  ;;  %v1705_v39 = vadd.f32 %v5616_v48, %v1704_v47 }
 0x180   :  { %7426 = vst [vmem:[#allocation52_spill] sm:$0xff] %v5625_v10  ;;  %vm7428_vm12 = vnez %v7427_v12  ;;  %v2419_v35 = vmax.f32 %v5573_v51, %v5623_v32  ;;  %v2374_v33 = vmax.f32 %v2310_v52, %v2342_v5  ;;  %v5634_v44 = vpop.eup %3887  ;;  %v1685_v55 = vadd.f32 %v5625_v10, %v1684_v8 }
 0x181   :  { %v5630_v20 = vsel %vm7428_vm12, %v2368_v54, -1e+30  ;;  %7429 = vst [vmem:[#allocation53_spill] sm:$0xff] %v5634_v44  ;;  %v5641_v7 = vsel %vm4677_vm15, %v2373_v21, -1e+30  ;;  %v2307_v47 = vadd.f32 %v5204_v18, %v2261_v14  ;;  %v2269_v54 = vpop.permute.xlu0 %2268  ;;  %v5644_v22 = vpop.eup %3889  ;;  %v1706_v51 = vadd.f32 %v5634_v44, %v1705_v39 }
 0x182   :  { %v2440_v16 = vmax.f32 %v5580_v50, %v5630_v20  ;;  %7431 = vst [vmem:[#allocation64_spill] sm:$0xff] %v5644_v22  ;;  %v5649_v5 = vsel %vm7341_vm11, %v2374_v33, -1e+30  ;;  %v2422_v8 = vmax.f32 %v2420_v40, %v5641_v7  ;;  %v2308_v12 = vadd.f32 %v7382_v9, %v2261_v14  ;;  %v5653_v50 = vpop.eup %3891 }
 0x183   :  { %7433 = vst [vmem:[#allocation65_spill] sm:$0xff] %v5653_v50  ;;  %v1686_v21 = vadd.f32 %v5644_v22, %v1685_v55  ;;  %v2443_v29 = vmax.f32 %v2441_v37, %v5649_v5  ;;  %v2339_v10 = vmul.f32 0.2, %v2307_v47  ;;  %v2313_v27 = vadd.f32 %v5204_v18, %v2273_v45 }
 0x184   :  { %v1707_v48 = vadd.f32 %v5653_v50, %v1706_v51  ;;  %v2340_v39 = vmul.f32 0.2, %v2308_v12  ;;  %v2314_v52 = vadd.f32 %v7382_v9, %v2273_v45  ;;  %v2311_v33 = vadd.f32 %v5204_v18, %v2269_v54 }
 0x185   :  { %v1687_v44 = vrot.slane %v1686_v21, 4  ;;  %v2371_v40 = vmax.f32 %v2307_v47, %v2339_v10  ;;  %v2345_v62 = vmul.f32 0.2, %v2313_v27  ;;  %v2312_v14 = vadd.f32 %v7382_v9, %v2269_v54 }
 0x186   :  { %v1708_v60 = vrot.slane %v1707_v48, 4  ;;  %v2372_v0 = vmax.f32 %v2308_v12, %v2340_v39  ;;  %v2346_v55 = vmul.f32 0.2, %v2314_v52  ;;  %v2343_v22 = vmul.f32 0.2, %v2311_v33 }
 0x187   :  { %v1688_v37 = vadd.f32 %v1687_v44, %v1686_v21  ;;  %vm7435_vm13 = vnez %v7434_v24  ;;  %v2377_v51 = vmax.f32 %v2313_v27, %v2345_v62  ;;  %v2344_v50 = vmul.f32 0.2, %v2312_v14  ;;  %v7440_v27 = vld [vmem:[#allocation78_spill] sm:$0xff] }
 0x188   :  { %v5664_v30 = vsel %vm7435_vm13, %v2371_v40, -1e+30  ;;  %v1709_v28 = vadd.f32 %v1708_v60, %v1707_v48  ;;  %v5668_v18 = vsel %vm7298_vm2, %v2372_v0, -1e+30  ;;  %v2378_v47 = vmax.f32 %v2314_v52, %v2346_v55  ;;  %v7441_v48 = vld [vmem:[#allocation110_spill] sm:$0xff] }
 0x189   :  { %v2421_v10 = vmax.f32 %v2419_v35, %v5664_v30  ;;  %v1689_v9 = vrot.slane %v1688_v37, 2  ;;  %v2442_v54 = vmax.f32 %v2440_v16, %v5668_v18  ;;  %v5674_v44 = vsel %vm4726_vm1, %v2377_v51, -1e+30  ;;  %v7442_v16 = vld [vmem:[#allocation68_spill] sm:$0xff] }
 0x18a   :  { %v2375_v24 = vmax.f32 %v2311_v33, %v2343_v22  ;;  %v1710_v21 = vrot.slane %v1709_v28, 2  ;;  %v5678_v62 = vsel %vm4733_vm8, %v2378_v47, -1e+30  ;;  %v2424_v60 = vmax.f32 %v2422_v8, %v5674_v44  ;;  %v7444_v22 = vld [vmem:[#allocation69_spill] sm:$0xff]  ;;  %v7446_v47 = vld [vmem:[#allocation23_spill] sm:$0xff] }
 0x18b   :  { %7439 = vst [vmem:[#allocation60_spill] sm:$0xff] %v5678_v62  ;;  %v2376_v0 = vmax.f32 %v2312_v14, %v2344_v50  ;;  %v768_v35 = vsub.f32 %v7441_v48, %v7440_v27  ;;  %v1690_v52 = vadd.f32 %v1689_v9, %v1688_v37  ;;  %v2445_v40 = vmax.f32 %v2443_v29, %v5678_v62  ;;  %v7447_v14 = vld [vmem:[#allocation114_spill] sm:$0xff]  ;;  %v7448_v37 = vld [vmem:[#allocation71_spill] sm:$0xff] }
 0x18c   :  { %vm7443_vm15 = vnez %v7442_v16  ;;  %v1711_v51 = vadd.f32 %v1710_v21, %v1709_v28  ;;  %vm7445_vm2 = vnez %v7444_v22  ;;  %vm441_vm3 = vcmp.gt.f32.partialorder %v7446_v47, 0.0  ;;  %v7449_v21 = vld [vmem:[#allocation120_spill] sm:$0xff]  ;;  %v7452_v47 = vld [vmem:[#allocation121_spill] sm:$0xff] }
 0x18d   :  { %v5686_v55 = vsel %vm7443_vm15, %v2375_v24, -1e+30  ;;  %v5690_v33 = vsel %vm7445_vm2, %v2376_v0, -1e+30  ;;  %v1691_v8 = vrot.slane %v1690_v52, 1  ;;  %vm442_vm1 = vcmp.gt.f32.partialorder %v7447_v14, 0.0 }
 0x18e   :  { %v2423_v45 = vmax.f32 %v2421_v10, %v5686_v55  ;;  %v2444_v50 = vmax.f32 %v2442_v54, %v5690_v33  ;;  %v716_v29 = vrot.slane %v7448_v37, 1  ;;  %v1712_v9 = vrot.slane %v1711_v51, 1  ;;  %v7451_v10 = vld [vmem:[#allocation82_spill] sm:$0xff] }
 0x18f   :  { %v829_v24 = vmul.f32 1.442695, %v768_v35  ;;  %v1692_v39 = vadd.f32 %v1691_v8, %v1690_v52  ;;  %v5698_v48 = vsel %vm441_vm3, %v7449_v21, 0.0  ;;  %v740_v22 = vsub.f32 %v7451_v10, %v7440_v27  ;;  %v7456_v8 = vld [vmem:[#allocation84_spill] sm:$0xff] }
 0x190   :  { %v2425_v12 = vmax.f32 %v2423_v45, %v2424_v60  ;;  %v2446_v28 = vmax.f32 %v2444_v50, %v2445_v40  ;;  %7450 = vst [vmem:[#allocation61_spill] sm:$0xff] %v5698_v48  ;;  %v1713_v0 = vadd.f32 %v1712_v9, %v1711_v51  ;;  %v5703_v41 = vsel %vm442_vm1, %v7452_v47, 0.0  ;;  %v7455_v40 = vld [vmem:[#allocation80_spill] sm:$0xff]  ;;  %v7457_v9 = vld [vmem:[#allocation90_spill] sm:$0xff] }
 0x191   :  { %7453 = vst [vmem:[#allocation73_spill] sm:$0xff] %v5703_v41  ;;  %v1714_v54 = vadd.f32 1e-16, %v1692_v39  ;;  %v742_v57 = vsub.f32 %v7454_v26, %v7440_v27  ;;  %v5708_v60 = vmax.f32 %v7448_v37, %v716_v29  ;;  %v744_v51 = vsub.f32 %v7455_v40, %v7440_v27  ;;  %v7458_v10 = vld [vmem:[#allocation88_spill] sm:$0xff]  ;;  %v7459_v37 = vld [vmem:[#allocation94_spill] sm:$0xff] }
 0x192   :  { %v2426_v16 = vrot.slane %v2425_v12, 4  ;;  %v2447_v14 = vrot.slane %v2446_v28, 4  ;;  %v1715_v35 = vadd.f32 1e-16, %v1713_v0  ;;  %3893 = vpow2.f32 %v829_v24 }
 0x193   :  { %v746_v50 = vsub.f32 %v7456_v8, %v7440_v27  ;;  %v748_v39 = vsub.f32 %v7457_v9, %v7440_v27  ;;  %v750_v26 = vsub.f32 %v7458_v10, %v7440_v27  ;;  %v752_v29 = vsub.f32 %v7459_v37, %v7440_v27 }
 0x194   :  { %v2427_v52 = vmax.f32 %v2425_v12, %v2426_v16  ;;  %v2448_v45 = vmax.f32 %v2446_v28, %v2447_v14  ;;  %v773_v0 = vmul.f32 1.442695, %v740_v22  ;;  %3895 = vrcp.f32 %v1714_v54  ;;  %v7460_v16 = vld [vmem:[#allocation92_spill] sm:$0xff]  ;;  %v7461_v14 = vld [vmem:[#allocation98_spill] sm:$0xff] }
 0x195   :  { %v754_v24 = vsub.f32 %v7460_v16, %v7440_v27  ;;  %v777_v28 = vmul.f32 1.442695, %v742_v57  ;;  %3897 = vrcp.f32 %v1715_v35  ;;  %v756_v40 = vsub.f32 %v7461_v14, %v7440_v27 }
 0x196   :  { %v2428_v21 = vrot.slane %v2427_v52, 2  ;;  %v2449_v12 = vrot.slane %v2448_v45, 2  ;;  %v781_v8 = vmul.f32 1.442695, %v744_v51  ;;  %v758_v10 = vsub.f32 %v7462_v4, %v7440_v27  ;;  %v7467_v4 = vld [vmem:[#allocation109_spill] sm:$0xff] }
 0x197   :  { %v760_v37 = vsub.f32 %v7463_v42, %v7440_v27  ;;  %v785_v22 = vmul.f32 1.442695, %v746_v50  ;;  %v762_v46 = vsub.f32 %v7464_v25, %v7440_v27  ;;  %3899 = vpow2.f32 %v773_v0  ;;  %v7468_v25 = vld [vmem:[#allocation81_spill] sm:$0xff] }
 0x198   :  { %v2429_v47 = vmax.f32 %v2427_v52, %v2428_v21  ;;  %v2450_v9 = vmax.f32 %v2448_v45, %v2449_v12  ;;  %v789_v57 = vmul.f32 1.442695, %v748_v39  ;;  %v7465_v52 = vld [vmem:[#allocation106_spill] sm:$0xff]  ;;  %3901 = vpow2.f32 %v777_v28  ;;  %v7466_v45 = vld [vmem:[#allocation104_spill] sm:$0xff] }
 0x199   :  { %v764_v21 = vsub.f32 %v7465_v52, %v7440_v27  ;;  %v793_v51 = vmul.f32 1.442695, %v750_v26  ;;  %v766_v12 = vsub.f32 %v7466_v45, %v7440_v27  ;;  %v770_v16 = vsub.f32 %v7467_v4, %v7440_v27  ;;  %v7473_v45 = vld [vmem:[#allocation87_spill] sm:$0xff]  ;;  %v7474_v4 = vld [vmem:[#allocation93_spill] sm:$0xff] }
 0x19a   :  { %v2430_v54 = vrot.slane %v2429_v47, 1  ;;  %v2451_v35 = vrot.slane %v2450_v9, 1  ;;  %3903 = vpow2.f32 %v781_v8  ;;  %v797_v42 = vmul.f32 1.442695, %v752_v29 }
 0x19b   :  { %3905 = vpow2.f32 %v785_v22  ;;  %v801_v50 = vmul.f32 1.442695, %v754_v24  ;;  %v805_v14 = vmul.f32 1.442695, %v756_v40  ;;  %v5742_v26 = vmul.f32 1.442695, %v758_v10 }
 0x19c   :  { %v5738_v0 = vmax.f32 %v2429_v47, %v2430_v54  ;;  %v5740_v62 = vmax.f32 %v2450_v9, %v2451_v35  ;;  %3907 = vpow2.f32 %v789_v57  ;;  %v5744_v28 = vpop.eup %3893  ;;  %v5746_v52 = vmul.f32 1.442695, %v760_v37  ;;  %v7469_v47 = vld [vmem:[#allocation85_spill] sm:$0xff]  ;;  %v7470_v10 = vld [vmem:[#allocation79_spill] sm:$0xff] }
 0x19d   :  { %3909 = vpow2.f32 %v793_v51  ;;  %v5748_v27 = vmul.f32 1.442695, %v762_v46  ;;  %v5750_v29 = vmul.f32 1.442695, %v764_v21  ;;  %v5752_v24 = vmul.f32 1.442695, %v766_v12 }
 0x19e   :  { %3911 = vpow2.f32 %v797_v42  ;;  %v5754_v40 = vmul.f32 1.442695, %v770_v16  ;;  %v3896_v9 = vpop.eup %3895  ;;  %v7471_v37 = vld [vmem:[#allocation83_spill] sm:$0xff]  ;;  %v7472_v46 = vld [vmem:[#allocation89_spill] sm:$0xff]  ;;  %v2453_v21 = vsub.f32 %v5233_v63, %v5738_v0  ;;  %v2454_v51 = vsub.f32 %v5237_v2, %v5740_v62 }
 0x19f   :  { %3913 = vpow2.f32 %v801_v50  ;;  %v3898_v35 = vpop.eup %3897  ;;  %v2455_v42 = vsub.f32 %v5278_v17, %v5738_v0  ;;  %v2456_v50 = vsub.f32 %v5291_v53, %v5740_v62  ;;  %v2457_v57 = vsub.f32 %v5241_v1, %v5738_v0 }
 0x1a0   :  { %v2459_v63 = vsub.f32 %v5249_v19, %v5738_v0  ;;  %v5783_v2 = vmul.f32 %v3896_v9, %v5698_v48  ;;  %v2458_v16 = vsub.f32 %v5245_v15, %v5740_v62  ;;  %v2460_v17 = vsub.f32 %v5257_v43, %v5740_v62 }
 0x1a1   :  { %v5780_v54 = vpop.eup %3899  ;;  %v2461_v53 = vsub.f32 %v5420_v49, %v5738_v0  ;;  %v5794_v1 = vmul.f32 %v3898_v35, %v5703_v41  ;;  %v2462_v19 = vsub.f32 %v5429_v58, %v5740_v62  ;;  %v2463_v9 = vsub.f32 %v5295_v34, %v5738_v0 }
 0x1a2   :  { %v5791_v12 = vpop.eup %3901  ;;  %v2464_v15 = vsub.f32 %v5404_v56, %v5740_v62  ;;  %v2465_v43 = vsub.f32 %v5490_v3, %v5738_v0  ;;  %v2466_v49 = vsub.f32 %v5498_v61, %v5740_v62  ;;  %v2485_v8 = vmul.f32 1.442695, %v2453_v21 }
 0x1a3   :  { %7475 = vst [vmem:[#allocation74_spill] sm:$0xff] %v5791_v12  ;;  %v2487_v35 = vmul.f32 1.442695, %v2454_v51  ;;  %v2467_v58 = vsub.f32 %v5470_v6, %v5738_v0  ;;  %v2489_v41 = vmul.f32 1.442695, %v2455_v42  ;;  %3915 = vpow2.f32 %v805_v14 }
 0x1a4   :  { %v5802_v22 = vpop.eup %3903  ;;  %v2491_v34 = vmul.f32 1.442695, %v2456_v50  ;;  %v2468_v56 = vsub.f32 %v5478_v11, %v5740_v62  ;;  %v2469_v3 = vsub.f32 %v5561_v38, %v5738_v0  ;;  %3917 = vpow2.f32 %v2485_v8 }
 0x1a5   :  { %7476 = vst [vmem:[#allocation78_spill] sm:$0xff] %v5802_v22  ;;  %v5808_v39 = vpop.eup %3905  ;;  %v2493_v61 = vmul.f32 1.442695, %v2457_v57  ;;  %v2470_v51 = vsub.f32 %v5570_v36, %v5740_v62  ;;  %v2471_v6 = vsub.f32 %v5535_v23, %v5738_v0  ;;  %3919 = vpow2.f32 %v2487_v35 }
 0x1a6   :  { %7477 = vst [vmem:[#allocation110_spill] sm:$0xff] %v5808_v39  ;;  %v5812_v48 = vpop.eup %3907  ;;  %v2495_v14 = vmul.f32 1.442695, %v2458_v16  ;;  %v2472_v11 = vsub.f32 %v5543_v13, %v5740_v62  ;;  %v2473_v38 = vsub.f32 %v5623_v32, %v5738_v0  ;;  %3921 = vpow2.f32 %v2489_v41 }
 0x1a7   :  { %7478 = vst [vmem:[#allocation68_spill] sm:$0xff] %v5812_v48  ;;  %v5818_v21 = vpop.eup %3909  ;;  %v2497_v8 = vmul.f32 1.442695, %v2459_v63  ;;  %v2474_v36 = vsub.f32 %v5630_v20, %v5740_v62  ;;  %v2475_v23 = vsub.f32 %v5605_v59, %v5738_v0  ;;  %3923 = vpow2.f32 %v2491_v34 }
 0x1a8   :  { %7479 = vst [vmem:[#allocation69_spill] sm:$0xff] %v5818_v21  ;;  %v5824_v42 = vpop.eup %3911  ;;  %v2499_v16 = vmul.f32 1.442695, %v2460_v17  ;;  %v2476_v50 = vsub.f32 %v5612_v31, %v5740_v62  ;;  %v2477_v13 = vsub.f32 %v5664_v30, %v5738_v0  ;;  %3925 = vpow2.f32 %v2493_v61 }
 0x1a9   :  { %7480 = vst [vmem:[#allocation23_spill] sm:$0xff] %v5824_v42  ;;  %v5830_v57 = vpop.eup %3913  ;;  %v2501_v32 = vmul.f32 1.442695, %v2461_v53  ;;  %v2478_v41 = vsub.f32 %v5668_v18, %v5740_v62  ;;  %v2479_v63 = vsub.f32 %v5641_v7, %v5738_v0  ;;  %3927 = vpow2.f32 %v2495_v14  ;;  %v7482_v7 = vld [vmem:[#allocation60_spill] sm:$0xff] }
 0x1aa   :  { %7481 = vst [vmem:[#allocation114_spill] sm:$0xff] %v5830_v57  ;;  %v2503_v20 = vmul.f32 1.442695, %v2462_v19  ;;  %v2480_v59 = vsub.f32 %v5649_v5, %v5740_v62  ;;  %v2481_v17 = vsub.f32 %v5686_v55, %v5738_v0  ;;  %3929 = vpow2.f32 %v2497_v8  ;;  %v5863_v8 = vld [vmem:[#allocation7 + $0x38] sm:$0xff]  }
 0x1ab   :  { %v2505_v31 = vmul.f32 1.442695, %v2463_v9  ;;  %v2482_v30 = vsub.f32 %v5690_v33, %v5740_v62  ;;  %v2483_v53 = vsub.f32 %v5674_v44, %v5738_v0  ;;  %3931 = vpow2.f32 %v2499_v16  ;;  %7484 = vst [vmem:[#allocation120_spill] sm:$0xff] %v5863_v8  ;;  %3661 = vmatprep.subr.bf16.mxu0 %v5863_v8 }
 0x1ac   :  { %v2507_v18 = vmul.f32 1.442695, %v2464_v15  ;;  %v2484_v35 = vsub.f32 %v7482_v7, %v5740_v62  ;;  %3933 = vpow2.f32 %v2501_v32  ;;  %v2509_v19 = vmul.f32 1.442695, %v2465_v43  ;;  %3662 = vmatpush3.bf16.msra.mxu0 %v5863_v8 }
 0x1ad   :  { %v2511_v34 = vmul.f32 1.442695, %v2466_v49  ;;  %v5854_v5 = vpop.eup %3915  ;;  %3935 = vpow2.f32 %v2503_v20  ;;  %v2513_v55 = vmul.f32 1.442695, %v2467_v58  ;;  %v2515_v61 = vmul.f32 1.442695, %v2468_v56 }
 0x1ae   :  { %7483 = vst [vmem:[#allocation71_spill] sm:$0xff] %v5854_v5  ;;  %v856_v9 = vadd.f32 %v5791_v12, %v5780_v54  ;;  %v5858_v33 = vpop.eup %3917  ;;  %3937 = vpow2.f32 %v2505_v31  ;;  %v2517_v44 = vmul.f32 1.442695, %v2469_v3  ;;  %v2519_v0 = vmul.f32 1.442695, %v2470_v51 }
 0x1af   :  { %v2521_v15 = vmul.f32 1.442695, %v2471_v6  ;;  %v5860_v14 = vpop.eup %3919  ;;  %3939 = vpow2.f32 %v2507_v18  ;;  %v2523_v62 = vmul.f32 1.442695, %v2472_v11  ;;  %v2525_v43 = vmul.f32 1.442695, %v2473_v38 }
 0x1b0   :  { %v857_v49 = vadd.f32 %v5802_v22, %v856_v9  ;;  %v5865_v58 = vpop.eup %3921  ;;  %3941 = vpow2.f32 %v2509_v19  ;;  %v2527_v56 = vmul.f32 1.442695, %v2474_v36  ;;  %v2529_v16 = vmul.f32 1.442695, %v2475_v23 }
 0x1b1   :  { %v2531_v32 = vmul.f32 1.442695, %v2476_v50  ;;  %v5867_v20 = vpop.eup %3923  ;;  %3943 = vpow2.f32 %v2511_v34  ;;  %v2533_v3 = vmul.f32 1.442695, %v2477_v13  ;;  %v2549_v51 = vadd.f32 %v5865_v58, %v5858_v33 }
 0x1b2   :  { %v858_v6 = vadd.f32 %v5808_v39, %v857_v49  ;;  %v5873_v11 = vpop.eup %3925  ;;  %3945 = vpow2.f32 %v2513_v55  ;;  %v2535_v38 = vmul.f32 1.442695, %v2478_v41  ;;  %v2537_v31 = vmul.f32 1.442695, %v2479_v63 }
 0x1b3   :  { %v2570_v36 = vadd.f32 %v5867_v20, %v5860_v14  ;;  %v5878_v23 = vpop.eup %3927  ;;  %3947 = vpow2.f32 %v2515_v61  ;;  %v2539_v50 = vmul.f32 1.442695, %v2480_v59  ;;  %v2550_v13 = vadd.f32 %v5873_v11, %v2549_v51 }
 0x1b4   :  { %v859_v18 = vadd.f32 %v5812_v48, %v858_v6  ;;  %v5882_v7 = vpop.eup %3929  ;;  %3949 = vpow2.f32 %v2517_v44  ;;  %v2541_v19 = vmul.f32 1.442695, %v2481_v17  ;;  %v2543_v34 = vmul.f32 1.442695, %v2482_v30  ;;  %v7485_v17 = vld [vmem:[#allocation91_spill] sm:$0xff] }
 0x1b5   :  { %v2571_v41 = vadd.f32 %v5878_v23, %v2570_v36  ;;  %v5885_v63 = vpop.eup %3931  ;;  %3951 = vpow2.f32 %v2519_v0  ;;  %v5887_v55 = vmul.f32 1.442695, %v2483_v53  ;;  %v2551_v9 = vadd.f32 %v5882_v7, %v2550_v13  ;;  %v7486_v0 = vld [vmem:[#allocation97_spill] sm:$0xff]  ;;  %v7487_v36 = vld [vmem:[#allocation95_spill] sm:$0xff] }
 0x1b6   :  { %v860_v59 = vadd.f32 %v5818_v21, %v859_v18  ;;  %v5891_v61 = vpop.eup %3933  ;;  %3953 = vpow2.f32 %v2521_v15  ;;  %v5893_v49 = vmul.f32 1.442695, %v2484_v35  ;;  %v7489_v13 = vsub.f32 %v7469_v47, %v5708_v60 }
 0x1b7   :  { %v2572_v44 = vadd.f32 %v5885_v63, %v2571_v41  ;;  %v5898_v51 = vpop.eup %3935  ;;  %3955 = vpow2.f32 %v2523_v62  ;;  %v2552_v53 = vadd.f32 %v5891_v61, %v2551_v9  ;;  %v7488_v41 = vsub.f32 %v7468_v25, %v5708_v60 }
 0x1b8   :  { %v5905_v18 = vpop.eup %3937  ;;  %3957 = vpow2.f32 %v2525_v43  ;;  %v861_v15 = vadd.f32 %v5824_v42, %v860_v59  ;;  %v5920_v6 = vmul.f32 1.442695, %v7489_v13  ;;  %v7490_v43 = vsub.f32 %v7470_v10, %v5708_v60 }
 0x1b9   :  { %v2573_v35 = vadd.f32 %v5898_v51, %v2572_v44  ;;  %v5912_v30 = vmul.f32 1.442695, %v7488_v41  ;;  %v5914_v62 = vpop.eup %3939  ;;  %3959 = vpow2.f32 %v2527_v56  ;;  %v2553_v9 = vadd.f32 %v5905_v18, %v2552_v53  ;;  %v7491_v41 = vld [vmem:[#allocation117_spill] sm:$0xff]  ;;  %v7492_v53 = vld [vmem:[#allocation111_spill] sm:$0xff] }
 0x1ba   :  { %v5925_v44 = vmul.f32 1.442695, %v7490_v43  ;;  %v5927_v59 = vpop.eup %3941  ;;  %3961 = vpow2.f32 %v2529_v16  ;;  %v1721_v56 = vmul.f32 %v7491_v41, %v5794_v1  ;;  %v1723_v8 = vmul.f32 %v7492_v53, %v5794_v1 }
 0x1bb   :  { %v2574_v25 = vadd.f32 %v5914_v62, %v2573_v35  ;;  %v5934_v42 = vpop.eup %3943  ;;  %3963 = vpow2.f32 %v2531_v32  ;;  %v2554_v47 = vadd.f32 %v5927_v59, %v2553_v9  ;;  %v7493_v10 = vsub.f32 %v7471_v37, %v5708_v60 }
 0x1bc   :  { %v7494_v16 = vsub.f32 %v7472_v46, %v5708_v60  ;;  %v5947_v43 = vpop.eup %3945  ;;  %3965 = vpow2.f32 %v2533_v3  ;;  %v862_v53 = vadd.f32 %v5830_v57, %v861_v15  ;;  %v5951_v32 = vpack.c.bf16 %v1723_v8, %v1721_v56  ;;  %v7497_v46 = vld [vmem:[#allocation18_spill] sm:$0xff]  ;;  %v7498_v15 = vld [vmem:[#allocation112_spill] sm:$0xff] }
 0x1bd   :  { %v5940_v13 = vmul.f32 1.442695, %v7493_v10  ;;  %v2575_v41 = vadd.f32 %v5934_v42, %v2574_v25  ;;  %v5953_v9 = vpop.eup %3947  ;;  %3967 = vpow2.f32 %v2535_v38  ;;  %v2555_v37 = vadd.f32 %v5947_v43, %v2554_v47  ;;  %v7496_v10 = vld [vmem:[#allocation115_spill] sm:$0xff]  ;;  %v7499_v25 = vld [vmem:[#allocation116_spill] sm:$0xff] }
 0x1be   :  { %v5945_v35 = vmul.f32 1.442695, %v7494_v16  ;;  %7495 = vst [vmem:[#allocation82_spill] sm:$0xff] %v5951_v32  ;;  %v1720_v21 = vmul.f32 %v7496_v10, %v5783_v2  ;;  %v1722_v16 = vmul.f32 %v7497_v46, %v5783_v2  ;;  %v5960_v48 = vpop.eup %3949  ;;  %3969 = vpow2.f32 %v2537_v31  ;;  %v7501_v46 = vld [vmem:[#allocation24_spill] sm:$0xff] }
 0x1bf   :  { %v2576_v3 = vadd.f32 %v5953_v9, %v2575_v41  ;;  %v1725_v8 = vmul.f32 %v7498_v15, %v5794_v1  ;;  %v1727_v56 = vmul.f32 %v7499_v25, %v5794_v1  ;;  %v5967_v38 = vpop.eup %3951  ;;  %3971 = vpow2.f32 %v2539_v50  ;;  %v7503_v15 = vld [vmem:[#allocation113_spill] sm:$0xff] }
 0x1c0   :  { %v2556_v47 = vadd.f32 %v5960_v48, %v2555_v37  ;;  %v5970_v10 = vpack.c.bf16 %v1722_v16, %v1720_v21  ;;  %v1724_v32 = vmul.f32 %v7501_v46, %v5783_v2  ;;  %v5974_v57 = vpop.eup %3953  ;;  %3973 = vpow2.f32 %v2541_v19  ;;  %v7504_v21 = vld [vmem:[#allocation119_spill] sm:$0xff]  ;;  %v7505_v16 = vld [vmem:[#allocation29_spill] sm:$0xff] }
 0x1c1   :  { %v2577_v31 = vadd.f32 %v5967_v38, %v2576_v3  ;;  %v5977_v41 = vpack.c.bf16 %v1727_v56, %v1725_v8  ;;  %v1726_v25 = vmul.f32 %v7503_v15, %v5783_v2  ;;  %v5981_v39 = vpop.eup %3955  ;;  %3975 = vpow2.f32 %v2543_v34  ;;  %v7507_v8 = vld [vmem:[#allocation118_spill] sm:$0xff] }
 0x1c2   :  { %7500 = vst [vmem:[#allocation121_spill] sm:$0xff] %v5970_v10  ;;  %v2557_v50 = vadd.f32 %v5974_v57, %v2556_v47  ;;  %v1729_v37 = vmul.f32 %v7504_v21, %v5794_v1  ;;  %v1731_v46 = vmul.f32 %v7505_v16, %v5794_v1  ;;  %v5988_v10 = vpop.eup %3957  ;;  %3977 = vpow2.f32 %v5887_v55  ;;  %v7509_v21 = vld [vmem:[#allocation33_spill] sm:$0xff] }
 0x1c3   :  { %7502 = vst [vmem:[#allocation86_spill] sm:$0xff] %v5977_v41  ;;  %v2578_v19 = vadd.f32 %v5981_v39, %v2577_v31  ;;  %v5992_v3 = vpack.c.bf16 %v1726_v25, %v1724_v32  ;;  %v1728_v56 = vmul.f32 %v7507_v8, %v5783_v2  ;;  %v5996_v34 = vpop.eup %3959  ;;  %3979 = vpow2.f32 %v5893_v49  ;;  %v7510_v32 = vld [vmem:[#allocation77_spill] sm:$0xff] }
 0x1c4   :  { %v2558_v47 = vadd.f32 %v5988_v10, %v2557_v50  ;;  %v6000_v15 = vpack.c.bf16 %v1731_v46, %v1729_v37  ;;  %v1730_v16 = vmul.f32 %v7509_v21, %v5783_v2  ;;  %v6004_v41 = vpop.eup %3961  ;;  %3981 = vpow2.f32 %v5742_v26  ;;  %v7511_v25 = vld [vmem:[#allocation41_spill] sm:$0xff] }
 0x1c5   :  { %7506 = vst [vmem:[#allocation80_spill] sm:$0xff] %v5992_v3  ;;  %v2579_v55 = vadd.f32 %v5996_v34, %v2578_v19  ;;  %v1733_v31 = vmul.f32 %v7510_v32, %v5794_v1  ;;  %v1735_v8 = vmul.f32 %v7511_v25, %v5794_v1  ;;  %v6012_v49 = vpop.eup %3963  ;;  %v7512_v37 = vsub.f32 %v7473_v45, %v5708_v60  ;;  %v7514_v19 = vld [vmem:[#allocation30_spill] sm:$0xff] }
 0x1c6   :  { %7508 = vst [vmem:[#allocation84_spill] sm:$0xff] %v6000_v15  ;;  %v2559_v50 = vadd.f32 %v6004_v41, %v2558_v47  ;;  %v6020_v21 = vpack.c.bf16 %v1730_v16, %v1728_v56  ;;  %v1732_v26 = vmul.f32 %v7514_v19, %v5783_v2  ;;  %v6024_v3 = vpop.eup %3965  ;;  %3983 = vpow2.f32 %v5746_v52  ;;  %v7516_v47 = vld [vmem:[#allocation40_spill] sm:$0xff]  ;;  %v7517_v16 = vld [vmem:[#allocation37_spill] sm:$0xff] }
 0x1c7   :  { %v6018_v46 = vmul.f32 1.442695, %v7512_v37  ;;  %v2580_v32 = vadd.f32 %v6012_v49, %v2579_v55  ;;  %v6028_v25 = vpack.c.bf16 %v1735_v8, %v1733_v31  ;;  %v1734_v15 = vmul.f32 %v7516_v47, %v5783_v2  ;;  %v6032_v22 = vpop.eup %3967  ;;  %v7518_v19 = vld [vmem:[#allocation49_spill] sm:$0xff]  ;;  %v7520_v8 = vld [vmem:[#allocation36_spill] sm:$0xff] }
 0x1c8   :  { %7513 = vst [vmem:[#allocation90_spill] sm:$0xff] %v6020_v21  ;;  %v2560_v45 = vadd.f32 %v6024_v3, %v2559_v50  ;;  %v863_v56 = vadd.f32 %v5854_v5, %v862_v53  ;;  %v1737_v37 = vmul.f32 %v7517_v16, %v5794_v1  ;;  %v1739_v21 = vmul.f32 %v7518_v19, %v5794_v1  ;;  %v6040_v55 = vpop.eup %3969  ;;  %v7522_v19 = vld [vmem:[#allocation48_spill] sm:$0xff] }
 0x1c9   :  { %7515 = vst [vmem:[#allocation88_spill] sm:$0xff] %v6028_v25  ;;  %v2581_v52 = vadd.f32 %v6032_v22, %v2580_v32  ;;  %3985 = vpow2.f32 %v5748_v27  ;;  %v6044_v31 = vpack.c.bf16 %v1734_v15, %v1732_v26  ;;  %v1736_v47 = vmul.f32 %v7520_v8, %v5783_v2  ;;  %v6048_v50 = vpop.eup %3971  ;;  %v7523_v15 = vld [vmem:[#allocation45_spill] sm:$0xff]  ;;  %v7524_v32 = vld [vmem:[#allocation123_spill] sm:$0xff] }
 0x1ca   :  { %v2561_v53 = vadd.f32 %v6040_v55, %v2560_v45  ;;  %3987 = vpow2.f32 %v5750_v29  ;;  %v6052_v16 = vpack.c.bf16 %v1739_v21, %v1737_v37  ;;  %v1738_v25 = vmul.f32 %v7522_v19, %v5783_v2  ;;  %v6056_v5 = vpop.eup %3973  ;;  %v7526_v37 = vld [vmem:[#allocation44_spill] sm:$0xff] }
 0x1cb   :  { %7519 = vst [vmem:[#allocation94_spill] sm:$0xff] %v6044_v31  ;;  %v2582_v27 = vadd.f32 %v6048_v50, %v2581_v52  ;;  %3989 = vpow2.f32 %v5912_v30  ;;  %v1741_v26 = vmul.f32 %v7523_v15, %v5794_v1  ;;  %v1743_v8 = vmul.f32 %v7524_v32, %v5794_v1  ;;  %v6064_v45 = vpop.eup %3975  ;;  %v7528_v32 = vld [vmem:[#allocation122_spill] sm:$0xff] }
 0x1cc   :  { %7521 = vst [vmem:[#allocation92_spill] sm:$0xff] %v6052_v16  ;;  %v2562_v29 = vadd.f32 %v6056_v5, %v2561_v53  ;;  %3991 = vpow2.f32 %v5920_v6  ;;  %v6068_v21 = vpack.c.bf16 %v1738_v25, %v1736_v47  ;;  %v1740_v19 = vmul.f32 %v7526_v37, %v5783_v2  ;;  %v6072_v52 = vpop.eup %3977  ;;  %v7529_v25 = vld [vmem:[#allocation125_spill] sm:$0xff] }
 0x1cd   :  { %v2583_v30 = vadd.f32 %v6064_v45, %v2582_v27  ;;  %3993 = vpow2.f32 %v5752_v24  ;;  %v6076_v15 = vpack.c.bf16 %v1743_v8, %v1741_v26  ;;  %v1742_v31 = vmul.f32 %v7528_v32, %v5783_v2  ;;  %v6080_v16 = vpop.eup %3979  ;;  %v7530_v53 = vld [vmem:[#allocation57_spill] sm:$0xff] }
 0x1ce   :  { %7525 = vst [vmem:[#allocation98_spill] sm:$0xff] %v6068_v21  ;;  %v2563_v6 = vadd.f32 %v6072_v52, %v2562_v29  ;;  %3995 = vpow2.f32 %v5925_v44  ;;  %v1745_v47 = vmul.f32 %v7529_v25, %v5794_v1  ;;  %v1747_v37 = vmul.f32 %v7530_v53, %v5794_v1  ;;  %v6088_v27 = vpop.eup %3981  ;;  %v7533_v29 = vld [vmem:[#allocation124_spill] sm:$0xff] }
 0x1cf   :  { %7527 = vst [vmem:[#allocation96_spill] sm:$0xff] %v6076_v15  ;;  %v2584_v24 = vadd.f32 %v6080_v16, %v2583_v30  ;;  %v7531_v26 = vsub.f32 %v7474_v4, %v5708_v60  ;;  %v6094_v32 = vpack.c.bf16 %v1742_v31, %v1740_v19  ;;  %v1744_v21 = vmul.f32 %v7533_v29, %v5783_v2  ;;  %v7535_v4 = vld [vmem:[#allocation56_spill] sm:$0xff]  ;;  %v7536_v31 = vld [vmem:[#allocation53_spill] sm:$0xff] }
 0x1d0   :  { %v2564_v44 = vrot.slane %v2563_v6, 4  ;;  %v864_v15 = vadd.f32 %v6088_v27, %v863_v56  ;;  %3997 = vpow2.f32 %v5940_v13  ;;  %v6100_v25 = vpack.c.bf16 %v1747_v37, %v1745_v47  ;;  %v6102_v53 = vpop.eup %3983  ;;  %v7537_v13 = vld [vmem:[#allocation65_spill] sm:$0xff] }
 0x1d1   :  { %v795_v8 = vmul.f32 1.442695, %v7531_v26  ;;  %7532 = vst [vmem:[#allocation102_spill] sm:$0xff] %v6094_v32  ;;  %v2585_v12 = vrot.slane %v2584_v24, 4  ;;  %3999 = vpow2.f32 %v5754_v40  ;;  %v1746_v30 = vmul.f32 %v7535_v4, %v5783_v2  ;;  %v7540_v4 = vld [vmem:[#allocation52_spill] sm:$0xff] }
 0x1d2   :  { %7534 = vst [vmem:[#allocation100_spill] sm:$0xff] %v6100_v25  ;;  %v1749_v19 = vmul.f32 %v7536_v31, %v5794_v1  ;;  %v2565_v26 = vadd.f32 %v2564_v44, %v2563_v6  ;;  %v865_v29 = vadd.f32 %v6102_v53, %v864_v15  ;;  %4001 = vpow2.f32 %v5945_v35 }
 0x1d3   :  { %v1751_v56 = vmul.f32 %v7537_v13, %v5794_v1  ;;  %v6113_v47 = vpop.eup %3985  ;;  %v2586_v37 = vadd.f32 %v2585_v12, %v2584_v24  ;;  %v7538_v40 = vsub.f32 %v7485_v17, %v5708_v60  ;;  %v6118_v25 = vpack.c.bf16 %v1746_v30, %v1744_v21  ;;  %v7542_v17 = vld [vmem:[#allocation101_spill] sm:$0xff]  ;;  %v7543_v21 = vld [vmem:[#allocation64_spill] sm:$0xff] }
 0x1d4   :  { %v1748_v31 = vmul.f32 %v7540_v4, %v5783_v2  ;;  %v6122_v6 = vpop.eup %3987  ;;  %v2566_v15 = vrot.slane %v2565_v26, 2  ;;  %v866_v35 = vadd.f32 %v6113_v47, %v865_v29  ;;  %4003 = vpow2.f32 %v6018_v46 }
 0x1d5   :  { %v799_v32 = vmul.f32 1.442695, %v7538_v40  ;;  %7539 = vst [vmem:[#allocation106_spill] sm:$0xff] %v6118_v25  ;;  %v6126_v1 = vpack.c.bf16 %v1751_v56, %v1749_v19  ;;  %v6128_v44 = vpop.eup %3989  ;;  %v2587_v12 = vrot.slane %v2586_v37, 2  ;;  %v759_v24 = vsub.f32 %v7542_v17, %v5708_v60  ;;  %v7546_v25 = vld [vmem:[#allocation99_spill] sm:$0xff] }
 0x1d6   :  { %v1750_v30 = vmul.f32 %v7543_v21, %v5783_v2  ;;  %v6134_v13 = vpop.eup %3991  ;;  %v2567_v40 = vadd.f32 %v2566_v15, %v2565_v26  ;;  %v867_v4 = vadd.f32 %v6122_v6, %v866_v35  ;;  %4005 = vpow2.f32 %v795_v8 }
 0x1d7   :  { %7541 = vst [vmem:[#allocation104_spill] sm:$0xff] %v6126_v1  ;;  %7544 = vst [vmem:[#allocation109_spill] sm:$0xff] %v6134_v13  ;;  %v7545_v46 = vsub.f32 %v7486_v0, %v5708_v60  ;;  %v6140_v29 = vpop.eup %3993  ;;  %v2588_v56 = vadd.f32 %v2587_v12, %v2586_v37  ;;  %v761_v1 = vsub.f32 %v7546_v25, %v5708_v60  ;;  %4007 = vpow2.f32 %v799_v32 }
 0x1d8   :  { %v835_v17 = vadd.f32 %v6134_v13, %v6128_v44  ;;  %v6146_v2 = vpack.c.bf16 %v1750_v30, %v1748_v31  ;;  %v6148_v21 = vpop.eup %3995  ;;  %v2568_v26 = vrot.slane %v2567_v40, 1  ;;  %v868_v8 = vadd.f32 %v6140_v29, %v867_v4  ;;  %v7550_v30 = vld [vmem:[#allocation105_spill] sm:$0xff]  ;;  %v7551_v4 = vld [vmem:[#allocation103_spill] sm:$0xff] }
 0x1d9   :  { %v803_v19 = vmul.f32 1.442695, %v7545_v46  ;;  %7548 = vst [vmem:[#allocation85_spill] sm:$0xff] %v6148_v21  ;;  %v7549_v0 = vsub.f32 %v7487_v36, %v5708_v60  ;;  %v2589_v35 = vrot.slane %v2588_v56, 1  ;;  %v811_v37 = vmul.f32 1.442695, %v759_v24 }
 0x1da   :  { %7547 = vst [vmem:[#allocation81_spill] sm:$0xff] %v6146_v2  ;;  %v836_v12 = vadd.f32 %v6148_v21, %v835_v17  ;;  %v6155_v25 = vpop.eup %3997  ;;  %v2569_v46 = vadd.f32 %v2568_v26, %v2567_v40  ;;  %v869_v31 = vadd.f32 %v5744_v28, %v868_v8  ;;  %v763_v2 = vsub.f32 %v7550_v30, %v5708_v60 }
 0x1db   :  { %v807_v15 = vmul.f32 1.442695, %v7549_v0  ;;  %4009 = vpow2.f32 %v803_v19  ;;  %v6160_v13 = vpop.eup %3999  ;;  %v2590_v32 = vadd.f32 %v2589_v35, %v2588_v56  ;;  %v765_v36 = vsub.f32 %v7551_v4, %v5708_v60  ;;  %v7553_v56 = vld [vmem:[#allocation108_spill] sm:$0xff] }
 0x1dc   :  { %v837_v0 = vadd.f32 %v6155_v25, %v836_v12  ;;  %v6165_v24 = vpop.eup %4001  ;;  %v2591_v17 = vadd.f32 1e-16, %v2569_v46  ;;  %v870_v21 = vadd.f32 %v6160_v13, %v869_v31  ;;  %v815_v40 = vmul.f32 1.442695, %v761_v1  ;;  %v7554_v1 = vld [vmem:[#allocation107_spill] sm:$0xff] }
 0x1dd   :  { %7552 = vst [vmem:[#allocation79_spill] sm:$0xff] %v6165_v24  ;;  %4011 = vpow2.f32 %v807_v15  ;;  %v2592_v26 = vadd.f32 1e-16, %v2590_v32  ;;  %v767_v35 = vsub.f32 %v7553_v56, %v5708_v60  ;;  %v819_v4 = vmul.f32 1.442695, %v763_v2 }
 0x1de   :  { %4013 = vpow2.f32 %v811_v37  ;;  %v838_v8 = vadd.f32 %v6165_v24, %v837_v0  ;;  %v6169_v19 = vpop.eup %4003  ;;  %v871_v30 = vrot.slane %v870_v21, 4  ;;  %v769_v15 = vsub.f32 %v7554_v1, %v5708_v60  ;;  %v7556_v1 = vld [vmem:[#allocation61_spill] sm:$0xff] }
 0x1df   :  { %4015 = vrcp.f32 %v2591_v17  ;;  %v823_v37 = vmul.f32 1.442695, %v765_v36  ;;  %v827_v24 = vmul.f32 1.442695, %v767_v35  ;;  %vm92_vm11 = vcmask 392192  }
 0x1e0   :  { %4017 = vrcp.f32 %v2592_v26  ;;  %v839_v12 = vadd.f32 %v6169_v19, %v838_v8  ;;  %v6174_v46 = vpop.eup %4005  ;;  %v872_v31 = vadd.f32 %v871_v30, %v870_v21  ;;  %v831_v8 = vmul.f32 1.442695, %v769_v15 }
 0x1e1   :  { %4019 = vpow2.f32 %v815_v40  ;;  %v6179_v0 = vpop.eup %4007  ;;  %vm109_vm8 = vcmask 7168  }
 0x1e2   :  { %v840_v32 = vadd.f32 %v6174_v46, %v839_v12  ;;  %v873_v56 = vrot.slane %v872_v31, 2  ;;  %4021 = vpow2.f32 %v819_v4 }
 0x1e3   :  { %4023 = vpow2.f32 %v823_v37  ;;  %v7558_v37 = vld [vmem:[#allocation73_spill] sm:$0xff] }
 0x1e4   :  { %v841_v2 = vadd.f32 %v6179_v0, %v840_v32  ;;  %v874_v26 = vadd.f32 %v873_v56, %v872_v31  ;;  %4025 = vpow2.f32 %v827_v24 }
 0x1e5   :  { %v6182_v17 = vpop.eup %4009  ;;  %4027 = vpow2.f32 %v831_v8 }
 0x1e6   :  { %7555 = vst [vmem:[#allocation83_spill] sm:$0xff] %v6182_v17  ;;  %v842_v21 = vadd.f32 %v6182_v17, %v841_v2  ;;  %v875_v60 = vrot.slane %v874_v26, 1  ;;  %v6198_v17 = vpop.permute.xlu1 %1800 }
 0x1e7   :  { %v6185_v30 = vpop.eup %4011  ;;  %7559 = vst [vmem:[#allocation87_spill] sm:$0xff] %v6198_v17  ;;  %3695 = vmatprep.subr.bf16.mxu0 %v6198_v17 }
 0x1e8   :  { %v6187_v36 = vpop.eup %4013  ;;  %v843_v40 = vadd.f32 %v6185_v30, %v842_v21  ;;  %v876_v12 = vadd.f32 %v875_v60, %v874_v26 }
 0x1e9   :  { %v4016_v35 = vpop.eup %4015 }
 0x1ea   :  { %v4018_v4 = vpop.eup %4017  ;;  %v6191_v32 = vmul.f32 %v4016_v35, %v7556_v1  ;;  %v844_v31 = vadd.f32 %v6187_v36, %v843_v40  ;;  %v878_v2 = vadd.f32 1e-16, %v876_v12 }
 0x1eb   :  { %v6194_v15 = vpop.eup %4019  ;;  %v2596_v56 = vmul.f32 %v4018_v4, %v7558_v37 }
 0x1ec   :  { %7557 = vst [vmem:[#allocation89_spill] sm:$0xff] %v6194_v15  ;;  %v845_v24 = vadd.f32 %v6194_v15, %v844_v31  ;;  %v2597_v21 = vmul.f32 %v5858_v33, %v6191_v32  ;;  %v2599_v26 = vmul.f32 %v5865_v58, %v6191_v32  ;;  %v2601_v8 = vmul.f32 %v5873_v11, %v6191_v32  ;;  %v6206_v60 = vpop.eup %4021 }
 0x1ed   :  { %4029 = vrcp.f32 %v878_v2  ;;  %v2598_v40 = vmul.f32 %v5860_v14, %v2596_v56  ;;  %v2600_v35 = vmul.f32 %v5867_v20, %v2596_v56  ;;  %v2602_v12 = vmul.f32 %v5878_v23, %v2596_v56  ;;  %v6216_v11 = vpop.eup %4023 }
 0x1ee   :  { %v846_v4 = vadd.f32 %v6206_v60, %v845_v24  ;;  %v2604_v33 = vmul.f32 %v5885_v63, %v2596_v56  ;;  %v2606_v58 = vmul.f32 %v5898_v51, %v2596_v56  ;;  %v2608_v31 = vmul.f32 %v5914_v62, %v2596_v56  ;;  %v6229_v51 = vpop.eup %4025 }
 0x1ef   :  { %v6218_v15 = vpack.c.bf16 %v2600_v35, %v2598_v40  ;;  %v2610_v2 = vmul.f32 %v5934_v42, %v2596_v56  ;;  %v2612_v14 = vmul.f32 %v5953_v9, %v2596_v56  ;;  %v2614_v20 = vmul.f32 %v5967_v38, %v2596_v56 }
 0x1f0   :  { %v847_v23 = vadd.f32 %v6216_v11, %v846_v4  ;;  %v6224_v17 = vpack.c.bf16 %v2604_v33, %v2602_v12  ;;  %v6226_v24 = vpack.c.bf16 %v2608_v31, %v2606_v58  ;;  %v2616_v63 = vmul.f32 %v5981_v39, %v2596_v56  ;;  %v6241_v33 = vpop.eup %4027 }
 0x1f1   :  { %v6231_v62 = vpack.c.bf16 %v2612_v14, %v2610_v2  ;;  %v2618_v40 = vmul.f32 %v5996_v34, %v2596_v56  ;;  %v2620_v42 = vmul.f32 %v6012_v49, %v2596_v56  ;;  %v2622_v9 = vmul.f32 %v6032_v22, %v2596_v56 }
 0x1f2   :  { %7560 = vst [vmem:[#allocation93_spill] sm:$0xff] %v6226_v24  ;;  %v848_v38 = vadd.f32 %v6229_v51, %v847_v23  ;;  %v6237_v35 = vpack.c.bf16 %v2616_v63, %v2614_v20  ;;  %v2624_v12 = vmul.f32 %v6048_v50, %v2596_v56  ;;  %v2626_v4 = vmul.f32 %v6064_v45, %v2596_v56 }
 0x1f3   :  { %7561 = vst [vmem:[#allocation60_spill] sm:$0xff] %v6231_v62  ;;  %v6243_v39 = vpack.c.bf16 %v2620_v42, %v2618_v40  ;;  %v2628_v58 = vmul.f32 %v6080_v16, %v2596_v56  ;;  %v6246_v31 = vpack.c.bf16 %v2599_v26, %v2597_v21  ;;  %v2603_v34 = vmul.f32 %v5882_v7, %v6191_v32 }
 0x1f4   :  { %7562 = vst [vmem:[#allocation91_spill] sm:$0xff] %v6237_v35  ;;  %v849_v22 = vadd.f32 %v6241_v33, %v848_v38  ;;  %v6251_v49 = vpack.c.bf16 %v2624_v12, %v2622_v9  ;;  %v2605_v50 = vmul.f32 %v5891_v61, %v6191_v32  ;;  %v2607_v45 = vmul.f32 %v5905_v18, %v6191_v32  ;;  %v7570_v9 = vld [vmem:[#allocation74_spill] sm:$0xff] }
 0x1f5   :  { %7563 = vst [vmem:[#allocation97_spill] sm:$0xff] %v6243_v39  ;;  %v6257_v2 = vpack.c.bf16 %v2628_v58, %v2626_v4  ;;  %v6259_v14 = vpack.c.bf16 %v2603_v34, %v2601_v8  ;;  %v2609_v16 = vmul.f32 %v5927_v59, %v6191_v32  ;;  %v2611_v7 = vmul.f32 %v5947_v43, %v6191_v32  ;;  %v7572_v4 = vld [vmem:[#allocation110_spill] sm:$0xff]  ;;  %v7573_v34 = vld [vmem:[#allocation68_spill] sm:$0xff] }
 0x1f6   :  { %7564 = vst [vmem:[#allocation95_spill] sm:$0xff] %v6251_v49  ;;  %v850_v56 = vrot.slane %v849_v22, 4  ;;  %v6265_v21 = vpack.c.bf16 %v2607_v45, %v2605_v50  ;;  %v2613_v26 = vmul.f32 %v5960_v48, %v6191_v32  ;;  %v2615_v61 = vmul.f32 %v5974_v57, %v6191_v32  ;;  %v7575_v45 = vld [vmem:[#allocation23_spill] sm:$0xff] }
 0x1f7   :  { %7565 = vst [vmem:[#allocation117_spill] sm:$0xff] %v6257_v2  ;;  %v4030_v18 = vpop.eup %4029  ;;  %v6271_v20 = vpack.c.bf16 %v2611_v7, %v2609_v16  ;;  %v2617_v8 = vmul.f32 %v5988_v10, %v6191_v32  ;;  %v2619_v59 = vmul.f32 %v6004_v41, %v6191_v32  ;;  %v2621_v43 = vmul.f32 %v6024_v3, %v6191_v32 }
 0x1f8   :  { %7566 = vst [vmem:[#allocation111_spill] sm:$0xff] %v6265_v21  ;;  %v882_v23 = vmul.f32 %v4030_v18, %v7558_v37  ;;  %v851_v63 = vadd.f32 %v850_v56, %v849_v22  ;;  %v6280_v40 = vpack.c.bf16 %v2615_v61, %v2613_v26  ;;  %v2623_v48 = vmul.f32 %v6040_v55, %v6191_v32  ;;  %v7571_v37 = vld [vmem:[#allocation78_spill] sm:$0xff]  ;;  %v7574_v55 = vld [vmem:[#allocation69_spill] sm:$0xff] }
 0x1f9   :  { %7567 = vst [vmem:[#allocation115_spill] sm:$0xff] %v6271_v20  ;;  %v6284_v57 = vpack.c.bf16 %v2619_v59, %v2617_v8  ;;  %v2625_v42 = vmul.f32 %v6056_v5, %v6191_v32  ;;  %v2627_v10 = vmul.f32 %v6072_v52, %v6191_v32  ;;  %v7576_v56 = vld [vmem:[#allocation114_spill] sm:$0xff]  ;;  %v7577_v52 = vld [vmem:[#allocation71_spill] sm:$0xff] }
 0x1fa   :  { %7568 = vst [vmem:[#allocation18_spill] sm:$0xff] %v6280_v40  ;;  %v884_v41 = vmul.f32 %v5780_v54, %v882_v23  ;;  %v886_v3 = vmul.f32 %v7570_v9, %v882_v23  ;;  %v852_v38 = vrot.slane %v851_v63, 2  ;;  %v888_v12 = vmul.f32 %v7571_v37, %v882_v23 }
 0x1fb   :  { %7569 = vst [vmem:[#allocation112_spill] sm:$0xff] %v6284_v57  ;;  %v890_v58 = vmul.f32 %v7572_v4, %v882_v23  ;;  %v892_v22 = vmul.f32 %v7573_v34, %v882_v23  ;;  %v894_v50 = vmul.f32 %v7574_v55, %v882_v23  ;;  %v896_v16 = vmul.f32 %v7575_v45, %v882_v23 }
 0x1fc   :  { %v916_v7 = vpack.c.bf16 %v886_v3, %v884_v41  ;;  %v853_v5 = vadd.f32 %v852_v38, %v851_v63  ;;  %v898_v26 = vmul.f32 %v7576_v56, %v882_v23  ;;  %v900_v32 = vmul.f32 %v7577_v52, %v882_v23  ;;  %v7584_v52 = vld [vmem:[#allocation89_spill] sm:$0xff] }
 0x1fd   :  { %v6299_v54 = vpack.c.bf16 %v890_v58, %v888_v12  ;;  %v6301_v61 = vpack.c.bf16 %v894_v50, %v892_v22  ;;  %v902_v18 = vmul.f32 %v6088_v27, %v882_v23  ;;  %v904_v8 = vmul.f32 %v6102_v53, %v882_v23  ;;  %v7582_v22 = vld [vmem:[#allocation79_spill] sm:$0xff] }
 0x1fe   :  { %947 = vxpose.xlu1.c.b16.start [1/8] %v916_v7, 128  ;;  %1220 = vmatprep.mubr.bf16.mxu1 %v916_v7  ;;  %v854_v59 = vrot.slane %v853_v5, 1  ;;  %v6305_v9 = vpack.c.bf16 %v898_v26, %v896_v16  ;;  %v906_v41 = vmul.f32 %v6113_v47, %v882_v23  ;;  %v908_v63 = vmul.f32 %v6122_v6, %v882_v23 }
 0x1ff   :  { %v6309_v3 = vpack.c.bf16 %v902_v18, %v900_v32  ;;  %v910_v38 = vmul.f32 %v6140_v29, %v882_v23  ;;  %v912_v37 = vmul.f32 %v5744_v28, %v882_v23  ;;  %v914_v12 = vmul.f32 %v6160_v13, %v882_v23 }
 0x200   :  { %v855_v27 = vadd.f32 %v854_v59, %v853_v5  ;;  %v6314_v4 = vpack.c.bf16 %v906_v41, %v904_v8  ;;  %v6316_v53 = vpack.c.bf16 %v2623_v48, %v2621_v43  ;;  %v6318_v58 = vpack.c.bf16 %v2627_v10, %v2625_v42  ;;  %v7580_v43 = vld [vmem:[#allocation109_spill] sm:$0xff] }
 0x201   :  { %v6320_v34 = vpack.c.bf16 %v910_v38, %v908_v63  ;;  %v6322_v47 = vpack.c.bf16 %v914_v12, %v912_v37  ;;  %v7581_v48 = vld [vmem:[#allocation85_spill] sm:$0xff]  ;;  %v7588_v63 = vld [vmem:[#allocation84_spill] sm:$0xff] }
 0x202   :  { %7578 = vst [vmem:[#allocation116_spill] sm:$0xff] %v6316_v53  ;;  %7579 = vst [vmem:[#allocation24_spill] sm:$0xff] %v6318_v58  ;;  %v877_v6 = vadd.f32 1e-16, %v855_v27  ;;  %948 = vxpose.xlu1.c.b16.cont [2/8] %v6299_v54, 128  ;;  %v7589_v38 = vld [vmem:[#allocation88_spill] sm:$0xff]  ;;  %v7592_v27 = vld [vmem:[#allocation121_spill] sm:$0xff] }
 0x203   :  { %v7590_v37 = vld [vmem:[#allocation92_spill] sm:$0xff] }
 0x204   :  { %4031 = vrcp.f32 %v877_v6  ;;  %v7591_v12 = vld [vmem:[#allocation96_spill] sm:$0xff] }
 0x205   :  { %v7593_v6 = vld [vmem:[#allocation100_spill] sm:$0xff] }
 0x206   :  { %949 = vxpose.xlu1.c.b16.cont [3/8] %v6301_v61, 128 }
 0x20a   :  { %950 = vxpose.xlu1.c.b16.cont [4/8] %v6305_v9, 128 }
 0x20e   :  { %v4032_v28 = vpop.eup %4031  ;;  %951 = vxpose.xlu1.c.b16.cont [5/8] %v6309_v3, 128 }
 0x20f   :  { %v881_v13 = vmul.f32 %v4032_v28, %v7556_v1  ;;  %v7594_v28 = vld [vmem:[#allocation80_spill] sm:$0xff] }
 0x211   :  { %v883_v29 = vmul.f32 %v6128_v44, %v881_v13  ;;  %v885_v23 = vmul.f32 %v7580_v43, %v881_v13  ;;  %v887_v42 = vmul.f32 %v7581_v48, %v881_v13  ;;  %v889_v10 = vmul.f32 %v6155_v25, %v881_v13  ;;  %v7583_v44 = vld [vmem:[#allocation83_spill] sm:$0xff]  ;;  %v7596_v43 = vld [vmem:[#allocation90_spill] sm:$0xff] }
 0x212   :  { %v891_v55 = vmul.f32 %v7582_v22, %v881_v13  ;;  %v893_v50 = vmul.f32 %v6169_v19, %v881_v13  ;;  %v895_v45 = vmul.f32 %v6174_v46, %v881_v13  ;;  %v897_v16 = vmul.f32 %v6179_v0, %v881_v13  ;;  %952 = vxpose.xlu1.c.b16.cont [6/8] %v6314_v4, 128  ;;  %v7597_v48 = vld [vmem:[#allocation94_spill] sm:$0xff] }
 0x213   :  { %v6338_v7 = vpack.c.bf16 %v885_v23, %v883_v29  ;;  %v6340_v1 = vpack.c.bf16 %v889_v10, %v887_v42  ;;  %v899_v5 = vmul.f32 %v7583_v44, %v881_v13  ;;  %v901_v56 = vmul.f32 %v6185_v30, %v881_v13  ;;  %v7595_v29 = vld [vmem:[#allocation104_spill] sm:$0xff]  ;;  %v7598_v42 = vld [vmem:[#allocation98_spill] sm:$0xff] }
 0x214   :  { %v6344_v26 = vpack.c.bf16 %v893_v50, %v891_v55  ;;  %v6346_v25 = vpack.c.bf16 %v897_v16, %v895_v45  ;;  %v903_v19 = vmul.f32 %v6187_v36, %v881_v13  ;;  %v905_v46 = vmul.f32 %v7584_v52, %v881_v13  ;;  %v7599_v22 = vld [vmem:[#allocation102_spill] sm:$0xff]  ;;  %v1811_v45 = vpop.permute.xlu0 %1810  ;;  %v7601_v16 = vld [vmem:[#allocation81_spill] sm:$0xff] }
 0x215   :  { %931 = vxpose.xlu0.c.b16.start [1/8] %v6338_v7, 128  ;;  %v6351_v0 = vpack.c.bf16 %v901_v56, %v899_v5  ;;  %v907_v32 = vmul.f32 %v6206_v60, %v881_v13  ;;  %v909_v18 = vmul.f32 %v6216_v11, %v881_v13  ;;  %v911_v8 = vmul.f32 %v6229_v51, %v881_v13  ;;  %v4065_v60 = vld [vmem:[#allocation7 + $0x20] sm:$0xff]   ;;  %v7586_v51 = vld [vmem:[#allocation82_spill] sm:$0xff]  ;;  %v4066_v52 = vld [vmem:[#allocation7 + $0x28] sm:$0xff]  }
 0x216   :  { %v6356_v59 = vpack.c.bf16 %v905_v46, %v903_v19  ;;  %953 = vxpose.xlu1.c.b16.cont [7/8] %v6320_v34, 128  ;;  %v913_v30 = vmul.f32 %v6241_v33, %v881_v13  ;;  %v7585_v11 = vld [vmem:[#allocation120_spill] sm:$0xff]  ;;  %v7587_v33 = vld [vmem:[#allocation86_spill] sm:$0xff]  ;;  %v1803_v13 = vpop.permute.xlu1 %1802 }
 0x217   :  { %v6360_v41 = vpack.c.bf16 %v909_v18, %v907_v32  ;;  %v7600_v50 = vld [vmem:[#allocation106_spill] sm:$0xff]  ;;  %v7602_v32 = vld [vmem:[#allocation87_spill] sm:$0xff] }
 0x218   :  { %v6362_v36 = vpack.c.bf16 %v913_v30, %v911_v8  ;;  %v1813_v5 = vpop.permute.xlu0 %1812  ;;  %v4067_v18 = vld [vmem:[#allocation7 + $0x30] sm:$0xff]   ;;  %v7603_v30 = vmov 0  }
 0x219   :  { %932 = vxpose.xlu0.c.b16.cont [2/8] %v6340_v1, 128 }
 0x21a   :  { %954 = vxpose.xlu1.c.b16.end [8/8] %v6322_v47, 128  ;;  %v1805_v23 = vpop.permute.xlu1 %1804 }
 0x21d   :  { %933 = vxpose.xlu0.c.b16.cont [3/8] %v6344_v26, 128 }
 0x21e   :  { %2685 = vrot.lane.b32.xlu1 %v4065_v60, %s4222_s29  ;;  %v1807_v10 = vpop.permute.xlu1 %1806 }
 0x221   :  { %934 = vxpose.xlu0.c.b16.cont [4/8] %v6346_v25, 128 }
 0x222   :  { %v1809_v55 = vpop.permute.xlu1 %1808 }
 0x225   :  { %935 = vxpose.xlu0.c.b16.cont [5/8] %v6351_v0, 128 }
 0x226   :  { %v6396_v44 = vpop.permute.xlu1 %2677 }
 0x229   :  { %936 = vxpose.xlu0.c.b16.cont [6/8] %v6356_v59, 128 }
 0x22a   :  { %v6400_v19 = vpop.permute.xlu1 %2679 }
 0x22d   :  { %937 = vxpose.xlu0.c.b16.cont [7/8] %v6360_v41, 128 }
 0x22e   :  { %v6406_v8 = vpop.permute.xlu1 %2681 }
 0x231   :  { %938 = vxpose.xlu0.c.b16.end [8/8] %v6362_v36, 128 }
 0x23a   :  { %1814 = vrot.lane.b32.xlu0 %v7585_v11, %s4221_s4 }
 0x241   :  { %1784 = vxpose.xlu1.c.b16.start [1/8] %v7586_v51, 128 }
 0x245   :  { %1785 = vxpose.xlu1.c.b16.cont [2/8] %v7587_v33, 128 }
 0x249   :  { %1786 = vxpose.xlu1.c.b16.cont [3/8] %v7588_v63, 128 }
 0x24d   :  { %1787 = vxpose.xlu1.c.b16.cont [4/8] %v7589_v38, 128 }
 0x251   :  { %1788 = vxpose.xlu1.c.b16.cont [5/8] %v7590_v37, 128 }
 0x255   :  { %1789 = vxpose.xlu1.c.b16.cont [6/8] %v7591_v12, 128 }
 0x258   :  { %1768 = vxpose.xlu0.c.b16.start [1/8] %v7592_v27, 128 }
 0x259   :  { %1790 = vxpose.xlu1.c.b16.cont [7/8] %v7593_v6, 128 }
 0x25c   :  { %1769 = vxpose.xlu0.c.b16.cont [2/8] %v7594_v28, 128 }
 0x25d   :  { %1791 = vxpose.xlu1.c.b16.end [8/8] %v7595_v29, 128 }
 0x260   :  { %1770 = vxpose.xlu0.c.b16.cont [3/8] %v7596_v43, 128 }
 0x261   :  { %2661 = vxpose.xlu1.c.b16.start [1/8] %v6218_v15, 128 }
 0x264   :  { %1771 = vxpose.xlu0.c.b16.cont [4/8] %v7597_v48, 128 }
 0x265   :  { %2662 = vxpose.xlu1.c.b16.cont [2/8] %v6224_v17, 128 }
 0x268   :  { %1772 = vxpose.xlu0.c.b16.cont [5/8] %v7598_v42, 128 }
 0x269   :  { %2663 = vxpose.xlu1.c.b16.cont [3/8] %v6226_v24, 128 }
 0x26c   :  { %1773 = vxpose.xlu0.c.b16.cont [6/8] %v7599_v22, 128 }
 0x26d   :  { %2664 = vxpose.xlu1.c.b16.cont [4/8] %v6231_v62, 128  ;;  %v7619_v62 = vld [vmem:[#allocation43_spill] sm:$0xff] }
 0x270   :  { %1774 = vxpose.xlu0.c.b16.cont [7/8] %v7600_v50, 128 }
 0x271   :  { %2665 = vxpose.xlu1.c.b16.cont [5/8] %v6237_v35, 128 }
 0x274   :  { %1775 = vxpose.xlu0.c.b16.end [8/8] %v7601_v16, 128 }
 0x275   :  { %2666 = vxpose.xlu1.c.b16.cont [6/8] %v6243_v39, 128  ;;  %v7612_v39 = vld [vmem:[#allocation31_spill] sm:$0xff] }
 0x279   :  { %2667 = vxpose.xlu1.c.b16.cont [7/8] %v6251_v49, 128 }
 0x27b   :  { %v939_v56 = vpop.trf.xlu0 }
 0x27c   :  { %3663 = vmatprep.mubr.bf16.mxu0 %v939_v56 }
 0x27d   :  { %2687 = vrot.lane.b32.xlu0 %v4066_v52, %s4222_s29  ;;  %2668 = vxpose.xlu1.c.b16.end [8/8] %v6257_v2, 128  ;;  %v6411_v52 = vpop.permute.xlu1 %2683 }
 0x27f   :  { %v940_v46 = vpop.trf.xlu0 }
 0x280   :  { %3664 = vmatmul.mubr.bf16.vlgmr.msra.gmra.mrb[0].mxu0 %v940_v46 }
 0x281   :  { %3696 = vmatpush3.bf16.msra.mxu0 %v7602_v32  ;;  %2689 = vrot.lane.b32.xlu0 %v4067_v18, %s4222_s29  ;;  %v955_v32 = vpop.trf.xlu1 }
 0x282   :  { %3697 = vmatprep.subr.bf16.mxu0 %v1803_v13  ;;  %3816 = vset.pattern.permute.xlu1 %v7603_v30 }
 0x283   :  { %v941_v60 = vpop.trf.xlu0 }
 0x284   :  { %3667 = vmatprep.mubr.bf16.mxu0 %v941_v60 }
 0x285   :  { %3698 = vmatpush3.bf16.msra.mxu0 %v1803_v13  ;;  %2691 = vrot.lane.b32.xlu0 %v7585_v11, %s4222_s29  ;;  %v956_v60 = vpop.trf.xlu1 }
 0x286   :  { %3699 = vmatprep.subr.bf16.mxu0 %v1805_v23 }
 0x287   :  { %v942_v56 = vpop.trf.xlu0 }
 0x288   :  { %3668 = vmatmul.mubr.bf16.gmra.mrb[4].mxu0 %v942_v56 }
 0x289   :  { %3700 = vmatpush3.bf16.msra.mxu0 %v1805_v23  ;;  %v957_v2 = vpop.trf.xlu1 }
 0x28a   :  { %3701 = vmatprep.subr.bf16.mxu0 %v1807_v10 }
 0x28b   :  { %v943_v46 = vpop.trf.xlu0 }
 0x28c   :  { %3671 = vmatprep.mubr.bf16.mxu0 %v943_v46 }
 0x28d   :  { %3702 = vmatpush3.bf16.msra.mxu0 %v1807_v10  ;;  %v958_v23 = vpop.trf.xlu1 }
 0x28e   :  { %3703 = vmatprep.subr.bf16.mxu0 %v1809_v55 }
 0x28f   :  { %v944_v18 = vpop.trf.xlu0 }
 0x290   :  { %3672 = vmatmul.mubr.bf16.gmra.mrb[8].mxu0 %v944_v18 }
 0x291   :  { %3704 = vmatpush3.bf16.msra.mxu0 %v1809_v55  ;;  %v959_v10 = vpop.trf.xlu1 }
 0x292   :  { %3705 = vmatprep.subr.bf16.mxu0 %v1811_v45 }
 0x293   :  { %v945_v13 = vpop.trf.xlu0 }
 0x294   :  { %3675 = vmatprep.mubr.bf16.mxu0 %v945_v13 }
 0x295   :  { %3706 = vmatpush3.bf16.msra.mxu0 %v1811_v45  ;;  %v960_v55 = vpop.trf.xlu1 }
 0x296   :  { %3707 = vmatprep.subr.bf16.mxu0 %v1813_v5 }
 0x297   :  { %v946_v11 = vpop.trf.xlu0 }
 0x298   :  { %3676 = vmatmul.mubr.bf16.gmra.mrb[12].mxu0 %v946_v11 }
 0x299   :  { %3708 = vmatpush3.bf16.msra.mxu0 %v1813_v5  ;;  %3679 = vmatprep.mubr.bf16.mxu0 %v955_v32  ;;  %v961_v5 = vpop.trf.xlu1 }
 0x2a0   :  { %3680 = vmatmul.mubr.bf16.gmra.mrb[16].mxu0 %v956_v60 }
 0x2a1   :  { %3683 = vmatprep.mubr.bf16.mxu0 %v957_v2  ;;  %v962_v2 = vpop.trf.xlu1 }
 0x2a3   :  { %2645 = vxpose.xlu0.c.b16.start [1/8] %v6246_v31, 128 }
 0x2a5   :  { %v2686_v60 = vpop.permute.xlu1 %2685 }
 0x2a7   :  { %2646 = vxpose.xlu0.c.b16.cont [2/8] %v6259_v14, 128 }
 0x2a8   :  { %3684 = vmatmul.mubr.bf16.gmra.mrb[20].mxu0 %v958_v23 }
 0x2a9   :  { %3687 = vmatprep.mubr.bf16.mxu0 %v959_v10  ;;  %v1792_v11 = vpop.trf.xlu1 }
 0x2ab   :  { %2647 = vxpose.xlu0.c.b16.cont [3/8] %v6265_v21, 128 }
 0x2ac   :  { %v1815_v45 = vpop.permute.xlu0 %1814 }
 0x2ad   :  { %3709 = vmatprep.subr.bf16.mxu0 %v1815_v45 }
 0x2ae   :  { %3710 = vmatpush3.bf16.msra.mxu0 %v1815_v45 }
 0x2af   :  { %2648 = vxpose.xlu0.c.b16.cont [4/8] %v6271_v20, 128  ;;  %3743 = vmatprep.subr.bf16.mxu0 %v6396_v44  ;;  %v7618_v20 = vld [vmem:[#allocation42_spill] sm:$0xff] }
 0x2b0   :  { %3688 = vmatmul.mubr.bf16.gmra.mrb[24].mxu0 %v960_v55 }
 0x2b1   :  { %3691 = vmatprep.mubr.bf16.mxu0 %v961_v5 }
 0x2b3   :  { %2649 = vxpose.xlu0.c.b16.cont [5/8] %v6280_v40, 128 }
 0x2b7   :  { %2650 = vxpose.xlu0.c.b16.cont [6/8] %v6284_v57, 128 }
 0x2b8   :  { %3692 = vmatmul.mubr.bf16.gmra.mrb[28].mxu0 %v962_v2 }
 0x2bb   :  { %2651 = vxpose.xlu0.c.b16.cont [7/8] %v6316_v53, 128  ;;  %v7609_v53 = vld [vmem:[#allocation22_spill] sm:$0xff] }
 0x2be   :  { %v1776_v56 = vpop.trf.xlu0 }
 0x2bf   :  { %2652 = vxpose.xlu0.c.b16.end [8/8] %v6318_v58, 128  ;;  %3711 = vmatprep.mubr.bf16.mxu0 %v1776_v56 }
 0x2c2   :  { %v1777_v46 = vpop.trf.xlu0 }
 0x2c3   :  { %3712 = vmatmul.mubr.bf16.vlgmr.msra.gmra.mrb[32].mxu0 %v1777_v46 }
 0x2c4   :  { %3744 = vmatpush3.bf16.msra.mxu0 %v6396_v44 }
 0x2c5   :  { %3745 = vmatprep.subr.bf16.mxu0 %v6400_v19 }
 0x2c6   :  { %v1778_v32 = vpop.trf.xlu0 }
 0x2c7   :  { %3715 = vmatprep.mubr.bf16.mxu0 %v1778_v32 }
 0x2c8   :  { %3746 = vmatpush3.bf16.msra.mxu0 %v6400_v19  ;;  %3815 = vset.pattern.permute.xlu0 %v7603_v30  ;;  %v1793_v19 = vpop.trf.xlu1 }
 0x2c9   :  { %3747 = vmatprep.subr.bf16.mxu0 %v6406_v8 }
 0x2ca   :  { %v1779_v18 = vpop.trf.xlu0 }
 0x2cb   :  { %3716 = vmatmul.mubr.bf16.gmra.mrb[36].mxu0 %v1779_v18 }
 0x2cc   :  { %3748 = vmatpush3.bf16.msra.mxu0 %v6406_v8  ;;  %v1794_v10 = vpop.trf.xlu1 }
 0x2cd   :  { %3749 = vmatprep.subr.bf16.mxu0 %v6411_v52 }
 0x2ce   :  { %v1780_v13 = vpop.trf.xlu0 }
 0x2cf   :  { %3719 = vmatprep.mubr.bf16.mxu0 %v1780_v13 }
 0x2d0   :  { %3750 = vmatpush3.bf16.msra.mxu0 %v6411_v52  ;;  %v1795_v55 = vpop.trf.xlu1 }
 0x2d1   :  { %3751 = vmatprep.subr.bf16.mxu0 %v2686_v60 }
 0x2d2   :  { %v1781_v44 = vpop.trf.xlu0 }
 0x2d3   :  { %3720 = vmatmul.mubr.bf16.gmra.mrb[40].mxu0 %v1781_v44 }
 0x2d4   :  { %3752 = vmatpush3.bf16.msra.mxu0 %v2686_v60  ;;  %v1796_v8 = vpop.trf.xlu1 }
 0x2d6   :  { %v1782_v30 = vpop.trf.xlu0 }
 0x2d7   :  { %3723 = vmatprep.mubr.bf16.mxu0 %v1782_v30 }
 0x2d8   :  { %v1797_v45 = vpop.trf.xlu1 }
 0x2da   :  { %v1783_v23 = vpop.trf.xlu0 }
 0x2db   :  { %3724 = vmatmul.mubr.bf16.gmra.mrb[44].mxu0 %v1783_v23 }
 0x2dc   :  { %3727 = vmatprep.mubr.bf16.mxu0 %v1792_v11  ;;  %v1798_v52 = vpop.trf.xlu1 }
 0x2e0   :  { %v1799_v46 = vpop.trf.xlu1 }
 0x2e3   :  { %3728 = vmatmul.mubr.bf16.gmra.mrb[48].mxu0 %v1793_v19 }
 0x2e4   :  { %3731 = vmatprep.mubr.bf16.mxu0 %v1794_v10  ;;  %v2669_v11 = vpop.trf.xlu1 }
 0x2e8   :  { %v2670_v30 = vpop.trf.xlu1 }
 0x2eb   :  { %3732 = vmatmul.mubr.bf16.gmra.mrb[52].mxu0 %v1795_v55 }
 0x2ec   :  { %3735 = vmatprep.mubr.bf16.mxu0 %v1796_v8  ;;  %v2671_v10 = vpop.trf.xlu1 }
 0x2ef   :  { %v2688_v5 = vpop.permute.xlu0 %2687 }
 0x2f0   :  { %3753 = vmatprep.subr.bf16.mxu0 %v2688_v5  ;;  %v2672_v8 = vpop.trf.xlu1 }
 0x2f1   :  { %3754 = vmatpush3.bf16.msra.mxu0 %v2688_v5 }
 0x2f3   :  { %3736 = vmatmul.mubr.bf16.gmra.mrb[56].mxu0 %v1797_v45  ;;  %v2690_v2 = vpop.permute.xlu0 %2689 }
 0x2f4   :  { %3755 = vmatprep.subr.bf16.mxu0 %v2690_v2  ;;  %3739 = vmatprep.mubr.bf16.mxu0 %v1798_v52  ;;  %v2673_v45 = vpop.trf.xlu1 }
 0x2f5   :  { %3756 = vmatpush3.bf16.msra.mxu0 %v2690_v2 }
 0x2f7   :  { %v2692_v56 = vpop.permute.xlu0 %2691 }
 0x2f8   :  { %3757 = vmatprep.subr.bf16.mxu0 %v2692_v56  ;;  %v2674_v5 = vpop.trf.xlu1 }
 0x2f9   :  { %3758 = vmatpush3.bf16.msra.mxu0 %v2692_v56 }
 0x2fb   :  { %3740 = vmatmul.mubr.bf16.gmra.mrb[60].mxu0 %v1799_v46 }
 0x2fc   :  { %v2675_v52 = vpop.trf.xlu1 }
 0x300   :  { %v2676_v2 = vpop.trf.xlu1 }
 0x309   :  { %v2653_v32 = vpop.trf.xlu0 }
 0x30a   :  { %3759 = vmatprep.mubr.bf16.mxu0 %v2653_v32 }
 0x30d   :  { %v2654_v18 = vpop.trf.xlu0 }
 0x30e   :  { %3760 = vmatmul.mubr.bf16.vlgmr.msra.gmra.mrb[64].mxu0 %v2654_v18 }
 0x311   :  { %v2655_v60 = vpop.trf.xlu0 }
 0x312   :  { %3763 = vmatprep.mubr.bf16.mxu0 %v2655_v60 }
 0x315   :  { %v2656_v13 = vpop.trf.xlu0 }
 0x316   :  { %3764 = vmatmul.mubr.bf16.gmra.mrb[68].mxu0 %v2656_v13 }
 0x319   :  { %v2657_v44 = vpop.trf.xlu0 }
 0x31a   :  { %3767 = vmatprep.mubr.bf16.mxu0 %v2657_v44 }
 0x31d   :  { %v2658_v19 = vpop.trf.xlu0 }
 0x31e   :  { %3768 = vmatmul.mubr.bf16.gmra.mrb[72].mxu0 %v2658_v19 }
 0x321   :  { %v2659_v23 = vpop.trf.xlu0 }
 0x322   :  { %3771 = vmatprep.mubr.bf16.mxu0 %v2659_v23 }
 0x325   :  { %v2660_v55 = vpop.trf.xlu0 }
 0x326   :  { %3772 = vmatmul.mubr.bf16.gmra.mrb[76].mxu0 %v2660_v55  ;;  %v7604_v55 = vld [vmem:[#allocation19_spill] sm:$0xff] }
 0x327   :  { %3775 = vmatprep.mubr.bf16.mxu0 %v2669_v11 }
 0x32e   :  { %3776 = vmatmul.mubr.bf16.gmra.mrb[80].mxu0 %v2670_v30  ;;  %v7608_v30 = vld [vmem:[#allocation20_spill] sm:$0xff] }
 0x32f   :  { %3779 = vmatprep.mubr.bf16.mxu0 %v2671_v10 }
 0x336   :  { %3780 = vmatmul.mubr.bf16.gmra.mrb[84].mxu0 %v2672_v8  ;;  %v7605_v8 = vld [vmem:[#allocation21_spill] sm:$0xff] }
 0x337   :  { %3783 = vmatprep.mubr.bf16.mxu0 %v2673_v45  ;;  %v360_v45 = vadd.f32 %v7605_v8, %v7604_v55  ;;  %v7610_v55 = vld [vmem:[#allocation27_spill] sm:$0xff]  ;;  %v7611_v8 = vld [vmem:[#allocation28_spill] sm:$0xff] }
 0x339   :  { %361 = vadd.xlane.f32.xlu1 %v360_v45  ;;  %v369_v45 = vadd.f32 %v7611_v8, %v7610_v55  ;;  %v7616_v55 = vld [vmem:[#allocation38_spill] sm:$0xff]  ;;  %v7617_v8 = vld [vmem:[#allocation39_spill] sm:$0xff] }
 0x33a   :  { %v378_v40 = vadd.f32 %v7617_v8, %v7616_v55  ;;  %v7625_v55 = vld [vmem:[#allocation55_spill] sm:$0xff] }
 0x33e   :  { %3784 = vmatmul.mubr.bf16.gmra.mrb[88].mxu0 %v2674_v5 }
 0x33f   :  { %3787 = vmatprep.mubr.bf16.mxu0 %v2675_v52 }
 0x346   :  { %3788 = vmatmul.mubr.bf16.gmra.mrb[92].mxu0 %v2676_v2 }
 0x353   :  { %v3665_v56 = vpop.f32.mrb[0].mxu0 }
 0x354   :  { %v1045_v46 = vpop.f32.mrb[1].mxu0 }
 0x355   :  { %v3666_v32 = vpop.f32.mrb[2].mxu0 }
 0x356   :  { %v1173_v18 = vpack.c.bf16 %v3666_v32, %v3665_v56  ;;  %v1048_v60 = vpop.f32.mrb[3].mxu0  ;;  %v7606_v32 = vld [vmem:[#allocation25_spill] sm:$0xff] }
 0x357   :  { %v1172_v13 = vpack.c.bf16 %v1048_v60, %v1045_v46  ;;  %v7607_v60 = vld [vmem:[#allocation26_spill] sm:$0xff] }
 0x358   :  { %v366_v58 = vadd.f32 %v7607_v60, %v7606_v32 }
 0x35a   :  { %367 = vadd.xlane.f32.xlu1 %v366_v58  ;;  %v7615_v58 = vld [vmem:[#allocation35_spill] sm:$0xff] }
 0x35b   :  { %v6430_v44 = vpop.f32.mrb[4].mxu0 }
 0x35c   :  { %v1061_v11 = vpop.f32.mrb[5].mxu0 }
 0x35d   :  { %v6432_v19 = vpop.f32.mrb[6].mxu0 }
 0x35e   :  { %v1064_v23 = vpop.f32.mrb[7].mxu0  ;;  %370 = vadd.xlane.f32.xlu1 %v369_v45 }
 0x35f   :  { %v1174_v10 = vpack.c.bf16 %v1064_v23, %v1061_v11  ;;  %v363_v11 = vadd.f32 %v7609_v53, %v7608_v30  ;;  %v7613_v53 = vld [vmem:[#allocation32_spill] sm:$0xff] }
 0x360   :  { %v372_v30 = vadd.f32 %v7613_v53, %v7612_v39  ;;  %v7620_v39 = vld [vmem:[#allocation46_spill] sm:$0xff]  ;;  %v7621_v53 = vld [vmem:[#allocation47_spill] sm:$0xff] }
 0x361   :  { %364 = vadd.xlane.f32.xlu0 %v363_v11 }
 0x362   :  { %373 = vadd.xlane.f32.xlu1 %v372_v30 }
 0x363   :  { %v6438_v5 = vpop.f32.mrb[8].mxu0 }
 0x364   :  { %v6440_v52 = vpop.f32.mrb[9].mxu0 }
 0x365   :  { %v6442_v2 = vpop.f32.mrb[10].mxu0 }
 0x366   :  { %v1080_v46 = vpop.f32.mrb[11].mxu0  ;;  %379 = vadd.xlane.f32.xlu1 %v378_v40 }
 0x367   :  { %v1176_v23 = vpack.c.bf16 %v1080_v46, %v6440_v52  ;;  %v7614_v52 = vld [vmem:[#allocation34_spill] sm:$0xff] }
 0x368   :  { %v375_v46 = vadd.f32 %v7615_v58, %v7614_v52  ;;  %v384_v52 = vadd.f32 %v7621_v53, %v7620_v39  ;;  %v7622_v58 = vld [vmem:[#allocation50_spill] sm:$0xff] }
 0x36a   :  { %376 = vadd.xlane.f32.xlu0 %v375_v46  ;;  %385 = vadd.xlane.f32.xlu1 %v384_v52  ;;  %v7624_v46 = vld [vmem:[#allocation54_spill] sm:$0xff] }
 0x36b   :  { %v6453_v49 = vpop.f32.mrb[12].mxu0  ;;  %v390_v8 = vadd.f32 %v7625_v55, %v7624_v46 }
 0x36c   :  { %v6455_v57 = vpop.f32.mrb[13].mxu0 }
 0x36d   :  { %v6457_v56 = vpop.f32.mrb[14].mxu0 }
 0x36e   :  { %v1179_v32 = vpack.c.bf16 %v6457_v56, %v6453_v49  ;;  %v1096_v60 = vpop.f32.mrb[15].mxu0  ;;  %v381_v49 = vadd.f32 %v7619_v62, %v7618_v20  ;;  %391 = vadd.xlane.f32.xlu1 %v390_v8  ;;  %v7626_v20 = vld [vmem:[#allocation58_spill] sm:$0xff] }
 0x36f   :  { %v1178_v11 = vpack.c.bf16 %v1096_v60, %v6455_v57  ;;  %v7623_v57 = vld [vmem:[#allocation51_spill] sm:$0xff] }
 0x370   :  { %382 = vadd.xlane.f32.xlu0 %v381_v49  ;;  %v387_v60 = vadd.f32 %v7623_v57, %v7622_v58  ;;  %v7630_v58 = vld [vmem:[#allocation66_spill] sm:$0xff]  ;;  %v7631_v57 = vld [vmem:[#allocation67_spill] sm:$0xff] }
 0x373   :  { %v3681_v45 = vpop.f32.mrb[16].mxu0 }
 0x374   :  { %v1109_v35 = vpop.f32.mrb[17].mxu0  ;;  %388 = vadd.xlane.f32.xlu0 %v387_v60 }
 0x375   :  { %v3682_v56 = vpop.f32.mrb[18].mxu0 }
 0x376   :  { %v1181_v21 = vpack.c.bf16 %v3682_v56, %v3681_v45  ;;  %v1112_v24 = vpop.f32.mrb[19].mxu0  ;;  %v7627_v45 = vld [vmem:[#allocation59_spill] sm:$0xff] }
 0x377   :  { %v1180_v30 = vpack.c.bf16 %v1112_v24, %v1109_v35  ;;  %v393_v49 = vadd.f32 %v7627_v45, %v7626_v20  ;;  %v7628_v24 = vld [vmem:[#allocation62_spill] sm:$0xff]  ;;  %v7629_v35 = vld [vmem:[#allocation63_spill] sm:$0xff] }
 0x378   :  { %v396_v52 = vadd.f32 %v7629_v35, %v7628_v24 }
 0x379   :  { %3407 = vmatprep.subr.bf16.mxu1 %v1180_v30  ;;  %394 = vadd.xlane.f32.xlu0 %v393_v49  ;;  %v399_v30 = vadd.f32 %v7631_v57, %v7630_v58 }
 0x37a   :  { %3408 = vmatpush3.bf16.msra.mxu1 %v1172_v13  ;;  %397 = vadd.xlane.f32.xlu1 %v396_v52 }
 0x37b   :  { %v3685_v40 = vpop.f32.mrb[20].mxu0  ;;  %3409 = vmatprep.subr.bf16.mxu1 %v1181_v21 }
 0x37c   :  { %v1125_v62 = vpop.f32.mrb[21].mxu0 }
 0x37d   :  { %v3686_v56 = vpop.f32.mrb[22].mxu0  ;;  %400 = vadd.xlane.f32.xlu0 %v399_v30 }
 0x37e   :  { %v1183_v39 = vpack.c.bf16 %v3686_v56, %v3685_v40  ;;  %v1128_v53 = vpop.f32.mrb[23].mxu0  ;;  %3410 = vmatpush3.bf16.msra.mxu1 %v1173_v18  ;;  %v7632_v18 = vpack.c.bf16 %v6432_v19, %v6430_v44  ;;  %v7633_v56 = vpack.c.bf16 %v6442_v2, %v6438_v5 }
 0x37f   :  { %v1182_v13 = vpack.c.bf16 %v1128_v53, %v1125_v62 }
 0x381   :  { %3411 = vmatprep.subr.bf16.mxu1 %v1182_v13 }
 0x382   :  { %3412 = vmatpush3.bf16.msra.mxu1 %v1174_v10 }
 0x383   :  { %v3689_v21 = vpop.f32.mrb[24].mxu0  ;;  %3413 = vmatprep.subr.bf16.mxu1 %v1183_v39 }
 0x384   :  { %v1141_v60 = vpop.f32.mrb[25].mxu0 }
 0x385   :  { %v3690_v46 = vpop.f32.mrb[26].mxu0 }
 0x386   :  { %v1185_v55 = vpack.c.bf16 %v3690_v46, %v3689_v21  ;;  %v1144_v8 = vpop.f32.mrb[27].mxu0  ;;  %3414 = vmatpush3.bf16.msra.mxu1 %v7632_v18 }
 0x387   :  { %v1184_v40 = vpack.c.bf16 %v1144_v8, %v1141_v60 }
 0x389   :  { %3415 = vmatprep.subr.bf16.mxu1 %v1184_v40 }
 0x38a   :  { %3416 = vmatpush3.bf16.msra.mxu1 %v1176_v23 }
 0x38b   :  { %v3693_v20 = vpop.f32.mrb[28].mxu0  ;;  %3417 = vmatprep.subr.bf16.mxu1 %v1185_v55 }
 0x38c   :  { %v1157_v62 = vpop.f32.mrb[29].mxu0 }
 0x38d   :  { %v3694_v45 = vpop.f32.mrb[30].mxu0 }
 0x38e   :  { %v1187_v49 = vpack.c.bf16 %v3694_v45, %v3693_v20  ;;  %v1160_v10 = vpop.f32.mrb[31].mxu0  ;;  %3418 = vmatpush3.bf16.msra.mxu1 %v7633_v56 }
 0x38f   :  { %v1186_v39 = vpack.c.bf16 %v1160_v10, %v1157_v62 }
 0x391   :  { %3419 = vmatprep.subr.bf16.mxu1 %v1186_v39 }
 0x392   :  { %3420 = vmatpush3.bf16.msra.mxu1 %v1178_v11 }
 0x393   :  { %3421 = vmatprep.subr.bf16.mxu1 %v1187_v49 }
 0x396   :  { %3422 = vmatpush3.bf16.msra.mxu1 %v1179_v32  ;;  %v3713_v44 = vpop.f32.mrb[32].mxu0 }
 0x397   :  { %v1858_v19 = vpop.f32.mrb[33].mxu0 }
 0x398   :  { %v3714_v53 = vpop.f32.mrb[34].mxu0 }
 0x399   :  { %1221 = vmatmul.mubr.bf16.vlgmr.msra.gmra.mrb[0].mxu1 %v6338_v7  ;;  %v1986_v23 = vpack.c.bf16 %v3714_v53, %v3713_v44  ;;  %v1861_v24 = vpop.f32.mrb[35].mxu0 }
 0x39a   :  { %1228 = vmatprep.mubr.bf16.mxu1 %v6299_v54  ;;  %v1985_v35 = vpack.c.bf16 %v1861_v24, %v1858_v19 }
 0x39e   :  { %v3717_v52 = vpop.f32.mrb[36].mxu0 }
 0x39f   :  { %v1874_v58 = vpop.f32.mrb[37].mxu0 }
 0x3a0   :  { %v3718_v57 = vpop.f32.mrb[38].mxu0 }
 0x3a1   :  { %1229 = vmatmul.mubr.bf16.gmra.mrb[4].mxu1 %v6340_v1  ;;  %v1988_v5 = vpack.c.bf16 %v3718_v57, %v3717_v52  ;;  %v1877_v2 = vpop.f32.mrb[39].mxu0 }
 0x3a2   :  { %1236 = vmatprep.mubr.bf16.mxu1 %v6301_v61  ;;  %v1987_v32 = vpack.c.bf16 %v1877_v2, %v1874_v58 }
 0x3a6   :  { %v3721_v11 = vpop.f32.mrb[40].mxu0 }
 0x3a7   :  { %v1890_v30 = vpop.f32.mrb[41].mxu0 }
 0x3a8   :  { %v3722_v13 = vpop.f32.mrb[42].mxu0 }
 0x3a9   :  { %1237 = vmatmul.mubr.bf16.gmra.mrb[8].mxu1 %v6344_v26  ;;  %v1990_v7 = vpack.c.bf16 %v3722_v13, %v3721_v11  ;;  %v1893_v21 = vpop.f32.mrb[43].mxu0  ;;  %v7634_v11 = vmov 0.0  }
 0x3aa   :  { %1244 = vmatprep.mubr.bf16.mxu1 %v6305_v9  ;;  %v1989_v54 = vpack.c.bf16 %v1893_v21, %v1890_v30  ;;  %93 = vst.msk [vmem:[#allocation2] sm:$0xff] %vm92_vm11, %v7634_v11  ;;  %94 = vst.msk [vmem:[#allocation2 + $0x8] sm:$0xff] %vm92_vm11, %v7634_v11 }
 0x3ab   :  { %95 = vst.msk [vmem:[#allocation2 + $0x10] sm:$0xff] %vm92_vm11, %v7634_v11  ;;  %96 = vst.msk [vmem:[#allocation2 + $0x18] sm:$0xff] %vm92_vm11, %v7634_v11 }
 0x3ac   :  { %97 = vst.msk [vmem:[#allocation2 + $0x20] sm:$0xff] %vm92_vm11, %v7634_v11  ;;  %98 = vst.msk [vmem:[#allocation2 + $0x28] sm:$0xff] %vm92_vm11, %v7634_v11 }
 0x3ad   :  { %99 = vst.msk [vmem:[#allocation2 + $0x30] sm:$0xff] %vm92_vm11, %v7634_v11  ;;  %100 = vst.msk [vmem:[#allocation2 + $0x38] sm:$0xff] %vm92_vm11, %v7634_v11 }
 0x3ae   :  { %v3725_v60 = vpop.f32.mrb[44].mxu0  ;;  %101 = vst.msk [vmem:[#allocation2 + $0x40] sm:$0xff] %vm92_vm11, %v7634_v11  ;;  %102 = vst.msk [vmem:[#allocation2 + $0x48] sm:$0xff] %vm92_vm11, %v7634_v11 }
 0x3af   :  { %v1906_v46 = vpop.f32.mrb[45].mxu0  ;;  %103 = vst.msk [vmem:[#allocation2 + $0x50] sm:$0xff] %vm92_vm11, %v7634_v11  ;;  %104 = vst.msk [vmem:[#allocation2 + $0x58] sm:$0xff] %vm92_vm11, %v7634_v11 }
 0x3b0   :  { %v3726_v55 = vpop.f32.mrb[46].mxu0  ;;  %105 = vst.msk [vmem:[#allocation2 + $0x60] sm:$0xff] %vm92_vm11, %v7634_v11  ;;  %106 = vst.msk [vmem:[#allocation2 + $0x68] sm:$0xff] %vm92_vm11, %v7634_v11 }
 0x3b1   :  { %1245 = vmatmul.mubr.bf16.gmra.mrb[12].mxu1 %v6346_v25  ;;  %v1992_v1 = vpack.c.bf16 %v3726_v55, %v3725_v60  ;;  %v1909_v8 = vpop.f32.mrb[47].mxu0  ;;  %107 = vst.msk [vmem:[#allocation2 + $0x70] sm:$0xff] %vm92_vm11, %v7634_v11  ;;  %108 = vst.msk [vmem:[#allocation2 + $0x78] sm:$0xff] %vm92_vm11, %v7634_v11 }
 0x3b2   :  { %1252 = vmatprep.mubr.bf16.mxu1 %v6309_v3  ;;  %v1991_v61 = vpack.c.bf16 %v1909_v8, %v1906_v46  ;;  %110 = vst.msk [vmem:[#allocation3] sm:$0xff] %vm109_vm8, %v7634_v11  ;;  %111 = vst.msk [vmem:[#allocation3 + $0x8] sm:$0xff] %vm109_vm8, %v7634_v11 }
 0x3b3   :  { %112 = vst.msk [vmem:[#allocation3 + $0x10] sm:$0xff] %vm109_vm8, %v7634_v11  ;;  %113 = vst.msk [vmem:[#allocation3 + $0x18] sm:$0xff] %vm109_vm8, %v7634_v11 }
 0x3b4   :  { %114 = vst.msk [vmem:[#allocation3 + $0x20] sm:$0xff] %vm109_vm8, %v7634_v11  ;;  %115 = vst.msk [vmem:[#allocation3 + $0x28] sm:$0xff] %vm109_vm8, %v7634_v11 }
 0x3b5   :  { %116 = vst.msk [vmem:[#allocation3 + $0x30] sm:$0xff] %vm109_vm8, %v7634_v11  ;;  %117 = vst.msk [vmem:[#allocation3 + $0x38] sm:$0xff] %vm109_vm8, %v7634_v11 }
 0x3b6   :  { %v3729_v18 = vpop.f32.mrb[48].mxu0  ;;  %118 = vst.msk [vmem:[#allocation3 + $0x40] sm:$0xff] %vm109_vm8, %v7634_v11  ;;  %119 = vst.msk [vmem:[#allocation3 + $0x48] sm:$0xff] %vm109_vm8, %v7634_v11 }
 0x3b7   :  { %v1922_v40 = vpop.f32.mrb[49].mxu0  ;;  %120 = vst.msk [vmem:[#allocation3 + $0x50] sm:$0xff] %vm109_vm8, %v7634_v11  ;;  %121 = vst.msk [vmem:[#allocation3 + $0x58] sm:$0xff] %vm109_vm8, %v7634_v11 }
 0x3b8   :  { %v3730_v20 = vpop.f32.mrb[50].mxu0  ;;  %122 = vst.msk [vmem:[#allocation3 + $0x60] sm:$0xff] %vm109_vm8, %v7634_v11  ;;  %123 = vst.msk [vmem:[#allocation3 + $0x68] sm:$0xff] %vm109_vm8, %v7634_v11 }
 0x3b9   :  { %v1994_v62 = vpack.c.bf16 %v3730_v20, %v3729_v18  ;;  %1253 = vmatmul.mubr.bf16.gmra.mrb[16].mxu1 %v6351_v0  ;;  %v1925_v26 = vpop.f32.mrb[51].mxu0  ;;  %124 = vst.msk [vmem:[#allocation3 + $0x70] sm:$0xff] %vm109_vm8, %v7634_v11  ;;  %125 = vst.msk [vmem:[#allocation3 + $0x78] sm:$0xff] %vm109_vm8, %v7634_v11  ;;  %v7635_v18 = vld [vmem:[#allocation75_spill] sm:$0xff] }
 0x3ba   :  { %v1993_v45 = vpack.c.bf16 %v1925_v26, %v1922_v40  ;;  %1260 = vmatprep.mubr.bf16.mxu1 %v6314_v4  ;;  %v346_v8 = vld [vmem:[#allocation3 + $0x10] sm:$0xff]  ;;  %v7636_v40 = vld [vmem:[#allocation76_spill] sm:$0xff] }
 0x3bb   :  { %v405_v20 = vadd.f32 %v7636_v40, %v7635_v18 }
 0x3bc   :  { %3495 = vmatprep.subr.bf16.mxu1 %v1993_v45 }
 0x3bd   :  { %3496 = vmatpush3.bf16.msra.mxu1 %v1985_v35  ;;  %406 = vadd.xlane.f32.xlu0 %v405_v20 }
 0x3be   :  { %v3733_v9 = vpop.f32.mrb[52].mxu0  ;;  %3497 = vmatprep.subr.bf16.mxu1 %v1994_v62 }
 0x3bf   :  { %v1938_v25 = vpop.f32.mrb[53].mxu0 }
 0x3c0   :  { %v3734_v49 = vpop.f32.mrb[54].mxu0 }
 0x3c1   :  { %v1996_v10 = vpack.c.bf16 %v3734_v49, %v3733_v9  ;;  %1261 = vmatmul.mubr.bf16.gmra.mrb[20].mxu1 %v6356_v59  ;;  %v1941_v3 = vpop.f32.mrb[55].mxu0 }
 0x3c2   :  { %v1995_v56 = vpack.c.bf16 %v1941_v3, %v1938_v25  ;;  %3498 = vmatpush3.bf16.msra.mxu1 %v1986_v23  ;;  %1268 = vmatprep.mubr.bf16.mxu1 %v6320_v34  ;;  %v347_v25 = vld [vmem:[#allocation3 + $0x18] sm:$0xff] }
 0x3c3   :  { %v7637_v3 = vld [vmem:[#allocation70_spill] sm:$0xff] }
 0x3c4   :  { %3499 = vmatprep.subr.bf16.mxu1 %v1995_v56  ;;  %v7638_v56 = vld [vmem:[#allocation72_spill] sm:$0xff] }
 0x3c6   :  { %3500 = vmatpush3.bf16.msra.mxu1 %v1987_v32  ;;  %v3737_v0 = vpop.f32.mrb[56].mxu0  ;;  %v362_v30 = vpop.xlane.xlu1 %361 }
 0x3c7   :  { %v1954_v39 = vpop.f32.mrb[57].mxu0  ;;  %3501 = vmatprep.subr.bf16.mxu1 %v1996_v10 }
 0x3c8   :  { %v3738_v4 = vpop.f32.mrb[58].mxu0 }
 0x3c9   :  { %v1998_v44 = vpack.c.bf16 %v3738_v4, %v3737_v0  ;;  %1269 = vmatmul.mubr.bf16.gmra.mrb[24].mxu1 %v6360_v41  ;;  %v1957_v19 = vpop.f32.mrb[59].mxu0  ;;  %v402_v0 = vadd.f32 %v7638_v56, %v7637_v3 }
 0x3ca   :  { %v1997_v53 = vpack.c.bf16 %v1957_v19, %v1954_v39  ;;  %3502 = vmatpush3.bf16.msra.mxu1 %v1988_v5  ;;  %1276 = vmatprep.mubr.bf16.mxu1 %v6322_v47  ;;  %v348_v39 = vld [vmem:[#allocation3 + $0x20] sm:$0xff] }
 0x3cb   :  { %403 = vadd.xlane.f32.xlu1 %v402_v0 }
 0x3cc   :  { %3503 = vmatprep.subr.bf16.mxu1 %v1997_v53 }
 0x3ce   :  { %3504 = vmatpush3.bf16.msra.mxu1 %v1989_v54  ;;  %v3741_v59 = vpop.f32.mrb[60].mxu0 }
 0x3cf   :  { %v1970_v23 = vpop.f32.mrb[61].mxu0  ;;  %3505 = vmatprep.subr.bf16.mxu1 %v1998_v44 }
 0x3d0   :  { %v3742_v34 = vpop.f32.mrb[62].mxu0 }
 0x3d1   :  { %v2000_v24 = vpack.c.bf16 %v3742_v34, %v3741_v59  ;;  %1277 = vmatmul.mubr.bf16.gmra.mrb[28].mxu1 %v6362_v36  ;;  %v1973_v35 = vpop.f32.mrb[63].mxu0  ;;  %v350_v34 = vld [vmem:[#allocation3 + $0x30] sm:$0xff] }
 0x3d2   :  { %v1999_v52 = vpack.c.bf16 %v1973_v35, %v1970_v23  ;;  %3506 = vmatpush3.bf16.msra.mxu1 %v1990_v7  ;;  %2033 = vmatprep.mubr.bf16.mxu1 %v7586_v51  ;;  %v349_v23 = vld [vmem:[#allocation3 + $0x28] sm:$0xff] }
 0x3d4   :  { %3507 = vmatprep.subr.bf16.mxu1 %v1999_v52 }
 0x3d6   :  { %3508 = vmatpush3.bf16.msra.mxu1 %v1991_v61  ;;  %v345_v61 = vld [vmem:[#allocation3 + $0x8] sm:$0xff] }
 0x3d7   :  { %3509 = vmatprep.subr.bf16.mxu1 %v2000_v24 }
 0x3da   :  { %3510 = vmatpush3.bf16.msra.mxu1 %v1992_v1  ;;  %v344_v1 = vld [vmem:[#allocation3] sm:$0xff] }
 0x3dd   :  { %2034 = vmatmul.mubr.bf16.vlgmr.msra.gmra.mrb[32].mxu1 %v7592_v27 }
 0x3de   :  { %2041 = vmatprep.mubr.bf16.mxu1 %v7587_v33 }
 0x3e1   :  { %v6506_v47 = vpop.f32.mrb[64].mxu0 }
 0x3e2   :  { %v6508_v41 = vpop.f32.mrb[65].mxu0 }
 0x3e3   :  { %v6510_v58 = vpop.f32.mrb[66].mxu0 }
 0x3e4   :  { %v2863_v36 = vpack.c.bf16 %v6510_v58, %v6506_v47  ;;  %v6514_v57 = vpop.f32.mrb[67].mxu0 }
 0x3e5   :  { %2042 = vmatmul.mubr.bf16.gmra.mrb[36].mxu1 %v7594_v28  ;;  %v2862_v51 = vpack.c.bf16 %v6514_v57, %v6508_v41  ;;  %v355_v57 = vld [vmem:[#allocation3 + $0x58] sm:$0xff] }
 0x3e6   :  { %2049 = vmatprep.mubr.bf16.mxu1 %v7588_v63 }
 0x3e7   :  { %v368_v54 = vpop.xlane.xlu1 %367 }
 0x3e8   :  { %v410_v45 = vadd.f32 %v368_v54, %v346_v8 }
 0x3e9   :  { %v6520_v27 = vpop.f32.mrb[68].mxu0 }
 0x3ea   :  { %v6522_v33 = vpop.f32.mrb[69].mxu0  ;;  %427 = vst.msk [vmem:[#allocation3 + $0x10] sm:$0xff] %vm109_vm8, %v410_v45 }
 0x3eb   :  { %v6524_v5 = vpop.f32.mrb[70].mxu0  ;;  %v371_v62 = vpop.xlane.xlu1 %370 }
 0x3ec   :  { %v2865_v2 = vpack.c.bf16 %v6524_v5, %v6520_v27  ;;  %v6528_v32 = vpop.f32.mrb[71].mxu0  ;;  %v411_v10 = vadd.f32 %v371_v62, %v347_v25 }
 0x3ed   :  { %2050 = vmatmul.mubr.bf16.gmra.mrb[40].mxu1 %v7596_v43  ;;  %v2864_v28 = vpack.c.bf16 %v6528_v32, %v6522_v33 }
 0x3ee   :  { %2057 = vmatprep.mubr.bf16.mxu1 %v7589_v38  ;;  %v365_v60 = vpop.xlane.xlu0 %364  ;;  %428 = vst.msk [vmem:[#allocation3 + $0x18] sm:$0xff] %vm109_vm8, %v411_v10 }
 0x3ef   :  { %v409_v9 = vadd.f32 %v365_v60, %v345_v61  ;;  %v374_v44 = vpop.xlane.xlu1 %373  ;;  %v351_v60 = vld [vmem:[#allocation3 + $0x38] sm:$0xff] }
 0x3f0   :  { %v412_v19 = vadd.f32 %v374_v44, %v348_v39  ;;  %v356_v39 = vld [vmem:[#allocation3 + $0x60] sm:$0xff] }
 0x3f1   :  { %v6566_v63 = vpop.f32.mrb[72].mxu0  ;;  %426 = vst.msk [vmem:[#allocation3 + $0x8] sm:$0xff] %vm109_vm8, %v409_v9 }
 0x3f2   :  { %v6568_v43 = vpop.f32.mrb[73].mxu0  ;;  %429 = vst.msk [vmem:[#allocation3 + $0x20] sm:$0xff] %vm109_vm8, %v412_v19  ;;  %v3093_v19 = vld [vmem:[#allocation3 + $0x10] sm:$0xff] }
 0x3f3   :  { %v6570_v13 = vpop.f32.mrb[74].mxu0  ;;  %v380_v52 = vpop.xlane.xlu1 %379  ;;  %vm3109_vm4 = vcmp.gt.f32.partialorder %v3093_v19, 0.0 }
 0x3f4   :  { %v2867_v38 = vpack.c.bf16 %v6570_v13, %v6566_v63  ;;  %v6606_v7 = vpop.f32.mrb[75].mxu0  ;;  %v414_v54 = vadd.f32 %v380_v52, %v350_v34 }
 0x3f5   :  { %2058 = vmatmul.mubr.bf16.gmra.mrb[44].mxu1 %v7597_v48  ;;  %v2866_v21 = vpack.c.bf16 %v6606_v7, %v6568_v43  ;;  %v408_v48 = vadd.f32 %v362_v30, %v344_v1  ;;  %v352_v1 = vld [vmem:[#allocation3 + $0x40] sm:$0xff] }
 0x3f6   :  { %2065 = vmatprep.mubr.bf16.mxu1 %v7590_v37  ;;  %431 = vst.msk [vmem:[#allocation3 + $0x30] sm:$0xff] %vm109_vm8, %v414_v54 }
 0x3f7   :  { %425 = vst.msk [vmem:[#allocation3] sm:$0xff] %vm109_vm8, %v408_v48  ;;  %v377_v59 = vpop.xlane.xlu0 %376  ;;  %v386_v18 = vpop.xlane.xlu1 %385  ;;  %v354_v48 = vld [vmem:[#allocation3 + $0x50] sm:$0xff] }
 0x3f8   :  { %v413_v35 = vadd.f32 %v377_v59, %v349_v23  ;;  %v416_v40 = vadd.f32 %v386_v18, %v352_v1  ;;  %v3092_v10 = vld [vmem:[#allocation3 + $0x8] sm:$0xff] }
 0x3f9   :  { %v6612_v46 = vpop.f32.mrb[76].mxu0  ;;  %4033 = vrcp.f32 %v3092_v10  ;;  %v357_v59 = vld [vmem:[#allocation3 + $0x68] sm:$0xff]  ;;  %v3095_v23 = vld [vmem:[#allocation3 + $0x20] sm:$0xff]  ;;  %vm3108_vm14 = vcmp.gt.f32.partialorder %v3092_v10, 0.0 }
 0x3fa   :  { %v6614_v55 = vpop.f32.mrb[77].mxu0  ;;  %430 = vst.msk [vmem:[#allocation3 + $0x28] sm:$0xff] %vm109_vm8, %v413_v35  ;;  %433 = vst.msk [vmem:[#allocation3 + $0x40] sm:$0xff] %vm109_vm8, %v416_v40  ;;  %vm3111_vm9 = vcmp.gt.f32.partialorder %v3095_v23, 0.0 }
 0x3fb   :  { %v6618_v26 = vpop.f32.mrb[78].mxu0  ;;  %v392_v25 = vpop.xlane.xlu1 %391 }
 0x3fc   :  { %v2869_v37 = vpack.c.bf16 %v6618_v26, %v6612_v46  ;;  %v6622_v49 = vpop.f32.mrb[79].mxu0  ;;  %v418_v41 = vadd.f32 %v392_v25, %v354_v48 }
 0x3fd   :  { %2066 = vmatmul.mubr.bf16.gmra.mrb[48].mxu1 %v7598_v42  ;;  %v2868_v4 = vpack.c.bf16 %v6622_v49, %v6614_v55  ;;  %v383_v8 = vpop.xlane.xlu0 %382 }
 0x3fe   :  { %2073 = vmatprep.mubr.bf16.mxu1 %v7591_v12  ;;  %v415_v61 = vadd.f32 %v383_v8, %v351_v60  ;;  %435 = vst.msk [vmem:[#allocation3 + $0x50] sm:$0xff] %vm109_vm8, %v418_v41 }
 0x400   :  { %432 = vst.msk [vmem:[#allocation3 + $0x38] sm:$0xff] %vm109_vm8, %v415_v61 }
 0x401   :  { %v3777_v53 = vpop.f32.mrb[80].mxu0  ;;  %v389_v62 = vpop.xlane.xlu0 %388  ;;  %v3096_v33 = vld [vmem:[#allocation3 + $0x28] sm:$0xff] }
 0x402   :  { %v2799_v42 = vpop.f32.mrb[81].mxu0  ;;  %vm3112_vm0 = vcmp.gt.f32.partialorder %v3096_v33, 0.0 }
 0x403   :  { %v3778_v24 = vpop.f32.mrb[82].mxu0 }
 0x404   :  { %v2871_v11 = vpack.c.bf16 %v3778_v24, %v3777_v53  ;;  %v2802_v30 = vpop.f32.mrb[83].mxu0 }
 0x405   :  { %2074 = vmatmul.mubr.bf16.gmra.mrb[52].mxu1 %v7599_v22  ;;  %v2870_v12 = vpack.c.bf16 %v2802_v30, %v2799_v42 }
 0x406   :  { %2081 = vmatprep.mubr.bf16.mxu1 %v7593_v6  ;;  %v353_v6 = vld [vmem:[#allocation3 + $0x48] sm:$0xff]  ;;  %v395_v44 = vpop.xlane.xlu0 %394 }
 0x407   :  { %3583 = vmatprep.subr.bf16.mxu1 %v2870_v12  ;;  %v417_v9 = vadd.f32 %v389_v62, %v353_v6  ;;  %v419_v47 = vadd.f32 %v395_v44, %v355_v57  ;;  %v398_v58 = vpop.xlane.xlu1 %397  ;;  %v3098_v27 = vld [vmem:[#allocation3 + $0x38] sm:$0xff]  ;;  %v3099_v12 = vld [vmem:[#allocation3 + $0x40] sm:$0xff] }
 0x408   :  { %3584 = vmatpush3.bf16.msra.mxu1 %v2862_v51  ;;  %v3091_v51 = vld [vmem:[#allocation3] sm:$0xff]  ;;  %vm3114_vm10 = vcmp.gt.f32.partialorder %v3098_v27, 0.0  ;;  %vm3115_vm12 = vcmp.gt.f32.partialorder %v3099_v12, 0.0 }
 0x409   :  { %v3781_v20 = vpop.f32.mrb[84].mxu0  ;;  %3585 = vmatprep.subr.bf16.mxu1 %v2871_v11  ;;  %434 = vst.msk [vmem:[#allocation3 + $0x48] sm:$0xff] %vm109_vm8, %v417_v9  ;;  %4035 = vrcp.f32 %v3091_v51  ;;  %436 = vst.msk [vmem:[#allocation3 + $0x58] sm:$0xff] %vm109_vm8, %v419_v47  ;;  %vm3107_vm7 = vcmp.gt.f32.partialorder %v3091_v51, 0.0  ;;  %v3097_v11 = vld [vmem:[#allocation3 + $0x30] sm:$0xff]  ;;  %v7640_v51 = vld [vmem:[#allocation111_spill] sm:$0xff] }
 0x40a   :  { %v2815_v22 = vpop.f32.mrb[85].mxu0  ;;  %4037 = vrcp.f32 %v3093_v19  ;;  %v401_v42 = vpop.xlane.xlu0 %400  ;;  %vm3113_vm5 = vcmp.gt.f32.partialorder %v3097_v11, 0.0  ;;  %v7643_v44 = vld [vmem:[#allocation91_spill] sm:$0xff]  ;;  %v7644_v19 = vld [vmem:[#allocation18_spill] sm:$0xff]  ;;  %v7645_v47 = vld [vmem:[#allocation97_spill] sm:$0xff] }
 0x40b   :  { %v3782_v45 = vpop.f32.mrb[86].mxu0  ;;  %v421_v24 = vadd.f32 %v401_v42, %v357_v59  ;;  %v1285_v59 = vld [vmem:[#allocation2] sm:$0xff] }
 0x40c   :  { %v2873_v3 = vpack.c.bf16 %v3782_v45, %v3781_v20  ;;  %v2818_v56 = vpop.f32.mrb[87].mxu0  ;;  %3586 = vmatpush3.bf16.msra.mxu1 %v2863_v36  ;;  %v3094_v36 = vld [vmem:[#allocation3 + $0x18] sm:$0xff] }
 0x40d   :  { %2082 = vmatmul.mubr.bf16.gmra.mrb[56].mxu1 %v7600_v50  ;;  %v2872_v0 = vpack.c.bf16 %v2818_v56, %v2815_v22  ;;  %v420_v50 = vadd.f32 %v398_v58, %v356_v39  ;;  %4039 = vrcp.f32 %v3094_v36  ;;  %438 = vst.msk [vmem:[#allocation3 + $0x68] sm:$0xff] %vm109_vm8, %v421_v24  ;;  %vm3110_vm6 = vcmp.gt.f32.partialorder %v3094_v36, 0.0  ;;  %v3101_v22 = vld [vmem:[#allocation3 + $0x50] sm:$0xff]  ;;  %v7642_v39 = vld [vmem:[#allocation115_spill] sm:$0xff]  ;;  %v7646_v58 = vld [vmem:[#allocation112_spill] sm:$0xff] }
 0x40e   :  { %2089 = vmatprep.mubr.bf16.mxu1 %v7595_v29  ;;  %4041 = vrcp.f32 %v3095_v23  ;;  %vm3117_vm15 = vcmp.gt.f32.partialorder %v3101_v22, 0.0  ;;  %v7649_v36 = vld [vmem:[#allocation117_spill] sm:$0xff] }
 0x40f   :  { %3587 = vmatprep.subr.bf16.mxu1 %v2872_v0  ;;  %437 = vst.msk [vmem:[#allocation3 + $0x60] sm:$0xff] %vm109_vm8, %v420_v50  ;;  %4043 = vrcp.f32 %v3096_v33  ;;  %v7641_v0 = vld [vmem:[#allocation60_spill] sm:$0xff] }
 0x410   :  { %3588 = vmatpush3.bf16.msra.mxu1 %v2864_v28  ;;  %v4034_v28 = vpop.eup %4033  ;;  %4045 = vrcp.f32 %v3097_v11  ;;  %v3100_v7 = vld [vmem:[#allocation3 + $0x48] sm:$0xff]  ;;  %v3102_v13 = vld [vmem:[#allocation3 + $0x58] sm:$0xff] }
 0x411   :  { %v3785_v53 = vpop.f32.mrb[88].mxu0  ;;  %3589 = vmatprep.subr.bf16.mxu1 %v2873_v3  ;;  %v3156_v54 = vsel %vm3108_vm14, %v4034_v28, 0.0  ;;  %4047 = vrcp.f32 %v3098_v27  ;;  %vm3116_vm13 = vcmp.gt.f32.partialorder %v3100_v7, 0.0  ;;  %vm3118_vm2 = vcmp.gt.f32.partialorder %v3102_v13, 0.0  ;;  %v7648_v50 = vld [vmem:[#allocation116_spill] sm:$0xff] }
 0x412   :  { %v2831_v29 = vpop.f32.mrb[89].mxu0  ;;  %3194 = vperm.xlu1 %3816, %v3156_v54   ;;  %4049 = vrcp.f32 %v3099_v12  ;;  %vm1317_vm14 = vcmask 130048  }
 0x413   :  { %v3786_v34 = vpop.f32.mrb[90].mxu0  ;;  %v4036_v30 = vpop.eup %4035  ;;  %4051 = vrcp.f32 %v3100_v7  ;;  %v1290_v7 = vld [vmem:[#allocation2 + $0x28] sm:$0xff] }
 0x414   :  { %v2875_v35 = vpack.c.bf16 %v3786_v34, %v3785_v53  ;;  %v2834_v52 = vpop.f32.mrb[91].mxu0  ;;  %3590 = vmatpush3.bf16.msra.mxu1 %v2865_v2  ;;  %v4038_v5 = vpop.eup %4037  ;;  %4053 = vrcp.f32 %v3101_v22  ;;  %v3104_v49 = vld [vmem:[#allocation3 + $0x68] sm:$0xff] }
 0x415   :  { %2090 = vmatmul.mubr.bf16.gmra.mrb[60].mxu1 %v7601_v16  ;;  %v2874_v32 = vpack.c.bf16 %v2834_v52, %v2831_v29  ;;  %v3155_v16 = vsel %vm3107_vm7, %v4036_v30, 0.0  ;;  %v3157_v60 = vsel %vm3109_vm4, %v4038_v5, 0.0  ;;  %4055 = vrcp.f32 %v3102_v13  ;;  %v7650_v53 = vld [vmem:[#allocation24_spill] sm:$0xff]  ;;  %v1287_v30 = vld [vmem:[#allocation2 + $0x10] sm:$0xff]  ;;  %v1288_v5 = vld [vmem:[#allocation2 + $0x18] sm:$0xff] }
 0x416   :  { %2910 = vmatprep.mubr.bf16.mxu1 %v6218_v15  ;;  %3189 = vperm.xlu0 %3815, %v3155_v16   ;;  %v3103_v48 = vld [vmem:[#allocation3 + $0x60] sm:$0xff]  ;;  %vm3120_vm1 = vcmp.gt.f32.partialorder %v3104_v49, 0.0 }
 0x417   :  { %3591 = vmatprep.subr.bf16.mxu1 %v2874_v32  ;;  %v4040_v1 = vpop.eup %4039  ;;  %3199 = vperm.xlu1 %3816, %v3157_v60   ;;  %4057 = vrcp.f32 %v3103_v48  ;;  %vm3119_vm3 = vcmp.gt.f32.partialorder %v3103_v48, 0.0  ;;  %v1292_v48 = vld [vmem:[#allocation2 + $0x38] sm:$0xff] }
 0x418   :  { %3592 = vmatpush3.bf16.msra.mxu1 %v2866_v21  ;;  %v3158_v43 = vsel %vm3110_vm6, %v4040_v1, 0.0  ;;  %v4042_v21 = vpop.eup %4041  ;;  %4059 = vrcp.f32 %v3104_v49  ;;  %vm3071_vm6 = vcmask 392448  }
 0x419   :  { %v3789_v2 = vpop.f32.mrb[92].mxu0  ;;  %3593 = vmatprep.subr.bf16.mxu1 %v2875_v35  ;;  %v3159_v20 = vsel %vm3111_vm9, %v4042_v21, 0.0  ;;  %v4044_v62 = vpop.eup %4043  ;;  %v1286_v35 = vld [vmem:[#allocation2 + $0x8] sm:$0xff] }
 0x41a   :  { %v2847_v15 = vpop.f32.mrb[93].mxu0  ;;  %3204 = vperm.xlu0 %3815, %v3158_v43   ;;  %v3160_v63 = vsel %vm3112_vm0, %v4044_v62, 0.0 }
 0x41b   :  { %v3790_v8 = vpop.f32.mrb[94].mxu0  ;;  %3209 = vperm.xlu1 %3816, %v3159_v20  }
 0x41c   :  { %v2877_v61 = vpack.c.bf16 %v3790_v8, %v3789_v2  ;;  %v2850_v18 = vpop.f32.mrb[95].mxu0  ;;  %3594 = vmatpush3.bf16.msra.mxu1 %v2867_v38  ;;  %v4046_v38 = vpop.eup %4045  ;;  %v1289_v8 = vld [vmem:[#allocation2 + $0x20] sm:$0xff] }
 0x41d   :  { %v2876_v40 = vpack.c.bf16 %v2850_v18, %v2847_v15  ;;  %v3161_v6 = vsel %vm3113_vm5, %v4046_v38, 0.0  ;;  %v4048_v45 = vpop.eup %4047 }
 0x41e   :  { %3214 = vperm.xlu0 %3815, %v3160_v63   ;;  %v3162_v55 = vsel %vm3114_vm10, %v4048_v45, 0.0  ;;  %v1291_v63 = vld [vmem:[#allocation2 + $0x30] sm:$0xff]  ;;  %v359_v45 = vld [vmem:[#allocation3 + $0x78] sm:$0xff] }
 0x41f   :  { %3595 = vmatprep.subr.bf16.mxu1 %v2876_v40  ;;  %3219 = vperm.xlu1 %3816, %v3161_v6  }
 0x420   :  { %3596 = vmatpush3.bf16.msra.mxu1 %v2868_v4  ;;  %v4050_v4 = vpop.eup %4049 }
 0x421   :  { %3597 = vmatprep.subr.bf16.mxu1 %v2877_v61  ;;  %v3163_v9 = vsel %vm3115_vm12, %v4050_v4, 0.0  ;;  %v4052_v25 = vpop.eup %4051  ;;  %v358_v4 = vld [vmem:[#allocation3 + $0x70] sm:$0xff] }
 0x422   :  { %3224 = vperm.xlu0 %3815, %v3162_v55   ;;  %v3164_v10 = vsel %vm3116_vm13, %v4052_v25, 0.0  ;;  %v4054_v3 = vpop.eup %4053 }
 0x423   :  { %3229 = vperm.xlu1 %3816, %v3163_v9   ;;  %v3165_v46 = vsel %vm3117_vm15, %v4054_v3, 0.0  ;;  %v4056_v26 = vpop.eup %4055 }
 0x424   :  { %3598 = vmatpush3.bf16.msra.mxu1 %v2869_v37  ;;  %v3166_v37 = vsel %vm3118_vm2, %v4056_v26, 0.0  ;;  %v4058_v56 = vpop.eup %4057 }
 0x425   :  { %v3167_v41 = vsel %vm3119_vm3, %v4058_v56, 0.0  ;;  %v4060_v57 = vpop.eup %4059  ;;  %v1293_v56 = vld [vmem:[#allocation2 + $0x40] sm:$0xff] }
 0x426   :  { %3234 = vperm.xlu0 %3815, %v3164_v10  }
 0x427   :  { %2911 = vmatmul.mubr.bf16.vlgmr.msra.gmra.mrb[64].mxu1 %v6246_v31  ;;  %3239 = vperm.xlu1 %3816, %v3165_v46   ;;  %v7639_v31 = vld [vmem:[#allocation93_spill] sm:$0xff] }
 0x428   :  { %2918 = vmatprep.mubr.bf16.mxu1 %v6224_v17  ;;  %v3168_v17 = vsel %vm3120_vm1, %v4060_v57, 0.0 }
 0x42a   :  { %3244 = vperm.xlu0 %3815, %v3166_v37  }
 0x42b   :  { %3249 = vperm.xlu1 %3816, %v3167_v41  }
 0x42e   :  { %3254 = vperm.xlu0 %3815, %v3168_v17   ;;  %v1294_v17 = vld [vmem:[#allocation2 + $0x48] sm:$0xff] }
 0x42f   :  { %2919 = vmatmul.mubr.bf16.gmra.mrb[68].mxu1 %v6259_v14  ;;  %v7647_v14 = vld [vmem:[#allocation95_spill] sm:$0xff] }
 0x430   :  { %2926 = vmatprep.mubr.bf16.mxu1 %v7639_v31 }
 0x437   :  { %2927 = vmatmul.mubr.bf16.gmra.mrb[72].mxu1 %v7640_v51 }
 0x438   :  { %2934 = vmatprep.mubr.bf16.mxu1 %v7641_v0 }
 0x43f   :  { %2935 = vmatmul.mubr.bf16.gmra.mrb[76].mxu1 %v7642_v39 }
 0x440   :  { %2942 = vmatprep.mubr.bf16.mxu1 %v7643_v44 }
 0x447   :  { %2943 = vmatmul.mubr.bf16.gmra.mrb[80].mxu1 %v7644_v19 }
 0x448   :  { %2950 = vmatprep.mubr.bf16.mxu1 %v7645_v47  ;;  %v1295_v47 = vld [vmem:[#allocation2 + $0x50] sm:$0xff] }
 0x44a   :  { %v407_v9 = vpop.xlane.xlu0 %406 }
 0x44b   :  { %v423_v10 = vadd.f32 %v407_v9, %v359_v45 }
 0x44d   :  { %440 = vst.msk [vmem:[#allocation3 + $0x78] sm:$0xff] %vm109_vm8, %v423_v10 }
 0x44f   :  { %2951 = vmatmul.mubr.bf16.gmra.mrb[84].mxu1 %v7646_v58 }
 0x450   :  { %2958 = vmatprep.mubr.bf16.mxu1 %v7647_v14 }
 0x457   :  { %2959 = vmatmul.mubr.bf16.gmra.mrb[88].mxu1 %v7648_v50 }
 0x458   :  { %2966 = vmatprep.mubr.bf16.mxu1 %v7649_v36  ;;  %v404_v3 = vpop.xlane.xlu1 %403  ;;  %v1296_v36 = vld [vmem:[#allocation2 + $0x58] sm:$0xff] }
 0x459   :  { %v422_v26 = vadd.f32 %v404_v3, %v358_v4 }
 0x45b   :  { %439 = vst.msk [vmem:[#allocation3 + $0x70] sm:$0xff] %vm109_vm8, %v422_v26  ;;  %vm2194_vm8 = vcmask 261248  }
 0x45f   :  { %2967 = vmatmul.mubr.bf16.gmra.mrb[92].mxu1 %v7650_v53 }
 0x46c   :  { %v3423_v29 = vpop.f32.mrb[0].mxu1 }
 0x46d   :  { %v3424_v42 = vpop.f32.mrb[1].mxu1 }
 0x46e   :  { %v3425_v23 = vadd.f32 %v3424_v42, %v3423_v29  ;;  %v3426_v34 = vpop.f32.mrb[2].mxu1 }
 0x46f   :  { %v3427_v24 = vpop.f32.mrb[3].mxu1 }
 0x470   :  { %v1301_v52 = vadd.f32 %v3425_v23, %v1285_v59  ;;  %v3428_v33 = vadd.f32 %v3427_v24, %v3426_v34  ;;  %v1297_v34 = vld [vmem:[#allocation2 + $0x60] sm:$0xff] }
 0x472   :  { %1318 = vst.msk [vmem:[#allocation2] sm:$0xff] %vm1317_vm14, %v1301_v52  ;;  %v1302_v32 = vadd.f32 %v3428_v33, %v1286_v35  ;;  %v1298_v33 = vld [vmem:[#allocation2 + $0x68] sm:$0xff] }
 0x474   :  { %1319 = vst.msk [vmem:[#allocation2 + $0x8] sm:$0xff] %vm1317_vm14, %v1302_v32  ;;  %v3429_v28 = vpop.f32.mrb[4].mxu1 }
 0x475   :  { %v3430_v11 = vpop.f32.mrb[5].mxu1 }
 0x476   :  { %v3431_v54 = vadd.f32 %v3430_v11, %v3429_v28  ;;  %v3432_v16 = vpop.f32.mrb[6].mxu1 }
 0x477   :  { %v3433_v27 = vpop.f32.mrb[7].mxu1 }
 0x478   :  { %v1303_v2 = vadd.f32 %v3431_v54, %v1287_v30  ;;  %v3434_v15 = vadd.f32 %v3433_v27, %v3432_v16  ;;  %v1299_v16 = vld [vmem:[#allocation2 + $0x70] sm:$0xff] }
 0x47a   :  { %1320 = vst.msk [vmem:[#allocation2 + $0x10] sm:$0xff] %vm1317_vm14, %v1303_v2  ;;  %v1304_v60 = vadd.f32 %v3434_v15, %v1288_v5  ;;  %v1300_v15 = vld [vmem:[#allocation2 + $0x78] sm:$0xff] }
 0x47c   :  { %1321 = vst.msk [vmem:[#allocation2 + $0x18] sm:$0xff] %vm1317_vm14, %v1304_v60  ;;  %v3435_v12 = vpop.f32.mrb[8].mxu1 }
 0x47d   :  { %v3436_v1 = vpop.f32.mrb[9].mxu1 }
 0x47e   :  { %v3437_v61 = vadd.f32 %v3436_v1, %v3435_v12  ;;  %v3438_v18 = vpop.f32.mrb[10].mxu1 }
 0x47f   :  { %v3439_v43 = vpop.f32.mrb[11].mxu1 }
 0x480   :  { %v1305_v21 = vadd.f32 %v3437_v61, %v1289_v8  ;;  %v3440_v40 = vadd.f32 %v3439_v43, %v3438_v18 }
 0x482   :  { %1322 = vst.msk [vmem:[#allocation2 + $0x20] sm:$0xff] %vm1317_vm14, %v1305_v21  ;;  %v1306_v20 = vadd.f32 %v3440_v40, %v1290_v7 }
 0x484   :  { %1323 = vst.msk [vmem:[#allocation2 + $0x28] sm:$0xff] %vm1317_vm14, %v1306_v20  ;;  %v3441_v22 = vpop.f32.mrb[12].mxu1 }
 0x485   :  { %v3442_v62 = vpop.f32.mrb[13].mxu1 }
 0x486   :  { %v3443_v13 = vadd.f32 %v3442_v62, %v3441_v22  ;;  %v3444_v38 = vpop.f32.mrb[14].mxu1 }
 0x487   :  { %v3445_v6 = vpop.f32.mrb[15].mxu1 }
 0x488   :  { %v1307_v55 = vadd.f32 %v3443_v13, %v1291_v63  ;;  %v3446_v49 = vadd.f32 %v3445_v6, %v3444_v38 }
 0x48a   :  { %1324 = vst.msk [vmem:[#allocation2 + $0x30] sm:$0xff] %vm1317_vm14, %v1307_v55  ;;  %v1308_v25 = vadd.f32 %v3446_v49, %v1292_v48 }
 0x48c   :  { %1325 = vst.msk [vmem:[#allocation2 + $0x38] sm:$0xff] %vm1317_vm14, %v1308_v25  ;;  %v3447_v46 = vpop.f32.mrb[16].mxu1 }
 0x48d   :  { %v3448_v37 = vpop.f32.mrb[17].mxu1 }
 0x48e   :  { %v3449_v41 = vadd.f32 %v3448_v37, %v3447_v46  ;;  %v3450_v57 = vpop.f32.mrb[18].mxu1 }
 0x48f   :  { %v3451_v31 = vpop.f32.mrb[19].mxu1 }
 0x490   :  { %v1309_v51 = vadd.f32 %v3449_v41, %v1293_v56  ;;  %v3452_v0 = vadd.f32 %v3451_v31, %v3450_v57 }
 0x492   :  { %1326 = vst.msk [vmem:[#allocation2 + $0x40] sm:$0xff] %vm1317_vm14, %v1309_v51  ;;  %v1310_v39 = vadd.f32 %v3452_v0, %v1294_v17 }
 0x494   :  { %1327 = vst.msk [vmem:[#allocation2 + $0x48] sm:$0xff] %vm1317_vm14, %v1310_v39  ;;  %v3453_v44 = vpop.f32.mrb[20].mxu1 }
 0x495   :  { %v3454_v19 = vpop.f32.mrb[21].mxu1 }
 0x496   :  { %v3455_v58 = vadd.f32 %v3454_v19, %v3453_v44  ;;  %v3456_v14 = vpop.f32.mrb[22].mxu1 }
 0x497   :  { %v3457_v50 = vpop.f32.mrb[23].mxu1 }
 0x498   :  { %v1311_v53 = vadd.f32 %v3455_v58, %v1295_v47  ;;  %v3458_v29 = vadd.f32 %v3457_v50, %v3456_v14 }
 0x49a   :  { %1328 = vst.msk [vmem:[#allocation2 + $0x50] sm:$0xff] %vm1317_vm14, %v1311_v53  ;;  %v1312_v42 = vadd.f32 %v3458_v29, %v1296_v36 }
 0x49c   :  { %1329 = vst.msk [vmem:[#allocation2 + $0x58] sm:$0xff] %vm1317_vm14, %v1312_v42  ;;  %v3459_v59 = vpop.f32.mrb[24].mxu1 }
 0x49d   :  { %v3460_v23 = vpop.f32.mrb[25].mxu1 }
 0x49e   :  { %v3461_v24 = vadd.f32 %v3460_v23, %v3459_v59  ;;  %v3462_v35 = vpop.f32.mrb[26].mxu1 }
 0x49f   :  { %v3463_v52 = vpop.f32.mrb[27].mxu1 }
 0x4a0   :  { %v1313_v32 = vadd.f32 %v3461_v24, %v1297_v34  ;;  %v3464_v28 = vadd.f32 %v3463_v52, %v3462_v35 }
 0x4a2   :  { %1330 = vst.msk [vmem:[#allocation2 + $0x60] sm:$0xff] %vm1317_vm14, %v1313_v32  ;;  %v1314_v11 = vadd.f32 %v3464_v28, %v1298_v33  ;;  %v6723_v28 = vpop.permute.xlu1 %3194 }
 0x4a4   :  { %1331 = vst.msk [vmem:[#allocation2 + $0x68] sm:$0xff] %vm1317_vm14, %v1314_v11  ;;  %v3465_v30 = vpop.f32.mrb[28].mxu1 }
 0x4a5   :  { %v3466_v54 = vpop.f32.mrb[29].mxu1 }
 0x4a6   :  { %v3467_v27 = vadd.f32 %v3466_v54, %v3465_v30  ;;  %v3468_v5 = vpop.f32.mrb[30].mxu1  ;;  %v6726_v54 = vpop.permute.xlu0 %3189 }
 0x4a7   :  { %v3469_v2 = vpop.f32.mrb[31].mxu1 }
 0x4a8   :  { %v1315_v60 = vadd.f32 %v3467_v27, %v1299_v16  ;;  %v3470_v12 = vadd.f32 %v3469_v2, %v3468_v5  ;;  %v6729_v27 = vpop.permute.xlu1 %3199 }
 0x4aa   :  { %1332 = vst.msk [vmem:[#allocation2 + $0x70] sm:$0xff] %vm1317_vm14, %v1315_v60  ;;  %v1316_v1 = vadd.f32 %v3470_v12, %v1300_v15  ;;  %v6731_v60 = vpop.permute.xlu0 %3204 }
 0x4ac   :  { %1333 = vst.msk [vmem:[#allocation2 + $0x78] sm:$0xff] %vm1317_vm14, %v1316_v1 }
 0x4b0   :  { %v3511_v8 = vpop.f32.mrb[32].mxu1 }
 0x4b1   :  { %v3512_v61 = vpop.f32.mrb[33].mxu1 }
 0x4b2   :  { %v3513_v18 = vadd.f32 %v3512_v61, %v3511_v8  ;;  %v3514_v43 = vpop.f32.mrb[34].mxu1  ;;  %v6735_v8 = vpop.permute.xlu1 %3209 }
 0x4b3   :  { %v3515_v7 = vpop.f32.mrb[35].mxu1 }
 0x4b4   :  { %v3516_v21 = vadd.f32 %v3515_v7, %v3514_v43  ;;  %2130 = vrot.lane.b32.xlu1 %v3513_v18, %s4223_s30  ;;  %v6737_v18 = vpop.permute.xlu0 %3214 }
 0x4b6   :  { %2132 = vrot.lane.b32.xlu0 %v3516_v21, %s4223_s30 }
 0x4b8   :  { %v3517_v40 = vpop.f32.mrb[36].mxu1 }
 0x4b9   :  { %v3518_v20 = vpop.f32.mrb[37].mxu1 }
 0x4ba   :  { %v3519_v22 = vadd.f32 %v3518_v20, %v3517_v40  ;;  %v3520_v62 = vpop.f32.mrb[38].mxu1 }
 0x4bb   :  { %v3521_v63 = vpop.f32.mrb[39].mxu1 }
 0x4bc   :  { %v3522_v13 = vadd.f32 %v3521_v63, %v3520_v62  ;;  %2134 = vrot.lane.b32.xlu1 %v3519_v22, %s4223_s30  ;;  %v6740_v22 = vpop.permute.xlu1 %3219  ;;  %v6743_v62 = vpop.permute.xlu0 %3224 }
 0x4c0   :  { %v3523_v38 = vpop.f32.mrb[40].mxu1  ;;  %2136 = vrot.lane.b32.xlu1 %v3522_v13, %s4223_s30 }
 0x4c1   :  { %v3524_v6 = vpop.f32.mrb[41].mxu1 }
 0x4c2   :  { %v3525_v48 = vadd.f32 %v3524_v6, %v3523_v38  ;;  %v3526_v45 = vpop.f32.mrb[42].mxu1 }
 0x4c3   :  { %v3527_v55 = vpop.f32.mrb[43].mxu1 }
 0x4c4   :  { %v3528_v49 = vadd.f32 %v3527_v55, %v3526_v45  ;;  %2138 = vrot.lane.b32.xlu0 %v3525_v48, %s4223_s30  ;;  %v6745_v48 = vpop.permute.xlu1 %3229 }
 0x4c6   :  { %2140 = vrot.lane.b32.xlu1 %v3528_v49, %s4223_s30  ;;  %v6748_v49 = vpop.permute.xlu0 %3234 }
 0x4c8   :  { %v3529_v4 = vpop.f32.mrb[44].mxu1 }
 0x4c9   :  { %v3530_v9 = vpop.f32.mrb[45].mxu1 }
 0x4ca   :  { %v3531_v25 = vadd.f32 %v3530_v9, %v3529_v4  ;;  %v3532_v10 = vpop.f32.mrb[46].mxu1  ;;  %v6751_v9 = vpop.permute.xlu1 %3239 }
 0x4cb   :  { %v3533_v3 = vpop.f32.mrb[47].mxu1 }
 0x4cc   :  { %v3534_v46 = vadd.f32 %v3533_v3, %v3532_v10  ;;  %2142 = vrot.lane.b32.xlu0 %v3531_v25, %s4223_s30 }
 0x4ce   :  { %2144 = vrot.lane.b32.xlu1 %v3534_v46, %s4223_s30  ;;  %v6753_v46 = vpop.permute.xlu0 %3244 }
 0x4d0   :  { %v3535_v26 = vpop.f32.mrb[48].mxu1 }
 0x4d1   :  { %v3536_v37 = vpop.f32.mrb[49].mxu1 }
 0x4d2   :  { %v3537_v56 = vadd.f32 %v3536_v37, %v3535_v26  ;;  %v3538_v41 = vpop.f32.mrb[50].mxu1 }
 0x4d3   :  { %v3539_v57 = vpop.f32.mrb[51].mxu1 }
 0x4d4   :  { %v3540_v31 = vadd.f32 %v3539_v57, %v3538_v41  ;;  %2146 = vrot.lane.b32.xlu0 %v3537_v56, %s4223_s30  ;;  %v6757_v56 = vpop.permute.xlu1 %3249  ;;  %v6759_v57 = vpop.permute.xlu0 %3254 }
 0x4d6   :  { %2148 = vrot.lane.b32.xlu1 %v3540_v31, %s4223_s30 }
 0x4d8   :  { %v3541_v17 = vpop.f32.mrb[52].mxu1 }
 0x4d9   :  { %v3542_v51 = vpop.f32.mrb[53].mxu1 }
 0x4da   :  { %v3543_v0 = vadd.f32 %v3542_v51, %v3541_v17  ;;  %v3544_v39 = vpop.f32.mrb[54].mxu1 }
 0x4db   :  { %v3545_v44 = vpop.f32.mrb[55].mxu1 }
 0x4dc   :  { %v3546_v19 = vadd.f32 %v3545_v44, %v3544_v39  ;;  %2150 = vrot.lane.b32.xlu0 %v3543_v0, %s4223_s30 }
 0x4de   :  { %2152 = vrot.lane.b32.xlu1 %v3546_v19, %s4223_s30  ;;  %v2098_v19 = vld [vmem:[#allocation2] sm:$0xff] }
 0x4e0   :  { %v3547_v47 = vpop.f32.mrb[56].mxu1 }
 0x4e1   :  { %v3548_v58 = vpop.f32.mrb[57].mxu1 }
 0x4e2   :  { %v3549_v14 = vadd.f32 %v3548_v58, %v3547_v47  ;;  %v3550_v50 = vpop.f32.mrb[58].mxu1 }
 0x4e3   :  { %v3551_v36 = vpop.f32.mrb[59].mxu1 }
 0x4e4   :  { %v3552_v53 = vadd.f32 %v3551_v36, %v3550_v50  ;;  %2154 = vrot.lane.b32.xlu0 %v3549_v14, %s4223_s30  ;;  %v2099_v14 = vld [vmem:[#allocation2 + $0x8] sm:$0xff]  ;;  %v3106_v36 = vld [vmem:[#allocation3 + $0x78] sm:$0xff] }
 0x4e5   :  { %4061 = vrcp.f32 %v3106_v36  ;;  %vm3122_vm7 = vcmp.gt.f32.partialorder %v3106_v36, 0.0 }
 0x4e6   :  { %2156 = vrot.lane.b32.xlu1 %v3552_v53, %s4223_s30 }
 0x4e8   :  { %v3553_v29 = vpop.f32.mrb[60].mxu1 }
 0x4e9   :  { %v3554_v42 = vpop.f32.mrb[61].mxu1 }
 0x4ea   :  { %v3555_v59 = vadd.f32 %v3554_v42, %v3553_v29  ;;  %v3556_v23 = vpop.f32.mrb[62].mxu1  ;;  %v3105_v42 = vld [vmem:[#allocation3 + $0x70] sm:$0xff] }
 0x4eb   :  { %v3557_v34 = vpop.f32.mrb[63].mxu1  ;;  %4063 = vrcp.f32 %v3105_v42  ;;  %vm3121_vm4 = vcmp.gt.f32.partialorder %v3105_v42, 0.0 }
 0x4ec   :  { %v3558_v24 = vadd.f32 %v3557_v34, %v3556_v23  ;;  %2158 = vrot.lane.b32.xlu0 %v3555_v59, %s4223_s30 }
 0x4ee   :  { %2160 = vrot.lane.b32.xlu1 %v3558_v24, %s4223_s30 }
 0x4fa   :  { %v3599_v35 = vpop.f32.mrb[64].mxu1 }
 0x4fb   :  { %v3600_v52 = vpop.f32.mrb[65].mxu1 }
 0x4fc   :  { %v3601_v33 = vadd.f32 %v3600_v52, %v3599_v35  ;;  %v3602_v32 = vpop.f32.mrb[66].mxu1  ;;  %v2100_v52 = vld [vmem:[#allocation2 + $0x10] sm:$0xff] }
 0x4fd   :  { %v3603_v11 = vpop.f32.mrb[67].mxu1 }
 0x4fe   :  { %v3604_v30 = vadd.f32 %v3603_v11, %v3602_v32  ;;  %3007 = vrot.lane.b32.xlu0 %v3601_v33, %s4224_s6  ;;  %v2101_v11 = vld [vmem:[#allocation2 + $0x18] sm:$0xff] }
 0x500   :  { %3009 = vrot.lane.b32.xlu1 %v3604_v30, %s4224_s6 }
 0x502   :  { %v3605_v16 = vpop.f32.mrb[68].mxu1 }
 0x503   :  { %v3606_v5 = vpop.f32.mrb[69].mxu1 }
 0x504   :  { %v3607_v2 = vadd.f32 %v3606_v5, %v3605_v16  ;;  %v3608_v15 = vpop.f32.mrb[70].mxu1 }
 0x505   :  { %v3609_v12 = vpop.f32.mrb[71].mxu1 }
 0x506   :  { %v3610_v1 = vadd.f32 %v3609_v12, %v3608_v15  ;;  %3011 = vrot.lane.b32.xlu0 %v3607_v2, %s4224_s6 }
 0x508   :  { %3013 = vrot.lane.b32.xlu1 %v3610_v1, %s4224_s6  ;;  %v4062_v1 = vpop.eup %4061 }
 0x50a   :  { %v3611_v61 = vpop.f32.mrb[72].mxu1 }
 0x50b   :  { %v3612_v43 = vpop.f32.mrb[73].mxu1 }
 0x50c   :  { %v3613_v7 = vadd.f32 %v3612_v43, %v3611_v61  ;;  %v3614_v21 = vpop.f32.mrb[74].mxu1 }
 0x50d   :  { %v3615_v40 = vpop.f32.mrb[75].mxu1 }
 0x50e   :  { %v3616_v20 = vadd.f32 %v3615_v40, %v3614_v21  ;;  %3015 = vrot.lane.b32.xlu0 %v3613_v7, %s4224_s6  ;;  %v2102_v7 = vld [vmem:[#allocation2 + $0x20] sm:$0xff]  ;;  %v4064_v40 = vpop.eup %4063 }
 0x510   :  { %3017 = vrot.lane.b32.xlu1 %v3616_v20, %s4224_s6 }
 0x512   :  { %v3617_v63 = vpop.f32.mrb[76].mxu1 }
 0x513   :  { %v3618_v13 = vpop.f32.mrb[77].mxu1 }
 0x514   :  { %v3619_v38 = vadd.f32 %v3618_v13, %v3617_v63  ;;  %v3620_v6 = vpop.f32.mrb[78].mxu1  ;;  %v2103_v63 = vld [vmem:[#allocation2 + $0x28] sm:$0xff] }
 0x515   :  { %v3621_v45 = vpop.f32.mrb[79].mxu1 }
 0x516   :  { %v3622_v55 = vadd.f32 %v3621_v45, %v3620_v6  ;;  %3019 = vrot.lane.b32.xlu0 %v3619_v38, %s4224_s6  ;;  %v3170_v38 = vsel %vm3122_vm7, %v4062_v1, 0.0  ;;  %v3169_v6 = vsel %vm3121_vm4, %v4064_v40, 0.0  ;;  %v6785_v1 = vld [vmem:[#allocation12] ss:$0 sm:$0xff] }
 0x518   :  { %3021 = vrot.lane.b32.xlu1 %v3622_v55, %s4224_s6  ;;  %v2104_v55 = vld [vmem:[#allocation2 + $0x30] sm:$0xff] }
 0x51a   :  { %v3623_v4 = vpop.f32.mrb[80].mxu1 }
 0x51b   :  { %v3624_v25 = vpop.f32.mrb[81].mxu1 }
 0x51c   :  { %v3625_v10 = vadd.f32 %v3624_v25, %v3623_v4  ;;  %v3626_v3 = vpop.f32.mrb[82].mxu1 }
 0x51d   :  { %v3627_v26 = vpop.f32.mrb[83].mxu1 }
 0x51e   :  { %v3628_v37 = vadd.f32 %v3627_v26, %v3626_v3  ;;  %3023 = vrot.lane.b32.xlu0 %v3625_v10, %s4224_s6  ;;  %v2105_v10 = vld [vmem:[#allocation2 + $0x38] sm:$0xff] }
 0x520   :  { %3025 = vrot.lane.b32.xlu1 %v3628_v37, %s4224_s6  ;;  %v2106_v37 = vld [vmem:[#allocation2 + $0x40] sm:$0xff] }
 0x522   :  { %v3629_v41 = vpop.f32.mrb[84].mxu1 }
 0x523   :  { %v3630_v31 = vpop.f32.mrb[85].mxu1 }
 0x524   :  { %v3631_v17 = vadd.f32 %v3630_v31, %v3629_v41  ;;  %v3632_v51 = vpop.f32.mrb[86].mxu1 }
 0x525   :  { %v3633_v0 = vpop.f32.mrb[87].mxu1 }
 0x526   :  { %v3634_v39 = vadd.f32 %v3633_v0, %v3632_v51  ;;  %v2131_v44 = vpop.permute.xlu1 %2130  ;;  %3027 = vrot.lane.b32.xlu0 %v3631_v17, %s4224_s6  ;;  %v2107_v17 = vld [vmem:[#allocation2 + $0x48] sm:$0xff] }
 0x527   :  { %v2178_v47 = vadd.f32 %v2131_v44, %v2098_v19 }
 0x528   :  { %v2133_v58 = vpop.permute.xlu0 %2132  ;;  %3029 = vrot.lane.b32.xlu1 %v3634_v39, %s4224_s6  ;;  %v2108_v39 = vld [vmem:[#allocation2 + $0x50] sm:$0xff] }
 0x529   :  { %2195 = vst.msk [vmem:[#allocation2] sm:$0xff] %vm2194_vm8, %v2178_v47  ;;  %v2179_v50 = vadd.f32 %v2133_v58, %v2099_v14  ;;  %v2109_v47 = vld [vmem:[#allocation2 + $0x58] sm:$0xff] }
 0x52a   :  { %v3635_v53 = vpop.f32.mrb[88].mxu1 }
 0x52b   :  { %2196 = vst.msk [vmem:[#allocation2 + $0x8] sm:$0xff] %vm2194_vm8, %v2179_v50  ;;  %v3636_v29 = vpop.f32.mrb[89].mxu1  ;;  %v2110_v50 = vld [vmem:[#allocation2 + $0x60] sm:$0xff] }
 0x52c   :  { %v3637_v59 = vadd.f32 %v3636_v29, %v3635_v53  ;;  %v3638_v23 = vpop.f32.mrb[90].mxu1  ;;  %v2111_v29 = vld [vmem:[#allocation2 + $0x68] sm:$0xff] }
 0x52d   :  { %v3639_v34 = vpop.f32.mrb[91].mxu1 }
 0x52e   :  { %v3640_v24 = vadd.f32 %v3639_v34, %v3638_v23  ;;  %v2135_v35 = vpop.permute.xlu1 %2134  ;;  %3031 = vrot.lane.b32.xlu0 %v3637_v59, %s4224_s6  ;;  %v2112_v23 = vld [vmem:[#allocation2 + $0x70] sm:$0xff] }
 0x52f   :  { %v2180_v33 = vadd.f32 %v2135_v35, %v2100_v52  ;;  %v2113_v35 = vld [vmem:[#allocation2 + $0x78] sm:$0xff] }
 0x530   :  { %3033 = vrot.lane.b32.xlu1 %v3640_v24, %s4224_s6 }
 0x531   :  { %2197 = vst.msk [vmem:[#allocation2 + $0x10] sm:$0xff] %vm2194_vm8, %v2180_v33 }
 0x532   :  { %v2137_v32 = vpop.permute.xlu1 %2136  ;;  %v3641_v30 = vpop.f32.mrb[92].mxu1 }
 0x533   :  { %v2181_v16 = vadd.f32 %v2137_v32, %v2101_v11  ;;  %v3642_v5 = vpop.f32.mrb[93].mxu1  ;;  %v2975_v32 = vld [vmem:[#allocation2] sm:$0xff] }
 0x534   :  { %v3643_v2 = vadd.f32 %v3642_v5, %v3641_v30  ;;  %v3644_v15 = vpop.f32.mrb[94].mxu1 }
 0x535   :  { %2198 = vst.msk [vmem:[#allocation2 + $0x18] sm:$0xff] %vm2194_vm8, %v2181_v16  ;;  %v3645_v12 = vpop.f32.mrb[95].mxu1  ;;  %v2976_v16 = vld [vmem:[#allocation2 + $0x8] sm:$0xff] }
 0x536   :  { %v3646_v61 = vadd.f32 %v3645_v12, %v3644_v15  ;;  %v2139_v43 = vpop.permute.xlu0 %2138  ;;  %3035 = vrot.lane.b32.xlu0 %v3643_v2, %s4224_s6 }
 0x537   :  { %v2182_v21 = vadd.f32 %v2139_v43, %v2102_v7 }
 0x538   :  { %v2141_v20 = vpop.permute.xlu1 %2140  ;;  %3037 = vrot.lane.b32.xlu1 %v3646_v61, %s4224_s6  ;;  %v2977_v15 = vld [vmem:[#allocation2 + $0x10] sm:$0xff] }
 0x539   :  { %2199 = vst.msk [vmem:[#allocation2 + $0x20] sm:$0xff] %vm2194_vm8, %v2182_v21  ;;  %v2183_v13 = vadd.f32 %v2141_v20, %v2103_v63 }
 0x53a   :  { %3264 = vperm.xlu0 %3815, %v3170_v38  }
 0x53b   :  { %2200 = vst.msk [vmem:[#allocation2 + $0x28] sm:$0xff] %vm2194_vm8, %v2183_v13 }
 0x53c   :  { %3259 = vperm.xlu1 %3816, %v3169_v6   ;;  %v2978_v7 = vld [vmem:[#allocation2 + $0x18] sm:$0xff] }
 0x53e   :  { %v2143_v45 = vpop.permute.xlu0 %2142 }
 0x53f   :  { %v2184_v4 = vadd.f32 %v2143_v45, %v2104_v55 }
 0x540   :  { %v2145_v25 = vpop.permute.xlu1 %2144  ;;  %v2979_v45 = vld [vmem:[#allocation2 + $0x20] sm:$0xff] }
 0x541   :  { %2201 = vst.msk [vmem:[#allocation2 + $0x30] sm:$0xff] %vm2194_vm8, %v2184_v4  ;;  %v2185_v3 = vadd.f32 %v2145_v25, %v2105_v10 }
 0x542   :  { %v2980_v25 = vld [vmem:[#allocation2 + $0x28] sm:$0xff] }
 0x543   :  { %2202 = vst.msk [vmem:[#allocation2 + $0x38] sm:$0xff] %vm2194_vm8, %v2185_v3 }
 0x546   :  { %v2147_v26 = vpop.permute.xlu0 %2146 }
 0x547   :  { %v2186_v41 = vadd.f32 %v2147_v26, %v2106_v37 }
 0x548   :  { %v2149_v31 = vpop.permute.xlu1 %2148 }
 0x549   :  { %2203 = vst.msk [vmem:[#allocation2 + $0x40] sm:$0xff] %vm2194_vm8, %v2186_v41  ;;  %v2187_v51 = vadd.f32 %v2149_v31, %v2107_v17  ;;  %v2981_v17 = vld [vmem:[#allocation2 + $0x30] sm:$0xff] }
 0x54b   :  { %2204 = vst.msk [vmem:[#allocation2 + $0x48] sm:$0xff] %vm2194_vm8, %v2187_v51 }
 0x54e   :  { %v2151_v0 = vpop.permute.xlu0 %2150 }
 0x54f   :  { %v2188_v44 = vadd.f32 %v2151_v0, %v2108_v39  ;;  %v2982_v39 = vld [vmem:[#allocation2 + $0x38] sm:$0xff] }
 0x550   :  { %v2153_v19 = vpop.permute.xlu1 %2152 }
 0x551   :  { %2205 = vst.msk [vmem:[#allocation2 + $0x50] sm:$0xff] %vm2194_vm8, %v2188_v44  ;;  %v2189_v58 = vadd.f32 %v2153_v19, %v2109_v47 }
 0x553   :  { %2206 = vst.msk [vmem:[#allocation2 + $0x58] sm:$0xff] %vm2194_vm8, %v2189_v58 }
 0x556   :  { %v2155_v14 = vpop.permute.xlu0 %2154 }
 0x557   :  { %v2190_v36 = vadd.f32 %v2155_v14, %v2110_v50 }
 0x558   :  { %v2157_v53 = vpop.permute.xlu1 %2156 }
 0x559   :  { %2207 = vst.msk [vmem:[#allocation2 + $0x60] sm:$0xff] %vm2194_vm8, %v2190_v36  ;;  %v2191_v42 = vadd.f32 %v2157_v53, %v2111_v29  ;;  %v2983_v36 = vld [vmem:[#allocation2 + $0x40] sm:$0xff] }
 0x55b   :  { %2208 = vst.msk [vmem:[#allocation2 + $0x68] sm:$0xff] %vm2194_vm8, %v2191_v42  ;;  %v2984_v42 = vld [vmem:[#allocation2 + $0x48] sm:$0xff] }
 0x55e   :  { %v2159_v59 = vpop.permute.xlu0 %2158 }
 0x55f   :  { %v2192_v34 = vadd.f32 %v2159_v59, %v2112_v23 }
 0x560   :  { %v2161_v24 = vpop.permute.xlu1 %2160 }
 0x561   :  { %2209 = vst.msk [vmem:[#allocation2 + $0x70] sm:$0xff] %vm2194_vm8, %v2192_v34  ;;  %v2193_v52 = vadd.f32 %v2161_v24, %v2113_v35 }
 0x563   :  { %2210 = vst.msk [vmem:[#allocation2 + $0x78] sm:$0xff] %vm2194_vm8, %v2193_v52 }
 0x570   :  { %v3008_v33 = vpop.permute.xlu0 %3007 }
 0x571   :  { %v3055_v11 = vadd.f32 %v3008_v33, %v2975_v32  ;;  %v2985_v33 = vld [vmem:[#allocation2 + $0x50] sm:$0xff] }
 0x572   :  { %v3010_v30 = vpop.permute.xlu1 %3009 }
 0x573   :  { %3072 = vst.msk [vmem:[#allocation2] sm:$0xff] %vm3071_vm6, %v3055_v11  ;;  %v3056_v5 = vadd.f32 %v3010_v30, %v2976_v16  ;;  %v2986_v30 = vld [vmem:[#allocation2 + $0x58] sm:$0xff] }
 0x575   :  { %3073 = vst.msk [vmem:[#allocation2 + $0x8] sm:$0xff] %vm3071_vm6, %v3056_v5 }
 0x578   :  { %v3012_v2 = vpop.permute.xlu0 %3011 }
 0x579   :  { %v3057_v12 = vadd.f32 %v3012_v2, %v2977_v15 }
 0x57a   :  { %v3171_v61 = vld [vmem:[#allocation2] sm:$0xff]  ;;  %v3014_v43 = vpop.permute.xlu1 %3013 }
 0x57b   :  { %v3267_v21 = vmul.f32 %v6726_v54, %v3171_v61  ;;  %3074 = vst.msk [vmem:[#allocation2 + $0x10] sm:$0xff] %vm3071_vm6, %v3057_v12  ;;  %v3058_v40 = vadd.f32 %v3014_v43, %v2978_v7  ;;  %v2987_v43 = vld [vmem:[#allocation2 + $0x60] sm:$0xff] }
 0x57c   :  { %v3172_v20 = vld [vmem:[#allocation2 + $0x8] sm:$0xff] }
 0x57d   :  { %v3290_v63 = vadd.f32 %v6785_v1, %v3267_v21  ;;  %v3268_v13 = vmul.f32 %v6723_v28, %v3172_v20  ;;  %3075 = vst.msk [vmem:[#allocation2 + $0x18] sm:$0xff] %vm3071_vm6, %v3058_v40  ;;  %v2988_v40 = vld [vmem:[#allocation2 + $0x68] sm:$0xff] }
 0x57f   :  { %3307 = vst.msk [vmem:[#allocation13] sm:$0xff] %vm92_vm11, %v3290_v63  ;;  %v3291_v38 = vadd.f32 %v6785_v1, %v3268_v13 }
 0x580   :  { %v3016_v6 = vpop.permute.xlu0 %3015 }
 0x581   :  { %3308 = vst.msk [vmem:[#allocation13 + $0x8] sm:$0xff] %vm92_vm11, %v3291_v38  ;;  %v3059_v55 = vadd.f32 %v3016_v6, %v2979_v45 }
 0x582   :  { %v3173_v54 = vld [vmem:[#allocation2 + $0x10] sm:$0xff]  ;;  %v3018_v4 = vpop.permute.xlu1 %3017 }
 0x583   :  { %v3269_v10 = vmul.f32 %v6729_v27, %v3173_v54  ;;  %3076 = vst.msk [vmem:[#allocation2 + $0x20] sm:$0xff] %vm3071_vm6, %v3059_v55  ;;  %v3060_v3 = vadd.f32 %v3018_v4, %v2980_v25  ;;  %v2989_v55 = vld [vmem:[#allocation2 + $0x70] sm:$0xff]  ;;  %v2990_v25 = vld [vmem:[#allocation2 + $0x78] sm:$0xff] }
 0x584   :  { %v3174_v28 = vld [vmem:[#allocation2 + $0x18] sm:$0xff] }
 0x585   :  { %v3292_v26 = vadd.f32 %v6785_v1, %v3269_v10  ;;  %v3270_v37 = vmul.f32 %v6731_v60, %v3174_v28  ;;  %3077 = vst.msk [vmem:[#allocation2 + $0x28] sm:$0xff] %vm3071_vm6, %v3060_v3 }
 0x587   :  { %3309 = vst.msk [vmem:[#allocation13 + $0x10] sm:$0xff] %vm92_vm11, %v3292_v26  ;;  %v3293_v41 = vadd.f32 %v6785_v1, %v3270_v37 }
 0x588   :  { %v3020_v31 = vpop.permute.xlu0 %3019 }
 0x589   :  { %3310 = vst.msk [vmem:[#allocation13 + $0x18] sm:$0xff] %vm92_vm11, %v3293_v41  ;;  %v3061_v51 = vadd.f32 %v3020_v31, %v2981_v17 }
 0x58a   :  { %v3175_v27 = vld [vmem:[#allocation2 + $0x20] sm:$0xff]  ;;  %v3022_v0 = vpop.permute.xlu1 %3021 }
 0x58b   :  { %v3271_v44 = vmul.f32 %v6735_v8, %v3175_v27  ;;  %3078 = vst.msk [vmem:[#allocation2 + $0x30] sm:$0xff] %vm3071_vm6, %v3061_v51  ;;  %v3062_v19 = vadd.f32 %v3022_v0, %v2982_v39 }
 0x58c   :  { %v3176_v60 = vld [vmem:[#allocation2 + $0x28] sm:$0xff] }
 0x58d   :  { %v3294_v47 = vadd.f32 %v6785_v1, %v3271_v44  ;;  %v3272_v58 = vmul.f32 %v6737_v18, %v3176_v60  ;;  %3079 = vst.msk [vmem:[#allocation2 + $0x38] sm:$0xff] %vm3071_vm6, %v3062_v19 }
 0x58f   :  { %3311 = vst.msk [vmem:[#allocation13 + $0x20] sm:$0xff] %vm92_vm11, %v3294_v47  ;;  %v3295_v14 = vadd.f32 %v6785_v1, %v3272_v58 }
 0x590   :  { %v3024_v50 = vpop.permute.xlu0 %3023 }
 0x591   :  { %3312 = vst.msk [vmem:[#allocation13 + $0x28] sm:$0xff] %vm92_vm11, %v3295_v14  ;;  %v3063_v53 = vadd.f32 %v3024_v50, %v2983_v36 }
 0x592   :  { %v3177_v8 = vld [vmem:[#allocation2 + $0x30] sm:$0xff]  ;;  %v3026_v29 = vpop.permute.xlu1 %3025 }
 0x593   :  { %v3273_v59 = vmul.f32 %v6740_v22, %v3177_v8  ;;  %3080 = vst.msk [vmem:[#allocation2 + $0x40] sm:$0xff] %vm3071_vm6, %v3063_v53  ;;  %v3064_v23 = vadd.f32 %v3026_v29, %v2984_v42 }
 0x594   :  { %v3178_v18 = vld [vmem:[#allocation2 + $0x38] sm:$0xff] }
 0x595   :  { %v3296_v34 = vadd.f32 %v6785_v1, %v3273_v59  ;;  %v3274_v24 = vmul.f32 %v6743_v62, %v3178_v18  ;;  %3081 = vst.msk [vmem:[#allocation2 + $0x48] sm:$0xff] %vm3071_vm6, %v3064_v23 }
 0x597   :  { %3313 = vst.msk [vmem:[#allocation13 + $0x30] sm:$0xff] %vm92_vm11, %v3296_v34  ;;  %v3297_v35 = vadd.f32 %v6785_v1, %v3274_v24 }
 0x598   :  { %v3028_v52 = vpop.permute.xlu0 %3027 }
 0x599   :  { %3314 = vst.msk [vmem:[#allocation13 + $0x38] sm:$0xff] %vm92_vm11, %v3297_v35  ;;  %v3065_v32 = vadd.f32 %v3028_v52, %v2985_v33 }
 0x59a   :  { %v3179_v22 = vld [vmem:[#allocation2 + $0x40] sm:$0xff]  ;;  %v3030_v11 = vpop.permute.xlu1 %3029 }
 0x59b   :  { %v3275_v16 = vmul.f32 %v6745_v48, %v3179_v22  ;;  %3082 = vst.msk [vmem:[#allocation2 + $0x50] sm:$0xff] %vm3071_vm6, %v3065_v32  ;;  %v3066_v5 = vadd.f32 %v3030_v11, %v2986_v30 }
 0x59c   :  { %v3180_v62 = vld [vmem:[#allocation2 + $0x48] sm:$0xff] }
 0x59d   :  { %v3298_v2 = vadd.f32 %v6785_v1, %v3275_v16  ;;  %v3276_v15 = vmul.f32 %v6748_v49, %v3180_v62  ;;  %3083 = vst.msk [vmem:[#allocation2 + $0x58] sm:$0xff] %vm3071_vm6, %v3066_v5 }
 0x59f   :  { %3315 = vst.msk [vmem:[#allocation13 + $0x40] sm:$0xff] %vm92_vm11, %v3298_v2  ;;  %v3299_v12 = vadd.f32 %v6785_v1, %v3276_v15 }
 0x5a0   :  { %v3032_v61 = vpop.permute.xlu0 %3031 }
 0x5a1   :  { %3316 = vst.msk [vmem:[#allocation13 + $0x48] sm:$0xff] %vm92_vm11, %v3299_v12  ;;  %v3067_v7 = vadd.f32 %v3032_v61, %v2987_v43 }
 0x5a2   :  { %v3181_v48 = vld [vmem:[#allocation2 + $0x50] sm:$0xff]  ;;  %v3034_v21 = vpop.permute.xlu1 %3033 }
 0x5a3   :  { %v3277_v20 = vmul.f32 %v6751_v9, %v3181_v48  ;;  %3084 = vst.msk [vmem:[#allocation2 + $0x60] sm:$0xff] %vm3071_vm6, %v3067_v7  ;;  %v3068_v63 = vadd.f32 %v3034_v21, %v2988_v40 }
 0x5a4   :  { %v3182_v49 = vld [vmem:[#allocation2 + $0x58] sm:$0xff] }
 0x5a5   :  { %v3300_v13 = vadd.f32 %v6785_v1, %v3277_v20  ;;  %v3278_v38 = vmul.f32 %v6753_v46, %v3182_v49  ;;  %3085 = vst.msk [vmem:[#allocation2 + $0x68] sm:$0xff] %vm3071_vm6, %v3068_v63 }
 0x5a7   :  { %3317 = vst.msk [vmem:[#allocation13 + $0x50] sm:$0xff] %vm92_vm11, %v3300_v13  ;;  %v3301_v6 = vadd.f32 %v6785_v1, %v3278_v38 }
 0x5a8   :  { %v3036_v45 = vpop.permute.xlu0 %3035 }
 0x5a9   :  { %3318 = vst.msk [vmem:[#allocation13 + $0x58] sm:$0xff] %vm92_vm11, %v3301_v6  ;;  %v3069_v54 = vadd.f32 %v3036_v45, %v2989_v55 }
 0x5aa   :  { %v3183_v9 = vld [vmem:[#allocation2 + $0x60] sm:$0xff]  ;;  %v3038_v4 = vpop.permute.xlu1 %3037 }
 0x5ab   :  { %v3279_v10 = vmul.f32 %v6757_v56, %v3183_v9  ;;  %3086 = vst.msk [vmem:[#allocation2 + $0x70] sm:$0xff] %vm3071_vm6, %v3069_v54  ;;  %v3070_v3 = vadd.f32 %v3038_v4, %v2990_v25 }
 0x5ac   :  { %v3184_v46 = vld [vmem:[#allocation2 + $0x68] sm:$0xff] }
 0x5ad   :  { %v3302_v28 = vadd.f32 %v6785_v1, %v3279_v10  ;;  %v3280_v26 = vmul.f32 %v6759_v57, %v3184_v46  ;;  %3087 = vst.msk [vmem:[#allocation2 + $0x78] sm:$0xff] %vm3071_vm6, %v3070_v3 }
 0x5af   :  { %3319 = vst.msk [vmem:[#allocation13 + $0x60] sm:$0xff] %vm92_vm11, %v3302_v28  ;;  %v3303_v37 = vadd.f32 %v6785_v1, %v3280_v26 }
 0x5b1   :  { %3320 = vst.msk [vmem:[#allocation13 + $0x68] sm:$0xff] %vm92_vm11, %v3303_v37 }
 0x5b2   :  { %v3185_v51 = vld [vmem:[#allocation2 + $0x70] sm:$0xff] }
 0x5b4   :  { %v3186_v31 = vld [vmem:[#allocation2 + $0x78] sm:$0xff] }
 0x5b9   :  { %v3265_v41 = vpop.permute.xlu0 %3264 }
 0x5ba   :  { %v3282_v17 = vmul.f32 %v3265_v41, %v3186_v31 }
 0x5bb   :  { %v3260_v56 = vpop.permute.xlu1 %3259 }
 0x5bc   :  { %v3305_v27 = vadd.f32 %v6785_v1, %v3282_v17  ;;  %v3281_v0 = vmul.f32 %v3260_v56, %v3185_v51 }
 0x5be   :  { %3322 = vst.msk [vmem:[#allocation13 + $0x78] sm:$0xff] %vm92_vm11, %v3305_v27  ;;  %v3304_v57 = vadd.f32 %v6785_v1, %v3281_v0 }
 0x5c0   :  { %3321 = vst.msk [vmem:[#allocation13 + $0x70] sm:$0xff] %vm92_vm11, %v3304_v57 }
 0x5c1   :  { %4189 = shalt.err (!%p4186_p2)
}
 0x5c2   :  { %s4190_s13 = scalar_lea.hbm %s6867_s5, 2048 }
 0x5c3   :  { %p4191_p3 = scmp.ne.s32.totalorder %s6867_s5, %s4190_s13  ;;  %p4194_p4 = scmp.lt.u32.totalorder %s4190_s13, %s6867_s5 }
 0x5c5   :  { %p4196_p5 = pnand %p4194_p4, %p4191_p3 }
 0x5c7   :  { %4199 = shalt.err (!%p4196_p5)
}
 0x5c8   :  { %3334 = dma.vmem_to_hbm [thread:$0]  %s3329_s8, 2048, %s6867_s5, [#allocation6], %s4213_s3, %s4213_s3, %s4214_s28  }
 0x5c9   :  { %4206 = dma.done.wait [#allocation6], 2048  }
 0x5ca   :  { %4207 = vsyncadd [#allocation6], 4294965248 }
 0x5cb   :  { %3338 = vsyncpa [#allocation5], 1 }
 0x5cc   :  { %3339 = vsyncpa [#allocation8], 1 }
 0x5cd   :  { %3340 = vsyncpa [#allocation11], 1 }
 0x5ce   :  { %3341 = vsyncpa [#allocation6], 1 }

</bundles_post_ra>
